<compile_context>
chip_gen: v7x
topology: tpu7x:2x2x1
jax: 0.10.0
libtpu: 0.0.40
codegen_flags: <defaults>
</compile_context>

<pallas_src>
import functools

import jax
import jax.numpy as jnp
from jax.experimental import pallas as pl
from jax.experimental.pallas import tpu as pltpu


DT = 0.05     # RK4 time step
F_L96 = 8.0   # L96 forcing


def _genmodel_kernel(x_ref, mask_ref, out_ref, *, dt, forcing, deltas):
    """Full observation rollout for one batch-row tile.

    x_ref    : VMEM (bc_tile, K) f32 -- initial state tile (prior sample / self.X)
    mask_ref : VMEM (bc_tile, K) f32 -- observer mask tile
    out_ref  : VMEM (n_obs, bc_tile, K) f32 -- all observations for this tile
    deltas   : static tuple of Python ints -- RK4 steps between consecutive obs
    """
    k_dim = x_ref.shape[-1]
    lane_axis = x_ref.ndim - 1          # pltpu.roll needs a non-negative axis

    def tendency(x):
        # Cyclic neighbours via XLU lane rotation (pltpu.roll == jnp.roll
        # semantics).  `forcing` is a Python float -> scalar splat operand,
        # not a per-call broadcast_in_dim.
        xp1 = pltpu.roll(x, shift=k_dim - 1, axis=lane_axis)   # X_{k+1}
        xm1 = pltpu.roll(x, shift=1, axis=lane_axis)           # X_{k-1}
        xm2 = pltpu.roll(x, shift=2, axis=lane_axis)           # X_{k-2}
        return (xp1 - xm2) * xm1 - x + forcing

    def rk4_step(x):
        # Low-storage RK4: running accumulator keeps only {x, acc, stage}
        # plus the roll temporaries live -> no vreg spills at bc_tile=64.
        k = tendency(x)                          # k1
        acc = k
        k = tendency(x + (0.5 * dt) * k)         # k2
        acc = acc + 2.0 * k
        k = tendency(x + (0.5 * dt) * k)         # k3
        acc = acc + 2.0 * k
        k = tendency(x + dt * k)                 # k4
        acc = acc + k
        return x + (dt / 6.0) * acc

    state = x_ref[...]
    # Fully static, fully unrolled rollout: no dynamic loop overhead, the
    # scheduler sees the entire dependency chain, and the output block stays
    # resident in VMEM with writes at statically known step indices.
    for obs_i, n_steps in enumerate(deltas):
        for _ in range(n_steps):
            state = rk4_step(state)
        # model_observer.forward: mask is reloaded from VMEM here (cheap, only
        # n_obs times) instead of being pinned in vregs for the whole rollout.
        out_ref[obs_i] = mask_ref[...] * state


def _tensorcores_per_chip():
    """2 for v7x-class chips (2 TCs/chip), else 1 (v5e/v6e)."""
    try:
        kind = jax.devices()[0].device_kind.lower()
    except Exception:
        return 1
    return 2 if "v7" in kind else 1


def gen_model_forward(x_init, mask, obs_steps, *, dt=DT, forcing=F_L96):
    """Pallas implementation of GenModel.forward(x=x_init, T_obs=obs_steps).

    `obs_steps` must be a static Python sequence of ints (they are baked into
    the kernel as compile-time constants).
    """
    if x_init.ndim == 2:                      # GenModel._forward: 2-D -> (1, *shape)
        x_init = x_init[None]
    assert x_init.ndim == 3, "state must be (B, C, K)"
    mask = jnp.broadcast_to(mask, x_init.shape)

    B, C, K = x_init.shape
    BC = B * C

    # GenModel.forward observes at sorted(T_obs); bake per-interval deltas.
    obs_sorted = sorted(int(s) for s in obs_steps)
    n_obs = len(obs_sorted)
    assert n_obs >= 1
    deltas = tuple(t - p for t, p in zip(obs_sorted, [0] + obs_sorted[:-1]))
    total_steps = obs_sorted[-1]

    x2d = x_init.reshape(BC, K).astype(jnp.float32)
    m2d = mask.reshape(BC, K).astype(jnp.float32)

    # Generation-aware tiling: split the batch only when there are 2 TCs to
    # run the halves concurrently; otherwise the split is pure serial overhead.
    n_tc = _tensorcores_per_chip()
    if n_tc >= 2 and BC % (8 * n_tc) == 0 and (BC // n_tc) >= 8:
        n_tiles = n_tc
        # CORE_PARALLEL so the independent batch halves actually shard across
        # the two v7x TensorCores (plain "parallel" can be a near no-op).
        sem = (getattr(pltpu, "CORE_PARALLEL", "parallel"),)
    else:
        n_tiles = 1
        sem = ("arbitrary",)
    bc_tile = BC // n_tiles

    # Advisory cost hint: ~29 flops / element / RK4 step, tiny byte footprint.
    cost = pl.CostEstimate(
        flops=int(29 * total_steps * BC * K),
        transcendentals=0,
        bytes_accessed=int(4 * BC * K * (2 + n_obs)),
    )

    out = pl.pallas_call(
        functools.partial(_genmodel_kernel, dt=float(dt), forcing=float(forcing),
                          deltas=deltas),
        out_shape=jax.ShapeDtypeStruct((n_obs, BC, K), jnp.float32),
        grid_spec=pltpu.PrefetchScalarGridSpec(
            num_scalar_prefetch=0,
            grid=(n_tiles,),                                   # batch-row tiles only
            in_specs=[
                pl.BlockSpec((bc_tile, K), lambda i: (i, 0)),  # x_init tile
                pl.BlockSpec((bc_tile, K), lambda i: (i, 0)),  # mask tile
            ],
            out_specs=pl.BlockSpec((n_obs, bc_tile, K), lambda i: (0, i, 0)),
        ),
        compiler_params=pltpu.CompilerParams(dimension_semantics=sem),
        cost_estimate=cost,
    )(x2d, m2d)

    return out.reshape(n_obs, B, C, K)


def reference_forward(x_init, mask, obs_steps, *, dt=DT, forcing=F_L96):
    """Pure-JAX reference for correctness checking."""
    def tendency(x):
        xp1 = jnp.roll(x, -1, axis=-1)
        xm1 = jnp.roll(x, 1, axis=-1)
        xm2 = jnp.roll(x, 2, axis=-1)
        return (xp1 - xm2) * xm1 - x + forcing

    def rk4_step(x):
        k1 = tendency(x)
        k2 = tendency(x + 0.5 * dt * k1)
        k3 = tendency(x + 0.5 * dt * k2)
        k4 = tendency(x + dt * k3)
        return x + (dt / 6.0) * (k1 + 2.0 * k2 + 2.0 * k3 + k4)

    x = x_init.astype(jnp.float32)
    ys = []
    done = 0
    for s in sorted(int(v) for v in obs_steps):
        for _ in range(s - done):
            x = rk4_step(x)
        done = s
        ys.append(mask.astype(jnp.float32) * x)
    return jnp.stack(ys, axis=0)


if __name__ == "__main__":
    key = jax.random.PRNGKey(0)
    k_state, k_mask = jax.random.split(key)
    B, C, K = 64, 1, 128              # ensemble batch, levels (J+1), L96 grid points

    # prior.sample(): deterministic Gaussian sample -> GenModel.set_state => self.X
    x_init = 2.5 + 1.0 * jax.random.normal(k_state, (B, C, K), dtype=jnp.float32)
    # model_observer.mask (partial observation operator, 0/1 mask)
    mask = (jax.random.uniform(k_mask, (B, C, K)) > 0.25).astype(jnp.float32)
    # T_obs: observe the state after 2, 5, 9 and 16 forwarder steps (static ints)
    obs_steps = [2, 5, 9, 16]

    out = gen_model_forward(x_init, mask, obs_steps)
    out = jax.block_until_ready(out)

    ref = reference_forward(x_init, mask, obs_steps)
    assert out.shape == (len(obs_steps), B, C, K)
    if not jnp.allclose(out, ref, atol=1e-3, rtol=1e-3):
        raise ValueError("Pallas kernel does not match reference rollout")

    # TODO(synk): sample()/log_prob() (stochastic observer + Gaussian likelihood) not ported;
    # only the deterministic forward() path is implemented here.
    print("KERNEL_OK")
</pallas_src>

<mosaic_0001>
module attributes {stable_mosaic.version = 11 : i64} {
  func.func @_genmodel_kernel(%arg0: i32, %arg1: memref<64x128xf32, #tpu.memory_space<vmem>>, %arg2: memref<64x128xf32, #tpu.memory_space<vmem>>, %arg3: memref<4x64x128xf32, #tpu.memory_space<vmem>>) attributes {dimension_semantics = [#tpu.dimension_semantics<arbitrary>], iteration_bounds = array<i64: 1>, scalar_prefetch = 0 : i64, scratch_operands = 0 : i64, tpu.core_type = #tpu.core_type<tc>, window_params = [{transform_indices = @transform_0, window_bounds = array<i64: 64, 128>}, {transform_indices = @transform_1, window_bounds = array<i64: 64, 128>}, {transform_indices = @transform_2, window_bounds = array<i64: 4, 64, 128>}]} {
    %c0 = arith.constant 0 : index
    %c0_0 = arith.constant 0 : index
    %0 = vector.load %arg1[%c0, %c0_0] : memref<64x128xf32, #tpu.memory_space<vmem>>, vector<64x128xf32>
    %c127_i32 = arith.constant 127 : i32
    %1 = tpu.dynamic_rotate %0 by %c127_i32 dim 1 : vector<64x128xf32>, i32 -> vector<64x128xf32>
    %c1_i32 = arith.constant 1 : i32
    %2 = tpu.dynamic_rotate %0 by %c1_i32 dim 1 : vector<64x128xf32>, i32 -> vector<64x128xf32>
    %c2_i32 = arith.constant 2 : i32
    %3 = tpu.dynamic_rotate %0 by %c2_i32 dim 1 : vector<64x128xf32>, i32 -> vector<64x128xf32>
    %4 = arith.subf %1, %3 : vector<64x128xf32>
    %5 = arith.mulf %4, %2 : vector<64x128xf32>
    %6 = arith.subf %5, %0 : vector<64x128xf32>
    %cst = arith.constant 8.000000e+00 : f32
    %7 = vector.broadcast %cst : f32 to vector<64x128xf32>
    %8 = arith.addf %6, %7 : vector<64x128xf32>
    %cst_1 = arith.constant 2.500000e-02 : f32
    %9 = vector.broadcast %cst_1 : f32 to vector<64x128xf32>
    %10 = arith.mulf %9, %8 : vector<64x128xf32>
    %11 = arith.addf %0, %10 : vector<64x128xf32>
    %c127_i32_2 = arith.constant 127 : i32
    %12 = tpu.dynamic_rotate %11 by %c127_i32_2 dim 1 : vector<64x128xf32>, i32 -> vector<64x128xf32>
    %c1_i32_3 = arith.constant 1 : i32
    %13 = tpu.dynamic_rotate %11 by %c1_i32_3 dim 1 : vector<64x128xf32>, i32 -> vector<64x128xf32>
    %c2_i32_4 = arith.constant 2 : i32
    %14 = tpu.dynamic_rotate %11 by %c2_i32_4 dim 1 : vector<64x128xf32>, i32 -> vector<64x128xf32>
    %15 = arith.subf %12, %14 : vector<64x128xf32>
    %16 = arith.mulf %15, %13 : vector<64x128xf32>
    %17 = arith.subf %16, %11 : vector<64x128xf32>
    %cst_5 = arith.constant 8.000000e+00 : f32
    %18 = vector.broadcast %cst_5 : f32 to vector<64x128xf32>
    %19 = arith.addf %17, %18 : vector<64x128xf32>
    %cst_6 = arith.constant 2.000000e+00 : f32
    %20 = vector.broadcast %cst_6 : f32 to vector<64x128xf32>
    %21 = arith.mulf %20, %19 : vector<64x128xf32>
    %22 = arith.addf %8, %21 : vector<64x128xf32>
    %cst_7 = arith.constant 2.500000e-02 : f32
    %23 = vector.broadcast %cst_7 : f32 to vector<64x128xf32>
    %24 = arith.mulf %23, %19 : vector<64x128xf32>
    %25 = arith.addf %0, %24 : vector<64x128xf32>
    %c127_i32_8 = arith.constant 127 : i32
    %26 = tpu.dynamic_rotate %25 by %c127_i32_8 dim 1 : vector<64x128xf32>, i32 -> vector<64x128xf32>
    %c1_i32_9 = arith.constant 1 : i32
    %27 = tpu.dynamic_rotate %25 by %c1_i32_9 dim 1 : vector<64x128xf32>, i32 -> vector<64x128xf32>
    %c2_i32_10 = arith.constant 2 : i32
    %28 = tpu.dynamic_rotate %25 by %c2_i32_10 dim 1 : vector<64x128xf32>, i32 -> vector<64x128xf32>
    %29 = arith.subf %26, %28 : vector<64x128xf32>
    %30 = arith.mulf %29, %27 : vector<64x128xf32>
    %31 = arith.subf %30, %25 : vector<64x128xf32>
    %cst_11 = arith.constant 8.000000e+00 : f32
    %32 = vector.broadcast %cst_11 : f32 to vector<64x128xf32>
    %33 = arith.addf %31, %32 : vector<64x128xf32>
    %cst_12 = arith.constant 2.000000e+00 : f32
    %34 = vector.broadcast %cst_12 : f32 to vector<64x128xf32>
    %35 = arith.mulf %34, %33 : vector<64x128xf32>
    %36 = arith.addf %22, %35 : vector<64x128xf32>
    %cst_13 = arith.constant 5.000000e-02 : f32
    %37 = vector.broadcast %cst_13 : f32 to vector<64x128xf32>
    %38 = arith.mulf %37, %33 : vector<64x128xf32>
    %39 = arith.addf %0, %38 : vector<64x128xf32>
    %c127_i32_14 = arith.constant 127 : i32
    %40 = tpu.dynamic_rotate %39 by %c127_i32_14 dim 1 : vector<64x128xf32>, i32 -> vector<64x128xf32>
    %c1_i32_15 = arith.constant 1 : i32
    %41 = tpu.dynamic_rotate %39 by %c1_i32_15 dim 1 : vector<64x128xf32>, i32 -> vector<64x128xf32>
    %c2_i32_16 = arith.constant 2 : i32
    %42 = tpu.dynamic_rotate %39 by %c2_i32_16 dim 1 : vector<64x128xf32>, i32 -> vector<64x128xf32>
    %43 = arith.subf %40, %42 : vector<64x128xf32>
    %44 = arith.mulf %43, %41 : vector<64x128xf32>
    %45 = arith.subf %44, %39 : vector<64x128xf32>
    %cst_17 = arith.constant 8.000000e+00 : f32
    %46 = vector.broadcast %cst_17 : f32 to vector<64x128xf32>
    %47 = arith.addf %45, %46 : vector<64x128xf32>
    %48 = arith.addf %36, %47 : vector<64x128xf32>
    %cst_18 = arith.constant 0.00833333377 : f32
    %49 = vector.broadcast %cst_18 : f32 to vector<64x128xf32>
    %50 = arith.mulf %49, %48 : vector<64x128xf32>
    %51 = arith.addf %0, %50 : vector<64x128xf32>
    %c127_i32_19 = arith.constant 127 : i32
    %52 = tpu.dynamic_rotate %51 by %c127_i32_19 dim 1 : vector<64x128xf32>, i32 -> vector<64x128xf32>
    %c1_i32_20 = arith.constant 1 : i32
    %53 = tpu.dynamic_rotate %51 by %c1_i32_20 dim 1 : vector<64x128xf32>, i32 -> vector<64x128xf32>
    %c2_i32_21 = arith.constant 2 : i32
    %54 = tpu.dynamic_rotate %51 by %c2_i32_21 dim 1 : vector<64x128xf32>, i32 -> vector<64x128xf32>
    %55 = arith.subf %52, %54 : vector<64x128xf32>
    %56 = arith.mulf %55, %53 : vector<64x128xf32>
    %57 = arith.subf %56, %51 : vector<64x128xf32>
    %cst_22 = arith.constant 8.000000e+00 : f32
    %58 = vector.broadcast %cst_22 : f32 to vector<64x128xf32>
    %59 = arith.addf %57, %58 : vector<64x128xf32>
    %cst_23 = arith.constant 2.500000e-02 : f32
    %60 = vector.broadcast %cst_23 : f32 to vector<64x128xf32>
    %61 = arith.mulf %60, %59 : vector<64x128xf32>
    %62 = arith.addf %51, %61 : vector<64x128xf32>
    %c127_i32_24 = arith.constant 127 : i32
    %63 = tpu.dynamic_rotate %62 by %c127_i32_24 dim 1 : vector<64x128xf32>, i32 -> vector<64x128xf32>
    %c1_i32_25 = arith.constant 1 : i32
    %64 = tpu.dynamic_rotate %62 by %c1_i32_25 dim 1 : vector<64x128xf32>, i32 -> vector<64x128xf32>
    %c2_i32_26 = arith.constant 2 : i32
    %65 = tpu.dynamic_rotate %62 by %c2_i32_26 dim 1 : vector<64x128xf32>, i32 -> vector<64x128xf32>
    %66 = arith.subf %63, %65 : vector<64x128xf32>
    %67 = arith.mulf %66, %64 : vector<64x128xf32>
    %68 = arith.subf %67, %62 : vector<64x128xf32>
    %cst_27 = arith.constant 8.000000e+00 : f32
    %69 = vector.broadcast %cst_27 : f32 to vector<64x128xf32>
    %70 = arith.addf %68, %69 : vector<64x128xf32>
    %cst_28 = arith.constant 2.000000e+00 : f32
    %71 = vector.broadcast %cst_28 : f32 to vector<64x128xf32>
    %72 = arith.mulf %71, %70 : vector<64x128xf32>
    %73 = arith.addf %59, %72 : vector<64x128xf32>
    %cst_29 = arith.constant 2.500000e-02 : f32
    %74 = vector.broadcast %cst_29 : f32 to vector<64x128xf32>
    %75 = arith.mulf %74, %70 : vector<64x128xf32>
    %76 = arith.addf %51, %75 : vector<64x128xf32>
    %c127_i32_30 = arith.constant 127 : i32
    %77 = tpu.dynamic_rotate %76 by %c127_i32_30 dim 1 : vector<64x128xf32>, i32 -> vector<64x128xf32>
    %c1_i32_31 = arith.constant 1 : i32
    %78 = tpu.dynamic_rotate %76 by %c1_i32_31 dim 1 : vector<64x128xf32>, i32 -> vector<64x128xf32>
    %c2_i32_32 = arith.constant 2 : i32
    %79 = tpu.dynamic_rotate %76 by %c2_i32_32 dim 1 : vector<64x128xf32>, i32 -> vector<64x128xf32>
    %80 = arith.subf %77, %79 : vector<64x128xf32>
    %81 = arith.mulf %80, %78 : vector<64x128xf32>
    %82 = arith.subf %81, %76 : vector<64x128xf32>
    %cst_33 = arith.constant 8.000000e+00 : f32
    %83 = vector.broadcast %cst_33 : f32 to vector<64x128xf32>
    %84 = arith.addf %82, %83 : vector<64x128xf32>
    %cst_34 = arith.constant 2.000000e+00 : f32
    %85 = vector.broadcast %cst_34 : f32 to vector<64x128xf32>
    %86 = arith.mulf %85, %84 : vector<64x128xf32>
    %87 = arith.addf %73, %86 : vector<64x128xf32>
    %cst_35 = arith.constant 5.000000e-02 : f32
    %88 = vector.broadcast %cst_35 : f32 to vector<64x128xf32>
    %89 = arith.mulf %88, %84 : vector<64x128xf32>
    %90 = arith.addf %51, %89 : vector<64x128xf32>
    %c127_i32_36 = arith.constant 127 : i32
    %91 = tpu.dynamic_rotate %90 by %c127_i32_36 dim 1 : vector<64x128xf32>, i32 -> vector<64x128xf32>
    %c1_i32_37 = arith.constant 1 : i32
    %92 = tpu.dynamic_rotate %90 by %c1_i32_37 dim 1 : vector<64x128xf32>, i32 -> vector<64x128xf32>
    %c2_i32_38 = arith.constant 2 : i32
    %93 = tpu.dynamic_rotate %90 by %c2_i32_38 dim 1 : vector<64x128xf32>, i32 -> vector<64x128xf32>
    %94 = arith.subf %91, %93 : vector<64x128xf32>
    %95 = arith.mulf %94, %92 : vector<64x128xf32>
    %96 = arith.subf %95, %90 : vector<64x128xf32>
    %cst_39 = arith.constant 8.000000e+00 : f32
    %97 = vector.broadcast %cst_39 : f32 to vector<64x128xf32>
    %98 = arith.addf %96, %97 : vector<64x128xf32>
    %99 = arith.addf %87, %98 : vector<64x128xf32>
    %cst_40 = arith.constant 0.00833333377 : f32
    %100 = vector.broadcast %cst_40 : f32 to vector<64x128xf32>
    %101 = arith.mulf %100, %99 : vector<64x128xf32>
    %102 = arith.addf %51, %101 : vector<64x128xf32>
    %c0_41 = arith.constant 0 : index
    %c0_42 = arith.constant 0 : index
    %103 = vector.load %arg2[%c0_41, %c0_42] : memref<64x128xf32, #tpu.memory_space<vmem>>, vector<64x128xf32>
    %104 = arith.mulf %103, %102 : vector<64x128xf32>
    %c0_43 = arith.constant 0 : index
    %c0_44 = arith.constant 0 : index
    %c0_45 = arith.constant 0 : index
    %105 = vector.load %arg3[%c0_43, %c0_44, %c0_45] : memref<4x64x128xf32, #tpu.memory_space<vmem>>, vector<1x64x128xf32>
    %106 = vector.shape_cast %105 : vector<1x64x128xf32> to vector<64x128xf32>
    %107 = vector.shape_cast %104 : vector<64x128xf32> to vector<1x64x128xf32>
    tpu.vector_store %arg3[%c0_43, %c0_44, %c0_45], %107 {strides = array<i32>} : memref<4x64x128xf32, #tpu.memory_space<vmem>>, vector<1x64x128xf32>,
    %c127_i32_46 = arith.constant 127 : i32
    %108 = tpu.dynamic_rotate %102 by %c127_i32_46 dim 1 : vector<64x128xf32>, i32 -> vector<64x128xf32>
    %c1_i32_47 = arith.constant 1 : i32
    %109 = tpu.dynamic_rotate %102 by %c1_i32_47 dim 1 : vector<64x128xf32>, i32 -> vector<64x128xf32>
    %c2_i32_48 = arith.constant 2 : i32
    %110 = tpu.dynamic_rotate %102 by %c2_i32_48 dim 1 : vector<64x128xf32>, i32 -> vector<64x128xf32>
    %111 = arith.subf %108, %110 : vector<64x128xf32>
    %112 = arith.mulf %111, %109 : vector<64x128xf32>
    %113 = arith.subf %112, %102 : vector<64x128xf32>
    %cst_49 = arith.constant 8.000000e+00 : f32
    %114 = vector.broadcast %cst_49 : f32 to vector<64x128xf32>
    %115 = arith.addf %113, %114 : vector<64x128xf32>
    %cst_50 = arith.constant 2.500000e-02 : f32
    %116 = vector.broadcast %cst_50 : f32 to vector<64x128xf32>
    %117 = arith.mulf %116, %115 : vector<64x128xf32>
    %118 = arith.addf %102, %117 : vector<64x128xf32>
    %c127_i32_51 = arith.constant 127 : i32
    %119 = tpu.dynamic_rotate %118 by %c127_i32_51 dim 1 : vector<64x128xf32>, i32 -> vector<64x128xf32>
    %c1_i32_52 = arith.constant 1 : i32
    %120 = tpu.dynamic_rotate %118 by %c1_i32_52 dim 1 : vector<64x128xf32>, i32 -> vector<64x128xf32>
    %c2_i32_53 = arith.constant 2 : i32
    %121 = tpu.dynamic_rotate %118 by %c2_i32_53 dim 1 : vector<64x128xf32>, i32 -> vector<64x128xf32>
    %122 = arith.subf %119, %121 : vector<64x128xf32>
    %123 = arith.mulf %122, %120 : vector<64x128xf32>
    %124 = arith.subf %123, %118 : vector<64x128xf32>
    %cst_54 = arith.constant 8.000000e+00 : f32
    %125 = vector.broadcast %cst_54 : f32 to vector<64x128xf32>
    %126 = arith.addf %124, %125 : vector<64x128xf32>
    %cst_55 = arith.constant 2.000000e+00 : f32
    %127 = vector.broadcast %cst_55 : f32 to vector<64x128xf32>
    %128 = arith.mulf %127, %126 : vector<64x128xf32>
    %129 = arith.addf %115, %128 : vector<64x128xf32>
    %cst_56 = arith.constant 2.500000e-02 : f32
    %130 = vector.broadcast %cst_56 : f32 to vector<64x128xf32>
    %131 = arith.mulf %130, %126 : vector<64x128xf32>
    %132 = arith.addf %102, %131 : vector<64x128xf32>
    %c127_i32_57 = arith.constant 127 : i32
    %133 = tpu.dynamic_rotate %132 by %c127_i32_57 dim 1 : vector<64x128xf32>, i32 -> vector<64x128xf32>
    %c1_i32_58 = arith.constant 1 : i32
    %134 = tpu.dynamic_rotate %132 by %c1_i32_58 dim 1 : vector<64x128xf32>, i32 -> vector<64x128xf32>
    %c2_i32_59 = arith.constant 2 : i32
    %135 = tpu.dynamic_rotate %132 by %c2_i32_59 dim 1 : vector<64x128xf32>, i32 -> vector<64x128xf32>
    %136 = arith.subf %133, %135 : vector<64x128xf32>
    %137 = arith.mulf %136, %134 : vector<64x128xf32>
    %138 = arith.subf %137, %132 : vector<64x128xf32>
    %cst_60 = arith.constant 8.000000e+00 : f32
    %139 = vector.broadcast %cst_60 : f32 to vector<64x128xf32>
    %140 = arith.addf %138, %139 : vector<64x128xf32>
    %cst_61 = arith.constant 2.000000e+00 : f32
    %141 = vector.broadcast %cst_61 : f32 to vector<64x128xf32>
    %142 = arith.mulf %141, %140 : vector<64x128xf32>
    %143 = arith.addf %129, %142 : vector<64x128xf32>
    %cst_62 = arith.constant 5.000000e-02 : f32
    %144 = vector.broadcast %cst_62 : f32 to vector<64x128xf32>
    %145 = arith.mulf %144, %140 : vector<64x128xf32>
    %146 = arith.addf %102, %145 : vector<64x128xf32>
    %c127_i32_63 = arith.constant 127 : i32
    %147 = tpu.dynamic_rotate %146 by %c127_i32_63 dim 1 : vector<64x128xf32>, i32 -> vector<64x128xf32>
    %c1_i32_64 = arith.constant 1 : i32
    %148 = tpu.dynamic_rotate %146 by %c1_i32_64 dim 1 : vector<64x128xf32>, i32 -> vector<64x128xf32>
    %c2_i32_65 = arith.constant 2 : i32
    %149 = tpu.dynamic_rotate %146 by %c2_i32_65 dim 1 : vector<64x128xf32>, i32 -> vector<64x128xf32>
    %150 = arith.subf %147, %149 : vector<64x128xf32>
    %151 = arith.mulf %150, %148 : vector<64x128xf32>
    %152 = arith.subf %151, %146 : vector<64x128xf32>
    %cst_66 = arith.constant 8.000000e+00 : f32
    %153 = vector.broadcast %cst_66 : f32 to vector<64x128xf32>
    %154 = arith.addf %152, %153 : vector<64x128xf32>
    %155 = arith.addf %143, %154 : vector<64x128xf32>
    %cst_67 = arith.constant 0.00833333377 : f32
    %156 = vector.broadcast %cst_67 : f32 to vector<64x128xf32>
    %157 = arith.mulf %156, %155 : vector<64x128xf32>
    %158 = arith.addf %102, %157 : vector<64x128xf32>
    %c127_i32_68 = arith.constant 127 : i32
    %159 = tpu.dynamic_rotate %158 by %c127_i32_68 dim 1 : vector<64x128xf32>, i32 -> vector<64x128xf32>
    %c1_i32_69 = arith.constant 1 : i32
    %160 = tpu.dynamic_rotate %158 by %c1_i32_69 dim 1 : vector<64x128xf32>, i32 -> vector<64x128xf32>
    %c2_i32_70 = arith.constant 2 : i32
    %161 = tpu.dynamic_rotate %158 by %c2_i32_70 dim 1 : vector<64x128xf32>, i32 -> vector<64x128xf32>
    %162 = arith.subf %159, %161 : vector<64x128xf32>
    %163 = arith.mulf %162, %160 : vector<64x128xf32>
    %164 = arith.subf %163, %158 : vector<64x128xf32>
    %cst_71 = arith.constant 8.000000e+00 : f32
    %165 = vector.broadcast %cst_71 : f32 to vector<64x128xf32>
    %166 = arith.addf %164, %165 : vector<64x128xf32>
    %cst_72 = arith.constant 2.500000e-02 : f32
    %167 = vector.broadcast %cst_72 : f32 to vector<64x128xf32>
    %168 = arith.mulf %167, %166 : vector<64x128xf32>
    %169 = arith.addf %158, %168 : vector<64x128xf32>
    %c127_i32_73 = arith.constant 127 : i32
    %170 = tpu.dynamic_rotate %169 by %c127_i32_73 dim 1 : vector<64x128xf32>, i32 -> vector<64x128xf32>
    %c1_i32_74 = arith.constant 1 : i32
    %171 = tpu.dynamic_rotate %169 by %c1_i32_74 dim 1 : vector<64x128xf32>, i32 -> vector<64x128xf32>
    %c2_i32_75 = arith.constant 2 : i32
    %172 = tpu.dynamic_rotate %169 by %c2_i32_75 dim 1 : vector<64x128xf32>, i32 -> vector<64x128xf32>
    %173 = arith.subf %170, %172 : vector<64x128xf32>
    %174 = arith.mulf %173, %171 : vector<64x128xf32>
    %175 = arith.subf %174, %169 : vector<64x128xf32>
    %cst_76 = arith.constant 8.000000e+00 : f32
    %176 = vector.broadcast %cst_76 : f32 to vector<64x128xf32>
    %177 = arith.addf %175, %176 : vector<64x128xf32>
    %cst_77 = arith.constant 2.000000e+00 : f32
    %178 = vector.broadcast %cst_77 : f32 to vector<64x128xf32>
    %179 = arith.mulf %178, %177 : vector<64x128xf32>
    %180 = arith.addf %166, %179 : vector<64x128xf32>
    %cst_78 = arith.constant 2.500000e-02 : f32
    %181 = vector.broadcast %cst_78 : f32 to vector<64x128xf32>
    %182 = arith.mulf %181, %177 : vector<64x128xf32>
    %183 = arith.addf %158, %182 : vector<64x128xf32>
    %c127_i32_79 = arith.constant 127 : i32
    %184 = tpu.dynamic_rotate %183 by %c127_i32_79 dim 1 : vector<64x128xf32>, i32 -> vector<64x128xf32>
    %c1_i32_80 = arith.constant 1 : i32
    %185 = tpu.dynamic_rotate %183 by %c1_i32_80 dim 1 : vector<64x128xf32>, i32 -> vector<64x128xf32>
    %c2_i32_81 = arith.constant 2 : i32
    %186 = tpu.dynamic_rotate %183 by %c2_i32_81 dim 1 : vector<64x128xf32>, i32 -> vector<64x128xf32>
    %187 = arith.subf %184, %186 : vector<64x128xf32>
    %188 = arith.mulf %187, %185 : vector<64x128xf32>
    %189 = arith.subf %188, %183 : vector<64x128xf32>
    %cst_82 = arith.constant 8.000000e+00 : f32
    %190 = vector.broadcast %cst_82 : f32 to vector<64x128xf32>
    %191 = arith.addf %189, %190 : vector<64x128xf32>
    %cst_83 = arith.constant 2.000000e+00 : f32
    %192 = vector.broadcast %cst_83 : f32 to vector<64x128xf32>
    %193 = arith.mulf %192, %191 : vector<64x128xf32>
    %194 = arith.addf %180, %193 : vector<64x128xf32>
    %cst_84 = arith.constant 5.000000e-02 : f32
    %195 = vector.broadcast %cst_84 : f32 to vector<64x128xf32>
    %196 = arith.mulf %195, %191 : vector<64x128xf32>
    %197 = arith.addf %158, %196 : vector<64x128xf32>
    %c127_i32_85 = arith.constant 127 : i32
    %198 = tpu.dynamic_rotate %197 by %c127_i32_85 dim 1 : vector<64x128xf32>, i32 -> vector<64x128xf32>
    %c1_i32_86 = arith.constant 1 : i32
    %199 = tpu.dynamic_rotate %197 by %c1_i32_86 dim 1 : vector<64x128xf32>, i32 -> vector<64x128xf32>
    %c2_i32_87 = arith.constant 2 : i32
    %200 = tpu.dynamic_rotate %197 by %c2_i32_87 dim 1 : vector<64x128xf32>, i32 -> vector<64x128xf32>
    %201 = arith.subf %198, %200 : vector<64x128xf32>
    %202 = arith.mulf %201, %199 : vector<64x128xf32>
    %203 = arith.subf %202, %197 : vector<64x128xf32>
    %cst_88 = arith.constant 8.000000e+00 : f32
    %204 = vector.broadcast %cst_88 : f32 to vector<64x128xf32>
    %205 = arith.addf %203, %204 : vector<64x128xf32>
    %206 = arith.addf %194, %205 : vector<64x128xf32>
    %cst_89 = arith.constant 0.00833333377 : f32
    %207 = vector.broadcast %cst_89 : f32 to vector<64x128xf32>
    %208 = arith.mulf %207, %206 : vector<64x128xf32>
    %209 = arith.addf %158, %208 : vector<64x128xf32>
    %c127_i32_90 = arith.constant 127 : i32
    %210 = tpu.dynamic_rotate %209 by %c127_i32_90 dim 1 : vector<64x128xf32>, i32 -> vector<64x128xf32>
    %c1_i32_91 = arith.constant 1 : i32
    %211 = tpu.dynamic_rotate %209 by %c1_i32_91 dim 1 : vector<64x128xf32>, i32 -> vector<64x128xf32>
    %c2_i32_92 = arith.constant 2 : i32
    %212 = tpu.dynamic_rotate %209 by %c2_i32_92 dim 1 : vector<64x128xf32>, i32 -> vector<64x128xf32>
    %213 = arith.subf %210, %212 : vector<64x128xf32>
    %214 = arith.mulf %213, %211 : vector<64x128xf32>
    %215 = arith.subf %214, %209 : vector<64x128xf32>
    %cst_93 = arith.constant 8.000000e+00 : f32
    %216 = vector.broadcast %cst_93 : f32 to vector<64x128xf32>
    %217 = arith.addf %215, %216 : vector<64x128xf32>
    %cst_94 = arith.constant 2.500000e-02 : f32
    %218 = vector.broadcast %cst_94 : f32 to vector<64x128xf32>
    %219 = arith.mulf %218, %217 : vector<64x128xf32>
    %220 = arith.addf %209, %219 : vector<64x128xf32>
    %c127_i32_95 = arith.constant 127 : i32
    %221 = tpu.dynamic_rotate %220 by %c127_i32_95 dim 1 : vector<64x128xf32>, i32 -> vector<64x128xf32>
    %c1_i32_96 = arith.constant 1 : i32
    %222 = tpu.dynamic_rotate %220 by %c1_i32_96 dim 1 : vector<64x128xf32>, i32 -> vector<64x128xf32>
    %c2_i32_97 = arith.constant 2 : i32
    %223 = tpu.dynamic_rotate %220 by %c2_i32_97 dim 1 : vector<64x128xf32>, i32 -> vector<64x128xf32>
    %224 = arith.subf %221, %223 : vector<64x128xf32>
    %225 = arith.mulf %224, %222 : vector<64x128xf32>
    %226 = arith.subf %225, %220 : vector<64x128xf32>
    %cst_98 = arith.constant 8.000000e+00 : f32
    %227 = vector.broadcast %cst_98 : f32 to vector<64x128xf32>
    %228 = arith.addf %226, %227 : vector<64x128xf32>
    %cst_99 = arith.constant 2.000000e+00 : f32
    %229 = vector.broadcast %cst_99 : f32 to vector<64x128xf32>
    %230 = arith.mulf %229, %228 : vector<64x128xf32>
    %231 = arith.addf %217, %230 : vector<64x128xf32>
    %cst_100 = arith.constant 2.500000e-02 : f32
    %232 = vector.broadcast %cst_100 : f32 to vector<64x128xf32>
    %233 = arith.mulf %232, %228 : vector<64x128xf32>
    %234 = arith.addf %209, %233 : vector<64x128xf32>
    %c127_i32_101 = arith.constant 127 : i32
    %235 = tpu.dynamic_rotate %234 by %c127_i32_101 dim 1 : vector<64x128xf32>, i32 -> vector<64x128xf32>
    %c1_i32_102 = arith.constant 1 : i32
    %236 = tpu.dynamic_rotate %234 by %c1_i32_102 dim 1 : vector<64x128xf32>, i32 -> vector<64x128xf32>
    %c2_i32_103 = arith.constant 2 : i32
    %237 = tpu.dynamic_rotate %234 by %c2_i32_103 dim 1 : vector<64x128xf32>, i32 -> vector<64x128xf32>
    %238 = arith.subf %235, %237 : vector<64x128xf32>
    %239 = arith.mulf %238, %236 : vector<64x128xf32>
    %240 = arith.subf %239, %234 : vector<64x128xf32>
    %cst_104 = arith.constant 8.000000e+00 : f32
    %241 = vector.broadcast %cst_104 : f32 to vector<64x128xf32>
    %242 = arith.addf %240, %241 : vector<64x128xf32>
    %cst_105 = arith.constant 2.000000e+00 : f32
    %243 = vector.broadcast %cst_105 : f32 to vector<64x128xf32>
    %244 = arith.mulf %243, %242 : vector<64x128xf32>
    %245 = arith.addf %231, %244 : vector<64x128xf32>
    %cst_106 = arith.constant 5.000000e-02 : f32
    %246 = vector.broadcast %cst_106 : f32 to vector<64x128xf32>
    %247 = arith.mulf %246, %242 : vector<64x128xf32>
    %248 = arith.addf %209, %247 : vector<64x128xf32>
    %c127_i32_107 = arith.constant 127 : i32
    %249 = tpu.dynamic_rotate %248 by %c127_i32_107 dim 1 : vector<64x128xf32>, i32 -> vector<64x128xf32>
    %c1_i32_108 = arith.constant 1 : i32
    %250 = tpu.dynamic_rotate %248 by %c1_i32_108 dim 1 : vector<64x128xf32>, i32 -> vector<64x128xf32>
    %c2_i32_109 = arith.constant 2 : i32
    %251 = tpu.dynamic_rotate %248 by %c2_i32_109 dim 1 : vector<64x128xf32>, i32 -> vector<64x128xf32>
    %252 = arith.subf %249, %251 : vector<64x128xf32>
    %253 = arith.mulf %252, %250 : vector<64x128xf32>
    %254 = arith.subf %253, %248 : vector<64x128xf32>
    %cst_110 = arith.constant 8.000000e+00 : f32
    %255 = vector.broadcast %cst_110 : f32 to vector<64x128xf32>
    %256 = arith.addf %254, %255 : vector<64x128xf32>
    %257 = arith.addf %245, %256 : vector<64x128xf32>
    %cst_111 = arith.constant 0.00833333377 : f32
    %258 = vector.broadcast %cst_111 : f32 to vector<64x128xf32>
    %259 = arith.mulf %258, %257 : vector<64x128xf32>
    %260 = arith.addf %209, %259 : vector<64x128xf32>
    %c0_112 = arith.constant 0 : index
    %c0_113 = arith.constant 0 : index
    %261 = vector.load %arg2[%c0_112, %c0_113] : memref<64x128xf32, #tpu.memory_space<vmem>>, vector<64x128xf32>
    %262 = arith.mulf %261, %260 : vector<64x128xf32>
    %c1 = arith.constant 1 : index
    %c0_114 = arith.constant 0 : index
    %c0_115 = arith.constant 0 : index
    %263 = vector.load %arg3[%c1, %c0_114, %c0_115] : memref<4x64x128xf32, #tpu.memory_space<vmem>>, vector<1x64x128xf32>
    %264 = vector.shape_cast %263 : vector<1x64x128xf32> to vector<64x128xf32>
    %265 = vector.shape_cast %262 : vector<64x128xf32> to vector<1x64x128xf32>
    tpu.vector_store %arg3[%c1, %c0_114, %c0_115], %265 {strides = array<i32>} : memref<4x64x128xf32, #tpu.memory_space<vmem>>, vector<1x64x128xf32>,
    %c127_i32_116 = arith.constant 127 : i32
    %266 = tpu.dynamic_rotate %260 by %c127_i32_116 dim 1 : vector<64x128xf32>, i32 -> vector<64x128xf32>
    %c1_i32_117 = arith.constant 1 : i32
    %267 = tpu.dynamic_rotate %260 by %c1_i32_117 dim 1 : vector<64x128xf32>, i32 -> vector<64x128xf32>
    %c2_i32_118 = arith.constant 2 : i32
    %268 = tpu.dynamic_rotate %260 by %c2_i32_118 dim 1 : vector<64x128xf32>, i32 -> vector<64x128xf32>
    %269 = arith.subf %266, %268 : vector<64x128xf32>
    %270 = arith.mulf %269, %267 : vector<64x128xf32>
    %271 = arith.subf %270, %260 : vector<64x128xf32>
    %cst_119 = arith.constant 8.000000e+00 : f32
    %272 = vector.broadcast %cst_119 : f32 to vector<64x128xf32>
    %273 = arith.addf %271, %272 : vector<64x128xf32>
    %cst_120 = arith.constant 2.500000e-02 : f32
    %274 = vector.broadcast %cst_120 : f32 to vector<64x128xf32>
    %275 = arith.mulf %274, %273 : vector<64x128xf32>
    %276 = arith.addf %260, %275 : vector<64x128xf32>
    %c127_i32_121 = arith.constant 127 : i32
    %277 = tpu.dynamic_rotate %276 by %c127_i32_121 dim 1 : vector<64x128xf32>, i32 -> vector<64x128xf32>
    %c1_i32_122 = arith.constant 1 : i32
    %278 = tpu.dynamic_rotate %276 by %c1_i32_122 dim 1 : vector<64x128xf32>, i32 -> vector<64x128xf32>
    %c2_i32_123 = arith.constant 2 : i32
    %279 = tpu.dynamic_rotate %276 by %c2_i32_123 dim 1 : vector<64x128xf32>, i32 -> vector<64x128xf32>
    %280 = arith.subf %277, %279 : vector<64x128xf32>
    %281 = arith.mulf %280, %278 : vector<64x128xf32>
    %282 = arith.subf %281, %276 : vector<64x128xf32>
    %cst_124 = arith.constant 8.000000e+00 : f32
    %283 = vector.broadcast %cst_124 : f32 to vector<64x128xf32>
    %284 = arith.addf %282, %283 : vector<64x128xf32>
    %cst_125 = arith.constant 2.000000e+00 : f32
    %285 = vector.broadcast %cst_125 : f32 to vector<64x128xf32>
    %286 = arith.mulf %285, %284 : vector<64x128xf32>
    %287 = arith.addf %273, %286 : vector<64x128xf32>
    %cst_126 = arith.constant 2.500000e-02 : f32
    %288 = vector.broadcast %cst_126 : f32 to vector<64x128xf32>
    %289 = arith.mulf %288, %284 : vector<64x128xf32>
    %290 = arith.addf %260, %289 : vector<64x128xf32>
    %c127_i32_127 = arith.constant 127 : i32
    %291 = tpu.dynamic_rotate %290 by %c127_i32_127 dim 1 : vector<64x128xf32>, i32 -> vector<64x128xf32>
    %c1_i32_128 = arith.constant 1 : i32
    %292 = tpu.dynamic_rotate %290 by %c1_i32_128 dim 1 : vector<64x128xf32>, i32 -> vector<64x128xf32>
    %c2_i32_129 = arith.constant 2 : i32
    %293 = tpu.dynamic_rotate %290 by %c2_i32_129 dim 1 : vector<64x128xf32>, i32 -> vector<64x128xf32>
    %294 = arith.subf %291, %293 : vector<64x128xf32>
    %295 = arith.mulf %294, %292 : vector<64x128xf32>
    %296 = arith.subf %295, %290 : vector<64x128xf32>
    %cst_130 = arith.constant 8.000000e+00 : f32
    %297 = vector.broadcast %cst_130 : f32 to vector<64x128xf32>
    %298 = arith.addf %296, %297 : vector<64x128xf32>
    %cst_131 = arith.constant 2.000000e+00 : f32
    %299 = vector.broadcast %cst_131 : f32 to vector<64x128xf32>
    %300 = arith.mulf %299, %298 : vector<64x128xf32>
    %301 = arith.addf %287, %300 : vector<64x128xf32>
    %cst_132 = arith.constant 5.000000e-02 : f32
    %302 = vector.broadcast %cst_132 : f32 to vector<64x128xf32>
    %303 = arith.mulf %302, %298 : vector<64x128xf32>
    %304 = arith.addf %260, %303 : vector<64x128xf32>
    %c127_i32_133 = arith.constant 127 : i32
    %305 = tpu.dynamic_rotate %304 by %c127_i32_133 dim 1 : vector<64x128xf32>, i32 -> vector<64x128xf32>
    %c1_i32_134 = arith.constant 1 : i32
    %306 = tpu.dynamic_rotate %304 by %c1_i32_134 dim 1 : vector<64x128xf32>, i32 -> vector<64x128xf32>
    %c2_i32_135 = arith.constant 2 : i32
    %307 = tpu.dynamic_rotate %304 by %c2_i32_135 dim 1 : vector<64x128xf32>, i32 -> vector<64x128xf32>
    %308 = arith.subf %305, %307 : vector<64x128xf32>
    %309 = arith.mulf %308, %306 : vector<64x128xf32>
    %310 = arith.subf %309, %304 : vector<64x128xf32>
    %cst_136 = arith.constant 8.000000e+00 : f32
    %311 = vector.broadcast %cst_136 : f32 to vector<64x128xf32>
    %312 = arith.addf %310, %311 : vector<64x128xf32>
    %313 = arith.addf %301, %312 : vector<64x128xf32>
    %cst_137 = arith.constant 0.00833333377 : f32
    %314 = vector.broadcast %cst_137 : f32 to vector<64x128xf32>
    %315 = arith.mulf %314, %313 : vector<64x128xf32>
    %316 = arith.addf %260, %315 : vector<64x128xf32>
    %c127_i32_138 = arith.constant 127 : i32
    %317 = tpu.dynamic_rotate %316 by %c127_i32_138 dim 1 : vector<64x128xf32>, i32 -> vector<64x128xf32>
    %c1_i32_139 = arith.constant 1 : i32
    %318 = tpu.dynamic_rotate %316 by %c1_i32_139 dim 1 : vector<64x128xf32>, i32 -> vector<64x128xf32>
    %c2_i32_140 = arith.constant 2 : i32
    %319 = tpu.dynamic_rotate %316 by %c2_i32_140 dim 1 : vector<64x128xf32>, i32 -> vector<64x128xf32>
    %320 = arith.subf %317, %319 : vector<64x128xf32>
    %321 = arith.mulf %320, %318 : vector<64x128xf32>
    %322 = arith.subf %321, %316 : vector<64x128xf32>
    %cst_141 = arith.constant 8.000000e+00 : f32
    %323 = vector.broadcast %cst_141 : f32 to vector<64x128xf32>
    %324 = arith.addf %322, %323 : vector<64x128xf32>
    %cst_142 = arith.constant 2.500000e-02 : f32
    %325 = vector.broadcast %cst_142 : f32 to vector<64x128xf32>
    %326 = arith.mulf %325, %324 : vector<64x128xf32>
    %327 = arith.addf %316, %326 : vector<64x128xf32>
    %c127_i32_143 = arith.constant 127 : i32
    %328 = tpu.dynamic_rotate %327 by %c127_i32_143 dim 1 : vector<64x128xf32>, i32 -> vector<64x128xf32>
    %c1_i32_144 = arith.constant 1 : i32
    %329 = tpu.dynamic_rotate %327 by %c1_i32_144 dim 1 : vector<64x128xf32>, i32 -> vector<64x128xf32>
    %c2_i32_145 = arith.constant 2 : i32
    %330 = tpu.dynamic_rotate %327 by %c2_i32_145 dim 1 : vector<64x128xf32>, i32 -> vector<64x128xf32>
    %331 = arith.subf %328, %330 : vector<64x128xf32>
    %332 = arith.mulf %331, %329 : vector<64x128xf32>
    %333 = arith.subf %332, %327 : vector<64x128xf32>
    %cst_146 = arith.constant 8.000000e+00 : f32
    %334 = vector.broadcast %cst_146 : f32 to vector<64x128xf32>
    %335 = arith.addf %333, %334 : vector<64x128xf32>
    %cst_147 = arith.constant 2.000000e+00 : f32
    %336 = vector.broadcast %cst_147 : f32 to vector<64x128xf32>
    %337 = arith.mulf %336, %335 : vector<64x128xf32>
    %338 = arith.addf %324, %337 : vector<64x128xf32>
    %cst_148 = arith.constant 2.500000e-02 : f32
    %339 = vector.broadcast %cst_148 : f32 to vector<64x128xf32>
    %340 = arith.mulf %339, %335 : vector<64x128xf32>
    %341 = arith.addf %316, %340 : vector<64x128xf32>
    %c127_i32_149 = arith.constant 127 : i32
    %342 = tpu.dynamic_rotate %341 by %c127_i32_149 dim 1 : vector<64x128xf32>, i32 -> vector<64x128xf32>
    %c1_i32_150 = arith.constant 1 : i32
    %343 = tpu.dynamic_rotate %341 by %c1_i32_150 dim 1 : vector<64x128xf32>, i32 -> vector<64x128xf32>
    %c2_i32_151 = arith.constant 2 : i32
    %344 = tpu.dynamic_rotate %341 by %c2_i32_151 dim 1 : vector<64x128xf32>, i32 -> vector<64x128xf32>
    %345 = arith.subf %342, %344 : vector<64x128xf32>
    %346 = arith.mulf %345, %343 : vector<64x128xf32>
    %347 = arith.subf %346, %341 : vector<64x128xf32>
    %cst_152 = arith.constant 8.000000e+00 : f32
    %348 = vector.broadcast %cst_152 : f32 to vector<64x128xf32>
    %349 = arith.addf %347, %348 : vector<64x128xf32>
    %cst_153 = arith.constant 2.000000e+00 : f32
    %350 = vector.broadcast %cst_153 : f32 to vector<64x128xf32>
    %351 = arith.mulf %350, %349 : vector<64x128xf32>
    %352 = arith.addf %338, %351 : vector<64x128xf32>
    %cst_154 = arith.constant 5.000000e-02 : f32
    %353 = vector.broadcast %cst_154 : f32 to vector<64x128xf32>
    %354 = arith.mulf %353, %349 : vector<64x128xf32>
    %355 = arith.addf %316, %354 : vector<64x128xf32>
    %c127_i32_155 = arith.constant 127 : i32
    %356 = tpu.dynamic_rotate %355 by %c127_i32_155 dim 1 : vector<64x128xf32>, i32 -> vector<64x128xf32>
    %c1_i32_156 = arith.constant 1 : i32
    %357 = tpu.dynamic_rotate %355 by %c1_i32_156 dim 1 : vector<64x128xf32>, i32 -> vector<64x128xf32>
    %c2_i32_157 = arith.constant 2 : i32
    %358 = tpu.dynamic_rotate %355 by %c2_i32_157 dim 1 : vector<64x128xf32>, i32 -> vector<64x128xf32>
    %359 = arith.subf %356, %358 : vector<64x128xf32>
    %360 = arith.mulf %359, %357 : vector<64x128xf32>
    %361 = arith.subf %360, %355 : vector<64x128xf32>
    %cst_158 = arith.constant 8.000000e+00 : f32
    %362 = vector.broadcast %cst_158 : f32 to vector<64x128xf32>
    %363 = arith.addf %361, %362 : vector<64x128xf32>
    %364 = arith.addf %352, %363 : vector<64x128xf32>
    %cst_159 = arith.constant 0.00833333377 : f32
    %365 = vector.broadcast %cst_159 : f32 to vector<64x128xf32>
    %366 = arith.mulf %365, %364 : vector<64x128xf32>
    %367 = arith.addf %316, %366 : vector<64x128xf32>
    %c127_i32_160 = arith.constant 127 : i32
    %368 = tpu.dynamic_rotate %367 by %c127_i32_160 dim 1 : vector<64x128xf32>, i32 -> vector<64x128xf32>
    %c1_i32_161 = arith.constant 1 : i32
    %369 = tpu.dynamic_rotate %367 by %c1_i32_161 dim 1 : vector<64x128xf32>, i32 -> vector<64x128xf32>
    %c2_i32_162 = arith.constant 2 : i32
    %370 = tpu.dynamic_rotate %367 by %c2_i32_162 dim 1 : vector<64x128xf32>, i32 -> vector<64x128xf32>
    %371 = arith.subf %368, %370 : vector<64x128xf32>
    %372 = arith.mulf %371, %369 : vector<64x128xf32>
    %373 = arith.subf %372, %367 : vector<64x128xf32>
    %cst_163 = arith.constant 8.000000e+00 : f32
    %374 = vector.broadcast %cst_163 : f32 to vector<64x128xf32>
    %375 = arith.addf %373, %374 : vector<64x128xf32>
    %cst_164 = arith.constant 2.500000e-02 : f32
    %376 = vector.broadcast %cst_164 : f32 to vector<64x128xf32>
    %377 = arith.mulf %376, %375 : vector<64x128xf32>
    %378 = arith.addf %367, %377 : vector<64x128xf32>
    %c127_i32_165 = arith.constant 127 : i32
    %379 = tpu.dynamic_rotate %378 by %c127_i32_165 dim 1 : vector<64x128xf32>, i32 -> vector<64x128xf32>
    %c1_i32_166 = arith.constant 1 : i32
    %380 = tpu.dynamic_rotate %378 by %c1_i32_166 dim 1 : vector<64x128xf32>, i32 -> vector<64x128xf32>
    %c2_i32_167 = arith.constant 2 : i32
    %381 = tpu.dynamic_rotate %378 by %c2_i32_167 dim 1 : vector<64x128xf32>, i32 -> vector<64x128xf32>
    %382 = arith.subf %379, %381 : vector<64x128xf32>
    %383 = arith.mulf %382, %380 : vector<64x128xf32>
    %384 = arith.subf %383, %378 : vector<64x128xf32>
    %cst_168 = arith.constant 8.000000e+00 : f32
    %385 = vector.broadcast %cst_168 : f32 to vector<64x128xf32>
    %386 = arith.addf %384, %385 : vector<64x128xf32>
    %cst_169 = arith.constant 2.000000e+00 : f32
    %387 = vector.broadcast %cst_169 : f32 to vector<64x128xf32>
    %388 = arith.mulf %387, %386 : vector<64x128xf32>
    %389 = arith.addf %375, %388 : vector<64x128xf32>
    %cst_170 = arith.constant 2.500000e-02 : f32
    %390 = vector.broadcast %cst_170 : f32 to vector<64x128xf32>
    %391 = arith.mulf %390, %386 : vector<64x128xf32>
    %392 = arith.addf %367, %391 : vector<64x128xf32>
    %c127_i32_171 = arith.constant 127 : i32
    %393 = tpu.dynamic_rotate %392 by %c127_i32_171 dim 1 : vector<64x128xf32>, i32 -> vector<64x128xf32>
    %c1_i32_172 = arith.constant 1 : i32
    %394 = tpu.dynamic_rotate %392 by %c1_i32_172 dim 1 : vector<64x128xf32>, i32 -> vector<64x128xf32>
    %c2_i32_173 = arith.constant 2 : i32
    %395 = tpu.dynamic_rotate %392 by %c2_i32_173 dim 1 : vector<64x128xf32>, i32 -> vector<64x128xf32>
    %396 = arith.subf %393, %395 : vector<64x128xf32>
    %397 = arith.mulf %396, %394 : vector<64x128xf32>
    %398 = arith.subf %397, %392 : vector<64x128xf32>
    %cst_174 = arith.constant 8.000000e+00 : f32
    %399 = vector.broadcast %cst_174 : f32 to vector<64x128xf32>
    %400 = arith.addf %398, %399 : vector<64x128xf32>
    %cst_175 = arith.constant 2.000000e+00 : f32
    %401 = vector.broadcast %cst_175 : f32 to vector<64x128xf32>
    %402 = arith.mulf %401, %400 : vector<64x128xf32>
    %403 = arith.addf %389, %402 : vector<64x128xf32>
    %cst_176 = arith.constant 5.000000e-02 : f32
    %404 = vector.broadcast %cst_176 : f32 to vector<64x128xf32>
    %405 = arith.mulf %404, %400 : vector<64x128xf32>
    %406 = arith.addf %367, %405 : vector<64x128xf32>
    %c127_i32_177 = arith.constant 127 : i32
    %407 = tpu.dynamic_rotate %406 by %c127_i32_177 dim 1 : vector<64x128xf32>, i32 -> vector<64x128xf32>
    %c1_i32_178 = arith.constant 1 : i32
    %408 = tpu.dynamic_rotate %406 by %c1_i32_178 dim 1 : vector<64x128xf32>, i32 -> vector<64x128xf32>
    %c2_i32_179 = arith.constant 2 : i32
    %409 = tpu.dynamic_rotate %406 by %c2_i32_179 dim 1 : vector<64x128xf32>, i32 -> vector<64x128xf32>
    %410 = arith.subf %407, %409 : vector<64x128xf32>
    %411 = arith.mulf %410, %408 : vector<64x128xf32>
    %412 = arith.subf %411, %406 : vector<64x128xf32>
    %cst_180 = arith.constant 8.000000e+00 : f32
    %413 = vector.broadcast %cst_180 : f32 to vector<64x128xf32>
    %414 = arith.addf %412, %413 : vector<64x128xf32>
    %415 = arith.addf %403, %414 : vector<64x128xf32>
    %cst_181 = arith.constant 0.00833333377 : f32
    %416 = vector.broadcast %cst_181 : f32 to vector<64x128xf32>
    %417 = arith.mulf %416, %415 : vector<64x128xf32>
    %418 = arith.addf %367, %417 : vector<64x128xf32>
    %c127_i32_182 = arith.constant 127 : i32
    %419 = tpu.dynamic_rotate %418 by %c127_i32_182 dim 1 : vector<64x128xf32>, i32 -> vector<64x128xf32>
    %c1_i32_183 = arith.constant 1 : i32
    %420 = tpu.dynamic_rotate %418 by %c1_i32_183 dim 1 : vector<64x128xf32>, i32 -> vector<64x128xf32>
    %c2_i32_184 = arith.constant 2 : i32
    %421 = tpu.dynamic_rotate %418 by %c2_i32_184 dim 1 : vector<64x128xf32>, i32 -> vector<64x128xf32>
    %422 = arith.subf %419, %421 : vector<64x128xf32>
    %423 = arith.mulf %422, %420 : vector<64x128xf32>
    %424 = arith.subf %423, %418 : vector<64x128xf32>
    %cst_185 = arith.constant 8.000000e+00 : f32
    %425 = vector.broadcast %cst_185 : f32 to vector<64x128xf32>
    %426 = arith.addf %424, %425 : vector<64x128xf32>
    %cst_186 = arith.constant 2.500000e-02 : f32
    %427 = vector.broadcast %cst_186 : f32 to vector<64x128xf32>
    %428 = arith.mulf %427, %426 : vector<64x128xf32>
    %429 = arith.addf %418, %428 : vector<64x128xf32>
    %c127_i32_187 = arith.constant 127 : i32
    %430 = tpu.dynamic_rotate %429 by %c127_i32_187 dim 1 : vector<64x128xf32>, i32 -> vector<64x128xf32>
    %c1_i32_188 = arith.constant 1 : i32
    %431 = tpu.dynamic_rotate %429 by %c1_i32_188 dim 1 : vector<64x128xf32>, i32 -> vector<64x128xf32>
    %c2_i32_189 = arith.constant 2 : i32
    %432 = tpu.dynamic_rotate %429 by %c2_i32_189 dim 1 : vector<64x128xf32>, i32 -> vector<64x128xf32>
    %433 = arith.subf %430, %432 : vector<64x128xf32>
    %434 = arith.mulf %433, %431 : vector<64x128xf32>
    %435 = arith.subf %434, %429 : vector<64x128xf32>
    %cst_190 = arith.constant 8.000000e+00 : f32
    %436 = vector.broadcast %cst_190 : f32 to vector<64x128xf32>
    %437 = arith.addf %435, %436 : vector<64x128xf32>
    %cst_191 = arith.constant 2.000000e+00 : f32
    %438 = vector.broadcast %cst_191 : f32 to vector<64x128xf32>
    %439 = arith.mulf %438, %437 : vector<64x128xf32>
    %440 = arith.addf %426, %439 : vector<64x128xf32>
    %cst_192 = arith.constant 2.500000e-02 : f32
    %441 = vector.broadcast %cst_192 : f32 to vector<64x128xf32>
    %442 = arith.mulf %441, %437 : vector<64x128xf32>
    %443 = arith.addf %418, %442 : vector<64x128xf32>
    %c127_i32_193 = arith.constant 127 : i32
    %444 = tpu.dynamic_rotate %443 by %c127_i32_193 dim 1 : vector<64x128xf32>, i32 -> vector<64x128xf32>
    %c1_i32_194 = arith.constant 1 : i32
    %445 = tpu.dynamic_rotate %443 by %c1_i32_194 dim 1 : vector<64x128xf32>, i32 -> vector<64x128xf32>
    %c2_i32_195 = arith.constant 2 : i32
    %446 = tpu.dynamic_rotate %443 by %c2_i32_195 dim 1 : vector<64x128xf32>, i32 -> vector<64x128xf32>
    %447 = arith.subf %444, %446 : vector<64x128xf32>
    %448 = arith.mulf %447, %445 : vector<64x128xf32>
    %449 = arith.subf %448, %443 : vector<64x128xf32>
    %cst_196 = arith.constant 8.000000e+00 : f32
    %450 = vector.broadcast %cst_196 : f32 to vector<64x128xf32>
    %451 = arith.addf %449, %450 : vector<64x128xf32>
    %cst_197 = arith.constant 2.000000e+00 : f32
    %452 = vector.broadcast %cst_197 : f32 to vector<64x128xf32>
    %453 = arith.mulf %452, %451 : vector<64x128xf32>
    %454 = arith.addf %440, %453 : vector<64x128xf32>
    %cst_198 = arith.constant 5.000000e-02 : f32
    %455 = vector.broadcast %cst_198 : f32 to vector<64x128xf32>
    %456 = arith.mulf %455, %451 : vector<64x128xf32>
    %457 = arith.addf %418, %456 : vector<64x128xf32>
    %c127_i32_199 = arith.constant 127 : i32
    %458 = tpu.dynamic_rotate %457 by %c127_i32_199 dim 1 : vector<64x128xf32>, i32 -> vector<64x128xf32>
    %c1_i32_200 = arith.constant 1 : i32
    %459 = tpu.dynamic_rotate %457 by %c1_i32_200 dim 1 : vector<64x128xf32>, i32 -> vector<64x128xf32>
    %c2_i32_201 = arith.constant 2 : i32
    %460 = tpu.dynamic_rotate %457 by %c2_i32_201 dim 1 : vector<64x128xf32>, i32 -> vector<64x128xf32>
    %461 = arith.subf %458, %460 : vector<64x128xf32>
    %462 = arith.mulf %461, %459 : vector<64x128xf32>
    %463 = arith.subf %462, %457 : vector<64x128xf32>
    %cst_202 = arith.constant 8.000000e+00 : f32
    %464 = vector.broadcast %cst_202 : f32 to vector<64x128xf32>
    %465 = arith.addf %463, %464 : vector<64x128xf32>
    %466 = arith.addf %454, %465 : vector<64x128xf32>
    %cst_203 = arith.constant 0.00833333377 : f32
    %467 = vector.broadcast %cst_203 : f32 to vector<64x128xf32>
    %468 = arith.mulf %467, %466 : vector<64x128xf32>
    %469 = arith.addf %418, %468 : vector<64x128xf32>
    %c0_204 = arith.constant 0 : index
    %c0_205 = arith.constant 0 : index
    %470 = vector.load %arg2[%c0_204, %c0_205] : memref<64x128xf32, #tpu.memory_space<vmem>>, vector<64x128xf32>
    %471 = arith.mulf %470, %469 : vector<64x128xf32>
    %c2 = arith.constant 2 : index
    %c0_206 = arith.constant 0 : index
    %c0_207 = arith.constant 0 : index
    %472 = vector.load %arg3[%c2, %c0_206, %c0_207] : memref<4x64x128xf32, #tpu.memory_space<vmem>>, vector<1x64x128xf32>
    %473 = vector.shape_cast %472 : vector<1x64x128xf32> to vector<64x128xf32>
    %474 = vector.shape_cast %471 : vector<64x128xf32> to vector<1x64x128xf32>
    tpu.vector_store %arg3[%c2, %c0_206, %c0_207], %474 {strides = array<i32>} : memref<4x64x128xf32, #tpu.memory_space<vmem>>, vector<1x64x128xf32>,
    %c127_i32_208 = arith.constant 127 : i32
    %475 = tpu.dynamic_rotate %469 by %c127_i32_208 dim 1 : vector<64x128xf32>, i32 -> vector<64x128xf32>
    %c1_i32_209 = arith.constant 1 : i32
    %476 = tpu.dynamic_rotate %469 by %c1_i32_209 dim 1 : vector<64x128xf32>, i32 -> vector<64x128xf32>
    %c2_i32_210 = arith.constant 2 : i32
    %477 = tpu.dynamic_rotate %469 by %c2_i32_210 dim 1 : vector<64x128xf32>, i32 -> vector<64x128xf32>
    %478 = arith.subf %475, %477 : vector<64x128xf32>
    %479 = arith.mulf %478, %476 : vector<64x128xf32>
    %480 = arith.subf %479, %469 : vector<64x128xf32>
    %cst_211 = arith.constant 8.000000e+00 : f32
    %481 = vector.broadcast %cst_211 : f32 to vector<64x128xf32>
    %482 = arith.addf %480, %481 : vector<64x128xf32>
    %cst_212 = arith.constant 2.500000e-02 : f32
    %483 = vector.broadcast %cst_212 : f32 to vector<64x128xf32>
    %484 = arith.mulf %483, %482 : vector<64x128xf32>
    %485 = arith.addf %469, %484 : vector<64x128xf32>
    %c127_i32_213 = arith.constant 127 : i32
    %486 = tpu.dynamic_rotate %485 by %c127_i32_213 dim 1 : vector<64x128xf32>, i32 -> vector<64x128xf32>
    %c1_i32_214 = arith.constant 1 : i32
    %487 = tpu.dynamic_rotate %485 by %c1_i32_214 dim 1 : vector<64x128xf32>, i32 -> vector<64x128xf32>
    %c2_i32_215 = arith.constant 2 : i32
    %488 = tpu.dynamic_rotate %485 by %c2_i32_215 dim 1 : vector<64x128xf32>, i32 -> vector<64x128xf32>
    %489 = arith.subf %486, %488 : vector<64x128xf32>
    %490 = arith.mulf %489, %487 : vector<64x128xf32>
    %491 = arith.subf %490, %485 : vector<64x128xf32>
    %cst_216 = arith.constant 8.000000e+00 : f32
    %492 = vector.broadcast %cst_216 : f32 to vector<64x128xf32>
    %493 = arith.addf %491, %492 : vector<64x128xf32>
    %cst_217 = arith.constant 2.000000e+00 : f32
    %494 = vector.broadcast %cst_217 : f32 to vector<64x128xf32>
    %495 = arith.mulf %494, %493 : vector<64x128xf32>
    %496 = arith.addf %482, %495 : vector<64x128xf32>
    %cst_218 = arith.constant 2.500000e-02 : f32
    %497 = vector.broadcast %cst_218 : f32 to vector<64x128xf32>
    %498 = arith.mulf %497, %493 : vector<64x128xf32>
    %499 = arith.addf %469, %498 : vector<64x128xf32>
    %c127_i32_219 = arith.constant 127 : i32
    %500 = tpu.dynamic_rotate %499 by %c127_i32_219 dim 1 : vector<64x128xf32>, i32 -> vector<64x128xf32>
    %c1_i32_220 = arith.constant 1 : i32
    %501 = tpu.dynamic_rotate %499 by %c1_i32_220 dim 1 : vector<64x128xf32>, i32 -> vector<64x128xf32>
    %c2_i32_221 = arith.constant 2 : i32
    %502 = tpu.dynamic_rotate %499 by %c2_i32_221 dim 1 : vector<64x128xf32>, i32 -> vector<64x128xf32>
    %503 = arith.subf %500, %502 : vector<64x128xf32>
    %504 = arith.mulf %503, %501 : vector<64x128xf32>
    %505 = arith.subf %504, %499 : vector<64x128xf32>
    %cst_222 = arith.constant 8.000000e+00 : f32
    %506 = vector.broadcast %cst_222 : f32 to vector<64x128xf32>
    %507 = arith.addf %505, %506 : vector<64x128xf32>
    %cst_223 = arith.constant 2.000000e+00 : f32
    %508 = vector.broadcast %cst_223 : f32 to vector<64x128xf32>
    %509 = arith.mulf %508, %507 : vector<64x128xf32>
    %510 = arith.addf %496, %509 : vector<64x128xf32>
    %cst_224 = arith.constant 5.000000e-02 : f32
    %511 = vector.broadcast %cst_224 : f32 to vector<64x128xf32>
    %512 = arith.mulf %511, %507 : vector<64x128xf32>
    %513 = arith.addf %469, %512 : vector<64x128xf32>
    %c127_i32_225 = arith.constant 127 : i32
    %514 = tpu.dynamic_rotate %513 by %c127_i32_225 dim 1 : vector<64x128xf32>, i32 -> vector<64x128xf32>
    %c1_i32_226 = arith.constant 1 : i32
    %515 = tpu.dynamic_rotate %513 by %c1_i32_226 dim 1 : vector<64x128xf32>, i32 -> vector<64x128xf32>
    %c2_i32_227 = arith.constant 2 : i32
    %516 = tpu.dynamic_rotate %513 by %c2_i32_227 dim 1 : vector<64x128xf32>, i32 -> vector<64x128xf32>
    %517 = arith.subf %514, %516 : vector<64x128xf32>
    %518 = arith.mulf %517, %515 : vector<64x128xf32>
    %519 = arith.subf %518, %513 : vector<64x128xf32>
    %cst_228 = arith.constant 8.000000e+00 : f32
    %520 = vector.broadcast %cst_228 : f32 to vector<64x128xf32>
    %521 = arith.addf %519, %520 : vector<64x128xf32>
    %522 = arith.addf %510, %521 : vector<64x128xf32>
    %cst_229 = arith.constant 0.00833333377 : f32
    %523 = vector.broadcast %cst_229 : f32 to vector<64x128xf32>
    %524 = arith.mulf %523, %522 : vector<64x128xf32>
    %525 = arith.addf %469, %524 : vector<64x128xf32>
    %c127_i32_230 = arith.constant 127 : i32
    %526 = tpu.dynamic_rotate %525 by %c127_i32_230 dim 1 : vector<64x128xf32>, i32 -> vector<64x128xf32>
    %c1_i32_231 = arith.constant 1 : i32
    %527 = tpu.dynamic_rotate %525 by %c1_i32_231 dim 1 : vector<64x128xf32>, i32 -> vector<64x128xf32>
    %c2_i32_232 = arith.constant 2 : i32
    %528 = tpu.dynamic_rotate %525 by %c2_i32_232 dim 1 : vector<64x128xf32>, i32 -> vector<64x128xf32>
    %529 = arith.subf %526, %528 : vector<64x128xf32>
    %530 = arith.mulf %529, %527 : vector<64x128xf32>
    %531 = arith.subf %530, %525 : vector<64x128xf32>
    %cst_233 = arith.constant 8.000000e+00 : f32
    %532 = vector.broadcast %cst_233 : f32 to vector<64x128xf32>
    %533 = arith.addf %531, %532 : vector<64x128xf32>
    %cst_234 = arith.constant 2.500000e-02 : f32
    %534 = vector.broadcast %cst_234 : f32 to vector<64x128xf32>
    %535 = arith.mulf %534, %533 : vector<64x128xf32>
    %536 = arith.addf %525, %535 : vector<64x128xf32>
    %c127_i32_235 = arith.constant 127 : i32
    %537 = tpu.dynamic_rotate %536 by %c127_i32_235 dim 1 : vector<64x128xf32>, i32 -> vector<64x128xf32>
    %c1_i32_236 = arith.constant 1 : i32
    %538 = tpu.dynamic_rotate %536 by %c1_i32_236 dim 1 : vector<64x128xf32>, i32 -> vector<64x128xf32>
    %c2_i32_237 = arith.constant 2 : i32
    %539 = tpu.dynamic_rotate %536 by %c2_i32_237 dim 1 : vector<64x128xf32>, i32 -> vector<64x128xf32>
    %540 = arith.subf %537, %539 : vector<64x128xf32>
    %541 = arith.mulf %540, %538 : vector<64x128xf32>
    %542 = arith.subf %541, %536 : vector<64x128xf32>
    %cst_238 = arith.constant 8.000000e+00 : f32
    %543 = vector.broadcast %cst_238 : f32 to vector<64x128xf32>
    %544 = arith.addf %542, %543 : vector<64x128xf32>
    %cst_239 = arith.constant 2.000000e+00 : f32
    %545 = vector.broadcast %cst_239 : f32 to vector<64x128xf32>
    %546 = arith.mulf %545, %544 : vector<64x128xf32>
    %547 = arith.addf %533, %546 : vector<64x128xf32>
    %cst_240 = arith.constant 2.500000e-02 : f32
    %548 = vector.broadcast %cst_240 : f32 to vector<64x128xf32>
    %549 = arith.mulf %548, %544 : vector<64x128xf32>
    %550 = arith.addf %525, %549 : vector<64x128xf32>
    %c127_i32_241 = arith.constant 127 : i32
    %551 = tpu.dynamic_rotate %550 by %c127_i32_241 dim 1 : vector<64x128xf32>, i32 -> vector<64x128xf32>
    %c1_i32_242 = arith.constant 1 : i32
    %552 = tpu.dynamic_rotate %550 by %c1_i32_242 dim 1 : vector<64x128xf32>, i32 -> vector<64x128xf32>
    %c2_i32_243 = arith.constant 2 : i32
    %553 = tpu.dynamic_rotate %550 by %c2_i32_243 dim 1 : vector<64x128xf32>, i32 -> vector<64x128xf32>
    %554 = arith.subf %551, %553 : vector<64x128xf32>
    %555 = arith.mulf %554, %552 : vector<64x128xf32>
    %556 = arith.subf %555, %550 : vector<64x128xf32>
    %cst_244 = arith.constant 8.000000e+00 : f32
    %557 = vector.broadcast %cst_244 : f32 to vector<64x128xf32>
    %558 = arith.addf %556, %557 : vector<64x128xf32>
    %cst_245 = arith.constant 2.000000e+00 : f32
    %559 = vector.broadcast %cst_245 : f32 to vector<64x128xf32>
    %560 = arith.mulf %559, %558 : vector<64x128xf32>
    %561 = arith.addf %547, %560 : vector<64x128xf32>
    %cst_246 = arith.constant 5.000000e-02 : f32
    %562 = vector.broadcast %cst_246 : f32 to vector<64x128xf32>
    %563 = arith.mulf %562, %558 : vector<64x128xf32>
    %564 = arith.addf %525, %563 : vector<64x128xf32>
    %c127_i32_247 = arith.constant 127 : i32
    %565 = tpu.dynamic_rotate %564 by %c127_i32_247 dim 1 : vector<64x128xf32>, i32 -> vector<64x128xf32>
    %c1_i32_248 = arith.constant 1 : i32
    %566 = tpu.dynamic_rotate %564 by %c1_i32_248 dim 1 : vector<64x128xf32>, i32 -> vector<64x128xf32>
    %c2_i32_249 = arith.constant 2 : i32
    %567 = tpu.dynamic_rotate %564 by %c2_i32_249 dim 1 : vector<64x128xf32>, i32 -> vector<64x128xf32>
    %568 = arith.subf %565, %567 : vector<64x128xf32>
    %569 = arith.mulf %568, %566 : vector<64x128xf32>
    %570 = arith.subf %569, %564 : vector<64x128xf32>
    %cst_250 = arith.constant 8.000000e+00 : f32
    %571 = vector.broadcast %cst_250 : f32 to vector<64x128xf32>
    %572 = arith.addf %570, %571 : vector<64x128xf32>
    %573 = arith.addf %561, %572 : vector<64x128xf32>
    %cst_251 = arith.constant 0.00833333377 : f32
    %574 = vector.broadcast %cst_251 : f32 to vector<64x128xf32>
    %575 = arith.mulf %574, %573 : vector<64x128xf32>
    %576 = arith.addf %525, %575 : vector<64x128xf32>
    %c127_i32_252 = arith.constant 127 : i32
    %577 = tpu.dynamic_rotate %576 by %c127_i32_252 dim 1 : vector<64x128xf32>, i32 -> vector<64x128xf32>
    %c1_i32_253 = arith.constant 1 : i32
    %578 = tpu.dynamic_rotate %576 by %c1_i32_253 dim 1 : vector<64x128xf32>, i32 -> vector<64x128xf32>
    %c2_i32_254 = arith.constant 2 : i32
    %579 = tpu.dynamic_rotate %576 by %c2_i32_254 dim 1 : vector<64x128xf32>, i32 -> vector<64x128xf32>
    %580 = arith.subf %577, %579 : vector<64x128xf32>
    %581 = arith.mulf %580, %578 : vector<64x128xf32>
    %582 = arith.subf %581, %576 : vector<64x128xf32>
    %cst_255 = arith.constant 8.000000e+00 : f32
    %583 = vector.broadcast %cst_255 : f32 to vector<64x128xf32>
    %584 = arith.addf %582, %583 : vector<64x128xf32>
    %cst_256 = arith.constant 2.500000e-02 : f32
    %585 = vector.broadcast %cst_256 : f32 to vector<64x128xf32>
    %586 = arith.mulf %585, %584 : vector<64x128xf32>
    %587 = arith.addf %576, %586 : vector<64x128xf32>
    %c127_i32_257 = arith.constant 127 : i32
    %588 = tpu.dynamic_rotate %587 by %c127_i32_257 dim 1 : vector<64x128xf32>, i32 -> vector<64x128xf32>
    %c1_i32_258 = arith.constant 1 : i32
    %589 = tpu.dynamic_rotate %587 by %c1_i32_258 dim 1 : vector<64x128xf32>, i32 -> vector<64x128xf32>
    %c2_i32_259 = arith.constant 2 : i32
    %590 = tpu.dynamic_rotate %587 by %c2_i32_259 dim 1 : vector<64x128xf32>, i32 -> vector<64x128xf32>
    %591 = arith.subf %588, %590 : vector<64x128xf32>
    %592 = arith.mulf %591, %589 : vector<64x128xf32>
    %593 = arith.subf %592, %587 : vector<64x128xf32>
    %cst_260 = arith.constant 8.000000e+00 : f32
    %594 = vector.broadcast %cst_260 : f32 to vector<64x128xf32>
    %595 = arith.addf %593, %594 : vector<64x128xf32>
    %cst_261 = arith.constant 2.000000e+00 : f32
    %596 = vector.broadcast %cst_261 : f32 to vector<64x128xf32>
    %597 = arith.mulf %596, %595 : vector<64x128xf32>
    %598 = arith.addf %584, %597 : vector<64x128xf32>
    %cst_262 = arith.constant 2.500000e-02 : f32
    %599 = vector.broadcast %cst_262 : f32 to vector<64x128xf32>
    %600 = arith.mulf %599, %595 : vector<64x128xf32>
    %601 = arith.addf %576, %600 : vector<64x128xf32>
    %c127_i32_263 = arith.constant 127 : i32
    %602 = tpu.dynamic_rotate %601 by %c127_i32_263 dim 1 : vector<64x128xf32>, i32 -> vector<64x128xf32>
    %c1_i32_264 = arith.constant 1 : i32
    %603 = tpu.dynamic_rotate %601 by %c1_i32_264 dim 1 : vector<64x128xf32>, i32 -> vector<64x128xf32>
    %c2_i32_265 = arith.constant 2 : i32
    %604 = tpu.dynamic_rotate %601 by %c2_i32_265 dim 1 : vector<64x128xf32>, i32 -> vector<64x128xf32>
    %605 = arith.subf %602, %604 : vector<64x128xf32>
    %606 = arith.mulf %605, %603 : vector<64x128xf32>
    %607 = arith.subf %606, %601 : vector<64x128xf32>
    %cst_266 = arith.constant 8.000000e+00 : f32
    %608 = vector.broadcast %cst_266 : f32 to vector<64x128xf32>
    %609 = arith.addf %607, %608 : vector<64x128xf32>
    %cst_267 = arith.constant 2.000000e+00 : f32
    %610 = vector.broadcast %cst_267 : f32 to vector<64x128xf32>
    %611 = arith.mulf %610, %609 : vector<64x128xf32>
    %612 = arith.addf %598, %611 : vector<64x128xf32>
    %cst_268 = arith.constant 5.000000e-02 : f32
    %613 = vector.broadcast %cst_268 : f32 to vector<64x128xf32>
    %614 = arith.mulf %613, %609 : vector<64x128xf32>
    %615 = arith.addf %576, %614 : vector<64x128xf32>
    %c127_i32_269 = arith.constant 127 : i32
    %616 = tpu.dynamic_rotate %615 by %c127_i32_269 dim 1 : vector<64x128xf32>, i32 -> vector<64x128xf32>
    %c1_i32_270 = arith.constant 1 : i32
    %617 = tpu.dynamic_rotate %615 by %c1_i32_270 dim 1 : vector<64x128xf32>, i32 -> vector<64x128xf32>
    %c2_i32_271 = arith.constant 2 : i32
    %618 = tpu.dynamic_rotate %615 by %c2_i32_271 dim 1 : vector<64x128xf32>, i32 -> vector<64x128xf32>
    %619 = arith.subf %616, %618 : vector<64x128xf32>
    %620 = arith.mulf %619, %617 : vector<64x128xf32>
    %621 = arith.subf %620, %615 : vector<64x128xf32>
    %cst_272 = arith.constant 8.000000e+00 : f32
    %622 = vector.broadcast %cst_272 : f32 to vector<64x128xf32>
    %623 = arith.addf %621, %622 : vector<64x128xf32>
    %624 = arith.addf %612, %623 : vector<64x128xf32>
    %cst_273 = arith.constant 0.00833333377 : f32
    %625 = vector.broadcast %cst_273 : f32 to vector<64x128xf32>
    %626 = arith.mulf %625, %624 : vector<64x128xf32>
    %627 = arith.addf %576, %626 : vector<64x128xf32>
    %c127_i32_274 = arith.constant 127 : i32
    %628 = tpu.dynamic_rotate %627 by %c127_i32_274 dim 1 : vector<64x128xf32>, i32 -> vector<64x128xf32>
    %c1_i32_275 = arith.constant 1 : i32
    %629 = tpu.dynamic_rotate %627 by %c1_i32_275 dim 1 : vector<64x128xf32>, i32 -> vector<64x128xf32>
    %c2_i32_276 = arith.constant 2 : i32
    %630 = tpu.dynamic_rotate %627 by %c2_i32_276 dim 1 : vector<64x128xf32>, i32 -> vector<64x128xf32>
    %631 = arith.subf %628, %630 : vector<64x128xf32>
    %632 = arith.mulf %631, %629 : vector<64x128xf32>
    %633 = arith.subf %632, %627 : vector<64x128xf32>
    %cst_277 = arith.constant 8.000000e+00 : f32
    %634 = vector.broadcast %cst_277 : f32 to vector<64x128xf32>
    %635 = arith.addf %633, %634 : vector<64x128xf32>
    %cst_278 = arith.constant 2.500000e-02 : f32
    %636 = vector.broadcast %cst_278 : f32 to vector<64x128xf32>
    %637 = arith.mulf %636, %635 : vector<64x128xf32>
    %638 = arith.addf %627, %637 : vector<64x128xf32>
    %c127_i32_279 = arith.constant 127 : i32
    %639 = tpu.dynamic_rotate %638 by %c127_i32_279 dim 1 : vector<64x128xf32>, i32 -> vector<64x128xf32>
    %c1_i32_280 = arith.constant 1 : i32
    %640 = tpu.dynamic_rotate %638 by %c1_i32_280 dim 1 : vector<64x128xf32>, i32 -> vector<64x128xf32>
    %c2_i32_281 = arith.constant 2 : i32
    %641 = tpu.dynamic_rotate %638 by %c2_i32_281 dim 1 : vector<64x128xf32>, i32 -> vector<64x128xf32>
    %642 = arith.subf %639, %641 : vector<64x128xf32>
    %643 = arith.mulf %642, %640 : vector<64x128xf32>
    %644 = arith.subf %643, %638 : vector<64x128xf32>
    %cst_282 = arith.constant 8.000000e+00 : f32
    %645 = vector.broadcast %cst_282 : f32 to vector<64x128xf32>
    %646 = arith.addf %644, %645 : vector<64x128xf32>
    %cst_283 = arith.constant 2.000000e+00 : f32
    %647 = vector.broadcast %cst_283 : f32 to vector<64x128xf32>
    %648 = arith.mulf %647, %646 : vector<64x128xf32>
    %649 = arith.addf %635, %648 : vector<64x128xf32>
    %cst_284 = arith.constant 2.500000e-02 : f32
    %650 = vector.broadcast %cst_284 : f32 to vector<64x128xf32>
    %651 = arith.mulf %650, %646 : vector<64x128xf32>
    %652 = arith.addf %627, %651 : vector<64x128xf32>
    %c127_i32_285 = arith.constant 127 : i32
    %653 = tpu.dynamic_rotate %652 by %c127_i32_285 dim 1 : vector<64x128xf32>, i32 -> vector<64x128xf32>
    %c1_i32_286 = arith.constant 1 : i32
    %654 = tpu.dynamic_rotate %652 by %c1_i32_286 dim 1 : vector<64x128xf32>, i32 -> vector<64x128xf32>
    %c2_i32_287 = arith.constant 2 : i32
    %655 = tpu.dynamic_rotate %652 by %c2_i32_287 dim 1 : vector<64x128xf32>, i32 -> vector<64x128xf32>
    %656 = arith.subf %653, %655 : vector<64x128xf32>
    %657 = arith.mulf %656, %654 : vector<64x128xf32>
    %658 = arith.subf %657, %652 : vector<64x128xf32>
    %cst_288 = arith.constant 8.000000e+00 : f32
    %659 = vector.broadcast %cst_288 : f32 to vector<64x128xf32>
    %660 = arith.addf %658, %659 : vector<64x128xf32>
    %cst_289 = arith.constant 2.000000e+00 : f32
    %661 = vector.broadcast %cst_289 : f32 to vector<64x128xf32>
    %662 = arith.mulf %661, %660 : vector<64x128xf32>
    %663 = arith.addf %649, %662 : vector<64x128xf32>
    %cst_290 = arith.constant 5.000000e-02 : f32
    %664 = vector.broadcast %cst_290 : f32 to vector<64x128xf32>
    %665 = arith.mulf %664, %660 : vector<64x128xf32>
    %666 = arith.addf %627, %665 : vector<64x128xf32>
    %c127_i32_291 = arith.constant 127 : i32
    %667 = tpu.dynamic_rotate %666 by %c127_i32_291 dim 1 : vector<64x128xf32>, i32 -> vector<64x128xf32>
    %c1_i32_292 = arith.constant 1 : i32
    %668 = tpu.dynamic_rotate %666 by %c1_i32_292 dim 1 : vector<64x128xf32>, i32 -> vector<64x128xf32>
    %c2_i32_293 = arith.constant 2 : i32
    %669 = tpu.dynamic_rotate %666 by %c2_i32_293 dim 1 : vector<64x128xf32>, i32 -> vector<64x128xf32>
    %670 = arith.subf %667, %669 : vector<64x128xf32>
    %671 = arith.mulf %670, %668 : vector<64x128xf32>
    %672 = arith.subf %671, %666 : vector<64x128xf32>
    %cst_294 = arith.constant 8.000000e+00 : f32
    %673 = vector.broadcast %cst_294 : f32 to vector<64x128xf32>
    %674 = arith.addf %672, %673 : vector<64x128xf32>
    %675 = arith.addf %663, %674 : vector<64x128xf32>
    %cst_295 = arith.constant 0.00833333377 : f32
    %676 = vector.broadcast %cst_295 : f32 to vector<64x128xf32>
    %677 = arith.mulf %676, %675 : vector<64x128xf32>
    %678 = arith.addf %627, %677 : vector<64x128xf32>
    %c127_i32_296 = arith.constant 127 : i32
    %679 = tpu.dynamic_rotate %678 by %c127_i32_296 dim 1 : vector<64x128xf32>, i32 -> vector<64x128xf32>
    %c1_i32_297 = arith.constant 1 : i32
    %680 = tpu.dynamic_rotate %678 by %c1_i32_297 dim 1 : vector<64x128xf32>, i32 -> vector<64x128xf32>
    %c2_i32_298 = arith.constant 2 : i32
    %681 = tpu.dynamic_rotate %678 by %c2_i32_298 dim 1 : vector<64x128xf32>, i32 -> vector<64x128xf32>
    %682 = arith.subf %679, %681 : vector<64x128xf32>
    %683 = arith.mulf %682, %680 : vector<64x128xf32>
    %684 = arith.subf %683, %678 : vector<64x128xf32>
    %cst_299 = arith.constant 8.000000e+00 : f32
    %685 = vector.broadcast %cst_299 : f32 to vector<64x128xf32>
    %686 = arith.addf %684, %685 : vector<64x128xf32>
    %cst_300 = arith.constant 2.500000e-02 : f32
    %687 = vector.broadcast %cst_300 : f32 to vector<64x128xf32>
    %688 = arith.mulf %687, %686 : vector<64x128xf32>
    %689 = arith.addf %678, %688 : vector<64x128xf32>
    %c127_i32_301 = arith.constant 127 : i32
    %690 = tpu.dynamic_rotate %689 by %c127_i32_301 dim 1 : vector<64x128xf32>, i32 -> vector<64x128xf32>
    %c1_i32_302 = arith.constant 1 : i32
    %691 = tpu.dynamic_rotate %689 by %c1_i32_302 dim 1 : vector<64x128xf32>, i32 -> vector<64x128xf32>
    %c2_i32_303 = arith.constant 2 : i32
    %692 = tpu.dynamic_rotate %689 by %c2_i32_303 dim 1 : vector<64x128xf32>, i32 -> vector<64x128xf32>
    %693 = arith.subf %690, %692 : vector<64x128xf32>
    %694 = arith.mulf %693, %691 : vector<64x128xf32>
    %695 = arith.subf %694, %689 : vector<64x128xf32>
    %cst_304 = arith.constant 8.000000e+00 : f32
    %696 = vector.broadcast %cst_304 : f32 to vector<64x128xf32>
    %697 = arith.addf %695, %696 : vector<64x128xf32>
    %cst_305 = arith.constant 2.000000e+00 : f32
    %698 = vector.broadcast %cst_305 : f32 to vector<64x128xf32>
    %699 = arith.mulf %698, %697 : vector<64x128xf32>
    %700 = arith.addf %686, %699 : vector<64x128xf32>
    %cst_306 = arith.constant 2.500000e-02 : f32
    %701 = vector.broadcast %cst_306 : f32 to vector<64x128xf32>
    %702 = arith.mulf %701, %697 : vector<64x128xf32>
    %703 = arith.addf %678, %702 : vector<64x128xf32>
    %c127_i32_307 = arith.constant 127 : i32
    %704 = tpu.dynamic_rotate %703 by %c127_i32_307 dim 1 : vector<64x128xf32>, i32 -> vector<64x128xf32>
    %c1_i32_308 = arith.constant 1 : i32
    %705 = tpu.dynamic_rotate %703 by %c1_i32_308 dim 1 : vector<64x128xf32>, i32 -> vector<64x128xf32>
    %c2_i32_309 = arith.constant 2 : i32
    %706 = tpu.dynamic_rotate %703 by %c2_i32_309 dim 1 : vector<64x128xf32>, i32 -> vector<64x128xf32>
    %707 = arith.subf %704, %706 : vector<64x128xf32>
    %708 = arith.mulf %707, %705 : vector<64x128xf32>
    %709 = arith.subf %708, %703 : vector<64x128xf32>
    %cst_310 = arith.constant 8.000000e+00 : f32
    %710 = vector.broadcast %cst_310 : f32 to vector<64x128xf32>
    %711 = arith.addf %709, %710 : vector<64x128xf32>
    %cst_311 = arith.constant 2.000000e+00 : f32
    %712 = vector.broadcast %cst_311 : f32 to vector<64x128xf32>
    %713 = arith.mulf %712, %711 : vector<64x128xf32>
    %714 = arith.addf %700, %713 : vector<64x128xf32>
    %cst_312 = arith.constant 5.000000e-02 : f32
    %715 = vector.broadcast %cst_312 : f32 to vector<64x128xf32>
    %716 = arith.mulf %715, %711 : vector<64x128xf32>
    %717 = arith.addf %678, %716 : vector<64x128xf32>
    %c127_i32_313 = arith.constant 127 : i32
    %718 = tpu.dynamic_rotate %717 by %c127_i32_313 dim 1 : vector<64x128xf32>, i32 -> vector<64x128xf32>
    %c1_i32_314 = arith.constant 1 : i32
    %719 = tpu.dynamic_rotate %717 by %c1_i32_314 dim 1 : vector<64x128xf32>, i32 -> vector<64x128xf32>
    %c2_i32_315 = arith.constant 2 : i32
    %720 = tpu.dynamic_rotate %717 by %c2_i32_315 dim 1 : vector<64x128xf32>, i32 -> vector<64x128xf32>
    %721 = arith.subf %718, %720 : vector<64x128xf32>
    %722 = arith.mulf %721, %719 : vector<64x128xf32>
    %723 = arith.subf %722, %717 : vector<64x128xf32>
    %cst_316 = arith.constant 8.000000e+00 : f32
    %724 = vector.broadcast %cst_316 : f32 to vector<64x128xf32>
    %725 = arith.addf %723, %724 : vector<64x128xf32>
    %726 = arith.addf %714, %725 : vector<64x128xf32>
    %cst_317 = arith.constant 0.00833333377 : f32
    %727 = vector.broadcast %cst_317 : f32 to vector<64x128xf32>
    %728 = arith.mulf %727, %726 : vector<64x128xf32>
    %729 = arith.addf %678, %728 : vector<64x128xf32>
    %c127_i32_318 = arith.constant 127 : i32
    %730 = tpu.dynamic_rotate %729 by %c127_i32_318 dim 1 : vector<64x128xf32>, i32 -> vector<64x128xf32>
    %c1_i32_319 = arith.constant 1 : i32
    %731 = tpu.dynamic_rotate %729 by %c1_i32_319 dim 1 : vector<64x128xf32>, i32 -> vector<64x128xf32>
    %c2_i32_320 = arith.constant 2 : i32
    %732 = tpu.dynamic_rotate %729 by %c2_i32_320 dim 1 : vector<64x128xf32>, i32 -> vector<64x128xf32>
    %733 = arith.subf %730, %732 : vector<64x128xf32>
    %734 = arith.mulf %733, %731 : vector<64x128xf32>
    %735 = arith.subf %734, %729 : vector<64x128xf32>
    %cst_321 = arith.constant 8.000000e+00 : f32
    %736 = vector.broadcast %cst_321 : f32 to vector<64x128xf32>
    %737 = arith.addf %735, %736 : vector<64x128xf32>
    %cst_322 = arith.constant 2.500000e-02 : f32
    %738 = vector.broadcast %cst_322 : f32 to vector<64x128xf32>
    %739 = arith.mulf %738, %737 : vector<64x128xf32>
    %740 = arith.addf %729, %739 : vector<64x128xf32>
    %c127_i32_323 = arith.constant 127 : i32
    %741 = tpu.dynamic_rotate %740 by %c127_i32_323 dim 1 : vector<64x128xf32>, i32 -> vector<64x128xf32>
    %c1_i32_324 = arith.constant 1 : i32
    %742 = tpu.dynamic_rotate %740 by %c1_i32_324 dim 1 : vector<64x128xf32>, i32 -> vector<64x128xf32>
    %c2_i32_325 = arith.constant 2 : i32
    %743 = tpu.dynamic_rotate %740 by %c2_i32_325 dim 1 : vector<64x128xf32>, i32 -> vector<64x128xf32>
    %744 = arith.subf %741, %743 : vector<64x128xf32>
    %745 = arith.mulf %744, %742 : vector<64x128xf32>
    %746 = arith.subf %745, %740 : vector<64x128xf32>
    %cst_326 = arith.constant 8.000000e+00 : f32
    %747 = vector.broadcast %cst_326 : f32 to vector<64x128xf32>
    %748 = arith.addf %746, %747 : vector<64x128xf32>
    %cst_327 = arith.constant 2.000000e+00 : f32
    %749 = vector.broadcast %cst_327 : f32 to vector<64x128xf32>
    %750 = arith.mulf %749, %748 : vector<64x128xf32>
    %751 = arith.addf %737, %750 : vector<64x128xf32>
    %cst_328 = arith.constant 2.500000e-02 : f32
    %752 = vector.broadcast %cst_328 : f32 to vector<64x128xf32>
    %753 = arith.mulf %752, %748 : vector<64x128xf32>
    %754 = arith.addf %729, %753 : vector<64x128xf32>
    %c127_i32_329 = arith.constant 127 : i32
    %755 = tpu.dynamic_rotate %754 by %c127_i32_329 dim 1 : vector<64x128xf32>, i32 -> vector<64x128xf32>
    %c1_i32_330 = arith.constant 1 : i32
    %756 = tpu.dynamic_rotate %754 by %c1_i32_330 dim 1 : vector<64x128xf32>, i32 -> vector<64x128xf32>
    %c2_i32_331 = arith.constant 2 : i32
    %757 = tpu.dynamic_rotate %754 by %c2_i32_331 dim 1 : vector<64x128xf32>, i32 -> vector<64x128xf32>
    %758 = arith.subf %755, %757 : vector<64x128xf32>
    %759 = arith.mulf %758, %756 : vector<64x128xf32>
    %760 = arith.subf %759, %754 : vector<64x128xf32>
    %cst_332 = arith.constant 8.000000e+00 : f32
    %761 = vector.broadcast %cst_332 : f32 to vector<64x128xf32>
    %762 = arith.addf %760, %761 : vector<64x128xf32>
    %cst_333 = arith.constant 2.000000e+00 : f32
    %763 = vector.broadcast %cst_333 : f32 to vector<64x128xf32>
    %764 = arith.mulf %763, %762 : vector<64x128xf32>
    %765 = arith.addf %751, %764 : vector<64x128xf32>
    %cst_334 = arith.constant 5.000000e-02 : f32
    %766 = vector.broadcast %cst_334 : f32 to vector<64x128xf32>
    %767 = arith.mulf %766, %762 : vector<64x128xf32>
    %768 = arith.addf %729, %767 : vector<64x128xf32>
    %c127_i32_335 = arith.constant 127 : i32
    %769 = tpu.dynamic_rotate %768 by %c127_i32_335 dim 1 : vector<64x128xf32>, i32 -> vector<64x128xf32>
    %c1_i32_336 = arith.constant 1 : i32
    %770 = tpu.dynamic_rotate %768 by %c1_i32_336 dim 1 : vector<64x128xf32>, i32 -> vector<64x128xf32>
    %c2_i32_337 = arith.constant 2 : i32
    %771 = tpu.dynamic_rotate %768 by %c2_i32_337 dim 1 : vector<64x128xf32>, i32 -> vector<64x128xf32>
    %772 = arith.subf %769, %771 : vector<64x128xf32>
    %773 = arith.mulf %772, %770 : vector<64x128xf32>
    %774 = arith.subf %773, %768 : vector<64x128xf32>
    %cst_338 = arith.constant 8.000000e+00 : f32
    %775 = vector.broadcast %cst_338 : f32 to vector<64x128xf32>
    %776 = arith.addf %774, %775 : vector<64x128xf32>
    %777 = arith.addf %765, %776 : vector<64x128xf32>
    %cst_339 = arith.constant 0.00833333377 : f32
    %778 = vector.broadcast %cst_339 : f32 to vector<64x128xf32>
    %779 = arith.mulf %778, %777 : vector<64x128xf32>
    %780 = arith.addf %729, %779 : vector<64x128xf32>
    %c127_i32_340 = arith.constant 127 : i32
    %781 = tpu.dynamic_rotate %780 by %c127_i32_340 dim 1 : vector<64x128xf32>, i32 -> vector<64x128xf32>
    %c1_i32_341 = arith.constant 1 : i32
    %782 = tpu.dynamic_rotate %780 by %c1_i32_341 dim 1 : vector<64x128xf32>, i32 -> vector<64x128xf32>
    %c2_i32_342 = arith.constant 2 : i32
    %783 = tpu.dynamic_rotate %780 by %c2_i32_342 dim 1 : vector<64x128xf32>, i32 -> vector<64x128xf32>
    %784 = arith.subf %781, %783 : vector<64x128xf32>
    %785 = arith.mulf %784, %782 : vector<64x128xf32>
    %786 = arith.subf %785, %780 : vector<64x128xf32>
    %cst_343 = arith.constant 8.000000e+00 : f32
    %787 = vector.broadcast %cst_343 : f32 to vector<64x128xf32>
    %788 = arith.addf %786, %787 : vector<64x128xf32>
    %cst_344 = arith.constant 2.500000e-02 : f32
    %789 = vector.broadcast %cst_344 : f32 to vector<64x128xf32>
    %790 = arith.mulf %789, %788 : vector<64x128xf32>
    %791 = arith.addf %780, %790 : vector<64x128xf32>
    %c127_i32_345 = arith.constant 127 : i32
    %792 = tpu.dynamic_rotate %791 by %c127_i32_345 dim 1 : vector<64x128xf32>, i32 -> vector<64x128xf32>
    %c1_i32_346 = arith.constant 1 : i32
    %793 = tpu.dynamic_rotate %791 by %c1_i32_346 dim 1 : vector<64x128xf32>, i32 -> vector<64x128xf32>
    %c2_i32_347 = arith.constant 2 : i32
    %794 = tpu.dynamic_rotate %791 by %c2_i32_347 dim 1 : vector<64x128xf32>, i32 -> vector<64x128xf32>
    %795 = arith.subf %792, %794 : vector<64x128xf32>
    %796 = arith.mulf %795, %793 : vector<64x128xf32>
    %797 = arith.subf %796, %791 : vector<64x128xf32>
    %cst_348 = arith.constant 8.000000e+00 : f32
    %798 = vector.broadcast %cst_348 : f32 to vector<64x128xf32>
    %799 = arith.addf %797, %798 : vector<64x128xf32>
    %cst_349 = arith.constant 2.000000e+00 : f32
    %800 = vector.broadcast %cst_349 : f32 to vector<64x128xf32>
    %801 = arith.mulf %800, %799 : vector<64x128xf32>
    %802 = arith.addf %788, %801 : vector<64x128xf32>
    %cst_350 = arith.constant 2.500000e-02 : f32
    %803 = vector.broadcast %cst_350 : f32 to vector<64x128xf32>
    %804 = arith.mulf %803, %799 : vector<64x128xf32>
    %805 = arith.addf %780, %804 : vector<64x128xf32>
    %c127_i32_351 = arith.constant 127 : i32
    %806 = tpu.dynamic_rotate %805 by %c127_i32_351 dim 1 : vector<64x128xf32>, i32 -> vector<64x128xf32>
    %c1_i32_352 = arith.constant 1 : i32
    %807 = tpu.dynamic_rotate %805 by %c1_i32_352 dim 1 : vector<64x128xf32>, i32 -> vector<64x128xf32>
    %c2_i32_353 = arith.constant 2 : i32
    %808 = tpu.dynamic_rotate %805 by %c2_i32_353 dim 1 : vector<64x128xf32>, i32 -> vector<64x128xf32>
    %809 = arith.subf %806, %808 : vector<64x128xf32>
    %810 = arith.mulf %809, %807 : vector<64x128xf32>
    %811 = arith.subf %810, %805 : vector<64x128xf32>
    %cst_354 = arith.constant 8.000000e+00 : f32
    %812 = vector.broadcast %cst_354 : f32 to vector<64x128xf32>
    %813 = arith.addf %811, %812 : vector<64x128xf32>
    %cst_355 = arith.constant 2.000000e+00 : f32
    %814 = vector.broadcast %cst_355 : f32 to vector<64x128xf32>
    %815 = arith.mulf %814, %813 : vector<64x128xf32>
    %816 = arith.addf %802, %815 : vector<64x128xf32>
    %cst_356 = arith.constant 5.000000e-02 : f32
    %817 = vector.broadcast %cst_356 : f32 to vector<64x128xf32>
    %818 = arith.mulf %817, %813 : vector<64x128xf32>
    %819 = arith.addf %780, %818 : vector<64x128xf32>
    %c127_i32_357 = arith.constant 127 : i32
    %820 = tpu.dynamic_rotate %819 by %c127_i32_357 dim 1 : vector<64x128xf32>, i32 -> vector<64x128xf32>
    %c1_i32_358 = arith.constant 1 : i32
    %821 = tpu.dynamic_rotate %819 by %c1_i32_358 dim 1 : vector<64x128xf32>, i32 -> vector<64x128xf32>
    %c2_i32_359 = arith.constant 2 : i32
    %822 = tpu.dynamic_rotate %819 by %c2_i32_359 dim 1 : vector<64x128xf32>, i32 -> vector<64x128xf32>
    %823 = arith.subf %820, %822 : vector<64x128xf32>
    %824 = arith.mulf %823, %821 : vector<64x128xf32>
    %825 = arith.subf %824, %819 : vector<64x128xf32>
    %cst_360 = arith.constant 8.000000e+00 : f32
    %826 = vector.broadcast %cst_360 : f32 to vector<64x128xf32>
    %827 = arith.addf %825, %826 : vector<64x128xf32>
    %828 = arith.addf %816, %827 : vector<64x128xf32>
    %cst_361 = arith.constant 0.00833333377 : f32
    %829 = vector.broadcast %cst_361 : f32 to vector<64x128xf32>
    %830 = arith.mulf %829, %828 : vector<64x128xf32>
    %831 = arith.addf %780, %830 : vector<64x128xf32>
    %c0_362 = arith.constant 0 : index
    %c0_363 = arith.constant 0 : index
    %832 = vector.load %arg2[%c0_362, %c0_363] : memref<64x128xf32, #tpu.memory_space<vmem>>, vector<64x128xf32>
    %833 = arith.mulf %832, %831 : vector<64x128xf32>
    %c3 = arith.constant 3 : index
    %c0_364 = arith.constant 0 : index
    %c0_365 = arith.constant 0 : index
    %834 = vector.load %arg3[%c3, %c0_364, %c0_365] : memref<4x64x128xf32, #tpu.memory_space<vmem>>, vector<1x64x128xf32>
    %835 = vector.shape_cast %834 : vector<1x64x128xf32> to vector<64x128xf32>
    %836 = vector.shape_cast %833 : vector<64x128xf32> to vector<1x64x128xf32>
    tpu.vector_store %arg3[%c3, %c0_364, %c0_365], %836 {strides = array<i32>} : memref<4x64x128xf32, #tpu.memory_space<vmem>>, vector<1x64x128xf32>,
    return
  }
  func.func @transform_0(%arg0: i32) -> (i32, i32) {
    %c0_i32 = arith.constant 0 : i32
    %c0_i32_0 = arith.constant 0 : i32
    return %arg0, %c0_i32 : i32, i32
  }
  func.func @transform_1(%arg0: i32) -> (i32, i32) {
    %c0_i32 = arith.constant 0 : i32
    %c0_i32_0 = arith.constant 0 : i32
    return %arg0, %c0_i32 : i32, i32
  }
  func.func @transform_2(%arg0: i32) -> (i32, i32, i32) {
    %c0_i32 = arith.constant 0 : i32
    %c0_i32_0 = arith.constant 0 : i32
    %c0_i32_1 = arith.constant 0 : i32
    return %c0_i32, %arg0, %c0_i32_0 : i32, i32, i32
  }
}

</mosaic_0001>

<bundles_post_ra>
// kernel: tpu_custom_call.1
= control target key start
LH: loop header
LB: loop body
LE: loop exit
PB: predicated region body
PF: predicated region fallthrough
CT: control target
= control target key end

     0   :  { %7 = vsyncpa [#allocation3], 0  ;;  %s13851_s0 = inlined_call_operand.hbm [shape: f32[64,128], index: 0, kind: input, shape index: {}]   ;;  %s13852_s1 = inlined_call_operand.hbm [shape: f32[64,128], index: 1, kind: input, shape index: {}]   ;;  %s13853_s2 = inlined_call_operand.hbm [shape: f32[4,64,128], index: 2, kind: output, shape index: {}]  }
   0x1   :  { %8 = vsyncpa [#allocation6], 0 }
   0x2   :  { %9 = vsyncpa [#allocation4], 0  ;;  %s7029_s9 = smov [#allocation2]   ;;  %s6957_s13 = scalar_lea.hbm %s13851_s0, 1024 }
   0x3   :  { %s15_s10 = sshll.u32 %s7029_s9, 4  ;;  %p6958_p0 = scmp.ne.s32.totalorder %s13851_s0, %s6957_s13  ;;  %s16_s10 = int_to_ptr.vmem [resolvable:$true] %s15_s10 }
   0x4   :  { %p6961_p1 = scmp.lt.u32.totalorder %s6957_s13, %s13851_s0 }
   0x6   :  { %p6963_p2 = pnand %p6961_p1, %p6958_p0 }
   0x8   :  { %6966 = shalt.err (!%p6963_p2)
}
   0x9   :  { %s6967_s18 = scalar_lea.vmem %s16_s10, 1024  ;;  %p6972_p4 = scmp.lt.s32.totalorder %s16_s10, %s16_s10 }
   0xa   :  { %p6968_p3 = scmp.ne.s32.totalorder %s16_s10, %s6967_s18  ;;  %p6973_p5 = scmp.lt.s32.totalorder %s6967_s18, %s6967_s18 }
   0xc   :  { %p6974_p6 = por %p6973_p5, %p6972_p4 }
   0xe   :  { %p6975_p7 = pnand %p6974_p6, %p6968_p3 }
  0x10   :  { %6978 = shalt.err (!%p6975_p7)
}
  0x11   :  { %s7030_s19 = smov 128   ;;  %s7031_s20 = smov 8  }
  0x12   :  { %21 = dma.hbm_to_vmem [thread:$0]  %s13851_s0, 1024, %s16_s10, [#allocation3], %s7030_s19, %s7030_s19, %s7031_s20  }
  0x13   :  { %s7032_s23 = smov [#allocation5]   ;;  %s6979_s27 = scalar_lea.hbm %s13852_s1, 1024 }
  0x14   :  { %s27_s24 = sshll.u32 %s7032_s23, 4  ;;  %p6980_p8 = scmp.ne.s32.totalorder %s13852_s1, %s6979_s27  ;;  %s28_s24 = int_to_ptr.vmem [resolvable:$true] %s27_s24 }
  0x15   :  { %p6983_p9 = scmp.lt.u32.totalorder %s6979_s27, %s13852_s1 }
  0x17   :  { %p6985_p10 = pnand %p6983_p9, %p6980_p8 }
  0x19   :  { %6988 = shalt.err (!%p6985_p10)
}
  0x1a   :  { %s6989_s4 = scalar_lea.vmem %s28_s24, 1024  ;;  %p6994_p12 = scmp.lt.s32.totalorder %s28_s24, %s28_s24 }
  0x1b   :  { %p6990_p11 = scmp.ne.s32.totalorder %s28_s24, %s6989_s4  ;;  %p6995_p13 = scmp.lt.s32.totalorder %s6989_s4, %s6989_s4 }
  0x1d   :  { %p6996_p0 = por %p6995_p13, %p6994_p12 }
  0x1f   :  { %p6997_p1 = pnand %p6996_p0, %p6990_p11 }
  0x21   :  { %7000 = shalt.err (!%p6997_p1)
}
  0x22   :  { %33 = dma.hbm_to_vmem [thread:$0]  %s13852_s1, 1024, %s28_s24, [#allocation6], %s7030_s19, %s7030_s19, %s7031_s20  }
  0x23   :  { %7023 = dma.done.wait [#allocation3], 1024  }
  0x24   :  { %7024 = vsyncadd [#allocation3], 4294966272 }
  0x25   :  { %7025 = dma.done.wait [#allocation6], 1024  }
  0x26   :  { %7026 = vsyncadd [#allocation6], 4294966272  ;;  %v7082_v0 = vld [vmem:[#allocation2 + $0x10] sm:$0xff]  ;;  %v7084_v1 = vld [vmem:[#allocation2] sm:$0xff]  ;;  %s7033_s6 = smov 127   ;;  %s7034_s1 = smov 2  }
  0x27   :  { %52 = vrot.lane.b32.xlu1 %v7082_v0, %s7033_s6  ;;  %48 = vrot.lane.b32.xlu0 %v7084_v1, %s7033_s6  ;;  %v7090_v2 = vld [vmem:[#allocation2 + $0x18] sm:$0xff]  ;;  %v7092_v3 = vld [vmem:[#allocation2 + $0x8] sm:$0xff]  ;;  %v7100_v5 = vld [vmem:[#allocation2 + $0x20] sm:$0xff]  ;;  %s7035_s7 = smov 1   ;;  %s7036_s8 = smov [#allocation7]  }
  0x28   :  { %v7098_v4 = vld [vmem:[#allocation2 + $0x28] sm:$0xff]  ;;  %v7106_v6 = vld [vmem:[#allocation2 + $0x38] sm:$0xff]  ;;  %v7108_v7 = vld [vmem:[#allocation2 + $0x30] sm:$0xff]  ;;  %s6936_s9 = sshll.u32 %s7036_s8, 4  ;;  %s6937_s9 = int_to_ptr.vmem [resolvable:$true] %s6936_s9 }
  0x29   :  { %s7001_s10 = scalar_lea.vmem %s6937_s9, 4096  ;;  %p7006_p3 = scmp.lt.s32.totalorder %s6937_s9, %s6937_s9 }
  0x2a   :  { %p7002_p2 = scmp.ne.s32.totalorder %s6937_s9, %s7001_s10  ;;  %p7007_p4 = scmp.lt.s32.totalorder %s7001_s10, %s7001_s10 }
  0x2b   :  { %54 = vrot.lane.b32.xlu1 %v7090_v2, %s7033_s6  ;;  %50 = vrot.lane.b32.xlu0 %v7092_v3, %s7033_s6 }
  0x2c   :  { %p7008_p5 = por %p7007_p4, %p7006_p3 }
  0x2e   :  { %p7009_p6 = pnand %p7008_p5, %p7002_p2 }
  0x2f   :  { %58 = vrot.lane.b32.xlu1 %v7098_v4, %s7033_s6  ;;  %56 = vrot.lane.b32.xlu0 %v7100_v5, %s7033_s6 }
  0x33   :  { %62 = vrot.lane.b32.xlu1 %v7106_v6, %s7033_s6  ;;  %60 = vrot.lane.b32.xlu0 %v7108_v7, %s7033_s6 }
  0x37   :  { %82 = vrot.lane.b32.xlu1 %v7092_v3, %s7034_s1  ;;  %80 = vrot.lane.b32.xlu0 %v7084_v1, %s7034_s1 }
  0x3b   :  { %86 = vrot.lane.b32.xlu1 %v7090_v2, %s7034_s1  ;;  %84 = vrot.lane.b32.xlu0 %v7082_v0, %s7034_s1 }
  0x3f   :  { %90 = vrot.lane.b32.xlu1 %v7098_v4, %s7034_s1  ;;  %88 = vrot.lane.b32.xlu0 %v7100_v5, %s7034_s1 }
  0x43   :  { %94 = vrot.lane.b32.xlu1 %v7106_v6, %s7034_s1  ;;  %92 = vrot.lane.b32.xlu0 %v7108_v7, %s7034_s1 }
  0x47   :  { %66 = vrot.lane.b32.xlu1 %v7092_v3, %s7035_s7  ;;  %64 = vrot.lane.b32.xlu0 %v7084_v1, %s7035_s7 }
  0x4b   :  { %70 = vrot.lane.b32.xlu1 %v7090_v2, %s7035_s7  ;;  %68 = vrot.lane.b32.xlu0 %v7082_v0, %s7035_s7 }
  0x4f   :  { %74 = vrot.lane.b32.xlu1 %v7098_v4, %s7035_s7  ;;  %72 = vrot.lane.b32.xlu0 %v7100_v5, %s7035_s7 }
  0x53   :  { %78 = vrot.lane.b32.xlu1 %v7106_v6, %s7035_s7  ;;  %76 = vrot.lane.b32.xlu0 %v7108_v7, %s7035_s7 }
  0x99   :  { %v53_v8 = vpop.permute.xlu1 %52  ;;  %v49_v9 = vpop.permute.xlu0 %48 }
  0x9d   :  { %v55_v10 = vpop.permute.xlu1 %54  ;;  %v51_v11 = vpop.permute.xlu0 %50 }
  0xa1   :  { %v59_v12 = vpop.permute.xlu1 %58  ;;  %v57_v13 = vpop.permute.xlu0 %56 }
  0xa5   :  { %v63_v14 = vpop.permute.xlu1 %62  ;;  %v61_v15 = vpop.permute.xlu0 %60 }
  0xa9   :  { %v83_v16 = vpop.permute.xlu1 %82  ;;  %v81_v17 = vpop.permute.xlu0 %80 }
  0xaa   :  { %v97_v24 = vsub.f32 %v51_v11, %v83_v16  ;;  %v96_v25 = vsub.f32 %v49_v9, %v81_v17 }
  0xad   :  { %v87_v18 = vpop.permute.xlu1 %86  ;;  %v85_v19 = vpop.permute.xlu0 %84 }
  0xae   :  { %v99_v30 = vsub.f32 %v55_v10, %v87_v18  ;;  %v98_v31 = vsub.f32 %v53_v8, %v85_v19 }
  0xb1   :  { %v91_v20 = vpop.permute.xlu1 %90  ;;  %v89_v21 = vpop.permute.xlu0 %88 }
  0xb2   :  { %v101_v40 = vsub.f32 %v59_v12, %v91_v20  ;;  %v100_v41 = vsub.f32 %v57_v13, %v89_v21 }
  0xb5   :  { %v95_v22 = vpop.permute.xlu1 %94  ;;  %v93_v23 = vpop.permute.xlu0 %92 }
  0xb6   :  { %v103_v52 = vsub.f32 %v63_v14, %v95_v22  ;;  %v102_v53 = vsub.f32 %v61_v15, %v93_v23 }
  0xb9   :  { %v67_v26 = vpop.permute.xlu1 %66  ;;  %v65_v27 = vpop.permute.xlu0 %64 }
  0xba   :  { %v105_v28 = vmul.f32 %v97_v24, %v67_v26  ;;  %v104_v29 = vmul.f32 %v96_v25, %v65_v27 }
  0xbc   :  { %v113_v32 = vsub.f32 %v105_v28, %v7092_v3  ;;  %v112_v33 = vsub.f32 %v104_v29, %v7084_v1 }
  0xbd   :  { %v71_v34 = vpop.permute.xlu1 %70  ;;  %v69_v35 = vpop.permute.xlu0 %68 }
  0xbe   :  { %v7148_v36 = vadd.f32 8.0, %v113_v32  ;;  %v7150_v37 = vadd.f32 8.0, %v112_v33  ;;  %v107_v38 = vmul.f32 %v99_v30, %v71_v34  ;;  %v106_v39 = vmul.f32 %v98_v31, %v69_v35 }
  0xc0   :  { %v129_v42 = vmul.f32 0.025, %v7148_v36  ;;  %v128_v43 = vmul.f32 0.025, %v7150_v37  ;;  %v115_v44 = vsub.f32 %v107_v38, %v7090_v2  ;;  %v114_v45 = vsub.f32 %v106_v39, %v7082_v0 }
  0xc1   :  { %v75_v46 = vpop.permute.xlu1 %74  ;;  %v73_v47 = vpop.permute.xlu0 %72 }
  0xc2   :  { %v7156_v48 = vadd.f32 8.0, %v115_v44  ;;  %v7158_v49 = vadd.f32 8.0, %v114_v45  ;;  %v109_v50 = vmul.f32 %v101_v40, %v75_v46  ;;  %v108_v51 = vmul.f32 %v100_v41, %v73_v47 }
  0xc3   :  { %v7161_v54 = vadd.f32 %v129_v42, %v7092_v3  ;;  %v7164_v55 = vadd.f32 %v128_v43, %v7084_v1 }
  0xc4   :  { %v131_v56 = vmul.f32 0.025, %v7156_v48  ;;  %v130_v57 = vmul.f32 0.025, %v7158_v49  ;;  %v117_v58 = vsub.f32 %v109_v50, %v7098_v4  ;;  %v116_v59 = vsub.f32 %v108_v51, %v7100_v5 }
  0xc5   :  { %146 = vrot.lane.b32.xlu1 %v7161_v54, %s7033_s6  ;;  %144 = vrot.lane.b32.xlu0 %v7164_v55, %s7033_s6  ;;  %v79_v60 = vpop.permute.xlu1 %78  ;;  %v77_v61 = vpop.permute.xlu0 %76 }
  0xc6   :  { %v7174_v62 = vadd.f32 8.0, %v117_v58  ;;  %v7176_v63 = vadd.f32 8.0, %v116_v59  ;;  %v111_v8 = vmul.f32 %v103_v52, %v79_v60  ;;  %v110_v9 = vmul.f32 %v102_v53, %v77_v61 }
  0xc7   :  { %v7179_v10 = vadd.f32 %v131_v56, %v7090_v2  ;;  %v7182_v11 = vadd.f32 %v130_v57, %v7082_v0 }
  0xc8   :  { %v133_v12 = vmul.f32 0.025, %v7174_v62  ;;  %v132_v13 = vmul.f32 0.025, %v7176_v63  ;;  %v119_v14 = vsub.f32 %v111_v8, %v7106_v6  ;;  %v118_v15 = vsub.f32 %v110_v9, %v7108_v7 }
  0xc9   :  { %150 = vrot.lane.b32.xlu1 %v7179_v10, %s7033_s6  ;;  %148 = vrot.lane.b32.xlu0 %v7182_v11, %s7033_s6 }
  0xca   :  { %v7192_v16 = vadd.f32 8.0, %v119_v14  ;;  %v7194_v17 = vadd.f32 8.0, %v118_v15  ;;  %v7197_v18 = vadd.f32 %v133_v12, %v7098_v4  ;;  %v7200_v19 = vadd.f32 %v132_v13, %v7100_v5 }
  0xcc   :  { %v135_v20 = vmul.f32 0.025, %v7192_v16  ;;  %v134_v21 = vmul.f32 0.025, %v7194_v17 }
  0xcd   :  { %154 = vrot.lane.b32.xlu1 %v7197_v18, %s7033_s6  ;;  %152 = vrot.lane.b32.xlu0 %v7200_v19, %s7033_s6 }
  0xce   :  { %v7209_v22 = vadd.f32 %v135_v20, %v7106_v6  ;;  %v7212_v23 = vadd.f32 %v134_v21, %v7108_v7 }
  0xd1   :  { %158 = vrot.lane.b32.xlu1 %v7209_v22, %s7033_s6  ;;  %156 = vrot.lane.b32.xlu0 %v7212_v23, %s7033_s6 }
  0xd5   :  { %178 = vrot.lane.b32.xlu1 %v7161_v54, %s7034_s1  ;;  %176 = vrot.lane.b32.xlu0 %v7164_v55, %s7034_s1 }
  0xd9   :  { %182 = vrot.lane.b32.xlu1 %v7179_v10, %s7034_s1  ;;  %180 = vrot.lane.b32.xlu0 %v7182_v11, %s7034_s1 }
  0xdd   :  { %186 = vrot.lane.b32.xlu1 %v7197_v18, %s7034_s1  ;;  %184 = vrot.lane.b32.xlu0 %v7200_v19, %s7034_s1 }
  0xe1   :  { %190 = vrot.lane.b32.xlu1 %v7209_v22, %s7034_s1  ;;  %188 = vrot.lane.b32.xlu0 %v7212_v23, %s7034_s1 }
  0xe5   :  { %162 = vrot.lane.b32.xlu1 %v7161_v54, %s7035_s7  ;;  %160 = vrot.lane.b32.xlu0 %v7164_v55, %s7035_s7 }
  0xe9   :  { %166 = vrot.lane.b32.xlu1 %v7179_v10, %s7035_s7  ;;  %164 = vrot.lane.b32.xlu0 %v7182_v11, %s7035_s7 }
  0xed   :  { %170 = vrot.lane.b32.xlu1 %v7197_v18, %s7035_s7  ;;  %168 = vrot.lane.b32.xlu0 %v7200_v19, %s7035_s7 }
  0xf1   :  { %174 = vrot.lane.b32.xlu1 %v7209_v22, %s7035_s7  ;;  %172 = vrot.lane.b32.xlu0 %v7212_v23, %s7035_s7 }
 0x137   :  { %v147_v24 = vpop.permute.xlu1 %146  ;;  %v145_v25 = vpop.permute.xlu0 %144 }
 0x13b   :  { %v151_v26 = vpop.permute.xlu1 %150  ;;  %v149_v27 = vpop.permute.xlu0 %148 }
 0x13f   :  { %v155_v28 = vpop.permute.xlu1 %154  ;;  %v153_v29 = vpop.permute.xlu0 %152 }
 0x143   :  { %v159_v30 = vpop.permute.xlu1 %158  ;;  %v157_v31 = vpop.permute.xlu0 %156 }
 0x147   :  { %v179_v32 = vpop.permute.xlu1 %178  ;;  %v177_v33 = vpop.permute.xlu0 %176 }
 0x148   :  { %v193_v42 = vsub.f32 %v147_v24, %v179_v32  ;;  %v192_v43 = vsub.f32 %v145_v25, %v177_v33 }
 0x14b   :  { %v183_v34 = vpop.permute.xlu1 %182  ;;  %v181_v35 = vpop.permute.xlu0 %180 }
 0x14c   :  { %v195_v50 = vsub.f32 %v151_v26, %v183_v34  ;;  %v194_v51 = vsub.f32 %v149_v27, %v181_v35 }
 0x14f   :  { %v187_v38 = vpop.permute.xlu1 %186  ;;  %v185_v39 = vpop.permute.xlu0 %184 }
 0x150   :  { %v197_v8 = vsub.f32 %v155_v28, %v187_v38  ;;  %v196_v9 = vsub.f32 %v153_v29, %v185_v39 }
 0x153   :  { %v191_v40 = vpop.permute.xlu1 %190  ;;  %v189_v41 = vpop.permute.xlu0 %188 }
 0x154   :  { %v199_v28 = vsub.f32 %v159_v30, %v191_v40  ;;  %v198_v29 = vsub.f32 %v157_v31, %v189_v41 }
 0x157   :  { %v163_v44 = vpop.permute.xlu1 %162  ;;  %v161_v45 = vpop.permute.xlu0 %160 }
 0x158   :  { %v201_v46 = vmul.f32 %v193_v42, %v163_v44  ;;  %v200_v47 = vmul.f32 %v192_v43, %v161_v45 }
 0x15a   :  { %v209_v52 = vsub.f32 %v201_v46, %v7161_v54  ;;  %v208_v53 = vsub.f32 %v200_v47, %v7164_v55 }
 0x15b   :  { %v167_v56 = vpop.permute.xlu1 %166  ;;  %v165_v57 = vpop.permute.xlu0 %164 }
 0x15c   :  { %v7252_v58 = vadd.f32 8.0, %v209_v52  ;;  %v7254_v59 = vadd.f32 8.0, %v208_v53  ;;  %v203_v60 = vmul.f32 %v195_v50, %v167_v56  ;;  %v202_v61 = vmul.f32 %v194_v51, %v165_v57 }
 0x15e   :  { %v241_v12 = vmul.f32 0.025, %v7252_v58  ;;  %v240_v13 = vmul.f32 0.025, %v7254_v59  ;;  %v211_v14 = vsub.f32 %v203_v60, %v7179_v10  ;;  %v210_v54 = vsub.f32 %v202_v61, %v7182_v11 }
 0x15f   :  { %v171_v15 = vpop.permute.xlu1 %170  ;;  %v169_v55 = vpop.permute.xlu0 %168 }
 0x160   :  { %v205_v20 = vmul.f32 %v197_v8, %v171_v15  ;;  %v204_v21 = vmul.f32 %v196_v9, %v169_v55  ;;  %v7260_v24 = vadd.f32 8.0, %v211_v14  ;;  %v7262_v25 = vadd.f32 8.0, %v210_v54 }
 0x161   :  { %v7265_v26 = vadd.f32 %v241_v12, %v7092_v3  ;;  %v7268_v27 = vadd.f32 %v240_v13, %v7084_v1 }
 0x162   :  { %v213_v10 = vsub.f32 %v205_v20, %v7197_v18  ;;  %v212_v11 = vsub.f32 %v204_v21, %v7200_v19  ;;  %v243_v32 = vmul.f32 0.025, %v7260_v24  ;;  %v242_v33 = vmul.f32 0.025, %v7262_v25 }
 0x163   :  { %258 = vrot.lane.b32.xlu1 %v7265_v26, %s7033_s6  ;;  %256 = vrot.lane.b32.xlu0 %v7268_v27, %s7033_s6  ;;  %v175_v34 = vpop.permute.xlu1 %174  ;;  %v173_v35 = vpop.permute.xlu0 %172 }
 0x164   :  { %v7278_v38 = vadd.f32 8.0, %v213_v10  ;;  %v7280_v30 = vadd.f32 8.0, %v212_v11  ;;  %v207_v31 = vmul.f32 %v199_v28, %v175_v34  ;;  %v206_v18 = vmul.f32 %v198_v29, %v173_v35 }
 0x165   :  { %v7283_v19 = vadd.f32 %v243_v32, %v7090_v2  ;;  %v7286_v39 = vadd.f32 %v242_v33, %v7082_v0  ;;  %v225_v10 = vmul.f32 2.0, %v7252_v58  ;;  %v224_v11 = vmul.f32 2.0, %v7254_v59 }
 0x166   :  { %v245_v40 = vmul.f32 0.025, %v7278_v38  ;;  %v244_v41 = vmul.f32 0.025, %v7280_v30  ;;  %v215_v42 = vsub.f32 %v207_v31, %v7209_v22  ;;  %v214_v43 = vsub.f32 %v206_v18, %v7212_v23 }
 0x167   :  { %262 = vrot.lane.b32.xlu1 %v7283_v19, %s7033_s6  ;;  %260 = vrot.lane.b32.xlu0 %v7286_v39, %s7033_s6  ;;  %v227_v32 = vmul.f32 2.0, %v7260_v24  ;;  %v226_v33 = vmul.f32 2.0, %v7262_v25  ;;  %v233_v59 = vadd.f32 %v225_v10, %v7148_v36  ;;  %v232_v24 = vadd.f32 %v224_v11, %v7150_v37 }
 0x168   :  { %v7297_v44 = vadd.f32 %v245_v40, %v7098_v4  ;;  %v7300_v45 = vadd.f32 %v244_v41, %v7100_v5  ;;  %v7302_v46 = vadd.f32 8.0, %v215_v42  ;;  %v7304_v47 = vadd.f32 8.0, %v214_v43 }
 0x169   :  { %v229_v40 = vmul.f32 2.0, %v7278_v38  ;;  %v228_v41 = vmul.f32 2.0, %v7280_v30  ;;  %v235_v25 = vadd.f32 %v227_v32, %v7156_v48 }
 0x16a   :  { %v247_v22 = vmul.f32 0.025, %v7302_v46  ;;  %v246_v23 = vmul.f32 0.025, %v7304_v47  ;;  %v231_v48 = vmul.f32 2.0, %v7302_v46 }
 0x16b   :  { %266 = vrot.lane.b32.xlu1 %v7297_v44, %s7033_s6  ;;  %264 = vrot.lane.b32.xlu0 %v7300_v45, %s7033_s6 }
 0x16c   :  { %v7313_v50 = vadd.f32 %v247_v22, %v7106_v6  ;;  %v7316_v51 = vadd.f32 %v246_v23, %v7108_v7  ;;  %v234_v23 = vadd.f32 %v226_v33, %v7158_v49 }
 0x16f   :  { %270 = vrot.lane.b32.xlu1 %v7313_v50, %s7033_s6  ;;  %268 = vrot.lane.b32.xlu0 %v7316_v51, %s7033_s6 }
 0x173   :  { %290 = vrot.lane.b32.xlu1 %v7265_v26, %s7034_s1  ;;  %288 = vrot.lane.b32.xlu0 %v7268_v27, %s7034_s1 }
 0x177   :  { %294 = vrot.lane.b32.xlu1 %v7283_v19, %s7034_s1  ;;  %292 = vrot.lane.b32.xlu0 %v7286_v39, %s7034_s1 }
 0x17b   :  { %298 = vrot.lane.b32.xlu1 %v7297_v44, %s7034_s1  ;;  %296 = vrot.lane.b32.xlu0 %v7300_v45, %s7034_s1 }
 0x17f   :  { %302 = vrot.lane.b32.xlu1 %v7313_v50, %s7034_s1  ;;  %300 = vrot.lane.b32.xlu0 %v7316_v51, %s7034_s1 }
 0x183   :  { %274 = vrot.lane.b32.xlu1 %v7265_v26, %s7035_s7  ;;  %272 = vrot.lane.b32.xlu0 %v7268_v27, %s7035_s7 }
 0x187   :  { %278 = vrot.lane.b32.xlu1 %v7283_v19, %s7035_s7  ;;  %276 = vrot.lane.b32.xlu0 %v7286_v39, %s7035_s7 }
 0x18b   :  { %282 = vrot.lane.b32.xlu1 %v7297_v44, %s7035_s7  ;;  %280 = vrot.lane.b32.xlu0 %v7300_v45, %s7035_s7 }
 0x18f   :  { %286 = vrot.lane.b32.xlu1 %v7313_v50, %s7035_s7  ;;  %284 = vrot.lane.b32.xlu0 %v7316_v51, %s7035_s7 }
 0x1d5   :  { %v259_v52 = vpop.permute.xlu1 %258  ;;  %v257_v53 = vpop.permute.xlu0 %256 }
 0x1d9   :  { %v263_v56 = vpop.permute.xlu1 %262  ;;  %v261_v57 = vpop.permute.xlu0 %260 }
 0x1dd   :  { %v267_v60 = vpop.permute.xlu1 %266  ;;  %v265_v61 = vpop.permute.xlu0 %264 }
 0x1e1   :  { %v7354_v8 = vpop.permute.xlu1 %270  ;;  %v7356_v9 = vpop.permute.xlu0 %268 }
 0x1e5   :  { %v291_v12 = vpop.permute.xlu1 %290  ;;  %v289_v13 = vpop.permute.xlu0 %288 }
 0x1e6   :  { %v305_v28 = vsub.f32 %v259_v52, %v291_v12  ;;  %v304_v29 = vsub.f32 %v257_v53, %v289_v13 }
 0x1e9   :  { %v295_v14 = vpop.permute.xlu1 %294  ;;  %v293_v54 = vpop.permute.xlu0 %292 }
 0x1ea   :  { %v307_v42 = vsub.f32 %v263_v56, %v295_v14  ;;  %v306_v43 = vsub.f32 %v261_v57, %v293_v54  ;;  %v237_v56 = vadd.f32 %v229_v40, %v7174_v62 }
 0x1ed   :  { %v299_v15 = vpop.permute.xlu1 %298  ;;  %v297_v55 = vpop.permute.xlu0 %296 }
 0x1ee   :  { %v309_v57 = vsub.f32 %v267_v60, %v299_v15 }
 0x1f1   :  { %v7358_v20 = vpop.permute.xlu1 %302  ;;  %v7360_v21 = vpop.permute.xlu0 %300 }
 0x1f2   :  { %v311_v49 = vsub.f32 %v7354_v8, %v7358_v20 }
 0x1f5   :  { %v275_v34 = vpop.permute.xlu1 %274  ;;  %v273_v35 = vpop.permute.xlu0 %272 }
 0x1f6   :  { %v313_v31 = vmul.f32 %v305_v28, %v275_v34  ;;  %v312_v18 = vmul.f32 %v304_v29, %v273_v35 }
 0x1f8   :  { %v321_v22 = vsub.f32 %v313_v31, %v7265_v26  ;;  %v320_v58 = vsub.f32 %v312_v18, %v7268_v27  ;;  %v236_v26 = vadd.f32 %v228_v41, %v7176_v63  ;;  %v308_v27 = vsub.f32 %v265_v61, %v297_v55 }
 0x1f9   :  { %v279_v52 = vpop.permute.xlu1 %278  ;;  %v277_v53 = vpop.permute.xlu0 %276 }
 0x1fa   :  { %v329_v12 = vadd.f32 8.0, %v321_v22  ;;  %v328_v38 = vadd.f32 8.0, %v320_v58  ;;  %v315_v13 = vmul.f32 %v307_v42, %v279_v52  ;;  %v314_v30 = vmul.f32 %v306_v43, %v277_v53 }
 0x1fc   :  { %v337_v14 = vmul.f32 2.0, %v329_v12  ;;  %v353_v36 = vmul.f32 0.05, %v329_v12  ;;  %v336_v54 = vmul.f32 2.0, %v328_v38  ;;  %v352_v37 = vmul.f32 0.05, %v328_v38 }
 0x1fd   :  { %v323_v28 = vsub.f32 %v315_v13, %v7283_v19  ;;  %v322_v29 = vsub.f32 %v314_v30, %v7286_v39  ;;  %v283_v10 = vpop.permute.xlu1 %282  ;;  %v281_v11 = vpop.permute.xlu0 %280  ;;  %v230_v19 = vmul.f32 2.0, %v7304_v47  ;;  %v310_v39 = vsub.f32 %v7356_v9, %v7360_v21 }
 0x1fe   :  { %v317_v62 = vmul.f32 %v309_v57, %v283_v10  ;;  %v316_v32 = vmul.f32 %v308_v27, %v281_v11  ;;  %v7382_v63 = vadd.f32 %v353_v36, %v7092_v3  ;;  %v7385_v60 = vadd.f32 %v352_v37, %v7084_v1 }
 0x1ff   :  { %v331_v61 = vadd.f32 8.0, %v323_v28  ;;  %v330_v15 = vadd.f32 8.0, %v322_v29  ;;  %v7387_v46 = vadd.f32 %v337_v14, %v233_v59  ;;  %v7389_v55 = vadd.f32 %v336_v54, %v232_v24 }
 0x200   :  { %v325_v8 = vsub.f32 %v317_v62, %v7297_v44  ;;  %v324_v20 = vsub.f32 %v316_v32, %v7300_v45  ;;  %370 = vrot.lane.b32.xlu1 %v7382_v63, %s7033_s6  ;;  %368 = vrot.lane.b32.xlu0 %v7385_v60, %s7033_s6  ;;  %v238_v30 = vadd.f32 %v230_v19, %v7194_v17 }
 0x201   :  { %v339_v33 = vmul.f32 2.0, %v331_v61  ;;  %v355_v34 = vmul.f32 0.05, %v331_v61  ;;  %v338_v35 = vmul.f32 2.0, %v330_v15  ;;  %v354_v31 = vmul.f32 0.05, %v330_v15  ;;  %v287_v18 = vpop.permute.xlu1 %286  ;;  %v285_v40 = vpop.permute.xlu0 %284 }
 0x202   :  { %v333_v47 = vadd.f32 8.0, %v325_v8  ;;  %v332_v41 = vadd.f32 8.0, %v324_v20  ;;  %v319_v42 = vmul.f32 %v311_v49, %v287_v18  ;;  %v318_v9 = vmul.f32 %v310_v39, %v285_v40 }
 0x203   :  { %v7401_v44 = vadd.f32 %v355_v34, %v7090_v2  ;;  %v7404_v45 = vadd.f32 %v354_v31, %v7082_v0  ;;  %v7406_v21 = vadd.f32 %v339_v33, %v235_v25  ;;  %v7408_v43 = vadd.f32 %v338_v35, %v234_v23 }
 0x204   :  { %v341_v22 = vmul.f32 2.0, %v333_v47  ;;  %v357_v58 = vmul.f32 0.05, %v333_v47  ;;  %v340_v59 = vmul.f32 2.0, %v332_v41  ;;  %v356_v24 = vmul.f32 0.05, %v332_v41 }
 0x205   :  { %v327_v52 = vsub.f32 %v319_v42, %v7313_v50  ;;  %v326_v53 = vsub.f32 %v318_v9, %v7316_v51  ;;  %374 = vrot.lane.b32.xlu1 %v7401_v44, %s7033_s6  ;;  %372 = vrot.lane.b32.xlu0 %v7404_v45, %s7033_s6  ;;  %v239_v51 = vadd.f32 %v231_v48, %v7192_v16 }
 0x206   :  { %v7417_v12 = vadd.f32 %v357_v58, %v7098_v4  ;;  %v7420_v25 = vadd.f32 %v356_v24, %v7100_v5  ;;  %v7422_v23 = vadd.f32 %v341_v22, %v237_v56  ;;  %v7424_v38 = vadd.f32 %v340_v59, %v236_v26 }
 0x207   :  { %v335_v13 = vadd.f32 8.0, %v327_v52  ;;  %v334_v50 = vadd.f32 8.0, %v326_v53 }
 0x209   :  { %v343_v57 = vmul.f32 2.0, %v335_v13  ;;  %v359_v27 = vmul.f32 0.05, %v335_v13  ;;  %v342_v14 = vmul.f32 2.0, %v334_v50  ;;  %v358_v36 = vmul.f32 0.05, %v334_v50  ;;  %378 = vrot.lane.b32.xlu1 %v7417_v12, %s7033_s6  ;;  %376 = vrot.lane.b32.xlu0 %v7420_v25, %s7033_s6 }
 0x20b   :  { %v7433_v56 = vadd.f32 %v359_v27, %v7106_v6  ;;  %v7436_v26 = vadd.f32 %v358_v36, %v7108_v7  ;;  %v7438_v54 = vadd.f32 %v343_v57, %v239_v51  ;;  %v7440_v16 = vadd.f32 %v342_v14, %v238_v30 }
 0x20d   :  { %382 = vrot.lane.b32.xlu1 %v7433_v56, %s7033_s6  ;;  %380 = vrot.lane.b32.xlu0 %v7436_v26, %s7033_s6 }
 0x211   :  { %402 = vrot.lane.b32.xlu1 %v7382_v63, %s7034_s1  ;;  %400 = vrot.lane.b32.xlu0 %v7385_v60, %s7034_s1 }
 0x215   :  { %406 = vrot.lane.b32.xlu1 %v7401_v44, %s7034_s1  ;;  %404 = vrot.lane.b32.xlu0 %v7404_v45, %s7034_s1 }
 0x219   :  { %410 = vrot.lane.b32.xlu1 %v7417_v12, %s7034_s1  ;;  %408 = vrot.lane.b32.xlu0 %v7420_v25, %s7034_s1 }
 0x21d   :  { %414 = vrot.lane.b32.xlu1 %v7433_v56, %s7034_s1  ;;  %412 = vrot.lane.b32.xlu0 %v7436_v26, %s7034_s1 }
 0x221   :  { %386 = vrot.lane.b32.xlu1 %v7382_v63, %s7035_s7  ;;  %384 = vrot.lane.b32.xlu0 %v7385_v60, %s7035_s7 }
 0x225   :  { %390 = vrot.lane.b32.xlu1 %v7401_v44, %s7035_s7  ;;  %388 = vrot.lane.b32.xlu0 %v7404_v45, %s7035_s7 }
 0x229   :  { %394 = vrot.lane.b32.xlu1 %v7417_v12, %s7035_s7  ;;  %392 = vrot.lane.b32.xlu0 %v7420_v25, %s7035_s7 }
 0x22d   :  { %398 = vrot.lane.b32.xlu1 %v7433_v56, %s7035_s7  ;;  %396 = vrot.lane.b32.xlu0 %v7436_v26, %s7035_s7 }
 0x272   :  { %v371_v17 = vpop.permute.xlu1 %370  ;;  %v369_v37 = vpop.permute.xlu0 %368 }
 0x277   :  { %v375_v48 = vpop.permute.xlu1 %374  ;;  %v373_v49 = vpop.permute.xlu0 %372 }
 0x27b   :  { %v379_v28 = vpop.permute.xlu1 %378  ;;  %v377_v29 = vpop.permute.xlu0 %376 }
 0x27f   :  { %v383_v10 = vpop.permute.xlu1 %382  ;;  %v381_v11 = vpop.permute.xlu0 %380 }
 0x283   :  { %v403_v62 = vpop.permute.xlu1 %402  ;;  %v401_v32 = vpop.permute.xlu0 %400 }
 0x284   :  { %v417_v33 = vsub.f32 %v371_v17, %v403_v62  ;;  %v416_v34 = vsub.f32 %v369_v37, %v401_v32 }
 0x287   :  { %v407_v61 = vpop.permute.xlu1 %406  ;;  %v405_v15 = vpop.permute.xlu0 %404 }
 0x288   :  { %v419_v47 = vsub.f32 %v375_v48, %v407_v61  ;;  %v418_v41 = vsub.f32 %v373_v49, %v405_v15 }
 0x28b   :  { %v411_v19 = vpop.permute.xlu1 %410  ;;  %v409_v39 = vpop.permute.xlu0 %408 }
 0x28c   :  { %v421_v57 = vsub.f32 %v379_v28, %v411_v19  ;;  %v420_v27 = vsub.f32 %v377_v29, %v409_v39 }
 0x28f   :  { %v415_v8 = vpop.permute.xlu1 %414  ;;  %v413_v20 = vpop.permute.xlu0 %412 }
 0x290   :  { %v423_v48 = vsub.f32 %v383_v10, %v415_v8  ;;  %v422_v49 = vsub.f32 %v381_v11, %v413_v20 }
 0x293   :  { %v387_v35 = vpop.permute.xlu1 %386  ;;  %v385_v31 = vpop.permute.xlu0 %384 }
 0x294   :  { %v425_v18 = vmul.f32 %v417_v33, %v387_v35  ;;  %v424_v40 = vmul.f32 %v416_v34, %v385_v31 }
 0x296   :  { %v433_v42 = vsub.f32 %v425_v18, %v7382_v63  ;;  %v432_v9 = vsub.f32 %v424_v40, %v7385_v60 }
 0x297   :  { %v391_v22 = vpop.permute.xlu1 %390  ;;  %v389_v58 = vpop.permute.xlu0 %388 }
 0x298   :  { %v441_v59 = vadd.f32 8.0, %v433_v42  ;;  %v440_v24 = vadd.f32 8.0, %v432_v9  ;;  %v427_v52 = vmul.f32 %v419_v47, %v391_v22  ;;  %v426_v53 = vmul.f32 %v418_v41, %v389_v58 }
 0x29a   :  { %v449_v13 = vadd.f32 %v441_v59, %v7387_v46  ;;  %v448_v50 = vadd.f32 %v440_v24, %v7389_v55  ;;  %v435_v51 = vsub.f32 %v427_v52, %v7401_v44  ;;  %v434_v30 = vsub.f32 %v426_v53, %v7404_v45 }
 0x29b   :  { %v395_v14 = vpop.permute.xlu1 %394  ;;  %v393_v63 = vpop.permute.xlu0 %392 }
 0x29c   :  { %v457_v36 = vmul.f32 0.008333334, %v449_v13  ;;  %v456_v60 = vmul.f32 0.008333334, %v448_v50  ;;  %v443_v17 = vadd.f32 8.0, %v435_v51  ;;  %v442_v37 = vadd.f32 8.0, %v434_v30 }
 0x29d   :  { %v429_v62 = vmul.f32 %v421_v57, %v395_v14  ;;  %v428_v32 = vmul.f32 %v420_v27, %v393_v63 }
 0x29e   :  { %v7485_v46 = vadd.f32 %v457_v36, %v7092_v3  ;;  %v7488_v55 = vadd.f32 %v456_v60, %v7084_v1  ;;  %v451_v44 = vadd.f32 %v443_v17, %v7406_v21  ;;  %v450_v45 = vadd.f32 %v442_v37, %v7408_v43 }
 0x29f   :  { %v437_v28 = vsub.f32 %v429_v62, %v7417_v12  ;;  %v436_v29 = vsub.f32 %v428_v32, %v7420_v25  ;;  %v399_v61 = vpop.permute.xlu1 %398  ;;  %v397_v15 = vpop.permute.xlu0 %396 }
 0x2a0   :  { %v459_v10 = vmul.f32 0.008333334, %v451_v44  ;;  %v458_v11 = vmul.f32 0.008333334, %v450_v45  ;;  %v431_v19 = vmul.f32 %v423_v48, %v399_v61  ;;  %v430_v39 = vmul.f32 %v422_v49, %v397_v15  ;;  %474 = vrot.lane.b32.xlu1 %v7485_v46, %s7033_s6  ;;  %472 = vrot.lane.b32.xlu0 %v7488_v55, %s7033_s6 }
 0x2a1   :  { %v445_v1 = vadd.f32 8.0, %v437_v28  ;;  %v444_v3 = vadd.f32 8.0, %v436_v29 }
 0x2a2   :  { %v7499_v21 = vadd.f32 %v459_v10, %v7090_v2  ;;  %v7502_v43 = vadd.f32 %v458_v11, %v7082_v0  ;;  %v439_v12 = vsub.f32 %v431_v19, %v7433_v56  ;;  %v438_v25 = vsub.f32 %v430_v39, %v7436_v26 }
 0x2a3   :  { %v453_v8 = vadd.f32 %v445_v1, %v7422_v23  ;;  %v452_v20 = vadd.f32 %v444_v3, %v7424_v38 }
 0x2a4   :  { %v447_v33 = vadd.f32 8.0, %v439_v12  ;;  %v446_v34 = vadd.f32 8.0, %v438_v25  ;;  %478 = vrot.lane.b32.xlu1 %v7499_v21, %s7033_s6  ;;  %476 = vrot.lane.b32.xlu0 %v7502_v43, %s7033_s6 }
 0x2a5   :  { %v461_v2 = vmul.f32 0.008333334, %v453_v8  ;;  %v460_v35 = vmul.f32 0.008333334, %v452_v20 }
 0x2a6   :  { %v455_v0 = vadd.f32 %v447_v33, %v7438_v54  ;;  %v454_v56 = vadd.f32 %v446_v34, %v7440_v16 }
 0x2a7   :  { %v7515_v26 = vadd.f32 %v461_v2, %v7098_v4  ;;  %v7518_v23 = vadd.f32 %v460_v35, %v7100_v5 }
 0x2a8   :  { %v463_v38 = vmul.f32 0.008333334, %v455_v0  ;;  %v462_v31 = vmul.f32 0.008333334, %v454_v56 }
 0x2a9   :  { %482 = vrot.lane.b32.xlu1 %v7515_v26, %s7033_s6  ;;  %480 = vrot.lane.b32.xlu0 %v7518_v23, %s7033_s6 }
 0x2aa   :  { %v7525_v18 = vadd.f32 %v463_v38, %v7106_v6  ;;  %v7528_v54 = vadd.f32 %v462_v31, %v7108_v7 }
 0x2ad   :  { %486 = vrot.lane.b32.xlu1 %v7525_v18, %s7033_s6  ;;  %484 = vrot.lane.b32.xlu0 %v7528_v54, %s7033_s6 }
 0x2b1   :  { %506 = vrot.lane.b32.xlu1 %v7485_v46, %s7034_s1  ;;  %504 = vrot.lane.b32.xlu0 %v7488_v55, %s7034_s1 }
 0x2b5   :  { %510 = vrot.lane.b32.xlu1 %v7499_v21, %s7034_s1  ;;  %508 = vrot.lane.b32.xlu0 %v7502_v43, %s7034_s1 }
 0x2b9   :  { %514 = vrot.lane.b32.xlu1 %v7515_v26, %s7034_s1  ;;  %512 = vrot.lane.b32.xlu0 %v7518_v23, %s7034_s1 }
 0x2bd   :  { %518 = vrot.lane.b32.xlu1 %v7525_v18, %s7034_s1  ;;  %516 = vrot.lane.b32.xlu0 %v7528_v54, %s7034_s1 }
 0x2c1   :  { %490 = vrot.lane.b32.xlu1 %v7485_v46, %s7035_s7  ;;  %488 = vrot.lane.b32.xlu0 %v7488_v55, %s7035_s7 }
 0x2c5   :  { %494 = vrot.lane.b32.xlu1 %v7499_v21, %s7035_s7  ;;  %492 = vrot.lane.b32.xlu0 %v7502_v43, %s7035_s7 }
 0x2c9   :  { %498 = vrot.lane.b32.xlu1 %v7515_v26, %s7035_s7  ;;  %496 = vrot.lane.b32.xlu0 %v7518_v23, %s7035_s7 }
 0x2cd   :  { %502 = vrot.lane.b32.xlu1 %v7525_v18, %s7035_s7  ;;  %500 = vrot.lane.b32.xlu0 %v7528_v54, %s7035_s7 }
 0x312   :  { %v475_v4 = vpop.permute.xlu1 %474  ;;  %v473_v5 = vpop.permute.xlu0 %472 }
 0x316   :  { %v479_v6 = vpop.permute.xlu1 %478  ;;  %v477_v7 = vpop.permute.xlu0 %476 }
 0x31b   :  { %v483_v16 = vpop.permute.xlu1 %482  ;;  %v481_v40 = vpop.permute.xlu0 %480 }
 0x31f   :  { %v487_v47 = vpop.permute.xlu1 %486  ;;  %v485_v41 = vpop.permute.xlu0 %484 }
 0x323   :  { %v507_v42 = vpop.permute.xlu1 %506  ;;  %v505_v9 = vpop.permute.xlu0 %504 }
 0x324   :  { %v521_v13 = vsub.f32 %v475_v4, %v507_v42  ;;  %v520_v50 = vsub.f32 %v473_v5, %v505_v9 }
 0x327   :  { %v511_v22 = vpop.permute.xlu1 %510  ;;  %v509_v58 = vpop.permute.xlu0 %508 }
 0x328   :  { %v523_v14 = vsub.f32 %v479_v6, %v511_v22  ;;  %v522_v63 = vsub.f32 %v477_v7, %v509_v58 }
 0x32b   :  { %v515_v59 = vpop.permute.xlu1 %514  ;;  %v513_v24 = vpop.permute.xlu0 %512 }
 0x32c   :  { %v525_v44 = vsub.f32 %v483_v16, %v515_v59  ;;  %v524_v45 = vsub.f32 %v481_v40, %v513_v24 }
 0x32f   :  { %v519_v52 = vpop.permute.xlu1 %518  ;;  %v517_v53 = vpop.permute.xlu0 %516 }
 0x330   :  { %v527_v12 = vsub.f32 %v487_v47, %v519_v52  ;;  %v526_v25 = vsub.f32 %v485_v41, %v517_v53 }
 0x333   :  { %v491_v51 = vpop.permute.xlu1 %490  ;;  %v489_v30 = vpop.permute.xlu0 %488 }
 0x334   :  { %v529_v57 = vmul.f32 %v521_v13, %v491_v51  ;;  %v528_v27 = vmul.f32 %v520_v50, %v489_v30 }
 0x336   :  { %v537_v36 = vsub.f32 %v529_v57, %v7485_v46  ;;  %v536_v60 = vsub.f32 %v528_v27, %v7488_v55 }
 0x337   :  { %v495_v17 = vpop.permute.xlu1 %494  ;;  %v493_v37 = vpop.permute.xlu0 %492 }
 0x338   :  { %v7568_v48 = vadd.f32 8.0, %v537_v36  ;;  %v7570_v49 = vadd.f32 8.0, %v536_v60  ;;  %v531_v62 = vmul.f32 %v523_v14, %v495_v17  ;;  %v530_v32 = vmul.f32 %v522_v63, %v493_v37 }
 0x33a   :  { %v553_v28 = vmul.f32 0.025, %v7568_v48  ;;  %v552_v29 = vmul.f32 0.025, %v7570_v49  ;;  %v539_v61 = vsub.f32 %v531_v62, %v7499_v21  ;;  %v538_v15 = vsub.f32 %v530_v32, %v7502_v43 }
 0x33b   :  { %v499_v10 = vpop.permute.xlu1 %498  ;;  %v497_v11 = vpop.permute.xlu0 %496 }
 0x33c   :  { %v7576_v19 = vadd.f32 8.0, %v539_v61  ;;  %v7578_v39 = vadd.f32 8.0, %v538_v15  ;;  %v533_v1 = vmul.f32 %v525_v44, %v499_v10  ;;  %v532_v3 = vmul.f32 %v524_v45, %v497_v11 }
 0x33d   :  { %v7581_v8 = vadd.f32 %v553_v28, %v7485_v46  ;;  %v7584_v20 = vadd.f32 %v552_v29, %v7488_v55 }
 0x33e   :  { %v555_v33 = vmul.f32 0.025, %v7576_v19  ;;  %v554_v34 = vmul.f32 0.025, %v7578_v39  ;;  %v541_v2 = vsub.f32 %v533_v1, %v7515_v26  ;;  %v540_v35 = vsub.f32 %v532_v3, %v7518_v23 }
 0x33f   :  { %570 = vrot.lane.b32.xlu1 %v7581_v8, %s7033_s6  ;;  %568 = vrot.lane.b32.xlu0 %v7584_v20, %s7033_s6  ;;  %v503_v0 = vpop.permute.xlu1 %502  ;;  %v501_v56 = vpop.permute.xlu0 %500 }
 0x340   :  { %v7594_v38 = vadd.f32 8.0, %v541_v2  ;;  %v7596_v31 = vadd.f32 8.0, %v540_v35  ;;  %v535_v4 = vmul.f32 %v527_v12, %v503_v0  ;;  %v534_v5 = vmul.f32 %v526_v25, %v501_v56 }
 0x341   :  { %v7599_v6 = vadd.f32 %v555_v33, %v7499_v21  ;;  %v7602_v7 = vadd.f32 %v554_v34, %v7502_v43 }
 0x342   :  { %v557_v16 = vmul.f32 0.025, %v7594_v38  ;;  %v556_v40 = vmul.f32 0.025, %v7596_v31  ;;  %v543_v47 = vsub.f32 %v535_v4, %v7525_v18  ;;  %v542_v41 = vsub.f32 %v534_v5, %v7528_v54 }
 0x343   :  { %574 = vrot.lane.b32.xlu1 %v7599_v6, %s7033_s6  ;;  %572 = vrot.lane.b32.xlu0 %v7602_v7, %s7033_s6 }
 0x344   :  { %v7612_v42 = vadd.f32 8.0, %v543_v47  ;;  %v7614_v9 = vadd.f32 8.0, %v542_v41  ;;  %v7617_v22 = vadd.f32 %v557_v16, %v7515_v26  ;;  %v7620_v58 = vadd.f32 %v556_v40, %v7518_v23 }
 0x346   :  { %v559_v59 = vmul.f32 0.025, %v7612_v42  ;;  %v558_v24 = vmul.f32 0.025, %v7614_v9 }
 0x347   :  { %578 = vrot.lane.b32.xlu1 %v7617_v22, %s7033_s6  ;;  %576 = vrot.lane.b32.xlu0 %v7620_v58, %s7033_s6 }
 0x348   :  { %v7629_v52 = vadd.f32 %v559_v59, %v7525_v18  ;;  %v7632_v53 = vadd.f32 %v558_v24, %v7528_v54 }
 0x34b   :  { %582 = vrot.lane.b32.xlu1 %v7629_v52, %s7033_s6  ;;  %580 = vrot.lane.b32.xlu0 %v7632_v53, %s7033_s6 }
 0x34f   :  { %602 = vrot.lane.b32.xlu1 %v7581_v8, %s7034_s1  ;;  %600 = vrot.lane.b32.xlu0 %v7584_v20, %s7034_s1 }
 0x353   :  { %606 = vrot.lane.b32.xlu1 %v7599_v6, %s7034_s1  ;;  %604 = vrot.lane.b32.xlu0 %v7602_v7, %s7034_s1 }
 0x357   :  { %610 = vrot.lane.b32.xlu1 %v7617_v22, %s7034_s1  ;;  %608 = vrot.lane.b32.xlu0 %v7620_v58, %s7034_s1 }
 0x35b   :  { %614 = vrot.lane.b32.xlu1 %v7629_v52, %s7034_s1  ;;  %612 = vrot.lane.b32.xlu0 %v7632_v53, %s7034_s1 }
 0x35f   :  { %586 = vrot.lane.b32.xlu1 %v7581_v8, %s7035_s7  ;;  %584 = vrot.lane.b32.xlu0 %v7584_v20, %s7035_s7 }
 0x363   :  { %590 = vrot.lane.b32.xlu1 %v7599_v6, %s7035_s7  ;;  %588 = vrot.lane.b32.xlu0 %v7602_v7, %s7035_s7 }
 0x367   :  { %594 = vrot.lane.b32.xlu1 %v7617_v22, %s7035_s7  ;;  %592 = vrot.lane.b32.xlu0 %v7620_v58, %s7035_s7 }
 0x36b   :  { %598 = vrot.lane.b32.xlu1 %v7629_v52, %s7035_s7  ;;  %596 = vrot.lane.b32.xlu0 %v7632_v53, %s7035_s7 }
 0x3b1   :  { %v571_v13 = vpop.permute.xlu1 %570  ;;  %v569_v50 = vpop.permute.xlu0 %568 }
 0x3b5   :  { %v575_v51 = vpop.permute.xlu1 %574  ;;  %v573_v30 = vpop.permute.xlu0 %572 }
 0x3b9   :  { %v579_v57 = vpop.permute.xlu1 %578  ;;  %v577_v27 = vpop.permute.xlu0 %576 }
 0x3bd   :  { %v583_v14 = vpop.permute.xlu1 %582  ;;  %v581_v63 = vpop.permute.xlu0 %580 }
 0x3c1   :  { %v603_v36 = vpop.permute.xlu1 %602  ;;  %v601_v60 = vpop.permute.xlu0 %600 }
 0x3c2   :  { %v617_v28 = vsub.f32 %v571_v13, %v603_v36  ;;  %v616_v29 = vsub.f32 %v569_v50, %v601_v60 }
 0x3c5   :  { %v607_v17 = vpop.permute.xlu1 %606  ;;  %v605_v37 = vpop.permute.xlu0 %604 }
 0x3c6   :  { %v619_v1 = vsub.f32 %v575_v51, %v607_v17  ;;  %v618_v3 = vsub.f32 %v573_v30, %v605_v37 }
 0x3c9   :  { %v611_v62 = vpop.permute.xlu1 %610  ;;  %v609_v32 = vpop.permute.xlu0 %608 }
 0x3ca   :  { %v621_v4 = vsub.f32 %v579_v57, %v611_v62  ;;  %v620_v5 = vsub.f32 %v577_v27, %v609_v32 }
 0x3cd   :  { %v615_v44 = vpop.permute.xlu1 %614  ;;  %v613_v45 = vpop.permute.xlu0 %612 }
 0x3ce   :  { %v623_v57 = vsub.f32 %v583_v14, %v615_v44  ;;  %v622_v27 = vsub.f32 %v581_v63, %v613_v45 }
 0x3d1   :  { %v587_v61 = vpop.permute.xlu1 %586  ;;  %v585_v15 = vpop.permute.xlu0 %584 }
 0x3d2   :  { %v625_v10 = vmul.f32 %v617_v28, %v587_v61  ;;  %v624_v11 = vmul.f32 %v616_v29, %v585_v15 }
 0x3d4   :  { %v633_v12 = vsub.f32 %v625_v10, %v7581_v8  ;;  %v632_v25 = vsub.f32 %v624_v11, %v7584_v20 }
 0x3d5   :  { %v591_v33 = vpop.permute.xlu1 %590  ;;  %v589_v34 = vpop.permute.xlu0 %588 }
 0x3d6   :  { %v7672_v2 = vadd.f32 8.0, %v633_v12  ;;  %v7674_v35 = vadd.f32 8.0, %v632_v25  ;;  %v627_v0 = vmul.f32 %v619_v1, %v591_v33  ;;  %v626_v56 = vmul.f32 %v618_v3, %v589_v34 }
 0x3d8   :  { %v665_v16 = vmul.f32 0.025, %v7672_v2  ;;  %v664_v40 = vmul.f32 0.025, %v7674_v35  ;;  %v635_v47 = vsub.f32 %v627_v0, %v7599_v6  ;;  %v634_v8 = vsub.f32 %v626_v56, %v7602_v7 }
 0x3d9   :  { %v595_v41 = vpop.permute.xlu1 %594  ;;  %v593_v20 = vpop.permute.xlu0 %592 }
 0x3da   :  { %v629_v59 = vmul.f32 %v621_v4, %v595_v41  ;;  %v628_v24 = vmul.f32 %v620_v5, %v593_v20  ;;  %v7680_v13 = vadd.f32 8.0, %v635_v47  ;;  %v7682_v50 = vadd.f32 8.0, %v634_v8 }
 0x3db   :  { %v7685_v51 = vadd.f32 %v665_v16, %v7485_v46  ;;  %v7688_v30 = vadd.f32 %v664_v40, %v7488_v55 }
 0x3dc   :  { %v637_v6 = vsub.f32 %v629_v59, %v7617_v22  ;;  %v636_v7 = vsub.f32 %v628_v24, %v7620_v58  ;;  %v667_v36 = vmul.f32 0.025, %v7680_v13  ;;  %v666_v60 = vmul.f32 0.025, %v7682_v50 }
 0x3dd   :  { %682 = vrot.lane.b32.xlu1 %v7685_v51, %s7033_s6  ;;  %680 = vrot.lane.b32.xlu0 %v7688_v30, %s7033_s6  ;;  %v599_v17 = vpop.permute.xlu1 %598  ;;  %v597_v37 = vpop.permute.xlu0 %596 }
 0x3de   :  { %v7698_v62 = vadd.f32 8.0, %v637_v6  ;;  %v7700_v14 = vadd.f32 8.0, %v636_v7  ;;  %v631_v63 = vmul.f32 %v623_v57, %v599_v17  ;;  %v630_v22 = vmul.f32 %v622_v27, %v597_v37 }
 0x3df   :  { %v7703_v58 = vadd.f32 %v667_v36, %v7499_v21  ;;  %v7706_v32 = vadd.f32 %v666_v60, %v7502_v43  ;;  %v649_v6 = vmul.f32 2.0, %v7672_v2  ;;  %v648_v7 = vmul.f32 2.0, %v7674_v35 }
 0x3e0   :  { %v669_v44 = vmul.f32 0.025, %v7698_v62  ;;  %v668_v45 = vmul.f32 0.025, %v7700_v14  ;;  %v639_v28 = vsub.f32 %v631_v63, %v7629_v52  ;;  %v638_v29 = vsub.f32 %v630_v22, %v7632_v53 }
 0x3e1   :  { %686 = vrot.lane.b32.xlu1 %v7703_v58, %s7033_s6  ;;  %684 = vrot.lane.b32.xlu0 %v7706_v32, %s7033_s6  ;;  %v651_v36 = vmul.f32 2.0, %v7680_v13  ;;  %v650_v60 = vmul.f32 2.0, %v7682_v50  ;;  %v657_v35 = vadd.f32 %v649_v6, %v7568_v48  ;;  %v656_v13 = vadd.f32 %v648_v7, %v7570_v49 }
 0x3e2   :  { %v7717_v61 = vadd.f32 %v669_v44, %v7515_v26  ;;  %v7720_v15 = vadd.f32 %v668_v45, %v7518_v23  ;;  %v7722_v10 = vadd.f32 8.0, %v639_v28  ;;  %v7724_v11 = vadd.f32 8.0, %v638_v29 }
 0x3e3   :  { %v653_v44 = vmul.f32 2.0, %v7698_v62  ;;  %v652_v45 = vmul.f32 2.0, %v7700_v14  ;;  %v659_v50 = vadd.f32 %v651_v36, %v7576_v19 }
 0x3e4   :  { %v671_v52 = vmul.f32 0.025, %v7722_v10  ;;  %v670_v53 = vmul.f32 0.025, %v7724_v11  ;;  %v655_v19 = vmul.f32 2.0, %v7722_v10 }
 0x3e5   :  { %690 = vrot.lane.b32.xlu1 %v7717_v61, %s7033_s6  ;;  %688 = vrot.lane.b32.xlu0 %v7720_v15, %s7033_s6 }
 0x3e6   :  { %v7733_v1 = vadd.f32 %v671_v52, %v7525_v18  ;;  %v7736_v3 = vadd.f32 %v670_v53, %v7528_v54  ;;  %v658_v53 = vadd.f32 %v650_v60, %v7578_v39 }
 0x3e9   :  { %694 = vrot.lane.b32.xlu1 %v7733_v1, %s7033_s6  ;;  %692 = vrot.lane.b32.xlu0 %v7736_v3, %s7033_s6 }
 0x3ed   :  { %714 = vrot.lane.b32.xlu1 %v7685_v51, %s7034_s1  ;;  %712 = vrot.lane.b32.xlu0 %v7688_v30, %s7034_s1 }
 0x3f1   :  { %718 = vrot.lane.b32.xlu1 %v7703_v58, %s7034_s1  ;;  %716 = vrot.lane.b32.xlu0 %v7706_v32, %s7034_s1 }
 0x3f5   :  { %722 = vrot.lane.b32.xlu1 %v7717_v61, %s7034_s1  ;;  %720 = vrot.lane.b32.xlu0 %v7720_v15, %s7034_s1 }
 0x3f9   :  { %726 = vrot.lane.b32.xlu1 %v7733_v1, %s7034_s1  ;;  %724 = vrot.lane.b32.xlu0 %v7736_v3, %s7034_s1 }
 0x3fd   :  { %698 = vrot.lane.b32.xlu1 %v7685_v51, %s7035_s7  ;;  %696 = vrot.lane.b32.xlu0 %v7688_v30, %s7035_s7 }
 0x401   :  { %702 = vrot.lane.b32.xlu1 %v7703_v58, %s7035_s7  ;;  %700 = vrot.lane.b32.xlu0 %v7706_v32, %s7035_s7 }
 0x405   :  { %706 = vrot.lane.b32.xlu1 %v7717_v61, %s7035_s7  ;;  %704 = vrot.lane.b32.xlu0 %v7720_v15, %s7035_s7 }
 0x409   :  { %710 = vrot.lane.b32.xlu1 %v7733_v1, %s7035_s7  ;;  %708 = vrot.lane.b32.xlu0 %v7736_v3, %s7035_s7 }
 0x44f   :  { %v683_v12 = vpop.permute.xlu1 %682  ;;  %v681_v25 = vpop.permute.xlu0 %680 }
 0x453   :  { %v687_v33 = vpop.permute.xlu1 %686  ;;  %v685_v34 = vpop.permute.xlu0 %684 }
 0x457   :  { %v691_v0 = vpop.permute.xlu1 %690  ;;  %v689_v56 = vpop.permute.xlu0 %688 }
 0x45b   :  { %v7774_v4 = vpop.permute.xlu1 %694  ;;  %v7776_v5 = vpop.permute.xlu0 %692 }
 0x45f   :  { %v715_v16 = vpop.permute.xlu1 %714  ;;  %v713_v40 = vpop.permute.xlu0 %712 }
 0x460   :  { %v729_v57 = vsub.f32 %v683_v12, %v715_v16  ;;  %v728_v27 = vsub.f32 %v681_v25, %v713_v40 }
 0x463   :  { %v719_v47 = vpop.permute.xlu1 %718  ;;  %v717_v8 = vpop.permute.xlu0 %716 }
 0x464   :  { %v731_v28 = vsub.f32 %v687_v33, %v719_v47  ;;  %v730_v29 = vsub.f32 %v685_v34, %v717_v8  ;;  %v661_v33 = vadd.f32 %v653_v44, %v7594_v38 }
 0x467   :  { %v723_v41 = vpop.permute.xlu1 %722  ;;  %v721_v20 = vpop.permute.xlu0 %720 }
 0x468   :  { %v733_v34 = vsub.f32 %v691_v0, %v723_v41 }
 0x46b   :  { %v7778_v59 = vpop.permute.xlu1 %726  ;;  %v7780_v24 = vpop.permute.xlu0 %724 }
 0x46c   :  { %v735_v39 = vsub.f32 %v7774_v4, %v7778_v59 }
 0x46f   :  { %v699_v17 = vpop.permute.xlu1 %698  ;;  %v697_v37 = vpop.permute.xlu0 %696 }
 0x470   :  { %v737_v63 = vmul.f32 %v729_v57, %v699_v17  ;;  %v736_v22 = vmul.f32 %v728_v27, %v697_v37 }
 0x472   :  { %v745_v52 = vsub.f32 %v737_v63, %v7685_v51  ;;  %v744_v2 = vsub.f32 %v736_v22, %v7688_v30  ;;  %v660_v51 = vadd.f32 %v652_v45, %v7596_v31  ;;  %v732_v30 = vsub.f32 %v689_v56, %v721_v20 }
 0x473   :  { %v703_v12 = vpop.permute.xlu1 %702  ;;  %v701_v25 = vpop.permute.xlu0 %700 }
 0x474   :  { %v753_v16 = vadd.f32 8.0, %v745_v52  ;;  %v752_v62 = vadd.f32 8.0, %v744_v2  ;;  %v739_v40 = vmul.f32 %v731_v28, %v703_v12  ;;  %v738_v14 = vmul.f32 %v730_v29, %v701_v25 }
 0x476   :  { %v761_v47 = vmul.f32 2.0, %v753_v16  ;;  %v777_v48 = vmul.f32 0.05, %v753_v16  ;;  %v760_v8 = vmul.f32 2.0, %v752_v62  ;;  %v776_v49 = vmul.f32 0.05, %v752_v62 }
 0x477   :  { %v747_v57 = vsub.f32 %v739_v40, %v7703_v58  ;;  %v746_v27 = vsub.f32 %v738_v14, %v7706_v32  ;;  %v707_v6 = vpop.permute.xlu1 %706  ;;  %v705_v7 = vpop.permute.xlu0 %704  ;;  %v654_v58 = vmul.f32 2.0, %v7724_v11  ;;  %v734_v32 = vsub.f32 %v7776_v5, %v7780_v24 }
 0x478   :  { %v741_v38 = vmul.f32 %v733_v34, %v707_v6  ;;  %v740_v36 = vmul.f32 %v732_v30, %v705_v7  ;;  %v7802_v31 = vadd.f32 %v777_v48, %v7485_v46  ;;  %v7805_v0 = vadd.f32 %v776_v49, %v7488_v55 }
 0x479   :  { %v755_v56 = vadd.f32 8.0, %v747_v57  ;;  %v754_v41 = vadd.f32 8.0, %v746_v27  ;;  %v7807_v10 = vadd.f32 %v761_v47, %v657_v35  ;;  %v7809_v20 = vadd.f32 %v760_v8, %v656_v13 }
 0x47a   :  { %v749_v4 = vsub.f32 %v741_v38, %v7717_v61  ;;  %v748_v59 = vsub.f32 %v740_v36, %v7720_v15  ;;  %794 = vrot.lane.b32.xlu1 %v7802_v31, %s7033_s6  ;;  %792 = vrot.lane.b32.xlu0 %v7805_v0, %s7033_s6  ;;  %v662_v14 = vadd.f32 %v654_v58, %v7614_v9 }
 0x47b   :  { %v763_v60 = vmul.f32 2.0, %v755_v56  ;;  %v779_v17 = vmul.f32 0.05, %v755_v56  ;;  %v762_v37 = vmul.f32 2.0, %v754_v41  ;;  %v778_v63 = vmul.f32 0.05, %v754_v41  ;;  %v711_v22 = vpop.permute.xlu1 %710  ;;  %v709_v44 = vpop.permute.xlu0 %708 }
 0x47c   :  { %v757_v11 = vadd.f32 8.0, %v749_v4  ;;  %v756_v45 = vadd.f32 8.0, %v748_v59  ;;  %v743_v28 = vmul.f32 %v735_v39, %v711_v22  ;;  %v742_v5 = vmul.f32 %v734_v32, %v709_v44 }
 0x47d   :  { %v7821_v61 = vadd.f32 %v779_v17, %v7499_v21  ;;  %v7824_v15 = vadd.f32 %v778_v63, %v7502_v43  ;;  %v7826_v24 = vadd.f32 %v763_v60, %v659_v50  ;;  %v7828_v29 = vadd.f32 %v762_v37, %v658_v53 }
 0x47e   :  { %v765_v52 = vmul.f32 2.0, %v757_v11  ;;  %v781_v2 = vmul.f32 0.05, %v757_v11  ;;  %v764_v35 = vmul.f32 2.0, %v756_v45  ;;  %v780_v13 = vmul.f32 0.05, %v756_v45 }
 0x47f   :  { %v751_v12 = vsub.f32 %v743_v28, %v7733_v1  ;;  %v750_v25 = vsub.f32 %v742_v5, %v7736_v3  ;;  %798 = vrot.lane.b32.xlu1 %v7821_v61, %s7033_s6  ;;  %796 = vrot.lane.b32.xlu0 %v7824_v15, %s7033_s6  ;;  %v663_v3 = vadd.f32 %v655_v19, %v7612_v42 }
 0x480   :  { %v7837_v16 = vadd.f32 %v781_v2, %v7515_v26  ;;  %v7840_v50 = vadd.f32 %v780_v13, %v7518_v23  ;;  %v7842_v53 = vadd.f32 %v765_v52, %v661_v33  ;;  %v7844_v62 = vadd.f32 %v764_v35, %v660_v51 }
 0x481   :  { %v759_v40 = vadd.f32 8.0, %v751_v12  ;;  %v758_v1 = vadd.f32 8.0, %v750_v25 }
 0x483   :  { %v767_v34 = vmul.f32 2.0, %v759_v40  ;;  %v783_v30 = vmul.f32 0.05, %v759_v40  ;;  %v766_v47 = vmul.f32 2.0, %v758_v1  ;;  %v782_v48 = vmul.f32 0.05, %v758_v1  ;;  %802 = vrot.lane.b32.xlu1 %v7837_v16, %s7033_s6  ;;  %800 = vrot.lane.b32.xlu0 %v7840_v50, %s7033_s6 }
 0x485   :  { %v7853_v33 = vadd.f32 %v783_v30, %v7525_v18  ;;  %v7856_v51 = vadd.f32 %v782_v48, %v7528_v54  ;;  %v7858_v8 = vadd.f32 %v767_v34, %v663_v3  ;;  %v7860_v42 = vadd.f32 %v766_v47, %v662_v14 }
 0x487   :  { %806 = vrot.lane.b32.xlu1 %v7853_v33, %s7033_s6  ;;  %804 = vrot.lane.b32.xlu0 %v7856_v51, %s7033_s6 }
 0x48b   :  { %826 = vrot.lane.b32.xlu1 %v7802_v31, %s7034_s1  ;;  %824 = vrot.lane.b32.xlu0 %v7805_v0, %s7034_s1 }
 0x48f   :  { %830 = vrot.lane.b32.xlu1 %v7821_v61, %s7034_s1  ;;  %828 = vrot.lane.b32.xlu0 %v7824_v15, %s7034_s1 }
 0x493   :  { %834 = vrot.lane.b32.xlu1 %v7837_v16, %s7034_s1  ;;  %832 = vrot.lane.b32.xlu0 %v7840_v50, %s7034_s1 }
 0x497   :  { %838 = vrot.lane.b32.xlu1 %v7853_v33, %s7034_s1  ;;  %836 = vrot.lane.b32.xlu0 %v7856_v51, %s7034_s1 }
 0x49b   :  { %810 = vrot.lane.b32.xlu1 %v7802_v31, %s7035_s7  ;;  %808 = vrot.lane.b32.xlu0 %v7805_v0, %s7035_s7 }
 0x49f   :  { %814 = vrot.lane.b32.xlu1 %v7821_v61, %s7035_s7  ;;  %812 = vrot.lane.b32.xlu0 %v7824_v15, %s7035_s7 }
 0x4a3   :  { %818 = vrot.lane.b32.xlu1 %v7837_v16, %s7035_s7  ;;  %816 = vrot.lane.b32.xlu0 %v7840_v50, %s7035_s7 }
 0x4a7   :  { %822 = vrot.lane.b32.xlu1 %v7853_v33, %s7035_s7  ;;  %820 = vrot.lane.b32.xlu0 %v7856_v51, %s7035_s7 }
 0x4ec   :  { %v795_v9 = vpop.permute.xlu1 %794  ;;  %v793_v49 = vpop.permute.xlu0 %792 }
 0x4f1   :  { %v799_v19 = vpop.permute.xlu1 %798  ;;  %v797_v39 = vpop.permute.xlu0 %796 }
 0x4f5   :  { %v803_v57 = vpop.permute.xlu1 %802  ;;  %v801_v27 = vpop.permute.xlu0 %800 }
 0x4f9   :  { %v7898_v6 = vpop.permute.xlu1 %806  ;;  %v7900_v7 = vpop.permute.xlu0 %804 }
 0x4fd   :  { %v827_v38 = vpop.permute.xlu1 %826  ;;  %v825_v36 = vpop.permute.xlu0 %824 }
 0x4fe   :  { %v841_v60 = vsub.f32 %v795_v9, %v827_v38  ;;  %v840_v17 = vsub.f32 %v793_v49, %v825_v36 }
 0x501   :  { %v831_v56 = vpop.permute.xlu1 %830  ;;  %v829_v41 = vpop.permute.xlu0 %828 }
 0x502   :  { %v843_v11 = vsub.f32 %v799_v19, %v831_v56  ;;  %v842_v45 = vsub.f32 %v797_v39, %v829_v41  ;;  %v897_v19 = vld [vmem:[#allocation5 + $0x8] sm:$0xff]  ;;  %v896_v39 = vld [vmem:[#allocation5] sm:$0xff] }
 0x505   :  { %v835_v58 = vpop.permute.xlu1 %834  ;;  %v833_v32 = vpop.permute.xlu0 %832 }
 0x506   :  { %v845_v34 = vsub.f32 %v803_v57, %v835_v58  ;;  %v844_v30 = vsub.f32 %v801_v27, %v833_v32 }
 0x509   :  { %v839_v4 = vpop.permute.xlu1 %838  ;;  %v837_v59 = vpop.permute.xlu0 %836 }
 0x50a   :  { %v847_v57 = vsub.f32 %v7898_v6, %v839_v4  ;;  %v846_v27 = vsub.f32 %v7900_v7, %v837_v59 }
 0x50d   :  { %v811_v37 = vpop.permute.xlu1 %810  ;;  %v809_v63 = vpop.permute.xlu0 %808 }
 0x50e   :  { %v849_v22 = vmul.f32 %v841_v60, %v811_v37  ;;  %v848_v44 = vmul.f32 %v840_v17, %v809_v63 }
 0x510   :  { %v857_v28 = vsub.f32 %v849_v22, %v7802_v31  ;;  %v856_v5 = vsub.f32 %v848_v44, %v7805_v0 }
 0x511   :  { %v815_v52 = vpop.permute.xlu1 %814  ;;  %v813_v2 = vpop.permute.xlu0 %812 }
 0x512   :  { %v865_v35 = vadd.f32 8.0, %v857_v28  ;;  %v864_v13 = vadd.f32 8.0, %v856_v5  ;;  %v851_v12 = vmul.f32 %v843_v11, %v815_v52  ;;  %v850_v25 = vmul.f32 %v842_v45, %v813_v2 }
 0x514   :  { %v873_v40 = vadd.f32 %v865_v35, %v7807_v10  ;;  %v872_v1 = vadd.f32 %v864_v13, %v7809_v20  ;;  %v859_v3 = vsub.f32 %v851_v12, %v7821_v61  ;;  %v858_v14 = vsub.f32 %v850_v25, %v7824_v15 }
 0x515   :  { %v819_v47 = vpop.permute.xlu1 %818  ;;  %v817_v31 = vpop.permute.xlu0 %816 }
 0x516   :  { %v881_v48 = vmul.f32 0.008333334, %v873_v40  ;;  %v880_v0 = vmul.f32 0.008333334, %v872_v1  ;;  %v867_v9 = vadd.f32 8.0, %v859_v3  ;;  %v866_v49 = vadd.f32 8.0, %v858_v14 }
 0x517   :  { %v853_v38 = vmul.f32 %v845_v34, %v819_v47  ;;  %v852_v36 = vmul.f32 %v844_v30, %v817_v31  ;;  %v902_v40 = vld [vmem:[#allocation5 + $0x30] sm:$0xff] }
 0x518   :  { %v7909_v10 = vadd.f32 %v881_v48, %v7485_v46  ;;  %v7912_v20 = vadd.f32 %v880_v0, %v7488_v55  ;;  %v875_v61 = vadd.f32 %v867_v9, %v7826_v24  ;;  %v874_v15 = vadd.f32 %v866_v49, %v7828_v29  ;;  %v899_v24 = vld [vmem:[#allocation5 + $0x18] sm:$0xff]  ;;  %v898_v29 = vld [vmem:[#allocation5 + $0x10] sm:$0xff] }
 0x519   :  { %v861_v56 = vsub.f32 %v853_v38, %v7837_v16  ;;  %v860_v41 = vsub.f32 %v852_v36, %v7840_v50  ;;  %v823_v58 = vpop.permute.xlu1 %822  ;;  %v821_v32 = vpop.permute.xlu0 %820 }
 0x51a   :  { %v905_v46 = vmul.f32 %v897_v19, %v7909_v10  ;;  %v904_v60 = vmul.f32 %v896_v39, %v7912_v20  ;;  %v883_v55 = vmul.f32 0.008333334, %v875_v61  ;;  %v882_v17 = vmul.f32 0.008333334, %v874_v15  ;;  %922 = vrot.lane.b32.xlu1 %v7909_v10, %s7033_s6  ;;  %920 = vrot.lane.b32.xlu0 %v7912_v20, %s7033_s6 }
 0x51b   :  { %v869_v6 = vadd.f32 8.0, %v861_v56  ;;  %v868_v16 = vadd.f32 8.0, %v860_v41  ;;  %v855_v7 = vmul.f32 %v847_v57, %v823_v58  ;;  %v854_v50 = vmul.f32 %v846_v27, %v821_v32 }
 0x51c   :  { %913 = vst [vmem:[#allocation7 + $0x8] sm:$0xff] %v905_v46  ;;  %912 = vst [vmem:[#allocation7] sm:$0xff] %v904_v60  ;;  %v7927_v4 = vadd.f32 %v883_v55, %v7499_v21  ;;  %v7930_v59 = vadd.f32 %v882_v17, %v7502_v43 }
 0x51d   :  { %v877_v37 = vadd.f32 %v869_v6, %v7842_v53  ;;  %v876_v63 = vadd.f32 %v868_v16, %v7844_v62  ;;  %v863_v22 = vsub.f32 %v855_v7, %v7853_v33  ;;  %v862_v44 = vsub.f32 %v854_v50, %v7856_v51  ;;  %v901_v62 = vld [vmem:[#allocation5 + $0x28] sm:$0xff]  ;;  %v900_v33 = vld [vmem:[#allocation5 + $0x20] sm:$0xff] }
 0x51e   :  { %v907_v11 = vmul.f32 %v899_v24, %v7927_v4  ;;  %v906_v45 = vmul.f32 %v898_v29, %v7930_v59  ;;  %926 = vrot.lane.b32.xlu1 %v7927_v4, %s7033_s6  ;;  %924 = vrot.lane.b32.xlu0 %v7930_v59, %s7033_s6 }
 0x51f   :  { %v885_v21 = vmul.f32 0.008333334, %v877_v37  ;;  %v884_v43 = vmul.f32 0.008333334, %v876_v63  ;;  %v871_v28 = vadd.f32 8.0, %v863_v22  ;;  %v870_v53 = vadd.f32 8.0, %v862_v44 }
 0x520   :  { %915 = vst [vmem:[#allocation7 + $0x18] sm:$0xff] %v907_v11  ;;  %914 = vst [vmem:[#allocation7 + $0x10] sm:$0xff] %v906_v45 }
 0x521   :  { %v7943_v51 = vadd.f32 %v885_v21, %v7515_v26  ;;  %v7946_v5 = vadd.f32 %v884_v43, %v7518_v23  ;;  %v879_v52 = vadd.f32 %v871_v28, %v7858_v8  ;;  %v878_v2 = vadd.f32 %v870_v53, %v7860_v42  ;;  %v903_v26 = vld [vmem:[#allocation5 + $0x38] sm:$0xff] }
 0x523   :  { %v909_v35 = vmul.f32 %v901_v62, %v7943_v51  ;;  %v908_v13 = vmul.f32 %v900_v33, %v7946_v5  ;;  %v887_v12 = vmul.f32 0.008333334, %v879_v52  ;;  %v886_v25 = vmul.f32 0.008333334, %v878_v2  ;;  %930 = vrot.lane.b32.xlu1 %v7943_v51, %s7033_s6  ;;  %928 = vrot.lane.b32.xlu0 %v7946_v5, %s7033_s6 }
 0x525   :  { %917 = vst [vmem:[#allocation7 + $0x28] sm:$0xff] %v909_v35  ;;  %916 = vst [vmem:[#allocation7 + $0x20] sm:$0xff] %v908_v13  ;;  %v7957_v23 = vadd.f32 %v887_v12, %v7525_v18  ;;  %v7960_v8 = vadd.f32 %v886_v25, %v7528_v54 }
 0x527   :  { %v911_v42 = vmul.f32 %v903_v26, %v7957_v23  ;;  %v910_v1 = vmul.f32 %v902_v40, %v7960_v8  ;;  %934 = vrot.lane.b32.xlu1 %v7957_v23, %s7033_s6  ;;  %932 = vrot.lane.b32.xlu0 %v7960_v8, %s7033_s6 }
 0x529   :  { %919 = vst [vmem:[#allocation7 + $0x38] sm:$0xff] %v911_v42  ;;  %918 = vst [vmem:[#allocation7 + $0x30] sm:$0xff] %v910_v1 }
 0x52b   :  { %954 = vrot.lane.b32.xlu1 %v7909_v10, %s7034_s1  ;;  %952 = vrot.lane.b32.xlu0 %v7912_v20, %s7034_s1 }
 0x52f   :  { %958 = vrot.lane.b32.xlu1 %v7927_v4, %s7034_s1  ;;  %956 = vrot.lane.b32.xlu0 %v7930_v59, %s7034_s1 }
 0x533   :  { %962 = vrot.lane.b32.xlu1 %v7943_v51, %s7034_s1  ;;  %960 = vrot.lane.b32.xlu0 %v7946_v5, %s7034_s1 }
 0x537   :  { %966 = vrot.lane.b32.xlu1 %v7957_v23, %s7034_s1  ;;  %964 = vrot.lane.b32.xlu0 %v7960_v8, %s7034_s1 }
 0x53b   :  { %938 = vrot.lane.b32.xlu1 %v7909_v10, %s7035_s7  ;;  %936 = vrot.lane.b32.xlu0 %v7912_v20, %s7035_s7 }
 0x53f   :  { %942 = vrot.lane.b32.xlu1 %v7927_v4, %s7035_s7  ;;  %940 = vrot.lane.b32.xlu0 %v7930_v59, %s7035_s7 }
 0x543   :  { %946 = vrot.lane.b32.xlu1 %v7943_v51, %s7035_s7  ;;  %944 = vrot.lane.b32.xlu0 %v7946_v5, %s7035_s7 }
 0x547   :  { %950 = vrot.lane.b32.xlu1 %v7957_v23, %s7035_s7  ;;  %948 = vrot.lane.b32.xlu0 %v7960_v8, %s7035_s7 }
 0x58c   :  { %v923_v18 = vpop.permute.xlu1 %922  ;;  %v921_v54 = vpop.permute.xlu0 %920 }
 0x590   :  { %v927_v3 = vpop.permute.xlu1 %926  ;;  %v925_v14 = vpop.permute.xlu0 %924 }
 0x595   :  { %v931_v34 = vpop.permute.xlu1 %930  ;;  %v929_v30 = vpop.permute.xlu0 %928 }
 0x599   :  { %v935_v47 = vpop.permute.xlu1 %934  ;;  %v933_v31 = vpop.permute.xlu0 %932 }
 0x59d   :  { %v955_v48 = vpop.permute.xlu1 %954  ;;  %v953_v0 = vpop.permute.xlu0 %952 }
 0x59e   :  { %v969_v61 = vsub.f32 %v923_v18, %v955_v48  ;;  %v968_v15 = vsub.f32 %v921_v54, %v953_v0 }
 0x5a1   :  { %v959_v9 = vpop.permute.xlu1 %958  ;;  %v957_v49 = vpop.permute.xlu0 %956 }
 0x5a2   :  { %v971_v58 = vsub.f32 %v927_v3, %v959_v9  ;;  %v970_v32 = vsub.f32 %v925_v14, %v957_v49 }
 0x5a5   :  { %v963_v19 = vpop.permute.xlu1 %962  ;;  %v961_v39 = vpop.permute.xlu0 %960 }
 0x5a6   :  { %v973_v7 = vsub.f32 %v931_v34, %v963_v19  ;;  %v972_v50 = vsub.f32 %v929_v30, %v961_v39 }
 0x5a9   :  { %v967_v38 = vpop.permute.xlu1 %966  ;;  %v965_v36 = vpop.permute.xlu0 %964 }
 0x5aa   :  { %v975_v62 = vsub.f32 %v935_v47, %v967_v38  ;;  %v974_v33 = vsub.f32 %v933_v31, %v965_v36 }
 0x5ad   :  { %v939_v57 = vpop.permute.xlu1 %938  ;;  %v937_v27 = vpop.permute.xlu0 %936 }
 0x5ae   :  { %v977_v56 = vmul.f32 %v969_v61, %v939_v57  ;;  %v976_v41 = vmul.f32 %v968_v15, %v937_v27 }
 0x5b0   :  { %v985_v46 = vsub.f32 %v977_v56, %v7909_v10  ;;  %v984_v60 = vsub.f32 %v976_v41, %v7912_v20 }
 0x5b1   :  { %v943_v55 = vpop.permute.xlu1 %942  ;;  %v941_v17 = vpop.permute.xlu0 %940 }
 0x5b2   :  { %v8002_v24 = vadd.f32 8.0, %v985_v46  ;;  %v8004_v29 = vadd.f32 8.0, %v984_v60  ;;  %v979_v6 = vmul.f32 %v971_v58, %v943_v55  ;;  %v978_v16 = vmul.f32 %v970_v32, %v941_v17 }
 0x5b4   :  { %v1001_v37 = vmul.f32 0.025, %v8002_v24  ;;  %v1000_v63 = vmul.f32 0.025, %v8004_v29  ;;  %v987_v22 = vsub.f32 %v979_v6, %v7927_v4  ;;  %v986_v44 = vsub.f32 %v978_v16, %v7930_v59 }
 0x5b5   :  { %v947_v11 = vpop.permute.xlu1 %946  ;;  %v945_v45 = vpop.permute.xlu0 %944 }
 0x5b6   :  { %v8010_v21 = vadd.f32 8.0, %v987_v22  ;;  %v8012_v43 = vadd.f32 8.0, %v986_v44  ;;  %v981_v28 = vmul.f32 %v973_v7, %v947_v11  ;;  %v980_v53 = vmul.f32 %v972_v50, %v945_v45 }
 0x5b7   :  { %v8015_v52 = vadd.f32 %v1001_v37, %v7909_v10  ;;  %v8018_v2 = vadd.f32 %v1000_v63, %v7912_v20 }
 0x5b8   :  { %v1003_v35 = vmul.f32 0.025, %v8010_v21  ;;  %v1002_v13 = vmul.f32 0.025, %v8012_v43  ;;  %v989_v12 = vsub.f32 %v981_v28, %v7943_v51  ;;  %v988_v25 = vsub.f32 %v980_v53, %v7946_v5 }
 0x5b9   :  { %1018 = vrot.lane.b32.xlu1 %v8015_v52, %s7033_s6  ;;  %1016 = vrot.lane.b32.xlu0 %v8018_v2, %s7033_s6  ;;  %v951_v26 = vpop.permute.xlu1 %950  ;;  %v949_v40 = vpop.permute.xlu0 %948 }
 0x5ba   :  { %v8028_v42 = vadd.f32 8.0, %v989_v12  ;;  %v8030_v1 = vadd.f32 8.0, %v988_v25  ;;  %v983_v18 = vmul.f32 %v975_v62, %v951_v26  ;;  %v982_v54 = vmul.f32 %v974_v33, %v949_v40 }
 0x5bb   :  { %v8033_v3 = vadd.f32 %v1003_v35, %v7927_v4  ;;  %v8036_v14 = vadd.f32 %v1002_v13, %v7930_v59 }
 0x5bc   :  { %v1005_v34 = vmul.f32 0.025, %v8028_v42  ;;  %v1004_v30 = vmul.f32 0.025, %v8030_v1  ;;  %v991_v47 = vsub.f32 %v983_v18, %v7957_v23  ;;  %v990_v31 = vsub.f32 %v982_v54, %v7960_v8 }
 0x5bd   :  { %1022 = vrot.lane.b32.xlu1 %v8033_v3, %s7033_s6  ;;  %1020 = vrot.lane.b32.xlu0 %v8036_v14, %s7033_s6 }
 0x5be   :  { %v8046_v48 = vadd.f32 8.0, %v991_v47  ;;  %v8048_v0 = vadd.f32 8.0, %v990_v31  ;;  %v8051_v9 = vadd.f32 %v1005_v34, %v7943_v51  ;;  %v8054_v49 = vadd.f32 %v1004_v30, %v7946_v5 }
 0x5c0   :  { %v1007_v19 = vmul.f32 0.025, %v8046_v48  ;;  %v1006_v39 = vmul.f32 0.025, %v8048_v0 }
 0x5c1   :  { %1026 = vrot.lane.b32.xlu1 %v8051_v9, %s7033_s6  ;;  %1024 = vrot.lane.b32.xlu0 %v8054_v49, %s7033_s6 }
 0x5c2   :  { %v8063_v38 = vadd.f32 %v1007_v19, %v7957_v23  ;;  %v8066_v36 = vadd.f32 %v1006_v39, %v7960_v8 }
 0x5c5   :  { %1030 = vrot.lane.b32.xlu1 %v8063_v38, %s7033_s6  ;;  %1028 = vrot.lane.b32.xlu0 %v8066_v36, %s7033_s6 }
 0x5c9   :  { %1050 = vrot.lane.b32.xlu1 %v8015_v52, %s7034_s1  ;;  %1048 = vrot.lane.b32.xlu0 %v8018_v2, %s7034_s1 }
 0x5cd   :  { %1054 = vrot.lane.b32.xlu1 %v8033_v3, %s7034_s1  ;;  %1052 = vrot.lane.b32.xlu0 %v8036_v14, %s7034_s1 }
 0x5d1   :  { %1058 = vrot.lane.b32.xlu1 %v8051_v9, %s7034_s1  ;;  %1056 = vrot.lane.b32.xlu0 %v8054_v49, %s7034_s1 }
 0x5d5   :  { %1062 = vrot.lane.b32.xlu1 %v8063_v38, %s7034_s1  ;;  %1060 = vrot.lane.b32.xlu0 %v8066_v36, %s7034_s1 }
 0x5d9   :  { %1034 = vrot.lane.b32.xlu1 %v8015_v52, %s7035_s7  ;;  %1032 = vrot.lane.b32.xlu0 %v8018_v2, %s7035_s7 }
 0x5dd   :  { %1038 = vrot.lane.b32.xlu1 %v8033_v3, %s7035_s7  ;;  %1036 = vrot.lane.b32.xlu0 %v8036_v14, %s7035_s7 }
 0x5e1   :  { %1042 = vrot.lane.b32.xlu1 %v8051_v9, %s7035_s7  ;;  %1040 = vrot.lane.b32.xlu0 %v8054_v49, %s7035_s7 }
 0x5e5   :  { %1046 = vrot.lane.b32.xlu1 %v8063_v38, %s7035_s7  ;;  %1044 = vrot.lane.b32.xlu0 %v8066_v36, %s7035_s7 }
 0x62b   :  { %v1019_v61 = vpop.permute.xlu1 %1018  ;;  %v1017_v15 = vpop.permute.xlu0 %1016 }
 0x62f   :  { %v1023_v57 = vpop.permute.xlu1 %1022  ;;  %v1021_v27 = vpop.permute.xlu0 %1020 }
 0x633   :  { %v1027_v56 = vpop.permute.xlu1 %1026  ;;  %v1025_v41 = vpop.permute.xlu0 %1024 }
 0x637   :  { %v1031_v58 = vpop.permute.xlu1 %1030  ;;  %v1029_v32 = vpop.permute.xlu0 %1028 }
 0x63b   :  { %v1051_v46 = vpop.permute.xlu1 %1050  ;;  %v1049_v60 = vpop.permute.xlu0 %1048 }
 0x63c   :  { %v1065_v37 = vsub.f32 %v1019_v61, %v1051_v46  ;;  %v1064_v63 = vsub.f32 %v1017_v15, %v1049_v60 }
 0x63f   :  { %v1055_v55 = vpop.permute.xlu1 %1054  ;;  %v1053_v17 = vpop.permute.xlu0 %1052 }
 0x640   :  { %v1067_v28 = vsub.f32 %v1023_v57, %v1055_v55  ;;  %v1066_v53 = vsub.f32 %v1021_v27, %v1053_v17 }
 0x643   :  { %v1059_v6 = vpop.permute.xlu1 %1058  ;;  %v1057_v16 = vpop.permute.xlu0 %1056 }
 0x644   :  { %v1069_v18 = vsub.f32 %v1027_v56, %v1059_v6  ;;  %v1068_v54 = vsub.f32 %v1025_v41, %v1057_v16 }
 0x647   :  { %v1063_v7 = vpop.permute.xlu1 %1062  ;;  %v1061_v50 = vpop.permute.xlu0 %1060 }
 0x648   :  { %v1071_v56 = vsub.f32 %v1031_v58, %v1063_v7  ;;  %v1070_v41 = vsub.f32 %v1029_v32, %v1061_v50 }
 0x64b   :  { %v1035_v22 = vpop.permute.xlu1 %1034  ;;  %v1033_v44 = vpop.permute.xlu0 %1032 }
 0x64c   :  { %v1073_v11 = vmul.f32 %v1065_v37, %v1035_v22  ;;  %v1072_v45 = vmul.f32 %v1064_v63, %v1033_v44 }
 0x64e   :  { %v1081_v62 = vsub.f32 %v1073_v11, %v8015_v52  ;;  %v1080_v33 = vsub.f32 %v1072_v45, %v8018_v2 }
 0x64f   :  { %v1039_v35 = vpop.permute.xlu1 %1038  ;;  %v1037_v13 = vpop.permute.xlu0 %1036 }
 0x650   :  { %v8106_v12 = vadd.f32 8.0, %v1081_v62  ;;  %v8108_v25 = vadd.f32 8.0, %v1080_v33  ;;  %v1075_v26 = vmul.f32 %v1067_v28, %v1039_v35  ;;  %v1074_v40 = vmul.f32 %v1066_v53, %v1037_v13 }
 0x652   :  { %v1113_v34 = vmul.f32 0.025, %v8106_v12  ;;  %v1112_v30 = vmul.f32 0.025, %v8108_v25  ;;  %v1083_v47 = vsub.f32 %v1075_v26, %v8033_v3  ;;  %v1082_v52 = vsub.f32 %v1074_v40, %v8036_v14 }
 0x653   :  { %v1043_v31 = vpop.permute.xlu1 %1042  ;;  %v1041_v2 = vpop.permute.xlu0 %1040 }
 0x654   :  { %v1077_v19 = vmul.f32 %v1069_v18, %v1043_v31  ;;  %v1076_v39 = vmul.f32 %v1068_v54, %v1041_v2  ;;  %v8114_v61 = vadd.f32 8.0, %v1083_v47  ;;  %v8116_v15 = vadd.f32 8.0, %v1082_v52 }
 0x655   :  { %v8119_v57 = vadd.f32 %v1113_v34, %v7909_v10  ;;  %v8122_v27 = vadd.f32 %v1112_v30, %v7912_v20 }
 0x656   :  { %v1085_v3 = vsub.f32 %v1077_v19, %v8051_v9  ;;  %v1084_v14 = vsub.f32 %v1076_v39, %v8054_v49  ;;  %v1115_v46 = vmul.f32 0.025, %v8114_v61  ;;  %v1114_v60 = vmul.f32 0.025, %v8116_v15 }
 0x657   :  { %1130 = vrot.lane.b32.xlu1 %v8119_v57, %s7033_s6  ;;  %1128 = vrot.lane.b32.xlu0 %v8122_v27, %s7033_s6  ;;  %v1047_v55 = vpop.permute.xlu1 %1046  ;;  %v1045_v17 = vpop.permute.xlu0 %1044 }
 0x658   :  { %v8132_v6 = vadd.f32 8.0, %v1085_v3  ;;  %v8134_v58 = vadd.f32 8.0, %v1084_v14  ;;  %v1079_v32 = vmul.f32 %v1071_v56, %v1047_v55  ;;  %v1078_v9 = vmul.f32 %v1070_v41, %v1045_v17 }
 0x659   :  { %v8137_v49 = vadd.f32 %v1115_v46, %v7927_v4  ;;  %v8140_v16 = vadd.f32 %v1114_v60, %v7930_v59  ;;  %v1097_v3 = vmul.f32 2.0, %v8106_v12  ;;  %v1096_v14 = vmul.f32 2.0, %v8108_v25 }
 0x65a   :  { %v1117_v7 = vmul.f32 0.025, %v8132_v6  ;;  %v1116_v50 = vmul.f32 0.025, %v8134_v58  ;;  %v1087_v37 = vsub.f32 %v1079_v32, %v8063_v38  ;;  %v1086_v63 = vsub.f32 %v1078_v9, %v8066_v36 }
 0x65b   :  { %1134 = vrot.lane.b32.xlu1 %v8137_v49, %s7033_s6  ;;  %1132 = vrot.lane.b32.xlu0 %v8140_v16, %s7033_s6  ;;  %v1099_v46 = vmul.f32 2.0, %v8114_v61  ;;  %v1098_v60 = vmul.f32 2.0, %v8116_v15  ;;  %v1105_v25 = vadd.f32 %v1097_v3, %v8002_v24  ;;  %v1104_v61 = vadd.f32 %v1096_v14, %v8004_v29 }
 0x65c   :  { %v8151_v22 = vadd.f32 %v1117_v7, %v7943_v51  ;;  %v8154_v44 = vadd.f32 %v1116_v50, %v7946_v5  ;;  %v8156_v11 = vadd.f32 8.0, %v1087_v37  ;;  %v8158_v45 = vadd.f32 8.0, %v1086_v63 }
 0x65d   :  { %v1101_v7 = vmul.f32 2.0, %v8132_v6  ;;  %v1100_v50 = vmul.f32 2.0, %v8134_v58  ;;  %v1107_v15 = vadd.f32 %v1099_v46, %v8010_v21 }
 0x65e   :  { %v1119_v38 = vmul.f32 0.025, %v8156_v11  ;;  %v1118_v36 = vmul.f32 0.025, %v8158_v45  ;;  %v1103_v21 = vmul.f32 2.0, %v8156_v11 }
 0x65f   :  { %1138 = vrot.lane.b32.xlu1 %v8151_v22, %s7033_s6  ;;  %1136 = vrot.lane.b32.xlu0 %v8154_v44, %s7033_s6 }
 0x660   :  { %v8167_v28 = vadd.f32 %v1119_v38, %v7957_v23  ;;  %v8170_v53 = vadd.f32 %v1118_v36, %v7960_v8  ;;  %v1106_v36 = vadd.f32 %v1098_v60, %v8012_v43 }
 0x663   :  { %1142 = vrot.lane.b32.xlu1 %v8167_v28, %s7033_s6  ;;  %1140 = vrot.lane.b32.xlu0 %v8170_v53, %s7033_s6 }
 0x667   :  { %1162 = vrot.lane.b32.xlu1 %v8119_v57, %s7034_s1  ;;  %1160 = vrot.lane.b32.xlu0 %v8122_v27, %s7034_s1 }
 0x66b   :  { %1166 = vrot.lane.b32.xlu1 %v8137_v49, %s7034_s1  ;;  %1164 = vrot.lane.b32.xlu0 %v8140_v16, %s7034_s1 }
 0x66f   :  { %1170 = vrot.lane.b32.xlu1 %v8151_v22, %s7034_s1  ;;  %1168 = vrot.lane.b32.xlu0 %v8154_v44, %s7034_s1 }
 0x673   :  { %1174 = vrot.lane.b32.xlu1 %v8167_v28, %s7034_s1  ;;  %1172 = vrot.lane.b32.xlu0 %v8170_v53, %s7034_s1 }
 0x677   :  { %1146 = vrot.lane.b32.xlu1 %v8119_v57, %s7035_s7  ;;  %1144 = vrot.lane.b32.xlu0 %v8122_v27, %s7035_s7 }
 0x67b   :  { %1150 = vrot.lane.b32.xlu1 %v8137_v49, %s7035_s7  ;;  %1148 = vrot.lane.b32.xlu0 %v8140_v16, %s7035_s7 }
 0x67f   :  { %1154 = vrot.lane.b32.xlu1 %v8151_v22, %s7035_s7  ;;  %1152 = vrot.lane.b32.xlu0 %v8154_v44, %s7035_s7 }
 0x683   :  { %1158 = vrot.lane.b32.xlu1 %v8167_v28, %s7035_s7  ;;  %1156 = vrot.lane.b32.xlu0 %v8170_v53, %s7035_s7 }
 0x6c9   :  { %v1131_v62 = vpop.permute.xlu1 %1130  ;;  %v1129_v33 = vpop.permute.xlu0 %1128 }
 0x6cd   :  { %v1135_v35 = vpop.permute.xlu1 %1134  ;;  %v1133_v13 = vpop.permute.xlu0 %1132 }
 0x6d1   :  { %v1139_v26 = vpop.permute.xlu1 %1138  ;;  %v1137_v40 = vpop.permute.xlu0 %1136 }
 0x6d5   :  { %v8208_v18 = vpop.permute.xlu1 %1142  ;;  %v8210_v54 = vpop.permute.xlu0 %1140 }
 0x6d9   :  { %v1163_v34 = vpop.permute.xlu1 %1162  ;;  %v1161_v30 = vpop.permute.xlu0 %1160 }
 0x6da   :  { %v1177_v56 = vsub.f32 %v1131_v62, %v1163_v34  ;;  %v1176_v41 = vsub.f32 %v1129_v33, %v1161_v30 }
 0x6dd   :  { %v1167_v47 = vpop.permute.xlu1 %1166  ;;  %v1165_v52 = vpop.permute.xlu0 %1164 }
 0x6de   :  { %v1179_v37 = vsub.f32 %v1135_v35, %v1167_v47  ;;  %v1178_v63 = vsub.f32 %v1133_v13, %v1165_v52  ;;  %v1109_v35 = vadd.f32 %v1101_v7, %v8028_v42 }
 0x6e1   :  { %v1171_v31 = vpop.permute.xlu1 %1170  ;;  %v1169_v2 = vpop.permute.xlu0 %1168 }
 0x6e2   :  { %v1181_v13 = vsub.f32 %v1139_v26, %v1171_v31 }
 0x6e5   :  { %v8212_v19 = vpop.permute.xlu1 %1174  ;;  %v8214_v39 = vpop.permute.xlu0 %1172 }
 0x6e6   :  { %v1183_v43 = vsub.f32 %v8208_v18, %v8212_v19 }
 0x6e9   :  { %v1147_v55 = vpop.permute.xlu1 %1146  ;;  %v1145_v17 = vpop.permute.xlu0 %1144 }
 0x6ea   :  { %v1185_v32 = vmul.f32 %v1177_v56, %v1147_v55  ;;  %v1184_v9 = vmul.f32 %v1176_v41, %v1145_v17 }
 0x6ec   :  { %v1193_v38 = vsub.f32 %v1185_v32, %v8119_v57  ;;  %v1192_v12 = vsub.f32 %v1184_v9, %v8122_v27  ;;  %v1108_v57 = vadd.f32 %v1100_v50, %v8030_v1  ;;  %v1180_v27 = vsub.f32 %v1137_v40, %v1169_v2 }
 0x6ed   :  { %v1151_v62 = vpop.permute.xlu1 %1150  ;;  %v1149_v33 = vpop.permute.xlu0 %1148 }
 0x6ee   :  { %v1201_v34 = vadd.f32 8.0, %v1193_v38  ;;  %v1200_v6 = vadd.f32 8.0, %v1192_v12  ;;  %v1187_v30 = vmul.f32 %v1179_v37, %v1151_v62  ;;  %v1186_v58 = vmul.f32 %v1178_v63, %v1149_v33 }
 0x6f0   :  { %v1209_v47 = vmul.f32 2.0, %v1201_v34  ;;  %v1225_v24 = vmul.f32 0.05, %v1201_v34  ;;  %v1208_v52 = vmul.f32 2.0, %v1200_v6  ;;  %v1224_v29 = vmul.f32 0.05, %v1200_v6 }
 0x6f1   :  { %v1195_v56 = vsub.f32 %v1187_v30, %v8137_v49  ;;  %v1194_v41 = vsub.f32 %v1186_v58, %v8140_v16  ;;  %v1155_v3 = vpop.permute.xlu1 %1154  ;;  %v1153_v14 = vpop.permute.xlu0 %1152  ;;  %v1102_v49 = vmul.f32 2.0, %v8158_v45  ;;  %v1182_v16 = vsub.f32 %v8210_v54, %v8214_v39 }
 0x6f2   :  { %v1189_v42 = vmul.f32 %v1181_v13, %v1155_v3  ;;  %v1188_v46 = vmul.f32 %v1180_v27, %v1153_v14  ;;  %v8236_v1 = vadd.f32 %v1225_v24, %v7909_v10  ;;  %v8239_v26 = vadd.f32 %v1224_v29, %v7912_v20 }
 0x6f3   :  { %v1203_v40 = vadd.f32 8.0, %v1195_v56  ;;  %v1202_v31 = vadd.f32 8.0, %v1194_v41  ;;  %v8241_v11 = vadd.f32 %v1209_v47, %v1105_v25  ;;  %v8243_v2 = vadd.f32 %v1208_v52, %v1104_v61 }
 0x6f4   :  { %v1197_v18 = vsub.f32 %v1189_v42, %v8151_v22  ;;  %v1196_v19 = vsub.f32 %v1188_v46, %v8154_v44  ;;  %1242 = vrot.lane.b32.xlu1 %v8236_v1, %s7033_s6  ;;  %1240 = vrot.lane.b32.xlu0 %v8239_v26, %s7033_s6  ;;  %v1110_v58 = vadd.f32 %v1102_v49, %v8048_v0 }
 0x6f5   :  { %v1211_v60 = vmul.f32 2.0, %v1203_v40  ;;  %v1227_v55 = vmul.f32 0.05, %v1203_v40  ;;  %v1210_v17 = vmul.f32 2.0, %v1202_v31  ;;  %v1226_v32 = vmul.f32 0.05, %v1202_v31  ;;  %v1159_v9 = vpop.permute.xlu1 %1158  ;;  %v1157_v7 = vpop.permute.xlu0 %1156 }
 0x6f6   :  { %v1205_v45 = vadd.f32 8.0, %v1197_v18  ;;  %v1204_v50 = vadd.f32 8.0, %v1196_v19  ;;  %v1191_v37 = vmul.f32 %v1183_v43, %v1159_v9  ;;  %v1190_v54 = vmul.f32 %v1182_v16, %v1157_v7 }
 0x6f7   :  { %v8255_v22 = vadd.f32 %v1227_v55, %v7927_v4  ;;  %v8258_v44 = vadd.f32 %v1226_v32, %v7930_v59  ;;  %v8260_v39 = vadd.f32 %v1211_v60, %v1107_v15  ;;  %v8262_v63 = vadd.f32 %v1210_v17, %v1106_v36 }
 0x6f8   :  { %v1213_v38 = vmul.f32 2.0, %v1205_v45  ;;  %v1229_v12 = vmul.f32 0.05, %v1205_v45  ;;  %v1212_v25 = vmul.f32 2.0, %v1204_v50  ;;  %v1228_v61 = vmul.f32 0.05, %v1204_v50 }
 0x6f9   :  { %v1199_v62 = vsub.f32 %v1191_v37, %v8167_v28  ;;  %v1198_v33 = vsub.f32 %v1190_v54, %v8170_v53  ;;  %1246 = vrot.lane.b32.xlu1 %v8255_v22, %s7033_s6  ;;  %1244 = vrot.lane.b32.xlu0 %v8258_v44, %s7033_s6  ;;  %v1111_v53 = vadd.f32 %v1103_v21, %v8046_v48 }
 0x6fa   :  { %v8271_v34 = vadd.f32 %v1229_v12, %v7943_v51  ;;  %v8274_v15 = vadd.f32 %v1228_v61, %v7946_v5  ;;  %v8276_v36 = vadd.f32 %v1213_v38, %v1109_v35  ;;  %v8278_v6 = vadd.f32 %v1212_v25, %v1108_v57 }
 0x6fb   :  { %v1207_v30 = vadd.f32 8.0, %v1199_v62  ;;  %v1206_v28 = vadd.f32 8.0, %v1198_v33 }
 0x6fd   :  { %v1215_v13 = vmul.f32 2.0, %v1207_v30  ;;  %v1231_v27 = vmul.f32 0.05, %v1207_v30  ;;  %v1214_v47 = vmul.f32 2.0, %v1206_v28  ;;  %v1230_v24 = vmul.f32 0.05, %v1206_v28  ;;  %1250 = vrot.lane.b32.xlu1 %v8271_v34, %s7033_s6  ;;  %1248 = vrot.lane.b32.xlu0 %v8274_v15, %s7033_s6 }
 0x6ff   :  { %v8287_v35 = vadd.f32 %v1231_v27, %v7957_v23  ;;  %v8290_v57 = vadd.f32 %v1230_v24, %v7960_v8  ;;  %v8292_v52 = vadd.f32 %v1215_v13, %v1111_v53  ;;  %v8294_v48 = vadd.f32 %v1214_v47, %v1110_v58 }
 0x701   :  { %1254 = vrot.lane.b32.xlu1 %v8287_v35, %s7033_s6  ;;  %1252 = vrot.lane.b32.xlu0 %v8290_v57, %s7033_s6 }
 0x705   :  { %1274 = vrot.lane.b32.xlu1 %v8236_v1, %s7034_s1  ;;  %1272 = vrot.lane.b32.xlu0 %v8239_v26, %s7034_s1 }
 0x709   :  { %1278 = vrot.lane.b32.xlu1 %v8255_v22, %s7034_s1  ;;  %1276 = vrot.lane.b32.xlu0 %v8258_v44, %s7034_s1 }
 0x70d   :  { %1282 = vrot.lane.b32.xlu1 %v8271_v34, %s7034_s1  ;;  %1280 = vrot.lane.b32.xlu0 %v8274_v15, %s7034_s1 }
 0x711   :  { %1286 = vrot.lane.b32.xlu1 %v8287_v35, %s7034_s1  ;;  %1284 = vrot.lane.b32.xlu0 %v8290_v57, %s7034_s1 }
 0x715   :  { %1258 = vrot.lane.b32.xlu1 %v8236_v1, %s7035_s7  ;;  %1256 = vrot.lane.b32.xlu0 %v8239_v26, %s7035_s7 }
 0x719   :  { %1262 = vrot.lane.b32.xlu1 %v8255_v22, %s7035_s7  ;;  %1260 = vrot.lane.b32.xlu0 %v8258_v44, %s7035_s7 }
 0x71d   :  { %1266 = vrot.lane.b32.xlu1 %v8271_v34, %s7035_s7  ;;  %1264 = vrot.lane.b32.xlu0 %v8274_v15, %s7035_s7 }
 0x721   :  { %1270 = vrot.lane.b32.xlu1 %v8287_v35, %s7035_s7  ;;  %1268 = vrot.lane.b32.xlu0 %v8290_v57, %s7035_s7 }
 0x766   :  { %v1243_v0 = vpop.permute.xlu1 %1242  ;;  %v1241_v29 = vpop.permute.xlu0 %1240 }
 0x76b   :  { %v1247_v21 = vpop.permute.xlu1 %1246  ;;  %v1245_v43 = vpop.permute.xlu0 %1244 }
 0x76f   :  { %v1251_v56 = vpop.permute.xlu1 %1250  ;;  %v1249_v41 = vpop.permute.xlu0 %1248 }
 0x773   :  { %v1255_v3 = vpop.permute.xlu1 %1254  ;;  %v1253_v14 = vpop.permute.xlu0 %1252 }
 0x777   :  { %v1275_v42 = vpop.permute.xlu1 %1274  ;;  %v1273_v46 = vpop.permute.xlu0 %1272 }
 0x778   :  { %v1289_v60 = vsub.f32 %v1243_v0, %v1275_v42  ;;  %v1288_v55 = vsub.f32 %v1241_v29, %v1273_v46 }
 0x77b   :  { %v1279_v40 = vpop.permute.xlu1 %1278  ;;  %v1277_v31 = vpop.permute.xlu0 %1276 }
 0x77c   :  { %v1291_v45 = vsub.f32 %v1247_v21, %v1279_v40  ;;  %v1290_v50 = vsub.f32 %v1245_v43, %v1277_v31 }
 0x77f   :  { %v1283_v49 = vpop.permute.xlu1 %1282  ;;  %v1281_v16 = vpop.permute.xlu0 %1280 }
 0x780   :  { %v1293_v13 = vsub.f32 %v1251_v56, %v1283_v49  ;;  %v1292_v27 = vsub.f32 %v1249_v41, %v1281_v16 }
 0x783   :  { %v1287_v18 = vpop.permute.xlu1 %1286  ;;  %v1285_v19 = vpop.permute.xlu0 %1284 }
 0x784   :  { %v1295_v21 = vsub.f32 %v1255_v3, %v1287_v18  ;;  %v1294_v43 = vsub.f32 %v1253_v14, %v1285_v19 }
 0x787   :  { %v1259_v17 = vpop.permute.xlu1 %1258  ;;  %v1257_v32 = vpop.permute.xlu0 %1256 }
 0x788   :  { %v1297_v9 = vmul.f32 %v1289_v60, %v1259_v17  ;;  %v1296_v7 = vmul.f32 %v1288_v55, %v1257_v32 }
 0x78a   :  { %v1305_v37 = vsub.f32 %v1297_v9, %v8236_v1  ;;  %v1304_v54 = vsub.f32 %v1296_v7, %v8239_v26 }
 0x78b   :  { %v1263_v38 = vpop.permute.xlu1 %1262  ;;  %v1261_v12 = vpop.permute.xlu0 %1260 }
 0x78c   :  { %v1313_v25 = vadd.f32 8.0, %v1305_v37  ;;  %v1312_v61 = vadd.f32 8.0, %v1304_v54  ;;  %v1299_v62 = vmul.f32 %v1291_v45, %v1263_v38  ;;  %v1298_v33 = vmul.f32 %v1290_v50, %v1261_v12 }
 0x78e   :  { %v1321_v30 = vadd.f32 %v1313_v25, %v8241_v11  ;;  %v1320_v28 = vadd.f32 %v1312_v61, %v8243_v2  ;;  %v1307_v53 = vsub.f32 %v1299_v62, %v8255_v22  ;;  %v1306_v58 = vsub.f32 %v1298_v33, %v8258_v44 }
 0x78f   :  { %v1267_v47 = vpop.permute.xlu1 %1266  ;;  %v1265_v1 = vpop.permute.xlu0 %1264 }
 0x790   :  { %v1329_v24 = vmul.f32 0.008333334, %v1321_v30  ;;  %v1328_v26 = vmul.f32 0.008333334, %v1320_v28  ;;  %v1315_v0 = vadd.f32 8.0, %v1307_v53  ;;  %v1314_v29 = vadd.f32 8.0, %v1306_v58 }
 0x791   :  { %v1301_v42 = vmul.f32 %v1293_v13, %v1267_v47  ;;  %v1300_v46 = vmul.f32 %v1292_v27, %v1265_v1 }
 0x792   :  { %v8339_v11 = vadd.f32 %v1329_v24, %v7909_v10  ;;  %v8342_v2 = vadd.f32 %v1328_v26, %v7912_v20  ;;  %v1323_v22 = vadd.f32 %v1315_v0, %v8260_v39  ;;  %v1322_v44 = vadd.f32 %v1314_v29, %v8262_v63 }
 0x793   :  { %v1309_v56 = vsub.f32 %v1301_v42, %v8271_v34  ;;  %v1308_v41 = vsub.f32 %v1300_v46, %v8274_v15  ;;  %v1271_v40 = vpop.permute.xlu1 %1270  ;;  %v1269_v31 = vpop.permute.xlu0 %1268 }
 0x794   :  { %v1331_v3 = vmul.f32 0.008333334, %v1323_v22  ;;  %v1330_v14 = vmul.f32 0.008333334, %v1322_v44  ;;  %v1303_v49 = vmul.f32 %v1295_v21, %v1271_v40  ;;  %v1302_v16 = vmul.f32 %v1294_v43, %v1269_v31  ;;  %1346 = vrot.lane.b32.xlu1 %v8339_v11, %s7033_s6  ;;  %1344 = vrot.lane.b32.xlu0 %v8342_v2, %s7033_s6 }
 0x795   :  { %v1317_v10 = vadd.f32 8.0, %v1309_v56  ;;  %v1316_v20 = vadd.f32 8.0, %v1308_v41 }
 0x796   :  { %v8353_v39 = vadd.f32 %v1331_v3, %v7927_v4  ;;  %v8356_v63 = vadd.f32 %v1330_v14, %v7930_v59  ;;  %v1311_v34 = vsub.f32 %v1303_v49, %v8287_v35  ;;  %v1310_v15 = vsub.f32 %v1302_v16, %v8290_v57 }
 0x797   :  { %v1325_v18 = vadd.f32 %v1317_v10, %v8276_v36  ;;  %v1324_v19 = vadd.f32 %v1316_v20, %v8278_v6 }
 0x798   :  { %v1319_v60 = vadd.f32 8.0, %v1311_v34  ;;  %v1318_v55 = vadd.f32 8.0, %v1310_v15  ;;  %1350 = vrot.lane.b32.xlu1 %v8353_v39, %s7033_s6  ;;  %1348 = vrot.lane.b32.xlu0 %v8356_v63, %s7033_s6 }
 0x799   :  { %v1333_v4 = vmul.f32 0.008333334, %v1325_v18  ;;  %v1332_v17 = vmul.f32 0.008333334, %v1324_v19 }
 0x79a   :  { %v1327_v59 = vadd.f32 %v1319_v60, %v8292_v52  ;;  %v1326_v35 = vadd.f32 %v1318_v55, %v8294_v48 }
 0x79b   :  { %v8369_v57 = vadd.f32 %v1333_v4, %v7943_v51  ;;  %v8372_v36 = vadd.f32 %v1332_v17, %v7946_v5 }
 0x79c   :  { %v1335_v6 = vmul.f32 0.008333334, %v1327_v59  ;;  %v1334_v32 = vmul.f32 0.008333334, %v1326_v35 }
 0x79d   :  { %1354 = vrot.lane.b32.xlu1 %v8369_v57, %s7033_s6  ;;  %1352 = vrot.lane.b32.xlu0 %v8372_v36, %s7033_s6 }
 0x79e   :  { %v8379_v9 = vadd.f32 %v1335_v6, %v7957_v23  ;;  %v8382_v52 = vadd.f32 %v1334_v32, %v7960_v8 }
 0x7a1   :  { %1358 = vrot.lane.b32.xlu1 %v8379_v9, %s7033_s6  ;;  %1356 = vrot.lane.b32.xlu0 %v8382_v52, %s7033_s6 }
 0x7a5   :  { %1378 = vrot.lane.b32.xlu1 %v8339_v11, %s7034_s1  ;;  %1376 = vrot.lane.b32.xlu0 %v8342_v2, %s7034_s1 }
 0x7a9   :  { %1382 = vrot.lane.b32.xlu1 %v8353_v39, %s7034_s1  ;;  %1380 = vrot.lane.b32.xlu0 %v8356_v63, %s7034_s1 }
 0x7ad   :  { %1386 = vrot.lane.b32.xlu1 %v8369_v57, %s7034_s1  ;;  %1384 = vrot.lane.b32.xlu0 %v8372_v36, %s7034_s1 }
 0x7b1   :  { %1390 = vrot.lane.b32.xlu1 %v8379_v9, %s7034_s1  ;;  %1388 = vrot.lane.b32.xlu0 %v8382_v52, %s7034_s1 }
 0x7b5   :  { %1362 = vrot.lane.b32.xlu1 %v8339_v11, %s7035_s7  ;;  %1360 = vrot.lane.b32.xlu0 %v8342_v2, %s7035_s7 }
 0x7b9   :  { %1366 = vrot.lane.b32.xlu1 %v8353_v39, %s7035_s7  ;;  %1364 = vrot.lane.b32.xlu0 %v8356_v63, %s7035_s7 }
 0x7bd   :  { %1370 = vrot.lane.b32.xlu1 %v8369_v57, %s7035_s7  ;;  %1368 = vrot.lane.b32.xlu0 %v8372_v36, %s7035_s7 }
 0x7c1   :  { %1374 = vrot.lane.b32.xlu1 %v8379_v9, %s7035_s7  ;;  %1372 = vrot.lane.b32.xlu0 %v8382_v52, %s7035_s7 }
 0x806   :  { %v1347_v51 = vpop.permute.xlu1 %1346  ;;  %v1345_v5 = vpop.permute.xlu0 %1344 }
 0x80a   :  { %v1351_v23 = vpop.permute.xlu1 %1350  ;;  %v1349_v8 = vpop.permute.xlu0 %1348 }
 0x80f   :  { %v1355_v48 = vpop.permute.xlu1 %1354  ;;  %v1353_v7 = vpop.permute.xlu0 %1352 }
 0x813   :  { %v1359_v45 = vpop.permute.xlu1 %1358  ;;  %v1357_v50 = vpop.permute.xlu0 %1356 }
 0x817   :  { %v1379_v37 = vpop.permute.xlu1 %1378  ;;  %v1377_v54 = vpop.permute.xlu0 %1376 }
 0x818   :  { %v1393_v30 = vsub.f32 %v1347_v51, %v1379_v37  ;;  %v1392_v28 = vsub.f32 %v1345_v5, %v1377_v54 }
 0x81b   :  { %v1383_v38 = vpop.permute.xlu1 %1382  ;;  %v1381_v12 = vpop.permute.xlu0 %1380 }
 0x81c   :  { %v1395_v47 = vsub.f32 %v1351_v23, %v1383_v38  ;;  %v1394_v1 = vsub.f32 %v1349_v8, %v1381_v12 }
 0x81f   :  { %v1387_v25 = vpop.permute.xlu1 %1386  ;;  %v1385_v61 = vpop.permute.xlu0 %1384 }
 0x820   :  { %v1397_v22 = vsub.f32 %v1355_v48, %v1387_v25  ;;  %v1396_v44 = vsub.f32 %v1353_v7, %v1385_v61 }
 0x823   :  { %v1391_v62 = vpop.permute.xlu1 %1390  ;;  %v1389_v33 = vpop.permute.xlu0 %1388 }
 0x824   :  { %v1399_v34 = vsub.f32 %v1359_v45, %v1391_v62  ;;  %v1398_v15 = vsub.f32 %v1357_v50, %v1389_v33 }
 0x827   :  { %v1363_v53 = vpop.permute.xlu1 %1362  ;;  %v1361_v58 = vpop.permute.xlu0 %1360 }
 0x828   :  { %v1401_v13 = vmul.f32 %v1393_v30, %v1363_v53  ;;  %v1400_v27 = vmul.f32 %v1392_v28, %v1361_v58 }
 0x82a   :  { %v1409_v24 = vsub.f32 %v1401_v13, %v8339_v11  ;;  %v1408_v26 = vsub.f32 %v1400_v27, %v8342_v2 }
 0x82b   :  { %v1367_v0 = vpop.permute.xlu1 %1366  ;;  %v1365_v29 = vpop.permute.xlu0 %1364 }
 0x82c   :  { %v8422_v21 = vadd.f32 8.0, %v1409_v24  ;;  %v8424_v43 = vadd.f32 8.0, %v1408_v26  ;;  %v1403_v42 = vmul.f32 %v1395_v47, %v1367_v0  ;;  %v1402_v46 = vmul.f32 %v1394_v1, %v1365_v29 }
 0x82e   :  { %v1425_v56 = vmul.f32 0.025, %v8422_v21  ;;  %v1424_v41 = vmul.f32 0.025, %v8424_v43  ;;  %v1411_v40 = vsub.f32 %v1403_v42, %v8353_v39  ;;  %v1410_v31 = vsub.f32 %v1402_v46, %v8356_v63 }
 0x82f   :  { %v1371_v3 = vpop.permute.xlu1 %1370  ;;  %v1369_v14 = vpop.permute.xlu0 %1368 }
 0x830   :  { %v8430_v49 = vadd.f32 8.0, %v1411_v40  ;;  %v8432_v16 = vadd.f32 8.0, %v1410_v31  ;;  %v1405_v10 = vmul.f32 %v1397_v22, %v1371_v3  ;;  %v1404_v20 = vmul.f32 %v1396_v44, %v1369_v14 }
 0x831   :  { %v8435_v18 = vadd.f32 %v1425_v56, %v8339_v11  ;;  %v8438_v19 = vadd.f32 %v1424_v41, %v8342_v2 }
 0x832   :  { %v1427_v60 = vmul.f32 0.025, %v8430_v49  ;;  %v1426_v55 = vmul.f32 0.025, %v8432_v16  ;;  %v1413_v4 = vsub.f32 %v1405_v10, %v8369_v57  ;;  %v1412_v17 = vsub.f32 %v1404_v20, %v8372_v36 }
 0x833   :  { %1442 = vrot.lane.b32.xlu1 %v8435_v18, %s7033_s6  ;;  %1440 = vrot.lane.b32.xlu0 %v8438_v19, %s7033_s6  ;;  %v1375_v59 = vpop.permute.xlu1 %1374  ;;  %v1373_v35 = vpop.permute.xlu0 %1372 }
 0x834   :  { %v8448_v6 = vadd.f32 8.0, %v1413_v4  ;;  %v8450_v32 = vadd.f32 8.0, %v1412_v17  ;;  %v1407_v51 = vmul.f32 %v1399_v34, %v1375_v59  ;;  %v1406_v5 = vmul.f32 %v1398_v15, %v1373_v35 }
 0x835   :  { %v8453_v23 = vadd.f32 %v1427_v60, %v8353_v39  ;;  %v8456_v8 = vadd.f32 %v1426_v55, %v8356_v63 }
 0x836   :  { %v1429_v48 = vmul.f32 0.025, %v8448_v6  ;;  %v1428_v7 = vmul.f32 0.025, %v8450_v32  ;;  %v1415_v45 = vsub.f32 %v1407_v51, %v8379_v9  ;;  %v1414_v50 = vsub.f32 %v1406_v5, %v8382_v52 }
 0x837   :  { %1446 = vrot.lane.b32.xlu1 %v8453_v23, %s7033_s6  ;;  %1444 = vrot.lane.b32.xlu0 %v8456_v8, %s7033_s6 }
 0x838   :  { %v8466_v37 = vadd.f32 8.0, %v1415_v45  ;;  %v8468_v54 = vadd.f32 8.0, %v1414_v50  ;;  %v8471_v38 = vadd.f32 %v1429_v48, %v8369_v57  ;;  %v8474_v12 = vadd.f32 %v1428_v7, %v8372_v36 }
 0x83a   :  { %v1431_v25 = vmul.f32 0.025, %v8466_v37  ;;  %v1430_v61 = vmul.f32 0.025, %v8468_v54 }
 0x83b   :  { %1450 = vrot.lane.b32.xlu1 %v8471_v38, %s7033_s6  ;;  %1448 = vrot.lane.b32.xlu0 %v8474_v12, %s7033_s6 }
 0x83c   :  { %v8483_v62 = vadd.f32 %v1431_v25, %v8379_v9  ;;  %v8486_v33 = vadd.f32 %v1430_v61, %v8382_v52 }
 0x83f   :  { %1454 = vrot.lane.b32.xlu1 %v8483_v62, %s7033_s6  ;;  %1452 = vrot.lane.b32.xlu0 %v8486_v33, %s7033_s6 }
 0x843   :  { %1474 = vrot.lane.b32.xlu1 %v8435_v18, %s7034_s1  ;;  %1472 = vrot.lane.b32.xlu0 %v8438_v19, %s7034_s1 }
 0x847   :  { %1478 = vrot.lane.b32.xlu1 %v8453_v23, %s7034_s1  ;;  %1476 = vrot.lane.b32.xlu0 %v8456_v8, %s7034_s1 }
 0x84b   :  { %1482 = vrot.lane.b32.xlu1 %v8471_v38, %s7034_s1  ;;  %1480 = vrot.lane.b32.xlu0 %v8474_v12, %s7034_s1 }
 0x84f   :  { %1486 = vrot.lane.b32.xlu1 %v8483_v62, %s7034_s1  ;;  %1484 = vrot.lane.b32.xlu0 %v8486_v33, %s7034_s1 }
 0x853   :  { %1458 = vrot.lane.b32.xlu1 %v8435_v18, %s7035_s7  ;;  %1456 = vrot.lane.b32.xlu0 %v8438_v19, %s7035_s7 }
 0x857   :  { %1462 = vrot.lane.b32.xlu1 %v8453_v23, %s7035_s7  ;;  %1460 = vrot.lane.b32.xlu0 %v8456_v8, %s7035_s7 }
 0x85b   :  { %1466 = vrot.lane.b32.xlu1 %v8471_v38, %s7035_s7  ;;  %1464 = vrot.lane.b32.xlu0 %v8474_v12, %s7035_s7 }
 0x85f   :  { %1470 = vrot.lane.b32.xlu1 %v8483_v62, %s7035_s7  ;;  %1468 = vrot.lane.b32.xlu0 %v8486_v33, %s7035_s7 }
 0x8a5   :  { %v1443_v30 = vpop.permute.xlu1 %1442  ;;  %v1441_v28 = vpop.permute.xlu0 %1440 }
 0x8a9   :  { %v1447_v53 = vpop.permute.xlu1 %1446  ;;  %v1445_v58 = vpop.permute.xlu0 %1444 }
 0x8ad   :  { %v1451_v13 = vpop.permute.xlu1 %1450  ;;  %v1449_v27 = vpop.permute.xlu0 %1448 }
 0x8b1   :  { %v1455_v47 = vpop.permute.xlu1 %1454  ;;  %v1453_v1 = vpop.permute.xlu0 %1452 }
 0x8b5   :  { %v1475_v24 = vpop.permute.xlu1 %1474  ;;  %v1473_v26 = vpop.permute.xlu0 %1472 }
 0x8b6   :  { %v1489_v56 = vsub.f32 %v1443_v30, %v1475_v24  ;;  %v1488_v41 = vsub.f32 %v1441_v28, %v1473_v26 }
 0x8b9   :  { %v1479_v0 = vpop.permute.xlu1 %1478  ;;  %v1477_v29 = vpop.permute.xlu0 %1476 }
 0x8ba   :  { %v1491_v10 = vsub.f32 %v1447_v53, %v1479_v0  ;;  %v1490_v20 = vsub.f32 %v1445_v58, %v1477_v29 }
 0x8bd   :  { %v1483_v42 = vpop.permute.xlu1 %1482  ;;  %v1481_v46 = vpop.permute.xlu0 %1480 }
 0x8be   :  { %v1493_v51 = vsub.f32 %v1451_v13, %v1483_v42  ;;  %v1492_v5 = vsub.f32 %v1449_v27, %v1481_v46 }
 0x8c1   :  { %v1487_v22 = vpop.permute.xlu1 %1486  ;;  %v1485_v44 = vpop.permute.xlu0 %1484 }
 0x8c2   :  { %v1495_v13 = vsub.f32 %v1455_v47, %v1487_v22  ;;  %v1494_v27 = vsub.f32 %v1453_v1, %v1485_v44 }
 0x8c5   :  { %v1459_v40 = vpop.permute.xlu1 %1458  ;;  %v1457_v31 = vpop.permute.xlu0 %1456 }
 0x8c6   :  { %v1497_v3 = vmul.f32 %v1489_v56, %v1459_v40  ;;  %v1496_v14 = vmul.f32 %v1488_v41, %v1457_v31 }
 0x8c8   :  { %v1505_v34 = vsub.f32 %v1497_v3, %v8435_v18  ;;  %v1504_v15 = vsub.f32 %v1496_v14, %v8438_v19 }
 0x8c9   :  { %v1463_v60 = vpop.permute.xlu1 %1462  ;;  %v1461_v55 = vpop.permute.xlu0 %1460 }
 0x8ca   :  { %v8526_v4 = vadd.f32 8.0, %v1505_v34  ;;  %v8528_v17 = vadd.f32 8.0, %v1504_v15  ;;  %v1499_v59 = vmul.f32 %v1491_v10, %v1463_v60  ;;  %v1498_v35 = vmul.f32 %v1490_v20, %v1461_v55 }
 0x8cc   :  { %v1537_v48 = vmul.f32 0.025, %v8526_v4  ;;  %v1536_v7 = vmul.f32 0.025, %v8528_v17  ;;  %v1507_v45 = vsub.f32 %v1499_v59, %v8453_v23  ;;  %v1506_v18 = vsub.f32 %v1498_v35, %v8456_v8 }
 0x8cd   :  { %v1467_v50 = vpop.permute.xlu1 %1466  ;;  %v1465_v19 = vpop.permute.xlu0 %1464 }
 0x8ce   :  { %v1501_v25 = vmul.f32 %v1493_v51, %v1467_v50  ;;  %v1500_v61 = vmul.f32 %v1492_v5, %v1465_v19  ;;  %v8534_v30 = vadd.f32 8.0, %v1507_v45  ;;  %v8536_v28 = vadd.f32 8.0, %v1506_v18 }
 0x8cf   :  { %v8539_v53 = vadd.f32 %v1537_v48, %v8339_v11  ;;  %v8542_v58 = vadd.f32 %v1536_v7, %v8342_v2 }
 0x8d0   :  { %v1509_v23 = vsub.f32 %v1501_v25, %v8471_v38  ;;  %v1508_v8 = vsub.f32 %v1500_v61, %v8474_v12  ;;  %v1539_v24 = vmul.f32 0.025, %v8534_v30  ;;  %v1538_v26 = vmul.f32 0.025, %v8536_v28 }
 0x8d1   :  { %1554 = vrot.lane.b32.xlu1 %v8539_v53, %s7033_s6  ;;  %1552 = vrot.lane.b32.xlu0 %v8542_v58, %s7033_s6  ;;  %v1471_v0 = vpop.permute.xlu1 %1470  ;;  %v1469_v29 = vpop.permute.xlu0 %1468 }
 0x8d2   :  { %v8552_v42 = vadd.f32 8.0, %v1509_v23  ;;  %v8554_v47 = vadd.f32 8.0, %v1508_v8  ;;  %v1503_v1 = vmul.f32 %v1495_v13, %v1471_v0  ;;  %v1502_v38 = vmul.f32 %v1494_v27, %v1469_v29 }
 0x8d3   :  { %v8557_v12 = vadd.f32 %v1539_v24, %v8353_v39  ;;  %v8560_v46 = vadd.f32 %v1538_v26, %v8356_v63  ;;  %v1521_v23 = vmul.f32 2.0, %v8526_v4  ;;  %v1520_v8 = vmul.f32 2.0, %v8528_v17 }
 0x8d4   :  { %v1541_v22 = vmul.f32 0.025, %v8552_v42  ;;  %v1540_v44 = vmul.f32 0.025, %v8554_v47  ;;  %v1511_v56 = vsub.f32 %v1503_v1, %v8483_v62  ;;  %v1510_v41 = vsub.f32 %v1502_v38, %v8486_v33 }
 0x8d5   :  { %1558 = vrot.lane.b32.xlu1 %v8557_v12, %s7033_s6  ;;  %1556 = vrot.lane.b32.xlu0 %v8560_v46, %s7033_s6  ;;  %v1523_v24 = vmul.f32 2.0, %v8534_v30  ;;  %v1522_v26 = vmul.f32 2.0, %v8536_v28  ;;  %v1529_v17 = vadd.f32 %v1521_v23, %v8422_v21  ;;  %v1528_v30 = vadd.f32 %v1520_v8, %v8424_v43 }
 0x8d6   :  { %v8571_v40 = vadd.f32 %v1541_v22, %v8369_v57  ;;  %v8574_v31 = vadd.f32 %v1540_v44, %v8372_v36  ;;  %v8576_v3 = vadd.f32 8.0, %v1511_v56  ;;  %v8578_v14 = vadd.f32 8.0, %v1510_v41 }
 0x8d7   :  { %v1525_v22 = vmul.f32 2.0, %v8552_v42  ;;  %v1524_v44 = vmul.f32 2.0, %v8554_v47  ;;  %v1531_v28 = vadd.f32 %v1523_v24, %v8430_v49 }
 0x8d8   :  { %v1543_v62 = vmul.f32 0.025, %v8576_v3  ;;  %v1542_v33 = vmul.f32 0.025, %v8578_v14  ;;  %v1527_v49 = vmul.f32 2.0, %v8576_v3 }
 0x8d9   :  { %1562 = vrot.lane.b32.xlu1 %v8571_v40, %s7033_s6  ;;  %1560 = vrot.lane.b32.xlu0 %v8574_v31, %s7033_s6 }
 0x8da   :  { %v8587_v10 = vadd.f32 %v1543_v62, %v8379_v9  ;;  %v8590_v20 = vadd.f32 %v1542_v33, %v8382_v52  ;;  %v1530_v33 = vadd.f32 %v1522_v26, %v8432_v16 }
 0x8dd   :  { %1566 = vrot.lane.b32.xlu1 %v8587_v10, %s7033_s6  ;;  %1564 = vrot.lane.b32.xlu0 %v8590_v20, %s7033_s6 }
 0x8e1   :  { %1586 = vrot.lane.b32.xlu1 %v8539_v53, %s7034_s1  ;;  %1584 = vrot.lane.b32.xlu0 %v8542_v58, %s7034_s1 }
 0x8e5   :  { %1590 = vrot.lane.b32.xlu1 %v8557_v12, %s7034_s1  ;;  %1588 = vrot.lane.b32.xlu0 %v8560_v46, %s7034_s1 }
 0x8e9   :  { %1594 = vrot.lane.b32.xlu1 %v8571_v40, %s7034_s1  ;;  %1592 = vrot.lane.b32.xlu0 %v8574_v31, %s7034_s1 }
 0x8ed   :  { %1598 = vrot.lane.b32.xlu1 %v8587_v10, %s7034_s1  ;;  %1596 = vrot.lane.b32.xlu0 %v8590_v20, %s7034_s1 }
 0x8f1   :  { %1570 = vrot.lane.b32.xlu1 %v8539_v53, %s7035_s7  ;;  %1568 = vrot.lane.b32.xlu0 %v8542_v58, %s7035_s7 }
 0x8f5   :  { %1574 = vrot.lane.b32.xlu1 %v8557_v12, %s7035_s7  ;;  %1572 = vrot.lane.b32.xlu0 %v8560_v46, %s7035_s7 }
 0x8f9   :  { %1578 = vrot.lane.b32.xlu1 %v8571_v40, %s7035_s7  ;;  %1576 = vrot.lane.b32.xlu0 %v8574_v31, %s7035_s7 }
 0x8fd   :  { %1582 = vrot.lane.b32.xlu1 %v8587_v10, %s7035_s7  ;;  %1580 = vrot.lane.b32.xlu0 %v8590_v20, %s7035_s7 }
 0x943   :  { %v1555_v34 = vpop.permute.xlu1 %1554  ;;  %v1553_v15 = vpop.permute.xlu0 %1552 }
 0x947   :  { %v1559_v60 = vpop.permute.xlu1 %1558  ;;  %v1557_v55 = vpop.permute.xlu0 %1556 }
 0x94b   :  { %v1563_v59 = vpop.permute.xlu1 %1562  ;;  %v1561_v35 = vpop.permute.xlu0 %1560 }
 0x94f   :  { %v8628_v51 = vpop.permute.xlu1 %1566  ;;  %v8630_v5 = vpop.permute.xlu0 %1564 }
 0x953   :  { %v1587_v48 = vpop.permute.xlu1 %1586  ;;  %v1585_v7 = vpop.permute.xlu0 %1584 }
 0x954   :  { %v1601_v13 = vsub.f32 %v1555_v34, %v1587_v48  ;;  %v1600_v27 = vsub.f32 %v1553_v15, %v1585_v7 }
 0x957   :  { %v1591_v45 = vpop.permute.xlu1 %1590  ;;  %v1589_v18 = vpop.permute.xlu0 %1588 }
 0x958   :  { %v1603_v56 = vsub.f32 %v1559_v60, %v1591_v45  ;;  %v1602_v41 = vsub.f32 %v1557_v55, %v1589_v18  ;;  %v1533_v60 = vadd.f32 %v1525_v22, %v8448_v6 }
 0x95b   :  { %v1595_v50 = vpop.permute.xlu1 %1594  ;;  %v1593_v19 = vpop.permute.xlu0 %1592 }
 0x95c   :  { %v1605_v55 = vsub.f32 %v1563_v59, %v1595_v50 }
 0x95f   :  { %v8632_v25 = vpop.permute.xlu1 %1598  ;;  %v8634_v61 = vpop.permute.xlu0 %1596 }
 0x960   :  { %v1607_v16 = vsub.f32 %v8628_v51, %v8632_v25 }
 0x963   :  { %v1571_v0 = vpop.permute.xlu1 %1570  ;;  %v1569_v29 = vpop.permute.xlu0 %1568 }
 0x964   :  { %v1609_v1 = vmul.f32 %v1601_v13, %v1571_v0  ;;  %v1608_v38 = vmul.f32 %v1600_v27, %v1569_v29 }
 0x966   :  { %v1617_v62 = vsub.f32 %v1609_v1, %v8539_v53  ;;  %v1616_v4 = vsub.f32 %v1608_v38, %v8542_v58  ;;  %v1532_v53 = vadd.f32 %v1524_v44, %v8450_v32  ;;  %v1604_v58 = vsub.f32 %v1561_v35, %v1593_v19 }
 0x967   :  { %v1575_v34 = vpop.permute.xlu1 %1574  ;;  %v1573_v15 = vpop.permute.xlu0 %1572 }
 0x968   :  { %v1625_v48 = vadd.f32 8.0, %v1617_v62  ;;  %v1624_v42 = vadd.f32 8.0, %v1616_v4  ;;  %v1611_v7 = vmul.f32 %v1603_v56, %v1575_v34  ;;  %v1610_v47 = vmul.f32 %v1602_v41, %v1573_v15 }
 0x96a   :  { %v1633_v45 = vmul.f32 2.0, %v1625_v48  ;;  %v1649_v21 = vmul.f32 0.05, %v1625_v48  ;;  %v1632_v18 = vmul.f32 2.0, %v1624_v42  ;;  %v1648_v43 = vmul.f32 0.05, %v1624_v42 }
 0x96b   :  { %v1619_v13 = vsub.f32 %v1611_v7, %v8557_v12  ;;  %v1618_v27 = vsub.f32 %v1610_v47, %v8560_v46  ;;  %v1579_v23 = vpop.permute.xlu1 %1578  ;;  %v1577_v8 = vpop.permute.xlu0 %1576  ;;  %v1526_v12 = vmul.f32 2.0, %v8578_v14  ;;  %v1606_v46 = vsub.f32 %v8630_v5, %v8634_v61 }
 0x96c   :  { %v1613_v6 = vmul.f32 %v1605_v55, %v1579_v23  ;;  %v1612_v24 = vmul.f32 %v1604_v58, %v1577_v8  ;;  %v8656_v32 = vadd.f32 %v1649_v21, %v8339_v11  ;;  %v8659_v59 = vadd.f32 %v1648_v43, %v8342_v2 }
 0x96d   :  { %v1627_v35 = vadd.f32 8.0, %v1619_v13  ;;  %v1626_v50 = vadd.f32 8.0, %v1618_v27  ;;  %v8661_v3 = vadd.f32 %v1633_v45, %v1529_v17  ;;  %v8663_v19 = vadd.f32 %v1632_v18, %v1528_v30 }
 0x96e   :  { %v1621_v51 = vsub.f32 %v1613_v6, %v8571_v40  ;;  %v1620_v25 = vsub.f32 %v1612_v24, %v8574_v31  ;;  %1666 = vrot.lane.b32.xlu1 %v8656_v32, %s7033_s6  ;;  %1664 = vrot.lane.b32.xlu0 %v8659_v59, %s7033_s6  ;;  %v1534_v47 = vadd.f32 %v1526_v12, %v8468_v54 }
 0x96f   :  { %v1635_v26 = vmul.f32 2.0, %v1627_v35  ;;  %v1651_v0 = vmul.f32 0.05, %v1627_v35  ;;  %v1634_v29 = vmul.f32 2.0, %v1626_v50  ;;  %v1650_v1 = vmul.f32 0.05, %v1626_v50  ;;  %v1583_v38 = vpop.permute.xlu1 %1582  ;;  %v1581_v22 = vpop.permute.xlu0 %1580 }
 0x970   :  { %v1629_v14 = vadd.f32 8.0, %v1621_v51  ;;  %v1628_v44 = vadd.f32 8.0, %v1620_v25  ;;  %v1615_v56 = vmul.f32 %v1607_v16, %v1583_v38  ;;  %v1614_v5 = vmul.f32 %v1606_v46, %v1581_v22 }
 0x971   :  { %v8675_v40 = vadd.f32 %v1651_v0, %v8353_v39  ;;  %v8678_v31 = vadd.f32 %v1650_v1, %v8356_v63  ;;  %v8680_v61 = vadd.f32 %v1635_v26, %v1531_v28  ;;  %v8682_v41 = vadd.f32 %v1634_v29, %v1530_v33 }
 0x972   :  { %v1637_v62 = vmul.f32 2.0, %v1629_v14  ;;  %v1653_v4 = vmul.f32 0.05, %v1629_v14  ;;  %v1636_v17 = vmul.f32 2.0, %v1628_v44  ;;  %v1652_v30 = vmul.f32 0.05, %v1628_v44 }
 0x973   :  { %v1623_v34 = vsub.f32 %v1615_v56, %v8587_v10  ;;  %v1622_v15 = vsub.f32 %v1614_v5, %v8590_v20  ;;  %1670 = vrot.lane.b32.xlu1 %v8675_v40, %s7033_s6  ;;  %1668 = vrot.lane.b32.xlu0 %v8678_v31, %s7033_s6  ;;  %v1535_v20 = vadd.f32 %v1527_v49, %v8466_v37 }
 0x974   :  { %v8691_v48 = vadd.f32 %v1653_v4, %v8369_v57  ;;  %v8694_v28 = vadd.f32 %v1652_v30, %v8372_v36  ;;  %v8696_v33 = vadd.f32 %v1637_v62, %v1533_v60  ;;  %v8698_v42 = vadd.f32 %v1636_v17, %v1532_v53 }
 0x975   :  { %v1631_v7 = vadd.f32 8.0, %v1623_v34  ;;  %v1630_v10 = vadd.f32 8.0, %v1622_v15 }
 0x977   :  { %v1639_v55 = vmul.f32 2.0, %v1631_v7  ;;  %v1655_v58 = vmul.f32 0.05, %v1631_v7  ;;  %v1638_v45 = vmul.f32 2.0, %v1630_v10  ;;  %v1654_v21 = vmul.f32 0.05, %v1630_v10  ;;  %1674 = vrot.lane.b32.xlu1 %v8691_v48, %s7033_s6  ;;  %1672 = vrot.lane.b32.xlu0 %v8694_v28, %s7033_s6 }
 0x979   :  { %v8707_v60 = vadd.f32 %v1655_v58, %v8379_v9  ;;  %v8710_v53 = vadd.f32 %v1654_v21, %v8382_v52  ;;  %v8712_v18 = vadd.f32 %v1639_v55, %v1535_v20  ;;  %v8714_v37 = vadd.f32 %v1638_v45, %v1534_v47 }
 0x97b   :  { %1678 = vrot.lane.b32.xlu1 %v8707_v60, %s7033_s6  ;;  %1676 = vrot.lane.b32.xlu0 %v8710_v53, %s7033_s6 }
 0x97f   :  { %1698 = vrot.lane.b32.xlu1 %v8656_v32, %s7034_s1  ;;  %1696 = vrot.lane.b32.xlu0 %v8659_v59, %s7034_s1 }
 0x983   :  { %1702 = vrot.lane.b32.xlu1 %v8675_v40, %s7034_s1  ;;  %1700 = vrot.lane.b32.xlu0 %v8678_v31, %s7034_s1 }
 0x987   :  { %1706 = vrot.lane.b32.xlu1 %v8691_v48, %s7034_s1  ;;  %1704 = vrot.lane.b32.xlu0 %v8694_v28, %s7034_s1 }
 0x98b   :  { %1710 = vrot.lane.b32.xlu1 %v8707_v60, %s7034_s1  ;;  %1708 = vrot.lane.b32.xlu0 %v8710_v53, %s7034_s1 }
 0x98f   :  { %1682 = vrot.lane.b32.xlu1 %v8656_v32, %s7035_s7  ;;  %1680 = vrot.lane.b32.xlu0 %v8659_v59, %s7035_s7 }
 0x993   :  { %1686 = vrot.lane.b32.xlu1 %v8675_v40, %s7035_s7  ;;  %1684 = vrot.lane.b32.xlu0 %v8678_v31, %s7035_s7 }
 0x997   :  { %1690 = vrot.lane.b32.xlu1 %v8691_v48, %s7035_s7  ;;  %1688 = vrot.lane.b32.xlu0 %v8694_v28, %s7035_s7 }
 0x99b   :  { %1694 = vrot.lane.b32.xlu1 %v8707_v60, %s7035_s7  ;;  %1692 = vrot.lane.b32.xlu0 %v8710_v53, %s7035_s7 }
 0x9e0   :  { %v1667_v54 = vpop.permute.xlu1 %1666  ;;  %v1665_v43 = vpop.permute.xlu0 %1664 }
 0x9e5   :  { %v1671_v49 = vpop.permute.xlu1 %1670  ;;  %v1669_v16 = vpop.permute.xlu0 %1668 }
 0x9e9   :  { %v1675_v13 = vpop.permute.xlu1 %1674  ;;  %v1673_v27 = vpop.permute.xlu0 %1672 }
 0x9ed   :  { %v1679_v23 = vpop.permute.xlu1 %1678  ;;  %v1677_v8 = vpop.permute.xlu0 %1676 }
 0x9f1   :  { %v1699_v6 = vpop.permute.xlu1 %1698  ;;  %v1697_v24 = vpop.permute.xlu0 %1696 }
 0x9f2   :  { %v1713_v26 = vsub.f32 %v1667_v54, %v1699_v6  ;;  %v1712_v0 = vsub.f32 %v1665_v43, %v1697_v24 }
 0x9f5   :  { %v1703_v35 = vpop.permute.xlu1 %1702  ;;  %v1701_v50 = vpop.permute.xlu0 %1700 }
 0x9f6   :  { %v1715_v14 = vsub.f32 %v1671_v49, %v1703_v35  ;;  %v1714_v44 = vsub.f32 %v1669_v16, %v1701_v50 }
 0x9f9   :  { %v1707_v12 = vpop.permute.xlu1 %1706  ;;  %v1705_v46 = vpop.permute.xlu0 %1704 }
 0x9fa   :  { %v1717_v55 = vsub.f32 %v1675_v13, %v1707_v12  ;;  %v1716_v58 = vsub.f32 %v1673_v27, %v1705_v46 }
 0x9fd   :  { %v1711_v51 = vpop.permute.xlu1 %1710  ;;  %v1709_v25 = vpop.permute.xlu0 %1708 }
 0x9fe   :  { %v1719_v49 = vsub.f32 %v1679_v23, %v1711_v51  ;;  %v1718_v16 = vsub.f32 %v1677_v8, %v1709_v25 }
 0xa01   :  { %v1683_v29 = vpop.permute.xlu1 %1682  ;;  %v1681_v1 = vpop.permute.xlu0 %1680 }
 0xa02   :  { %v1721_v38 = vmul.f32 %v1713_v26, %v1683_v29  ;;  %v1720_v22 = vmul.f32 %v1712_v0, %v1681_v1 }
 0xa04   :  { %v1729_v56 = vsub.f32 %v1721_v38, %v8656_v32  ;;  %v1728_v5 = vsub.f32 %v1720_v22, %v8659_v59 }
 0xa05   :  { %v1687_v62 = vpop.permute.xlu1 %1686  ;;  %v1685_v4 = vpop.permute.xlu0 %1684 }
 0xa06   :  { %v1737_v17 = vadd.f32 8.0, %v1729_v56  ;;  %v1736_v30 = vadd.f32 8.0, %v1728_v5  ;;  %v1723_v34 = vmul.f32 %v1715_v14, %v1687_v62  ;;  %v1722_v15 = vmul.f32 %v1714_v44, %v1685_v4 }
 0xa08   :  { %v1745_v7 = vadd.f32 %v1737_v17, %v8661_v3  ;;  %v1744_v10 = vadd.f32 %v1736_v30, %v8663_v19  ;;  %v1731_v20 = vsub.f32 %v1723_v34, %v8675_v40  ;;  %v1730_v47 = vsub.f32 %v1722_v15, %v8678_v31 }
 0xa09   :  { %v1691_v45 = vpop.permute.xlu1 %1690  ;;  %v1689_v32 = vpop.permute.xlu0 %1688 }
 0xa0a   :  { %v1753_v21 = vmul.f32 0.008333334, %v1745_v7  ;;  %v1752_v59 = vmul.f32 0.008333334, %v1744_v10  ;;  %v1739_v54 = vadd.f32 8.0, %v1731_v20  ;;  %v1738_v43 = vadd.f32 8.0, %v1730_v47 }
 0xa0b   :  { %v1725_v6 = vmul.f32 %v1717_v55, %v1691_v45  ;;  %v1724_v24 = vmul.f32 %v1716_v58, %v1689_v32 }
 0xa0c   :  { %v8759_v3 = vadd.f32 %v1753_v21, %v8339_v11  ;;  %v8762_v19 = vadd.f32 %v1752_v59, %v8342_v2  ;;  %v1747_v40 = vadd.f32 %v1739_v54, %v8680_v61  ;;  %v1746_v31 = vadd.f32 %v1738_v43, %v8682_v41 }
 0xa0d   :  { %v1733_v13 = vsub.f32 %v1725_v6, %v8691_v48  ;;  %v1732_v27 = vsub.f32 %v1724_v24, %v8694_v28  ;;  %v1695_v35 = vpop.permute.xlu1 %1694  ;;  %v1693_v50 = vpop.permute.xlu0 %1692 }
 0xa0e   :  { %v1755_v23 = vmul.f32 0.008333334, %v1747_v40  ;;  %v1754_v8 = vmul.f32 0.008333334, %v1746_v31  ;;  %v1727_v12 = vmul.f32 %v1719_v49, %v1695_v35  ;;  %v1726_v46 = vmul.f32 %v1718_v16, %v1693_v50  ;;  %1770 = vrot.lane.b32.xlu1 %v8759_v3, %s7033_s6  ;;  %1768 = vrot.lane.b32.xlu0 %v8762_v19, %s7033_s6 }
 0xa0f   :  { %v1741_v11 = vadd.f32 8.0, %v1733_v13  ;;  %v1740_v2 = vadd.f32 8.0, %v1732_v27 }
 0xa10   :  { %v8773_v61 = vadd.f32 %v1755_v23, %v8353_v39  ;;  %v8776_v41 = vadd.f32 %v1754_v8, %v8356_v63  ;;  %v1735_v48 = vsub.f32 %v1727_v12, %v8707_v60  ;;  %v1734_v28 = vsub.f32 %v1726_v46, %v8710_v53 }
 0xa11   :  { %v1749_v51 = vadd.f32 %v1741_v11, %v8696_v33  ;;  %v1748_v25 = vadd.f32 %v1740_v2, %v8698_v42 }
 0xa12   :  { %v1743_v26 = vadd.f32 8.0, %v1735_v48  ;;  %v1742_v0 = vadd.f32 8.0, %v1734_v28  ;;  %1774 = vrot.lane.b32.xlu1 %v8773_v61, %s7033_s6  ;;  %1772 = vrot.lane.b32.xlu0 %v8776_v41, %s7033_s6 }
 0xa13   :  { %v1757_v39 = vmul.f32 0.008333334, %v1749_v51  ;;  %v1756_v29 = vmul.f32 0.008333334, %v1748_v25 }
 0xa14   :  { %v1751_v63 = vadd.f32 %v1743_v26, %v8712_v18  ;;  %v1750_v60 = vadd.f32 %v1742_v0, %v8714_v37 }
 0xa15   :  { %v8789_v53 = vadd.f32 %v1757_v39, %v8369_v57  ;;  %v8792_v33 = vadd.f32 %v1756_v29, %v8372_v36 }
 0xa16   :  { %v1759_v42 = vmul.f32 0.008333334, %v1751_v63  ;;  %v1758_v1 = vmul.f32 0.008333334, %v1750_v60 }
 0xa17   :  { %1778 = vrot.lane.b32.xlu1 %v8789_v53, %s7033_s6  ;;  %1776 = vrot.lane.b32.xlu0 %v8792_v33, %s7033_s6 }
 0xa18   :  { %v8799_v38 = vadd.f32 %v1759_v42, %v8379_v9  ;;  %v8802_v18 = vadd.f32 %v1758_v1, %v8382_v52 }
 0xa1b   :  { %1782 = vrot.lane.b32.xlu1 %v8799_v38, %s7033_s6  ;;  %1780 = vrot.lane.b32.xlu0 %v8802_v18, %s7033_s6 }
 0xa1f   :  { %1802 = vrot.lane.b32.xlu1 %v8759_v3, %s7034_s1  ;;  %1800 = vrot.lane.b32.xlu0 %v8762_v19, %s7034_s1 }
 0xa23   :  { %1806 = vrot.lane.b32.xlu1 %v8773_v61, %s7034_s1  ;;  %1804 = vrot.lane.b32.xlu0 %v8776_v41, %s7034_s1 }
 0xa27   :  { %1810 = vrot.lane.b32.xlu1 %v8789_v53, %s7034_s1  ;;  %1808 = vrot.lane.b32.xlu0 %v8792_v33, %s7034_s1 }
 0xa2b   :  { %1814 = vrot.lane.b32.xlu1 %v8799_v38, %s7034_s1  ;;  %1812 = vrot.lane.b32.xlu0 %v8802_v18, %s7034_s1 }
 0xa2f   :  { %1786 = vrot.lane.b32.xlu1 %v8759_v3, %s7035_s7  ;;  %1784 = vrot.lane.b32.xlu0 %v8762_v19, %s7035_s7 }
 0xa33   :  { %1790 = vrot.lane.b32.xlu1 %v8773_v61, %s7035_s7  ;;  %1788 = vrot.lane.b32.xlu0 %v8776_v41, %s7035_s7 }
 0xa37   :  { %1794 = vrot.lane.b32.xlu1 %v8789_v53, %s7035_s7  ;;  %1792 = vrot.lane.b32.xlu0 %v8792_v33, %s7035_s7 }
 0xa3b   :  { %1798 = vrot.lane.b32.xlu1 %v8799_v38, %s7035_s7  ;;  %1796 = vrot.lane.b32.xlu0 %v8802_v18, %s7035_s7 }
 0xa80   :  { %v1771_v57 = vpop.permute.xlu1 %1770  ;;  %v1769_v36 = vpop.permute.xlu0 %1768 }
 0xa84   :  { %v1775_v9 = vpop.permute.xlu1 %1774  ;;  %v1773_v52 = vpop.permute.xlu0 %1772 }
 0xa89   :  { %v1779_v37 = vpop.permute.xlu1 %1778  ;;  %v1777_v22 = vpop.permute.xlu0 %1776 }
 0xa8d   :  { %v1783_v14 = vpop.permute.xlu1 %1782  ;;  %v1781_v44 = vpop.permute.xlu0 %1780 }
 0xa91   :  { %v1803_v56 = vpop.permute.xlu1 %1802  ;;  %v1801_v5 = vpop.permute.xlu0 %1800 }
 0xa92   :  { %v1817_v7 = vsub.f32 %v1771_v57, %v1803_v56  ;;  %v1816_v10 = vsub.f32 %v1769_v36, %v1801_v5 }
 0xa95   :  { %v1807_v62 = vpop.permute.xlu1 %1806  ;;  %v1805_v4 = vpop.permute.xlu0 %1804 }
 0xa96   :  { %v1819_v45 = vsub.f32 %v1775_v9, %v1807_v62  ;;  %v1818_v32 = vsub.f32 %v1773_v52, %v1805_v4 }
 0xa99   :  { %v1811_v17 = vpop.permute.xlu1 %1810  ;;  %v1809_v30 = vpop.permute.xlu0 %1808 }
 0xa9a   :  { %v1821_v40 = vsub.f32 %v1779_v37, %v1811_v17  ;;  %v1820_v31 = vsub.f32 %v1777_v22, %v1809_v30 }
 0xa9d   :  { %v1815_v34 = vpop.permute.xlu1 %1814  ;;  %v1813_v15 = vpop.permute.xlu0 %1812 }
 0xa9e   :  { %v1823_v48 = vsub.f32 %v1783_v14, %v1815_v34  ;;  %v1822_v28 = vsub.f32 %v1781_v44, %v1813_v15 }
 0xaa1   :  { %v1787_v20 = vpop.permute.xlu1 %1786  ;;  %v1785_v47 = vpop.permute.xlu0 %1784 }
 0xaa2   :  { %v1825_v55 = vmul.f32 %v1817_v7, %v1787_v20  ;;  %v1824_v58 = vmul.f32 %v1816_v10, %v1785_v47 }
 0xaa4   :  { %v1833_v21 = vsub.f32 %v1825_v55, %v8759_v3  ;;  %v1832_v59 = vsub.f32 %v1824_v58, %v8762_v19 }
 0xaa5   :  { %v1791_v54 = vpop.permute.xlu1 %1790  ;;  %v1789_v43 = vpop.permute.xlu0 %1788 }
 0xaa6   :  { %v8842_v49 = vadd.f32 8.0, %v1833_v21  ;;  %v8844_v16 = vadd.f32 8.0, %v1832_v59  ;;  %v1827_v6 = vmul.f32 %v1819_v45, %v1791_v54  ;;  %v1826_v24 = vmul.f32 %v1818_v32, %v1789_v43 }
 0xaa8   :  { %v1849_v13 = vmul.f32 0.025, %v8842_v49  ;;  %v1848_v27 = vmul.f32 0.025, %v8844_v16  ;;  %v1835_v35 = vsub.f32 %v1827_v6, %v8773_v61  ;;  %v1834_v50 = vsub.f32 %v1826_v24, %v8776_v41 }
 0xaa9   :  { %v1795_v23 = vpop.permute.xlu1 %1794  ;;  %v1793_v8 = vpop.permute.xlu0 %1792 }
 0xaaa   :  { %v8850_v12 = vadd.f32 8.0, %v1835_v35  ;;  %v8852_v46 = vadd.f32 8.0, %v1834_v50  ;;  %v1829_v11 = vmul.f32 %v1821_v40, %v1795_v23  ;;  %v1828_v2 = vmul.f32 %v1820_v31, %v1793_v8 }
 0xaab   :  { %v8855_v51 = vadd.f32 %v1849_v13, %v8759_v3  ;;  %v8858_v25 = vadd.f32 %v1848_v27, %v8762_v19 }
 0xaac   :  { %v1851_v26 = vmul.f32 0.025, %v8850_v12  ;;  %v1850_v0 = vmul.f32 0.025, %v8852_v46  ;;  %v1837_v39 = vsub.f32 %v1829_v11, %v8789_v53  ;;  %v1836_v29 = vsub.f32 %v1828_v2, %v8792_v33 }
 0xaad   :  { %1866 = vrot.lane.b32.xlu1 %v8855_v51, %s7033_s6  ;;  %1864 = vrot.lane.b32.xlu0 %v8858_v25, %s7033_s6  ;;  %v1799_v63 = vpop.permute.xlu1 %1798  ;;  %v1797_v60 = vpop.permute.xlu0 %1796 }
 0xaae   :  { %v8868_v42 = vadd.f32 8.0, %v1837_v39  ;;  %v8870_v1 = vadd.f32 8.0, %v1836_v29  ;;  %v1831_v57 = vmul.f32 %v1823_v48, %v1799_v63  ;;  %v1830_v36 = vmul.f32 %v1822_v28, %v1797_v60 }
 0xaaf   :  { %v8873_v9 = vadd.f32 %v1851_v26, %v8773_v61  ;;  %v8876_v52 = vadd.f32 %v1850_v0, %v8776_v41 }
 0xab0   :  { %v1853_v37 = vmul.f32 0.025, %v8868_v42  ;;  %v1852_v22 = vmul.f32 0.025, %v8870_v1  ;;  %v1839_v14 = vsub.f32 %v1831_v57, %v8799_v38  ;;  %v1838_v44 = vsub.f32 %v1830_v36, %v8802_v18 }
 0xab1   :  { %1870 = vrot.lane.b32.xlu1 %v8873_v9, %s7033_s6  ;;  %1868 = vrot.lane.b32.xlu0 %v8876_v52, %s7033_s6 }
 0xab2   :  { %v8886_v56 = vadd.f32 8.0, %v1839_v14  ;;  %v8888_v5 = vadd.f32 8.0, %v1838_v44  ;;  %v8891_v62 = vadd.f32 %v1853_v37, %v8789_v53  ;;  %v8894_v4 = vadd.f32 %v1852_v22, %v8792_v33 }
 0xab4   :  { %v1855_v17 = vmul.f32 0.025, %v8886_v56  ;;  %v1854_v30 = vmul.f32 0.025, %v8888_v5 }
 0xab5   :  { %1874 = vrot.lane.b32.xlu1 %v8891_v62, %s7033_s6  ;;  %1872 = vrot.lane.b32.xlu0 %v8894_v4, %s7033_s6 }
 0xab6   :  { %v8903_v34 = vadd.f32 %v1855_v17, %v8799_v38  ;;  %v8906_v15 = vadd.f32 %v1854_v30, %v8802_v18 }
 0xab9   :  { %1878 = vrot.lane.b32.xlu1 %v8903_v34, %s7033_s6  ;;  %1876 = vrot.lane.b32.xlu0 %v8906_v15, %s7033_s6 }
 0xabd   :  { %1898 = vrot.lane.b32.xlu1 %v8855_v51, %s7034_s1  ;;  %1896 = vrot.lane.b32.xlu0 %v8858_v25, %s7034_s1 }
 0xac1   :  { %1902 = vrot.lane.b32.xlu1 %v8873_v9, %s7034_s1  ;;  %1900 = vrot.lane.b32.xlu0 %v8876_v52, %s7034_s1 }
 0xac5   :  { %1906 = vrot.lane.b32.xlu1 %v8891_v62, %s7034_s1  ;;  %1904 = vrot.lane.b32.xlu0 %v8894_v4, %s7034_s1 }
 0xac9   :  { %1910 = vrot.lane.b32.xlu1 %v8903_v34, %s7034_s1  ;;  %1908 = vrot.lane.b32.xlu0 %v8906_v15, %s7034_s1 }
 0xacd   :  { %1882 = vrot.lane.b32.xlu1 %v8855_v51, %s7035_s7  ;;  %1880 = vrot.lane.b32.xlu0 %v8858_v25, %s7035_s7 }
 0xad1   :  { %1886 = vrot.lane.b32.xlu1 %v8873_v9, %s7035_s7  ;;  %1884 = vrot.lane.b32.xlu0 %v8876_v52, %s7035_s7 }
 0xad5   :  { %1890 = vrot.lane.b32.xlu1 %v8891_v62, %s7035_s7  ;;  %1888 = vrot.lane.b32.xlu0 %v8894_v4, %s7035_s7 }
 0xad9   :  { %1894 = vrot.lane.b32.xlu1 %v8903_v34, %s7035_s7  ;;  %1892 = vrot.lane.b32.xlu0 %v8906_v15, %s7035_s7 }
 0xb1f   :  { %v1867_v7 = vpop.permute.xlu1 %1866  ;;  %v1865_v10 = vpop.permute.xlu0 %1864 }
 0xb23   :  { %v1871_v20 = vpop.permute.xlu1 %1870  ;;  %v1869_v47 = vpop.permute.xlu0 %1868 }
 0xb27   :  { %v1875_v55 = vpop.permute.xlu1 %1874  ;;  %v1873_v58 = vpop.permute.xlu0 %1872 }
 0xb2b   :  { %v1879_v45 = vpop.permute.xlu1 %1878  ;;  %v1877_v32 = vpop.permute.xlu0 %1876 }
 0xb2f   :  { %v1899_v21 = vpop.permute.xlu1 %1898  ;;  %v1897_v59 = vpop.permute.xlu0 %1896 }
 0xb30   :  { %v1913_v13 = vsub.f32 %v1867_v7, %v1899_v21  ;;  %v1912_v27 = vsub.f32 %v1865_v10, %v1897_v59 }
 0xb33   :  { %v1903_v54 = vpop.permute.xlu1 %1902  ;;  %v1901_v43 = vpop.permute.xlu0 %1900 }
 0xb34   :  { %v1915_v11 = vsub.f32 %v1871_v20, %v1903_v54  ;;  %v1914_v2 = vsub.f32 %v1869_v47, %v1901_v43 }
 0xb37   :  { %v1907_v6 = vpop.permute.xlu1 %1906  ;;  %v1905_v24 = vpop.permute.xlu0 %1904 }
 0xb38   :  { %v1917_v57 = vsub.f32 %v1875_v55, %v1907_v6  ;;  %v1916_v36 = vsub.f32 %v1873_v58, %v1905_v24 }
 0xb3b   :  { %v1911_v40 = vpop.permute.xlu1 %1910  ;;  %v1909_v31 = vpop.permute.xlu0 %1908 }
 0xb3c   :  { %v1919_v55 = vsub.f32 %v1879_v45, %v1911_v40  ;;  %v1918_v58 = vsub.f32 %v1877_v32, %v1909_v31 }
 0xb3f   :  { %v1883_v35 = vpop.permute.xlu1 %1882  ;;  %v1881_v50 = vpop.permute.xlu0 %1880 }
 0xb40   :  { %v1921_v23 = vmul.f32 %v1913_v13, %v1883_v35  ;;  %v1920_v8 = vmul.f32 %v1912_v27, %v1881_v50 }
 0xb42   :  { %v1929_v48 = vsub.f32 %v1921_v23, %v8855_v51  ;;  %v1928_v28 = vsub.f32 %v1920_v8, %v8858_v25 }
 0xb43   :  { %v1887_v26 = vpop.permute.xlu1 %1886  ;;  %v1885_v0 = vpop.permute.xlu0 %1884 }
 0xb44   :  { %v8946_v39 = vadd.f32 8.0, %v1929_v48  ;;  %v8948_v29 = vadd.f32 8.0, %v1928_v28  ;;  %v1923_v63 = vmul.f32 %v1915_v11, %v1887_v26  ;;  %v1922_v60 = vmul.f32 %v1914_v2, %v1885_v0 }
 0xb46   :  { %v1961_v37 = vmul.f32 0.025, %v8946_v39  ;;  %v1960_v22 = vmul.f32 0.025, %v8948_v29  ;;  %v1931_v14 = vsub.f32 %v1923_v63, %v8873_v9  ;;  %v1930_v51 = vsub.f32 %v1922_v60, %v8876_v52 }
 0xb47   :  { %v1891_v44 = vpop.permute.xlu1 %1890  ;;  %v1889_v25 = vpop.permute.xlu0 %1888 }
 0xb48   :  { %v1925_v17 = vmul.f32 %v1917_v57, %v1891_v44  ;;  %v1924_v30 = vmul.f32 %v1916_v36, %v1889_v25  ;;  %v8954_v7 = vadd.f32 8.0, %v1931_v14  ;;  %v8956_v10 = vadd.f32 8.0, %v1930_v51 }
 0xb49   :  { %v8959_v20 = vadd.f32 %v1961_v37, %v8759_v3  ;;  %v8962_v47 = vadd.f32 %v1960_v22, %v8762_v19 }
 0xb4a   :  { %v1933_v9 = vsub.f32 %v1925_v17, %v8891_v62  ;;  %v1932_v52 = vsub.f32 %v1924_v30, %v8894_v4  ;;  %v1963_v21 = vmul.f32 0.025, %v8954_v7  ;;  %v1962_v59 = vmul.f32 0.025, %v8956_v10 }
 0xb4b   :  { %1978 = vrot.lane.b32.xlu1 %v8959_v20, %s7033_s6  ;;  %1976 = vrot.lane.b32.xlu0 %v8962_v47, %s7033_s6  ;;  %v1895_v54 = vpop.permute.xlu1 %1894  ;;  %v1893_v43 = vpop.permute.xlu0 %1892 }
 0xb4c   :  { %v8972_v6 = vadd.f32 8.0, %v1933_v9  ;;  %v8974_v45 = vadd.f32 8.0, %v1932_v52  ;;  %v1927_v32 = vmul.f32 %v1919_v55, %v1895_v54  ;;  %v1926_v62 = vmul.f32 %v1918_v58, %v1893_v43 }
 0xb4d   :  { %v8977_v4 = vadd.f32 %v1963_v21, %v8773_v61  ;;  %v8980_v24 = vadd.f32 %v1962_v59, %v8776_v41  ;;  %v1945_v9 = vmul.f32 2.0, %v8946_v39  ;;  %v1944_v52 = vmul.f32 2.0, %v8948_v29 }
 0xb4e   :  { %v1965_v40 = vmul.f32 0.025, %v8972_v6  ;;  %v1964_v31 = vmul.f32 0.025, %v8974_v45  ;;  %v1935_v13 = vsub.f32 %v1927_v32, %v8903_v34  ;;  %v1934_v27 = vsub.f32 %v1926_v62, %v8906_v15 }
 0xb4f   :  { %1982 = vrot.lane.b32.xlu1 %v8977_v4, %s7033_s6  ;;  %1980 = vrot.lane.b32.xlu0 %v8980_v24, %s7033_s6  ;;  %v1947_v21 = vmul.f32 2.0, %v8954_v7  ;;  %v1946_v59 = vmul.f32 2.0, %v8956_v10  ;;  %v1953_v29 = vadd.f32 %v1945_v9, %v8842_v49  ;;  %v1952_v7 = vadd.f32 %v1944_v52, %v8844_v16 }
 0xb50   :  { %v8991_v35 = vadd.f32 %v1965_v40, %v8789_v53  ;;  %v8994_v50 = vadd.f32 %v1964_v31, %v8792_v33  ;;  %v8996_v23 = vadd.f32 8.0, %v1935_v13  ;;  %v8998_v8 = vadd.f32 8.0, %v1934_v27 }
 0xb51   :  { %v1949_v40 = vmul.f32 2.0, %v8972_v6  ;;  %v1948_v31 = vmul.f32 2.0, %v8974_v45  ;;  %v1955_v10 = vadd.f32 %v1947_v21, %v8850_v12 }
 0xb52   :  { %v1967_v34 = vmul.f32 0.025, %v8996_v23  ;;  %v1966_v15 = vmul.f32 0.025, %v8998_v8  ;;  %v1951_v12 = vmul.f32 2.0, %v8996_v23 }
 0xb53   :  { %1986 = vrot.lane.b32.xlu1 %v8991_v35, %s7033_s6  ;;  %1984 = vrot.lane.b32.xlu0 %v8994_v50, %s7033_s6 }
 0xb54   :  { %v9007_v11 = vadd.f32 %v1967_v34, %v8799_v38  ;;  %v9010_v2 = vadd.f32 %v1966_v15, %v8802_v18  ;;  %v1954_v15 = vadd.f32 %v1946_v59, %v8852_v46 }
 0xb57   :  { %1990 = vrot.lane.b32.xlu1 %v9007_v11, %s7033_s6  ;;  %1988 = vrot.lane.b32.xlu0 %v9010_v2, %s7033_s6 }
 0xb5b   :  { %2010 = vrot.lane.b32.xlu1 %v8959_v20, %s7034_s1  ;;  %2008 = vrot.lane.b32.xlu0 %v8962_v47, %s7034_s1 }
 0xb5f   :  { %2014 = vrot.lane.b32.xlu1 %v8977_v4, %s7034_s1  ;;  %2012 = vrot.lane.b32.xlu0 %v8980_v24, %s7034_s1 }
 0xb63   :  { %2018 = vrot.lane.b32.xlu1 %v8991_v35, %s7034_s1  ;;  %2016 = vrot.lane.b32.xlu0 %v8994_v50, %s7034_s1 }
 0xb67   :  { %2022 = vrot.lane.b32.xlu1 %v9007_v11, %s7034_s1  ;;  %2020 = vrot.lane.b32.xlu0 %v9010_v2, %s7034_s1 }
 0xb6b   :  { %1994 = vrot.lane.b32.xlu1 %v8959_v20, %s7035_s7  ;;  %1992 = vrot.lane.b32.xlu0 %v8962_v47, %s7035_s7 }
 0xb6f   :  { %1998 = vrot.lane.b32.xlu1 %v8977_v4, %s7035_s7  ;;  %1996 = vrot.lane.b32.xlu0 %v8980_v24, %s7035_s7 }
 0xb73   :  { %2002 = vrot.lane.b32.xlu1 %v8991_v35, %s7035_s7  ;;  %2000 = vrot.lane.b32.xlu0 %v8994_v50, %s7035_s7 }
 0xb77   :  { %2006 = vrot.lane.b32.xlu1 %v9007_v11, %s7035_s7  ;;  %2004 = vrot.lane.b32.xlu0 %v9010_v2, %s7035_s7 }
 0xbbd   :  { %v1979_v48 = vpop.permute.xlu1 %1978  ;;  %v1977_v28 = vpop.permute.xlu0 %1976 }
 0xbc1   :  { %v1983_v26 = vpop.permute.xlu1 %1982  ;;  %v1981_v0 = vpop.permute.xlu0 %1980 }
 0xbc5   :  { %v1987_v63 = vpop.permute.xlu1 %1986  ;;  %v1985_v60 = vpop.permute.xlu0 %1984 }
 0xbc9   :  { %v9048_v57 = vpop.permute.xlu1 %1990  ;;  %v9050_v36 = vpop.permute.xlu0 %1988 }
 0xbcd   :  { %v2011_v37 = vpop.permute.xlu1 %2010  ;;  %v2009_v22 = vpop.permute.xlu0 %2008 }
 0xbce   :  { %v2025_v55 = vsub.f32 %v1979_v48, %v2011_v37  ;;  %v2024_v58 = vsub.f32 %v1977_v28, %v2009_v22 }
 0xbd1   :  { %v2015_v14 = vpop.permute.xlu1 %2014  ;;  %v2013_v51 = vpop.permute.xlu0 %2012 }
 0xbd2   :  { %v2027_v13 = vsub.f32 %v1983_v26, %v2015_v14  ;;  %v2026_v27 = vsub.f32 %v1981_v0, %v2013_v51  ;;  %v1957_v26 = vadd.f32 %v1949_v40, %v8868_v42 }
 0xbd5   :  { %v2019_v44 = vpop.permute.xlu1 %2018  ;;  %v2017_v25 = vpop.permute.xlu0 %2016 }
 0xbd6   :  { %v2029_v0 = vsub.f32 %v1987_v63, %v2019_v44 }
 0xbd9   :  { %v9052_v17 = vpop.permute.xlu1 %2022  ;;  %v9054_v30 = vpop.permute.xlu0 %2020 }
 0xbda   :  { %v2031_v46 = vsub.f32 %v9048_v57, %v9052_v17 }
 0xbdd   :  { %v1995_v54 = vpop.permute.xlu1 %1994  ;;  %v1993_v43 = vpop.permute.xlu0 %1992 }
 0xbde   :  { %v2033_v32 = vmul.f32 %v2025_v55, %v1995_v54  ;;  %v2032_v62 = vmul.f32 %v2024_v58, %v1993_v43 }
 0xbe0   :  { %v2041_v34 = vsub.f32 %v2033_v32, %v8959_v20  ;;  %v2040_v39 = vsub.f32 %v2032_v62, %v8962_v47  ;;  %v1956_v20 = vadd.f32 %v1948_v31, %v8870_v1  ;;  %v2028_v47 = vsub.f32 %v1985_v60, %v2017_v25 }
 0xbe1   :  { %v1999_v48 = vpop.permute.xlu1 %1998  ;;  %v1997_v28 = vpop.permute.xlu0 %1996 }
 0xbe2   :  { %v2049_v37 = vadd.f32 8.0, %v2041_v34  ;;  %v2048_v6 = vadd.f32 8.0, %v2040_v39  ;;  %v2035_v22 = vmul.f32 %v2027_v13, %v1999_v48  ;;  %v2034_v45 = vmul.f32 %v2026_v27, %v1997_v28 }
 0xbe4   :  { %v2057_v14 = vmul.f32 2.0, %v2049_v37  ;;  %v2073_v49 = vmul.f32 0.05, %v2049_v37  ;;  %v2056_v51 = vmul.f32 2.0, %v2048_v6  ;;  %v2072_v16 = vmul.f32 0.05, %v2048_v6 }
 0xbe5   :  { %v2043_v55 = vsub.f32 %v2035_v22, %v8977_v4  ;;  %v2042_v58 = vsub.f32 %v2034_v45, %v8980_v24  ;;  %v2003_v9 = vpop.permute.xlu1 %2002  ;;  %v2001_v52 = vpop.permute.xlu0 %2000  ;;  %v1950_v4 = vmul.f32 2.0, %v8998_v8  ;;  %v2030_v24 = vsub.f32 %v9050_v36, %v9054_v30 }
 0xbe6   :  { %v2037_v42 = vmul.f32 %v2029_v0, %v2003_v9  ;;  %v2036_v21 = vmul.f32 %v2028_v47, %v2001_v52  ;;  %v9076_v1 = vadd.f32 %v2073_v49, %v8759_v3  ;;  %v9079_v63 = vadd.f32 %v2072_v16, %v8762_v19 }
 0xbe7   :  { %v2051_v60 = vadd.f32 8.0, %v2043_v55  ;;  %v2050_v44 = vadd.f32 8.0, %v2042_v58  ;;  %v9081_v23 = vadd.f32 %v2057_v14, %v1953_v29  ;;  %v9083_v25 = vadd.f32 %v2056_v51, %v1952_v7 }
 0xbe8   :  { %v2045_v57 = vsub.f32 %v2037_v42, %v8991_v35  ;;  %v2044_v17 = vsub.f32 %v2036_v21, %v8994_v50  ;;  %2090 = vrot.lane.b32.xlu1 %v9076_v1, %s7033_s6  ;;  %2088 = vrot.lane.b32.xlu0 %v9079_v63, %s7033_s6  ;;  %v1958_v45 = vadd.f32 %v1950_v4, %v8888_v5 }
 0xbe9   :  { %v2059_v59 = vmul.f32 2.0, %v2051_v60  ;;  %v2075_v54 = vmul.f32 0.05, %v2051_v60  ;;  %v2058_v43 = vmul.f32 2.0, %v2050_v44  ;;  %v2074_v32 = vmul.f32 0.05, %v2050_v44  ;;  %v2007_v62 = vpop.permute.xlu1 %2006  ;;  %v2005_v40 = vpop.permute.xlu0 %2004 }
 0xbea   :  { %v2053_v8 = vadd.f32 8.0, %v2045_v57  ;;  %v2052_v31 = vadd.f32 8.0, %v2044_v17  ;;  %v2039_v13 = vmul.f32 %v2031_v46, %v2007_v62  ;;  %v2038_v36 = vmul.f32 %v2030_v24, %v2005_v40 }
 0xbeb   :  { %v9095_v35 = vadd.f32 %v2075_v54, %v8773_v61  ;;  %v9098_v50 = vadd.f32 %v2074_v32, %v8776_v41  ;;  %v9100_v30 = vadd.f32 %v2059_v59, %v1955_v10  ;;  %v9102_v27 = vadd.f32 %v2058_v43, %v1954_v15 }
 0xbec   :  { %v2061_v34 = vmul.f32 2.0, %v2053_v8  ;;  %v2077_v39 = vmul.f32 0.05, %v2053_v8  ;;  %v2060_v29 = vmul.f32 2.0, %v2052_v31  ;;  %v2076_v7 = vmul.f32 0.05, %v2052_v31 }
 0xbed   :  { %v2047_v48 = vsub.f32 %v2039_v13, %v9007_v11  ;;  %v2046_v28 = vsub.f32 %v2038_v36, %v9010_v2  ;;  %2094 = vrot.lane.b32.xlu1 %v9095_v35, %s7033_s6  ;;  %2092 = vrot.lane.b32.xlu0 %v9098_v50, %s7033_s6  ;;  %v1959_v2 = vadd.f32 %v1951_v12, %v8886_v56 }
 0xbee   :  { %v9111_v37 = vadd.f32 %v2077_v39, %v8789_v53  ;;  %v9114_v10 = vadd.f32 %v2076_v7, %v8792_v33  ;;  %v9116_v15 = vadd.f32 %v2061_v34, %v1957_v26  ;;  %v9118_v6 = vadd.f32 %v2060_v29, %v1956_v20 }
 0xbef   :  { %v2055_v22 = vadd.f32 8.0, %v2047_v48  ;;  %v2054_v11 = vadd.f32 8.0, %v2046_v28 }
 0xbf1   :  { %v2063_v0 = vmul.f32 2.0, %v2055_v22  ;;  %v2079_v47 = vmul.f32 0.05, %v2055_v22  ;;  %v2062_v14 = vmul.f32 2.0, %v2054_v11  ;;  %v2078_v49 = vmul.f32 0.05, %v2054_v11  ;;  %2098 = vrot.lane.b32.xlu1 %v9111_v37, %s7033_s6  ;;  %2096 = vrot.lane.b32.xlu0 %v9114_v10, %s7033_s6 }
 0xbf3   :  { %v9127_v26 = vadd.f32 %v2079_v47, %v8799_v38  ;;  %v9130_v20 = vadd.f32 %v2078_v49, %v8802_v18  ;;  %v9132_v51 = vadd.f32 %v2063_v0, %v1959_v2  ;;  %v9134_v56 = vadd.f32 %v2062_v14, %v1958_v45 }
 0xbf5   :  { %2102 = vrot.lane.b32.xlu1 %v9127_v26, %s7033_s6  ;;  %2100 = vrot.lane.b32.xlu0 %v9130_v20, %s7033_s6 }
 0xbf9   :  { %2122 = vrot.lane.b32.xlu1 %v9076_v1, %s7034_s1  ;;  %2120 = vrot.lane.b32.xlu0 %v9079_v63, %s7034_s1 }
 0xbfd   :  { %2126 = vrot.lane.b32.xlu1 %v9095_v35, %s7034_s1  ;;  %2124 = vrot.lane.b32.xlu0 %v9098_v50, %s7034_s1 }
 0xc01   :  { %2130 = vrot.lane.b32.xlu1 %v9111_v37, %s7034_s1  ;;  %2128 = vrot.lane.b32.xlu0 %v9114_v10, %s7034_s1 }
 0xc05   :  { %2134 = vrot.lane.b32.xlu1 %v9127_v26, %s7034_s1  ;;  %2132 = vrot.lane.b32.xlu0 %v9130_v20, %s7034_s1 }
 0xc09   :  { %2106 = vrot.lane.b32.xlu1 %v9076_v1, %s7035_s7  ;;  %2104 = vrot.lane.b32.xlu0 %v9079_v63, %s7035_s7 }
 0xc0d   :  { %2110 = vrot.lane.b32.xlu1 %v9095_v35, %s7035_s7  ;;  %2108 = vrot.lane.b32.xlu0 %v9098_v50, %s7035_s7 }
 0xc11   :  { %2114 = vrot.lane.b32.xlu1 %v9111_v37, %s7035_s7  ;;  %2112 = vrot.lane.b32.xlu0 %v9114_v10, %s7035_s7 }
 0xc15   :  { %2118 = vrot.lane.b32.xlu1 %v9127_v26, %s7035_s7  ;;  %2116 = vrot.lane.b32.xlu0 %v9130_v20, %s7035_s7 }
 0xc5a   :  { %v2091_v5 = vpop.permute.xlu1 %2090  ;;  %v2089_v16 = vpop.permute.xlu0 %2088 }
 0xc5f   :  { %v2095_v12 = vpop.permute.xlu1 %2094  ;;  %v2093_v46 = vpop.permute.xlu0 %2092 }
 0xc63   :  { %v2099_v55 = vpop.permute.xlu1 %2098  ;;  %v2097_v58 = vpop.permute.xlu0 %2096 }
 0xc67   :  { %v9172_v9 = vpop.permute.xlu1 %2102  ;;  %v9174_v52 = vpop.permute.xlu0 %2100 }
 0xc6b   :  { %v2123_v42 = vpop.permute.xlu1 %2122  ;;  %v2121_v21 = vpop.permute.xlu0 %2120 }
 0xc6c   :  { %v2137_v59 = vsub.f32 %v2091_v5, %v2123_v42  ;;  %v2136_v54 = vsub.f32 %v2089_v16, %v2121_v21 }
 0xc6f   :  { %v2127_v60 = vpop.permute.xlu1 %2126  ;;  %v2125_v44 = vpop.permute.xlu0 %2124 }
 0xc70   :  { %v2139_v8 = vsub.f32 %v2095_v12, %v2127_v60  ;;  %v2138_v31 = vsub.f32 %v2093_v46, %v2125_v44  ;;  %v2193_v12 = vld [vmem:[#allocation5 + $0x8] sm:$0xff]  ;;  %v2192_v46 = vld [vmem:[#allocation5] sm:$0xff] }
 0xc73   :  { %v2131_v4 = vpop.permute.xlu1 %2130  ;;  %v2129_v24 = vpop.permute.xlu0 %2128 }
 0xc74   :  { %v2141_v0 = vsub.f32 %v2099_v55, %v2131_v4  ;;  %v2140_v47 = vsub.f32 %v2097_v58, %v2129_v24 }
 0xc77   :  { %v2135_v57 = vpop.permute.xlu1 %2134  ;;  %v2133_v17 = vpop.permute.xlu0 %2132 }
 0xc78   :  { %v2143_v55 = vsub.f32 %v9172_v9, %v2135_v57  ;;  %v2142_v58 = vsub.f32 %v9174_v52, %v2133_v17 }
 0xc7b   :  { %v2107_v43 = vpop.permute.xlu1 %2106  ;;  %v2105_v32 = vpop.permute.xlu0 %2104 }
 0xc7c   :  { %v2145_v62 = vmul.f32 %v2137_v59, %v2107_v43  ;;  %v2144_v40 = vmul.f32 %v2136_v54, %v2105_v32 }
 0xc7e   :  { %v2153_v13 = vsub.f32 %v2145_v62, %v9076_v1  ;;  %v2152_v36 = vsub.f32 %v2144_v40, %v9079_v63 }
 0xc7f   :  { %v2111_v34 = vpop.permute.xlu1 %2110  ;;  %v2109_v39 = vpop.permute.xlu0 %2108 }
 0xc80   :  { %v2161_v29 = vadd.f32 8.0, %v2153_v13  ;;  %v2160_v7 = vadd.f32 8.0, %v2152_v36  ;;  %v2147_v48 = vmul.f32 %v2139_v8, %v2111_v34  ;;  %v2146_v28 = vmul.f32 %v2138_v31, %v2109_v39 }
 0xc82   :  { %v2169_v22 = vadd.f32 %v2161_v29, %v9081_v23  ;;  %v2168_v11 = vadd.f32 %v2160_v7, %v9083_v25  ;;  %v2155_v2 = vsub.f32 %v2147_v48, %v9095_v35  ;;  %v2154_v45 = vsub.f32 %v2146_v28, %v9098_v50 }
 0xc83   :  { %v2115_v14 = vpop.permute.xlu1 %2114  ;;  %v2113_v1 = vpop.permute.xlu0 %2112 }
 0xc84   :  { %v2177_v49 = vmul.f32 0.008333334, %v2169_v22  ;;  %v2176_v63 = vmul.f32 0.008333334, %v2168_v11  ;;  %v2163_v5 = vadd.f32 8.0, %v2155_v2  ;;  %v2162_v16 = vadd.f32 8.0, %v2154_v45 }
 0xc85   :  { %v2149_v42 = vmul.f32 %v2141_v0, %v2115_v14  ;;  %v2148_v21 = vmul.f32 %v2140_v47, %v2113_v1  ;;  %v2198_v22 = vld [vmem:[#allocation5 + $0x30] sm:$0xff] }
 0xc86   :  { %v9183_v23 = vadd.f32 %v2177_v49, %v8759_v3  ;;  %v9186_v25 = vadd.f32 %v2176_v63, %v8762_v19  ;;  %v2171_v35 = vadd.f32 %v2163_v5, %v9100_v30  ;;  %v2170_v50 = vadd.f32 %v2162_v16, %v9102_v27  ;;  %v2195_v30 = vld [vmem:[#allocation5 + $0x18] sm:$0xff]  ;;  %v2194_v27 = vld [vmem:[#allocation5 + $0x10] sm:$0xff] }
 0xc87   :  { %v2157_v60 = vsub.f32 %v2149_v42, %v9111_v37  ;;  %v2156_v44 = vsub.f32 %v2148_v21, %v9114_v10  ;;  %v2119_v4 = vpop.permute.xlu1 %2118  ;;  %v2117_v24 = vpop.permute.xlu0 %2116 }
 0xc88   :  { %v2201_v3 = vmul.f32 %v2193_v12, %v9183_v23  ;;  %v2200_v59 = vmul.f32 %v2192_v46, %v9186_v25  ;;  %v2179_v19 = vmul.f32 0.008333334, %v2171_v35  ;;  %v2178_v54 = vmul.f32 0.008333334, %v2170_v50  ;;  %2219 = vrot.lane.b32.xlu1 %v9183_v23, %s7033_s6  ;;  %2217 = vrot.lane.b32.xlu0 %v9186_v25, %s7033_s6 }
 0xc89   :  { %v2165_v9 = vadd.f32 8.0, %v2157_v60  ;;  %v2164_v37 = vadd.f32 8.0, %v2156_v44  ;;  %v2151_v52 = vmul.f32 %v2143_v55, %v2119_v4  ;;  %v2150_v10 = vmul.f32 %v2142_v58, %v2117_v24 }
 0xc8a   :  { %2210 = vst [vmem:[#allocation7 + $0x48] sm:$0xff] %v2201_v3  ;;  %2209 = vst [vmem:[#allocation7 + $0x40] sm:$0xff] %v2200_v59  ;;  %v9201_v57 = vadd.f32 %v2179_v19, %v8773_v61  ;;  %v9204_v17 = vadd.f32 %v2178_v54, %v8776_v41 }
 0xc8b   :  { %v2173_v43 = vadd.f32 %v2165_v9, %v9116_v15  ;;  %v2172_v32 = vadd.f32 %v2164_v37, %v9118_v6  ;;  %v2159_v62 = vsub.f32 %v2151_v52, %v9127_v26  ;;  %v2158_v40 = vsub.f32 %v2150_v10, %v9130_v20  ;;  %v2197_v6 = vld [vmem:[#allocation5 + $0x28] sm:$0xff]  ;;  %v2196_v26 = vld [vmem:[#allocation5 + $0x20] sm:$0xff] }
 0xc8c   :  { %v2203_v8 = vmul.f32 %v2195_v30, %v9201_v57  ;;  %v2202_v31 = vmul.f32 %v2194_v27, %v9204_v17  ;;  %2223 = vrot.lane.b32.xlu1 %v9201_v57, %s7033_s6  ;;  %2221 = vrot.lane.b32.xlu0 %v9204_v17, %s7033_s6 }
 0xc8d   :  { %v2181_v61 = vmul.f32 0.008333334, %v2173_v43  ;;  %v2180_v41 = vmul.f32 0.008333334, %v2172_v32  ;;  %v2167_v13 = vadd.f32 8.0, %v2159_v62  ;;  %v2166_v15 = vadd.f32 8.0, %v2158_v40 }
 0xc8e   :  { %2212 = vst [vmem:[#allocation7 + $0x58] sm:$0xff] %v2203_v8  ;;  %2211 = vst [vmem:[#allocation7 + $0x50] sm:$0xff] %v2202_v31 }
 0xc8f   :  { %v9217_v20 = vadd.f32 %v2181_v61, %v8789_v53  ;;  %v9220_v36 = vadd.f32 %v2180_v41, %v8792_v33  ;;  %v2175_v34 = vadd.f32 %v2167_v13, %v9132_v51  ;;  %v2174_v39 = vadd.f32 %v2166_v15, %v9134_v56  ;;  %v2199_v53 = vld [vmem:[#allocation5 + $0x38] sm:$0xff] }
 0xc91   :  { %v2205_v29 = vmul.f32 %v2197_v6, %v9217_v20  ;;  %v2204_v7 = vmul.f32 %v2196_v26, %v9220_v36  ;;  %v2183_v48 = vmul.f32 0.008333334, %v2175_v34  ;;  %v2182_v28 = vmul.f32 0.008333334, %v2174_v39  ;;  %2227 = vrot.lane.b32.xlu1 %v9217_v20, %s7033_s6  ;;  %2225 = vrot.lane.b32.xlu0 %v9220_v36, %s7033_s6 }
 0xc93   :  { %2214 = vst [vmem:[#allocation7 + $0x68] sm:$0xff] %v2205_v29  ;;  %2213 = vst [vmem:[#allocation7 + $0x60] sm:$0xff] %v2204_v7  ;;  %v9231_v33 = vadd.f32 %v2183_v48, %v8799_v38  ;;  %v9234_v51 = vadd.f32 %v2182_v28, %v8802_v18 }
 0xc95   :  { %v2207_v56 = vmul.f32 %v2199_v53, %v9231_v33  ;;  %v2206_v11 = vmul.f32 %v2198_v22, %v9234_v51  ;;  %2231 = vrot.lane.b32.xlu1 %v9231_v33, %s7033_s6  ;;  %2229 = vrot.lane.b32.xlu0 %v9234_v51, %s7033_s6 }
 0xc97   :  { %2216 = vst [vmem:[#allocation7 + $0x78] sm:$0xff] %v2207_v56  ;;  %2215 = vst [vmem:[#allocation7 + $0x70] sm:$0xff] %v2206_v11 }
 0xc99   :  { %2251 = vrot.lane.b32.xlu1 %v9183_v23, %s7034_s1  ;;  %2249 = vrot.lane.b32.xlu0 %v9186_v25, %s7034_s1 }
 0xc9d   :  { %2255 = vrot.lane.b32.xlu1 %v9201_v57, %s7034_s1  ;;  %2253 = vrot.lane.b32.xlu0 %v9204_v17, %s7034_s1 }
 0xca1   :  { %2259 = vrot.lane.b32.xlu1 %v9217_v20, %s7034_s1  ;;  %2257 = vrot.lane.b32.xlu0 %v9220_v36, %s7034_s1 }
 0xca5   :  { %2263 = vrot.lane.b32.xlu1 %v9231_v33, %s7034_s1  ;;  %2261 = vrot.lane.b32.xlu0 %v9234_v51, %s7034_s1 }
 0xca9   :  { %2235 = vrot.lane.b32.xlu1 %v9183_v23, %s7035_s7  ;;  %2233 = vrot.lane.b32.xlu0 %v9186_v25, %s7035_s7 }
 0xcad   :  { %2239 = vrot.lane.b32.xlu1 %v9201_v57, %s7035_s7  ;;  %2237 = vrot.lane.b32.xlu0 %v9204_v17, %s7035_s7 }
 0xcb1   :  { %2243 = vrot.lane.b32.xlu1 %v9217_v20, %s7035_s7  ;;  %2241 = vrot.lane.b32.xlu0 %v9220_v36, %s7035_s7 }
 0xcb5   :  { %2247 = vrot.lane.b32.xlu1 %v9231_v33, %s7035_s7  ;;  %2245 = vrot.lane.b32.xlu0 %v9234_v51, %s7035_s7 }
 0xcfa   :  { %v2220_v38 = vpop.permute.xlu1 %2219  ;;  %v2218_v18 = vpop.permute.xlu0 %2217 }
 0xcfe   :  { %v2224_v2 = vpop.permute.xlu1 %2223  ;;  %v2222_v45 = vpop.permute.xlu0 %2221 }
 0xd03   :  { %v2228_v0 = vpop.permute.xlu1 %2227  ;;  %v2226_v47 = vpop.permute.xlu0 %2225 }
 0xd07   :  { %v2232_v14 = vpop.permute.xlu1 %2231  ;;  %v2230_v1 = vpop.permute.xlu0 %2229 }
 0xd0b   :  { %v2252_v49 = vpop.permute.xlu1 %2251  ;;  %v2250_v63 = vpop.permute.xlu0 %2249 }
 0xd0c   :  { %v2266_v35 = vsub.f32 %v2220_v38, %v2252_v49  ;;  %v2265_v50 = vsub.f32 %v2218_v18, %v2250_v63 }
 0xd0f   :  { %v2256_v5 = vpop.permute.xlu1 %2255  ;;  %v2254_v16 = vpop.permute.xlu0 %2253 }
 0xd10   :  { %v2268_v4 = vsub.f32 %v2224_v2, %v2256_v5  ;;  %v2267_v24 = vsub.f32 %v2222_v45, %v2254_v16 }
 0xd13   :  { %v2260_v12 = vpop.permute.xlu1 %2259  ;;  %v2258_v46 = vpop.permute.xlu0 %2257 }
 0xd14   :  { %v2270_v52 = vsub.f32 %v2228_v0, %v2260_v12  ;;  %v2269_v10 = vsub.f32 %v2226_v47, %v2258_v46 }
 0xd17   :  { %v2264_v42 = vpop.permute.xlu1 %2263  ;;  %v2262_v21 = vpop.permute.xlu0 %2261 }
 0xd18   :  { %v2272_v6 = vsub.f32 %v2232_v14, %v2264_v42  ;;  %v2271_v26 = vsub.f32 %v2230_v1, %v2262_v21 }
 0xd1b   :  { %v2236_v55 = vpop.permute.xlu1 %2235  ;;  %v2234_v58 = vpop.permute.xlu0 %2233 }
 0xd1c   :  { %v2274_v60 = vmul.f32 %v2266_v35, %v2236_v55  ;;  %v2273_v44 = vmul.f32 %v2265_v50, %v2234_v58 }
 0xd1e   :  { %v2282_v3 = vsub.f32 %v2274_v60, %v9183_v23  ;;  %v2281_v59 = vsub.f32 %v2273_v44, %v9186_v25 }
 0xd1f   :  { %v2240_v19 = vpop.permute.xlu1 %2239  ;;  %v2238_v54 = vpop.permute.xlu0 %2237 }
 0xd20   :  { %v9276_v30 = vadd.f32 8.0, %v2282_v3  ;;  %v9278_v27 = vadd.f32 8.0, %v2281_v59  ;;  %v2276_v9 = vmul.f32 %v2268_v4, %v2240_v19  ;;  %v2275_v37 = vmul.f32 %v2267_v24, %v2238_v54 }
 0xd22   :  { %v2298_v43 = vmul.f32 0.025, %v9276_v30  ;;  %v2297_v32 = vmul.f32 0.025, %v9278_v27  ;;  %v2284_v62 = vsub.f32 %v2276_v9, %v9201_v57  ;;  %v2283_v40 = vsub.f32 %v2275_v37, %v9204_v17 }
 0xd23   :  { %v2244_v8 = vpop.permute.xlu1 %2243  ;;  %v2242_v31 = vpop.permute.xlu0 %2241 }
 0xd24   :  { %v9284_v61 = vadd.f32 8.0, %v2284_v62  ;;  %v9286_v41 = vadd.f32 8.0, %v2283_v40  ;;  %v2278_v13 = vmul.f32 %v2270_v52, %v2244_v8  ;;  %v2277_v15 = vmul.f32 %v2269_v10, %v2242_v31 }
 0xd25   :  { %v9289_v34 = vadd.f32 %v2298_v43, %v9183_v23  ;;  %v9292_v39 = vadd.f32 %v2297_v32, %v9186_v25 }
 0xd26   :  { %v2300_v29 = vmul.f32 0.025, %v9284_v61  ;;  %v2299_v7 = vmul.f32 0.025, %v9286_v41  ;;  %v2286_v48 = vsub.f32 %v2278_v13, %v9217_v20  ;;  %v2285_v28 = vsub.f32 %v2277_v15, %v9220_v36 }
 0xd27   :  { %2315 = vrot.lane.b32.xlu1 %v9289_v34, %s7033_s6  ;;  %2313 = vrot.lane.b32.xlu0 %v9292_v39, %s7033_s6  ;;  %v2248_v53 = vpop.permute.xlu1 %2247  ;;  %v2246_v22 = vpop.permute.xlu0 %2245 }
 0xd28   :  { %v9302_v56 = vadd.f32 8.0, %v2286_v48  ;;  %v9304_v11 = vadd.f32 8.0, %v2285_v28  ;;  %v2280_v38 = vmul.f32 %v2272_v6, %v2248_v53  ;;  %v2279_v18 = vmul.f32 %v2271_v26, %v2246_v22 }
 0xd29   :  { %v9307_v2 = vadd.f32 %v2300_v29, %v9201_v57  ;;  %v9310_v45 = vadd.f32 %v2299_v7, %v9204_v17 }
 0xd2a   :  { %v2302_v0 = vmul.f32 0.025, %v9302_v56  ;;  %v2301_v47 = vmul.f32 0.025, %v9304_v11  ;;  %v2288_v14 = vsub.f32 %v2280_v38, %v9231_v33  ;;  %v2287_v1 = vsub.f32 %v2279_v18, %v9234_v51 }
 0xd2b   :  { %2319 = vrot.lane.b32.xlu1 %v9307_v2, %s7033_s6  ;;  %2317 = vrot.lane.b32.xlu0 %v9310_v45, %s7033_s6 }
 0xd2c   :  { %v9320_v49 = vadd.f32 8.0, %v2288_v14  ;;  %v9322_v63 = vadd.f32 8.0, %v2287_v1  ;;  %v9325_v5 = vadd.f32 %v2302_v0, %v9217_v20  ;;  %v9328_v16 = vadd.f32 %v2301_v47, %v9220_v36 }
 0xd2e   :  { %v2304_v12 = vmul.f32 0.025, %v9320_v49  ;;  %v2303_v46 = vmul.f32 0.025, %v9322_v63 }
 0xd2f   :  { %2323 = vrot.lane.b32.xlu1 %v9325_v5, %s7033_s6  ;;  %2321 = vrot.lane.b32.xlu0 %v9328_v16, %s7033_s6 }
 0xd30   :  { %v9337_v42 = vadd.f32 %v2304_v12, %v9231_v33  ;;  %v9340_v21 = vadd.f32 %v2303_v46, %v9234_v51 }
 0xd33   :  { %2327 = vrot.lane.b32.xlu1 %v9337_v42, %s7033_s6  ;;  %2325 = vrot.lane.b32.xlu0 %v9340_v21, %s7033_s6 }
 0xd37   :  { %2347 = vrot.lane.b32.xlu1 %v9289_v34, %s7034_s1  ;;  %2345 = vrot.lane.b32.xlu0 %v9292_v39, %s7034_s1 }
 0xd3b   :  { %2351 = vrot.lane.b32.xlu1 %v9307_v2, %s7034_s1  ;;  %2349 = vrot.lane.b32.xlu0 %v9310_v45, %s7034_s1 }
 0xd3f   :  { %2355 = vrot.lane.b32.xlu1 %v9325_v5, %s7034_s1  ;;  %2353 = vrot.lane.b32.xlu0 %v9328_v16, %s7034_s1 }
 0xd43   :  { %2359 = vrot.lane.b32.xlu1 %v9337_v42, %s7034_s1  ;;  %2357 = vrot.lane.b32.xlu0 %v9340_v21, %s7034_s1 }
 0xd47   :  { %2331 = vrot.lane.b32.xlu1 %v9289_v34, %s7035_s7  ;;  %2329 = vrot.lane.b32.xlu0 %v9292_v39, %s7035_s7 }
 0xd4b   :  { %2335 = vrot.lane.b32.xlu1 %v9307_v2, %s7035_s7  ;;  %2333 = vrot.lane.b32.xlu0 %v9310_v45, %s7035_s7 }
 0xd4f   :  { %2339 = vrot.lane.b32.xlu1 %v9325_v5, %s7035_s7  ;;  %2337 = vrot.lane.b32.xlu0 %v9328_v16, %s7035_s7 }
 0xd53   :  { %2343 = vrot.lane.b32.xlu1 %v9337_v42, %s7035_s7  ;;  %2341 = vrot.lane.b32.xlu0 %v9340_v21, %s7035_s7 }
 0xd99   :  { %v2316_v35 = vpop.permute.xlu1 %2315  ;;  %v2314_v50 = vpop.permute.xlu0 %2313 }
 0xd9d   :  { %v2320_v55 = vpop.permute.xlu1 %2319  ;;  %v2318_v58 = vpop.permute.xlu0 %2317 }
 0xda1   :  { %v2324_v60 = vpop.permute.xlu1 %2323  ;;  %v2322_v44 = vpop.permute.xlu0 %2321 }
 0xda5   :  { %v2328_v4 = vpop.permute.xlu1 %2327  ;;  %v2326_v24 = vpop.permute.xlu0 %2325 }
 0xda9   :  { %v2348_v3 = vpop.permute.xlu1 %2347  ;;  %v2346_v59 = vpop.permute.xlu0 %2345 }
 0xdaa   :  { %v2362_v43 = vsub.f32 %v2316_v35, %v2348_v3  ;;  %v2361_v32 = vsub.f32 %v2314_v50, %v2346_v59 }
 0xdad   :  { %v2352_v19 = vpop.permute.xlu1 %2351  ;;  %v2350_v54 = vpop.permute.xlu0 %2349 }
 0xdae   :  { %v2364_v13 = vsub.f32 %v2320_v55, %v2352_v19  ;;  %v2363_v15 = vsub.f32 %v2318_v58, %v2350_v54 }
 0xdb1   :  { %v2356_v9 = vpop.permute.xlu1 %2355  ;;  %v2354_v37 = vpop.permute.xlu0 %2353 }
 0xdb2   :  { %v2366_v38 = vsub.f32 %v2324_v60, %v2356_v9  ;;  %v2365_v18 = vsub.f32 %v2322_v44, %v2354_v37 }
 0xdb5   :  { %v2360_v52 = vpop.permute.xlu1 %2359  ;;  %v2358_v10 = vpop.permute.xlu0 %2357 }
 0xdb6   :  { %v2368_v60 = vsub.f32 %v2328_v4, %v2360_v52  ;;  %v2367_v44 = vsub.f32 %v2326_v24, %v2358_v10 }
 0xdb9   :  { %v2332_v62 = vpop.permute.xlu1 %2331  ;;  %v2330_v40 = vpop.permute.xlu0 %2329 }
 0xdba   :  { %v2370_v8 = vmul.f32 %v2362_v43, %v2332_v62  ;;  %v2369_v31 = vmul.f32 %v2361_v32, %v2330_v40 }
 0xdbc   :  { %v2378_v6 = vsub.f32 %v2370_v8, %v9289_v34  ;;  %v2377_v26 = vsub.f32 %v2369_v31, %v9292_v39 }
 0xdbd   :  { %v2336_v29 = vpop.permute.xlu1 %2335  ;;  %v2334_v7 = vpop.permute.xlu0 %2333 }
 0xdbe   :  { %v9380_v48 = vadd.f32 8.0, %v2378_v6  ;;  %v9382_v28 = vadd.f32 8.0, %v2377_v26  ;;  %v2372_v53 = vmul.f32 %v2364_v13, %v2336_v29  ;;  %v2371_v22 = vmul.f32 %v2363_v15, %v2334_v7 }
 0xdc0   :  { %v2410_v0 = vmul.f32 0.025, %v9380_v48  ;;  %v2409_v47 = vmul.f32 0.025, %v9382_v28  ;;  %v2380_v14 = vsub.f32 %v2372_v53, %v9307_v2  ;;  %v2379_v34 = vsub.f32 %v2371_v22, %v9310_v45 }
 0xdc1   :  { %v2340_v1 = vpop.permute.xlu1 %2339  ;;  %v2338_v39 = vpop.permute.xlu0 %2337 }
 0xdc2   :  { %v2374_v12 = vmul.f32 %v2366_v38, %v2340_v1  ;;  %v2373_v46 = vmul.f32 %v2365_v18, %v2338_v39  ;;  %v9388_v35 = vadd.f32 8.0, %v2380_v14  ;;  %v9390_v50 = vadd.f32 8.0, %v2379_v34 }
 0xdc3   :  { %v9393_v55 = vadd.f32 %v2410_v0, %v9183_v23  ;;  %v9396_v58 = vadd.f32 %v2409_v47, %v9186_v25 }
 0xdc4   :  { %v2382_v2 = vsub.f32 %v2374_v12, %v9325_v5  ;;  %v2381_v45 = vsub.f32 %v2373_v46, %v9328_v16  ;;  %v2412_v3 = vmul.f32 0.025, %v9388_v35  ;;  %v2411_v59 = vmul.f32 0.025, %v9390_v50 }
 0xdc5   :  { %2427 = vrot.lane.b32.xlu1 %v9393_v55, %s7033_s6  ;;  %2425 = vrot.lane.b32.xlu0 %v9396_v58, %s7033_s6  ;;  %v2344_v19 = vpop.permute.xlu1 %2343  ;;  %v2342_v54 = vpop.permute.xlu0 %2341 }
 0xdc6   :  { %v9406_v9 = vadd.f32 8.0, %v2382_v2  ;;  %v9408_v4 = vadd.f32 8.0, %v2381_v45  ;;  %v2376_v24 = vmul.f32 %v2368_v60, %v2344_v19  ;;  %v2375_v5 = vmul.f32 %v2367_v44, %v2342_v54 }
 0xdc7   :  { %v9411_v16 = vadd.f32 %v2412_v3, %v9201_v57  ;;  %v9414_v37 = vadd.f32 %v2411_v59, %v9204_v17  ;;  %v2394_v2 = vmul.f32 2.0, %v9380_v48  ;;  %v2393_v45 = vmul.f32 2.0, %v9382_v28 }
 0xdc8   :  { %v2414_v52 = vmul.f32 0.025, %v9406_v9  ;;  %v2413_v10 = vmul.f32 0.025, %v9408_v4  ;;  %v2384_v43 = vsub.f32 %v2376_v24, %v9337_v42  ;;  %v2383_v32 = vsub.f32 %v2375_v5, %v9340_v21 }
 0xdc9   :  { %2431 = vrot.lane.b32.xlu1 %v9411_v16, %s7033_s6  ;;  %2429 = vrot.lane.b32.xlu0 %v9414_v37, %s7033_s6  ;;  %v2396_v3 = vmul.f32 2.0, %v9388_v35  ;;  %v2395_v59 = vmul.f32 2.0, %v9390_v50  ;;  %v2402_v28 = vadd.f32 %v2394_v2, %v9276_v30  ;;  %v2401_v35 = vadd.f32 %v2393_v45, %v9278_v27 }
 0xdca   :  { %v9425_v62 = vadd.f32 %v2414_v52, %v9217_v20  ;;  %v9428_v40 = vadd.f32 %v2413_v10, %v9220_v36  ;;  %v9430_v8 = vadd.f32 8.0, %v2384_v43  ;;  %v9432_v31 = vadd.f32 8.0, %v2383_v32 }
 0xdcb   :  { %v2398_v52 = vmul.f32 2.0, %v9406_v9  ;;  %v2397_v10 = vmul.f32 2.0, %v9408_v4  ;;  %v2404_v50 = vadd.f32 %v2396_v3, %v9284_v61 }
 0xdcc   :  { %v2416_v42 = vmul.f32 0.025, %v9430_v8  ;;  %v2415_v21 = vmul.f32 0.025, %v9432_v31  ;;  %v2400_v61 = vmul.f32 2.0, %v9430_v8 }
 0xdcd   :  { %2435 = vrot.lane.b32.xlu1 %v9425_v62, %s7033_s6  ;;  %2433 = vrot.lane.b32.xlu0 %v9428_v40, %s7033_s6 }
 0xdce   :  { %v9441_v13 = vadd.f32 %v2416_v42, %v9231_v33  ;;  %v9444_v15 = vadd.f32 %v2415_v21, %v9234_v51  ;;  %v2403_v21 = vadd.f32 %v2395_v59, %v9286_v41 }
 0xdd1   :  { %2439 = vrot.lane.b32.xlu1 %v9441_v13, %s7033_s6  ;;  %2437 = vrot.lane.b32.xlu0 %v9444_v15, %s7033_s6 }
 0xdd5   :  { %2459 = vrot.lane.b32.xlu1 %v9393_v55, %s7034_s1  ;;  %2457 = vrot.lane.b32.xlu0 %v9396_v58, %s7034_s1 }
 0xdd9   :  { %2463 = vrot.lane.b32.xlu1 %v9411_v16, %s7034_s1  ;;  %2461 = vrot.lane.b32.xlu0 %v9414_v37, %s7034_s1 }
 0xddd   :  { %2467 = vrot.lane.b32.xlu1 %v9425_v62, %s7034_s1  ;;  %2465 = vrot.lane.b32.xlu0 %v9428_v40, %s7034_s1 }
 0xde1   :  { %2471 = vrot.lane.b32.xlu1 %v9441_v13, %s7034_s1  ;;  %2469 = vrot.lane.b32.xlu0 %v9444_v15, %s7034_s1 }
 0xde5   :  { %2443 = vrot.lane.b32.xlu1 %v9393_v55, %s7035_s7  ;;  %2441 = vrot.lane.b32.xlu0 %v9396_v58, %s7035_s7 }
 0xde9   :  { %2447 = vrot.lane.b32.xlu1 %v9411_v16, %s7035_s7  ;;  %2445 = vrot.lane.b32.xlu0 %v9414_v37, %s7035_s7 }
 0xded   :  { %2451 = vrot.lane.b32.xlu1 %v9425_v62, %s7035_s7  ;;  %2449 = vrot.lane.b32.xlu0 %v9428_v40, %s7035_s7 }
 0xdf1   :  { %2455 = vrot.lane.b32.xlu1 %v9441_v13, %s7035_s7  ;;  %2453 = vrot.lane.b32.xlu0 %v9444_v15, %s7035_s7 }
 0xe37   :  { %v2428_v6 = vpop.permute.xlu1 %2427  ;;  %v2426_v26 = vpop.permute.xlu0 %2425 }
 0xe3b   :  { %v2432_v29 = vpop.permute.xlu1 %2431  ;;  %v2430_v7 = vpop.permute.xlu0 %2429 }
 0xe3f   :  { %v2436_v53 = vpop.permute.xlu1 %2435  ;;  %v2434_v22 = vpop.permute.xlu0 %2433 }
 0xe43   :  { %v9482_v38 = vpop.permute.xlu1 %2439  ;;  %v9484_v18 = vpop.permute.xlu0 %2437 }
 0xe47   :  { %v2460_v0 = vpop.permute.xlu1 %2459  ;;  %v2458_v47 = vpop.permute.xlu0 %2457 }
 0xe48   :  { %v2474_v60 = vsub.f32 %v2428_v6, %v2460_v0  ;;  %v2473_v44 = vsub.f32 %v2426_v26, %v2458_v47 }
 0xe4b   :  { %v2464_v14 = vpop.permute.xlu1 %2463  ;;  %v2462_v34 = vpop.permute.xlu0 %2461 }
 0xe4c   :  { %v2476_v43 = vsub.f32 %v2432_v29, %v2464_v14  ;;  %v2475_v32 = vsub.f32 %v2430_v7, %v2462_v34  ;;  %v2406_v29 = vadd.f32 %v2398_v52, %v9302_v56 }
 0xe4f   :  { %v2468_v1 = vpop.permute.xlu1 %2467  ;;  %v2466_v39 = vpop.permute.xlu0 %2465 }
 0xe50   :  { %v2478_v7 = vsub.f32 %v2436_v53, %v2468_v1 }
 0xe53   :  { %v9486_v12 = vpop.permute.xlu1 %2471  ;;  %v9488_v46 = vpop.permute.xlu0 %2469 }
 0xe54   :  { %v2480_v41 = vsub.f32 %v9482_v38, %v9486_v12 }
 0xe57   :  { %v2444_v19 = vpop.permute.xlu1 %2443  ;;  %v2442_v54 = vpop.permute.xlu0 %2441 }
 0xe58   :  { %v2482_v24 = vmul.f32 %v2474_v60, %v2444_v19  ;;  %v2481_v5 = vmul.f32 %v2473_v44, %v2442_v54 }
 0xe5a   :  { %v2490_v42 = vsub.f32 %v2482_v24, %v9393_v55  ;;  %v2489_v48 = vsub.f32 %v2481_v5, %v9396_v58  ;;  %v2405_v55 = vadd.f32 %v2397_v10, %v9304_v11  ;;  %v2477_v58 = vsub.f32 %v2434_v22, %v2466_v39 }
 0xe5b   :  { %v2448_v6 = vpop.permute.xlu1 %2447  ;;  %v2446_v26 = vpop.permute.xlu0 %2445 }
 0xe5c   :  { %v2498_v0 = vadd.f32 8.0, %v2490_v42  ;;  %v2497_v9 = vadd.f32 8.0, %v2489_v48  ;;  %v2484_v47 = vmul.f32 %v2476_v43, %v2448_v6  ;;  %v2483_v4 = vmul.f32 %v2475_v32, %v2446_v26 }
 0xe5e   :  { %v2506_v14 = vmul.f32 2.0, %v2498_v0  ;;  %v2522_v30 = vmul.f32 0.05, %v2498_v0  ;;  %v2505_v34 = vmul.f32 2.0, %v2497_v9  ;;  %v2521_v27 = vmul.f32 0.05, %v2497_v9 }
 0xe5f   :  { %v2492_v60 = vsub.f32 %v2484_v47, %v9411_v16  ;;  %v2491_v44 = vsub.f32 %v2483_v4, %v9414_v37  ;;  %v2452_v2 = vpop.permute.xlu1 %2451  ;;  %v2450_v45 = vpop.permute.xlu0 %2449  ;;  %v2399_v16 = vmul.f32 2.0, %v9432_v31  ;;  %v2479_v37 = vsub.f32 %v9484_v18, %v9488_v46 }
 0xe60   :  { %v2486_v56 = vmul.f32 %v2478_v7, %v2452_v2  ;;  %v2485_v3 = vmul.f32 %v2477_v58, %v2450_v45  ;;  %v9510_v11 = vadd.f32 %v2522_v30, %v9183_v23  ;;  %v9513_v53 = vadd.f32 %v2521_v27, %v9186_v25 }
 0xe61   :  { %v2500_v22 = vadd.f32 8.0, %v2492_v60  ;;  %v2499_v1 = vadd.f32 8.0, %v2491_v44  ;;  %v9515_v8 = vadd.f32 %v2506_v14, %v2402_v28  ;;  %v9517_v39 = vadd.f32 %v2505_v34, %v2401_v35 }
 0xe62   :  { %v2494_v38 = vsub.f32 %v2486_v56, %v9425_v62  ;;  %v2493_v12 = vsub.f32 %v2485_v3, %v9428_v40  ;;  %2539 = vrot.lane.b32.xlu1 %v9510_v11, %s7033_s6  ;;  %2537 = vrot.lane.b32.xlu0 %v9513_v53, %s7033_s6  ;;  %v2407_v4 = vadd.f32 %v2399_v16, %v9322_v63 }
 0xe63   :  { %v2508_v59 = vmul.f32 2.0, %v2500_v22  ;;  %v2524_v19 = vmul.f32 0.05, %v2500_v22  ;;  %v2507_v54 = vmul.f32 2.0, %v2499_v1  ;;  %v2523_v24 = vmul.f32 0.05, %v2499_v1  ;;  %v2456_v5 = vpop.permute.xlu1 %2455  ;;  %v2454_v52 = vpop.permute.xlu0 %2453 }
 0xe64   :  { %v2502_v31 = vadd.f32 8.0, %v2494_v38  ;;  %v2501_v10 = vadd.f32 8.0, %v2493_v12  ;;  %v2488_v43 = vmul.f32 %v2480_v41, %v2456_v5  ;;  %v2487_v18 = vmul.f32 %v2479_v37, %v2454_v52 }
 0xe65   :  { %v9529_v62 = vadd.f32 %v2524_v19, %v9201_v57  ;;  %v9532_v40 = vadd.f32 %v2523_v24, %v9204_v17  ;;  %v9534_v46 = vadd.f32 %v2508_v59, %v2404_v50  ;;  %v9536_v32 = vadd.f32 %v2507_v54, %v2403_v21 }
 0xe66   :  { %v2510_v42 = vmul.f32 2.0, %v2502_v31  ;;  %v2526_v48 = vmul.f32 0.05, %v2502_v31  ;;  %v2509_v28 = vmul.f32 2.0, %v2501_v10  ;;  %v2525_v35 = vmul.f32 0.05, %v2501_v10 }
 0xe67   :  { %v2496_v6 = vsub.f32 %v2488_v43, %v9441_v13  ;;  %v2495_v26 = vsub.f32 %v2487_v18, %v9444_v15  ;;  %2543 = vrot.lane.b32.xlu1 %v9529_v62, %s7033_s6  ;;  %2541 = vrot.lane.b32.xlu0 %v9532_v40, %s7033_s6  ;;  %v2408_v15 = vadd.f32 %v2400_v61, %v9320_v49 }
 0xe68   :  { %v9545_v0 = vadd.f32 %v2526_v48, %v9217_v20  ;;  %v9548_v50 = vadd.f32 %v2525_v35, %v9220_v36  ;;  %v9550_v21 = vadd.f32 %v2510_v42, %v2406_v29  ;;  %v9552_v9 = vadd.f32 %v2509_v28, %v2405_v55 }
 0xe69   :  { %v2504_v47 = vadd.f32 8.0, %v2496_v6  ;;  %v2503_v13 = vadd.f32 8.0, %v2495_v26 }
 0xe6b   :  { %v2512_v7 = vmul.f32 2.0, %v2504_v47  ;;  %v2528_v58 = vmul.f32 0.05, %v2504_v47  ;;  %v2511_v14 = vmul.f32 2.0, %v2503_v13  ;;  %v2527_v30 = vmul.f32 0.05, %v2503_v13  ;;  %2547 = vrot.lane.b32.xlu1 %v9545_v0, %s7033_s6  ;;  %2545 = vrot.lane.b32.xlu0 %v9548_v50, %s7033_s6 }
 0xe6d   :  { %v9561_v29 = vadd.f32 %v2528_v58, %v9231_v33  ;;  %v9564_v55 = vadd.f32 %v2527_v30, %v9234_v51  ;;  %v9566_v34 = vadd.f32 %v2512_v7, %v2408_v15  ;;  %v9568_v49 = vadd.f32 %v2511_v14, %v2407_v4 }
 0xe6f   :  { %2551 = vrot.lane.b32.xlu1 %v9561_v29, %s7033_s6  ;;  %2549 = vrot.lane.b32.xlu0 %v9564_v55, %s7033_s6 }
 0xe73   :  { %2571 = vrot.lane.b32.xlu1 %v9510_v11, %s7034_s1  ;;  %2569 = vrot.lane.b32.xlu0 %v9513_v53, %s7034_s1 }
 0xe77   :  { %2575 = vrot.lane.b32.xlu1 %v9529_v62, %s7034_s1  ;;  %2573 = vrot.lane.b32.xlu0 %v9532_v40, %s7034_s1 }
 0xe7b   :  { %2579 = vrot.lane.b32.xlu1 %v9545_v0, %s7034_s1  ;;  %2577 = vrot.lane.b32.xlu0 %v9548_v50, %s7034_s1 }
 0xe7f   :  { %2583 = vrot.lane.b32.xlu1 %v9561_v29, %s7034_s1  ;;  %2581 = vrot.lane.b32.xlu0 %v9564_v55, %s7034_s1 }
 0xe83   :  { %2555 = vrot.lane.b32.xlu1 %v9510_v11, %s7035_s7  ;;  %2553 = vrot.lane.b32.xlu0 %v9513_v53, %s7035_s7 }
 0xe87   :  { %2559 = vrot.lane.b32.xlu1 %v9529_v62, %s7035_s7  ;;  %2557 = vrot.lane.b32.xlu0 %v9532_v40, %s7035_s7 }
 0xe8b   :  { %2563 = vrot.lane.b32.xlu1 %v9545_v0, %s7035_s7  ;;  %2561 = vrot.lane.b32.xlu0 %v9548_v50, %s7035_s7 }
 0xe8f   :  { %2567 = vrot.lane.b32.xlu1 %v9561_v29, %s7035_s7  ;;  %2565 = vrot.lane.b32.xlu0 %v9564_v55, %s7035_s7 }
 0xed4   :  { %v2540_v63 = vpop.permute.xlu1 %2539  ;;  %v2538_v27 = vpop.permute.xlu0 %2537 }
 0xed9   :  { %v2544_v61 = vpop.permute.xlu1 %2543  ;;  %v2542_v41 = vpop.permute.xlu0 %2541 }
 0xedd   :  { %v2548_v60 = vpop.permute.xlu1 %2547  ;;  %v2546_v44 = vpop.permute.xlu0 %2545 }
 0xee1   :  { %v2552_v2 = vpop.permute.xlu1 %2551  ;;  %v2550_v45 = vpop.permute.xlu0 %2549 }
 0xee5   :  { %v2572_v56 = vpop.permute.xlu1 %2571  ;;  %v2570_v3 = vpop.permute.xlu0 %2569 }
 0xee6   :  { %v2586_v59 = vsub.f32 %v2540_v63, %v2572_v56  ;;  %v2585_v19 = vsub.f32 %v2538_v27, %v2570_v3 }
 0xee9   :  { %v2576_v22 = vpop.permute.xlu1 %2575  ;;  %v2574_v1 = vpop.permute.xlu0 %2573 }
 0xeea   :  { %v2588_v31 = vsub.f32 %v2544_v61, %v2576_v22  ;;  %v2587_v10 = vsub.f32 %v2542_v41, %v2574_v1 }
 0xeed   :  { %v2580_v16 = vpop.permute.xlu1 %2579  ;;  %v2578_v37 = vpop.permute.xlu0 %2577 }
 0xeee   :  { %v2590_v7 = vsub.f32 %v2548_v60, %v2580_v16  ;;  %v2589_v58 = vsub.f32 %v2546_v44, %v2578_v37 }
 0xef1   :  { %v2584_v38 = vpop.permute.xlu1 %2583  ;;  %v2582_v12 = vpop.permute.xlu0 %2581 }
 0xef2   :  { %v2592_v61 = vsub.f32 %v2552_v2, %v2584_v38  ;;  %v2591_v41 = vsub.f32 %v2550_v45, %v2582_v12 }
 0xef5   :  { %v2556_v54 = vpop.permute.xlu1 %2555  ;;  %v2554_v24 = vpop.permute.xlu0 %2553 }
 0xef6   :  { %v2594_v5 = vmul.f32 %v2586_v59, %v2556_v54  ;;  %v2593_v52 = vmul.f32 %v2585_v19, %v2554_v24 }
 0xef8   :  { %v2602_v43 = vsub.f32 %v2594_v5, %v9510_v11  ;;  %v2601_v18 = vsub.f32 %v2593_v52, %v9513_v53 }
 0xef9   :  { %v2560_v42 = vpop.permute.xlu1 %2559  ;;  %v2558_v48 = vpop.permute.xlu0 %2557 }
 0xefa   :  { %v2610_v28 = vadd.f32 8.0, %v2602_v43  ;;  %v2609_v35 = vadd.f32 8.0, %v2601_v18  ;;  %v2596_v6 = vmul.f32 %v2588_v31, %v2560_v42  ;;  %v2595_v26 = vmul.f32 %v2587_v10, %v2558_v48 }
 0xefc   :  { %v2618_v47 = vadd.f32 %v2610_v28, %v9515_v8  ;;  %v2617_v13 = vadd.f32 %v2609_v35, %v9517_v39  ;;  %v2604_v15 = vsub.f32 %v2596_v6, %v9529_v62  ;;  %v2603_v4 = vsub.f32 %v2595_v26, %v9532_v40 }
 0xefd   :  { %v2564_v14 = vpop.permute.xlu1 %2563  ;;  %v2562_v11 = vpop.permute.xlu0 %2561 }
 0xefe   :  { %v2626_v30 = vmul.f32 0.008333334, %v2618_v47  ;;  %v2625_v53 = vmul.f32 0.008333334, %v2617_v13  ;;  %v2612_v63 = vadd.f32 8.0, %v2604_v15  ;;  %v2611_v27 = vadd.f32 8.0, %v2603_v4 }
 0xeff   :  { %v2598_v56 = vmul.f32 %v2590_v7, %v2564_v14  ;;  %v2597_v3 = vmul.f32 %v2589_v58, %v2562_v11 }
 0xf00   :  { %v9613_v8 = vadd.f32 %v2626_v30, %v9183_v23  ;;  %v9616_v39 = vadd.f32 %v2625_v53, %v9186_v25  ;;  %v2620_v62 = vadd.f32 %v2612_v63, %v9534_v46  ;;  %v2619_v40 = vadd.f32 %v2611_v27, %v9536_v32 }
 0xf01   :  { %v2606_v60 = vsub.f32 %v2598_v56, %v9545_v0  ;;  %v2605_v44 = vsub.f32 %v2597_v3, %v9548_v50  ;;  %v2568_v22 = vpop.permute.xlu1 %2567  ;;  %v2566_v1 = vpop.permute.xlu0 %2565 }
 0xf02   :  { %v2628_v2 = vmul.f32 0.008333334, %v2620_v62  ;;  %v2627_v45 = vmul.f32 0.008333334, %v2619_v40  ;;  %v2600_v16 = vmul.f32 %v2592_v61, %v2568_v22  ;;  %v2599_v37 = vmul.f32 %v2591_v41, %v2566_v1  ;;  %2643 = vrot.lane.b32.xlu1 %v9613_v8, %s7033_s6  ;;  %2641 = vrot.lane.b32.xlu0 %v9616_v39, %s7033_s6 }
 0xf03   :  { %v2614_v23 = vadd.f32 8.0, %v2606_v60  ;;  %v2613_v25 = vadd.f32 8.0, %v2605_v44 }
 0xf04   :  { %v9627_v46 = vadd.f32 %v2628_v2, %v9201_v57  ;;  %v9630_v32 = vadd.f32 %v2627_v45, %v9204_v17  ;;  %v2608_v0 = vsub.f32 %v2600_v16, %v9561_v29  ;;  %v2607_v50 = vsub.f32 %v2599_v37, %v9564_v55 }
 0xf05   :  { %v2622_v38 = vadd.f32 %v2614_v23, %v9550_v21  ;;  %v2621_v12 = vadd.f32 %v2613_v25, %v9552_v9 }
 0xf06   :  { %v2616_v59 = vadd.f32 8.0, %v2608_v0  ;;  %v2615_v19 = vadd.f32 8.0, %v2607_v50  ;;  %2647 = vrot.lane.b32.xlu1 %v9627_v46, %s7033_s6  ;;  %2645 = vrot.lane.b32.xlu0 %v9630_v32, %s7033_s6 }
 0xf07   :  { %v2630_v57 = vmul.f32 0.008333334, %v2622_v38  ;;  %v2629_v54 = vmul.f32 0.008333334, %v2621_v12 }
 0xf08   :  { %v2624_v17 = vadd.f32 %v2616_v59, %v9566_v34  ;;  %v2623_v29 = vadd.f32 %v2615_v19, %v9568_v49 }
 0xf09   :  { %v9643_v55 = vadd.f32 %v2630_v57, %v9217_v20  ;;  %v9646_v21 = vadd.f32 %v2629_v54, %v9220_v36 }
 0xf0a   :  { %v2632_v9 = vmul.f32 0.008333334, %v2624_v17  ;;  %v2631_v24 = vmul.f32 0.008333334, %v2623_v29 }
 0xf0b   :  { %2651 = vrot.lane.b32.xlu1 %v9643_v55, %s7033_s6  ;;  %2649 = vrot.lane.b32.xlu0 %v9646_v21, %s7033_s6 }
 0xf0c   :  { %v9653_v5 = vadd.f32 %v2632_v9, %v9231_v33  ;;  %v9656_v34 = vadd.f32 %v2631_v24, %v9234_v51 }
 0xf0f   :  { %2655 = vrot.lane.b32.xlu1 %v9653_v5, %s7033_s6  ;;  %2653 = vrot.lane.b32.xlu0 %v9656_v34, %s7033_s6 }
 0xf13   :  { %2675 = vrot.lane.b32.xlu1 %v9613_v8, %s7034_s1  ;;  %2673 = vrot.lane.b32.xlu0 %v9616_v39, %s7034_s1 }
 0xf17   :  { %2679 = vrot.lane.b32.xlu1 %v9627_v46, %s7034_s1  ;;  %2677 = vrot.lane.b32.xlu0 %v9630_v32, %s7034_s1 }
 0xf1b   :  { %2683 = vrot.lane.b32.xlu1 %v9643_v55, %s7034_s1  ;;  %2681 = vrot.lane.b32.xlu0 %v9646_v21, %s7034_s1 }
 0xf1f   :  { %2687 = vrot.lane.b32.xlu1 %v9653_v5, %s7034_s1  ;;  %2685 = vrot.lane.b32.xlu0 %v9656_v34, %s7034_s1 }
 0xf23   :  { %2659 = vrot.lane.b32.xlu1 %v9613_v8, %s7035_s7  ;;  %2657 = vrot.lane.b32.xlu0 %v9616_v39, %s7035_s7 }
 0xf27   :  { %2663 = vrot.lane.b32.xlu1 %v9627_v46, %s7035_s7  ;;  %2661 = vrot.lane.b32.xlu0 %v9630_v32, %s7035_s7 }
 0xf2b   :  { %2667 = vrot.lane.b32.xlu1 %v9643_v55, %s7035_s7  ;;  %2665 = vrot.lane.b32.xlu0 %v9646_v21, %s7035_s7 }
 0xf2f   :  { %2671 = vrot.lane.b32.xlu1 %v9653_v5, %s7035_s7  ;;  %2669 = vrot.lane.b32.xlu0 %v9656_v34, %s7035_s7 }
 0xf74   :  { %v2644_v20 = vpop.permute.xlu1 %2643  ;;  %v2642_v36 = vpop.permute.xlu0 %2641 }
 0xf78   :  { %v2648_v33 = vpop.permute.xlu1 %2647  ;;  %v2646_v51 = vpop.permute.xlu0 %2645 }
 0xf7d   :  { %v2652_v49 = vpop.permute.xlu1 %2651  ;;  %v2650_v52 = vpop.permute.xlu0 %2649 }
 0xf81   :  { %v2656_v31 = vpop.permute.xlu1 %2655  ;;  %v2654_v10 = vpop.permute.xlu0 %2653 }
 0xf85   :  { %v2676_v43 = vpop.permute.xlu1 %2675  ;;  %v2674_v18 = vpop.permute.xlu0 %2673 }
 0xf86   :  { %v2690_v47 = vsub.f32 %v2644_v20, %v2676_v43  ;;  %v2689_v13 = vsub.f32 %v2642_v36, %v2674_v18 }
 0xf89   :  { %v2680_v42 = vpop.permute.xlu1 %2679  ;;  %v2678_v48 = vpop.permute.xlu0 %2677 }
 0xf8a   :  { %v2692_v14 = vsub.f32 %v2648_v33, %v2680_v42  ;;  %v2691_v11 = vsub.f32 %v2646_v51, %v2678_v48 }
 0xf8d   :  { %v2684_v28 = vpop.permute.xlu1 %2683  ;;  %v2682_v35 = vpop.permute.xlu0 %2681 }
 0xf8e   :  { %v2694_v62 = vsub.f32 %v2652_v49, %v2684_v28  ;;  %v2693_v40 = vsub.f32 %v2650_v52, %v2682_v35 }
 0xf91   :  { %v2688_v6 = vpop.permute.xlu1 %2687  ;;  %v2686_v26 = vpop.permute.xlu0 %2685 }
 0xf92   :  { %v2696_v0 = vsub.f32 %v2656_v31, %v2688_v6  ;;  %v2695_v50 = vsub.f32 %v2654_v10, %v2686_v26 }
 0xf95   :  { %v2660_v15 = vpop.permute.xlu1 %2659  ;;  %v2658_v4 = vpop.permute.xlu0 %2657 }
 0xf96   :  { %v2698_v7 = vmul.f32 %v2690_v47, %v2660_v15  ;;  %v2697_v58 = vmul.f32 %v2689_v13, %v2658_v4 }
 0xf98   :  { %v2706_v30 = vsub.f32 %v2698_v7, %v9613_v8  ;;  %v2705_v53 = vsub.f32 %v2697_v58, %v9616_v39 }
 0xf99   :  { %v2664_v63 = vpop.permute.xlu1 %2663  ;;  %v2662_v27 = vpop.permute.xlu0 %2661 }
 0xf9a   :  { %v9696_v61 = vadd.f32 8.0, %v2706_v30  ;;  %v9698_v41 = vadd.f32 8.0, %v2705_v53  ;;  %v2700_v56 = vmul.f32 %v2692_v14, %v2664_v63  ;;  %v2699_v3 = vmul.f32 %v2691_v11, %v2662_v27 }
 0xf9c   :  { %v2722_v60 = vmul.f32 0.025, %v9696_v61  ;;  %v2721_v44 = vmul.f32 0.025, %v9698_v41  ;;  %v2708_v22 = vsub.f32 %v2700_v56, %v9627_v46  ;;  %v2707_v1 = vsub.f32 %v2699_v3, %v9630_v32 }
 0xf9d   :  { %v2668_v2 = vpop.permute.xlu1 %2667  ;;  %v2666_v45 = vpop.permute.xlu0 %2665 }
 0xf9e   :  { %v9704_v16 = vadd.f32 8.0, %v2708_v22  ;;  %v9706_v37 = vadd.f32 8.0, %v2707_v1  ;;  %v2702_v23 = vmul.f32 %v2694_v62, %v2668_v2  ;;  %v2701_v25 = vmul.f32 %v2693_v40, %v2666_v45 }
 0xf9f   :  { %v9709_v38 = vadd.f32 %v2722_v60, %v9613_v8  ;;  %v9712_v12 = vadd.f32 %v2721_v44, %v9616_v39 }
 0xfa0   :  { %v2724_v59 = vmul.f32 0.025, %v9704_v16  ;;  %v2723_v19 = vmul.f32 0.025, %v9706_v37  ;;  %v2710_v57 = vsub.f32 %v2702_v23, %v9643_v55  ;;  %v2709_v54 = vsub.f32 %v2701_v25, %v9646_v21 }
 0xfa1   :  { %2739 = vrot.lane.b32.xlu1 %v9709_v38, %s7033_s6  ;;  %2737 = vrot.lane.b32.xlu0 %v9712_v12, %s7033_s6  ;;  %v2672_v17 = vpop.permute.xlu1 %2671  ;;  %v2670_v29 = vpop.permute.xlu0 %2669 }
 0xfa2   :  { %v9722_v9 = vadd.f32 8.0, %v2710_v57  ;;  %v9724_v24 = vadd.f32 8.0, %v2709_v54  ;;  %v2704_v20 = vmul.f32 %v2696_v0, %v2672_v17  ;;  %v2703_v36 = vmul.f32 %v2695_v50, %v2670_v29 }
 0xfa3   :  { %v9727_v33 = vadd.f32 %v2724_v59, %v9627_v46  ;;  %v9730_v51 = vadd.f32 %v2723_v19, %v9630_v32 }
 0xfa4   :  { %v2726_v49 = vmul.f32 0.025, %v9722_v9  ;;  %v2725_v52 = vmul.f32 0.025, %v9724_v24  ;;  %v2712_v31 = vsub.f32 %v2704_v20, %v9653_v5  ;;  %v2711_v10 = vsub.f32 %v2703_v36, %v9656_v34 }
 0xfa5   :  { %2743 = vrot.lane.b32.xlu1 %v9727_v33, %s7033_s6  ;;  %2741 = vrot.lane.b32.xlu0 %v9730_v51, %s7033_s6 }
 0xfa6   :  { %v9740_v43 = vadd.f32 8.0, %v2712_v31  ;;  %v9742_v18 = vadd.f32 8.0, %v2711_v10  ;;  %v9745_v42 = vadd.f32 %v2726_v49, %v9643_v55  ;;  %v9748_v48 = vadd.f32 %v2725_v52, %v9646_v21 }
 0xfa8   :  { %v2728_v28 = vmul.f32 0.025, %v9740_v43  ;;  %v2727_v35 = vmul.f32 0.025, %v9742_v18 }
 0xfa9   :  { %2747 = vrot.lane.b32.xlu1 %v9745_v42, %s7033_s6  ;;  %2745 = vrot.lane.b32.xlu0 %v9748_v48, %s7033_s6 }
 0xfaa   :  { %v9757_v6 = vadd.f32 %v2728_v28, %v9653_v5  ;;  %v9760_v26 = vadd.f32 %v2727_v35, %v9656_v34 }
 0xfad   :  { %2751 = vrot.lane.b32.xlu1 %v9757_v6, %s7033_s6  ;;  %2749 = vrot.lane.b32.xlu0 %v9760_v26, %s7033_s6 }
 0xfb1   :  { %2771 = vrot.lane.b32.xlu1 %v9709_v38, %s7034_s1  ;;  %2769 = vrot.lane.b32.xlu0 %v9712_v12, %s7034_s1 }
 0xfb5   :  { %2775 = vrot.lane.b32.xlu1 %v9727_v33, %s7034_s1  ;;  %2773 = vrot.lane.b32.xlu0 %v9730_v51, %s7034_s1 }
 0xfb9   :  { %2779 = vrot.lane.b32.xlu1 %v9745_v42, %s7034_s1  ;;  %2777 = vrot.lane.b32.xlu0 %v9748_v48, %s7034_s1 }
 0xfbd   :  { %2783 = vrot.lane.b32.xlu1 %v9757_v6, %s7034_s1  ;;  %2781 = vrot.lane.b32.xlu0 %v9760_v26, %s7034_s1 }
 0xfc1   :  { %2755 = vrot.lane.b32.xlu1 %v9709_v38, %s7035_s7  ;;  %2753 = vrot.lane.b32.xlu0 %v9712_v12, %s7035_s7 }
 0xfc5   :  { %2759 = vrot.lane.b32.xlu1 %v9727_v33, %s7035_s7  ;;  %2757 = vrot.lane.b32.xlu0 %v9730_v51, %s7035_s7 }
 0xfc9   :  { %2763 = vrot.lane.b32.xlu1 %v9745_v42, %s7035_s7  ;;  %2761 = vrot.lane.b32.xlu0 %v9748_v48, %s7035_s7 }
 0xfcd   :  { %2767 = vrot.lane.b32.xlu1 %v9757_v6, %s7035_s7  ;;  %2765 = vrot.lane.b32.xlu0 %v9760_v26, %s7035_s7 }
0x1013   :  { %v2740_v47 = vpop.permute.xlu1 %2739  ;;  %v2738_v13 = vpop.permute.xlu0 %2737 }
0x1017   :  { %v2744_v15 = vpop.permute.xlu1 %2743  ;;  %v2742_v4 = vpop.permute.xlu0 %2741 }
0x101b   :  { %v2748_v7 = vpop.permute.xlu1 %2747  ;;  %v2746_v58 = vpop.permute.xlu0 %2745 }
0x101f   :  { %v2752_v14 = vpop.permute.xlu1 %2751  ;;  %v2750_v11 = vpop.permute.xlu0 %2749 }
0x1023   :  { %v2772_v30 = vpop.permute.xlu1 %2771  ;;  %v2770_v53 = vpop.permute.xlu0 %2769 }
0x1024   :  { %v2786_v60 = vsub.f32 %v2740_v47, %v2772_v30  ;;  %v2785_v44 = vsub.f32 %v2738_v13, %v2770_v53 }
0x1027   :  { %v2776_v63 = vpop.permute.xlu1 %2775  ;;  %v2774_v27 = vpop.permute.xlu0 %2773 }
0x1028   :  { %v2788_v23 = vsub.f32 %v2744_v15, %v2776_v63  ;;  %v2787_v25 = vsub.f32 %v2742_v4, %v2774_v27 }
0x102b   :  { %v2780_v56 = vpop.permute.xlu1 %2779  ;;  %v2778_v3 = vpop.permute.xlu0 %2777 }
0x102c   :  { %v2790_v20 = vsub.f32 %v2748_v7, %v2780_v56  ;;  %v2789_v36 = vsub.f32 %v2746_v58, %v2778_v3 }
0x102f   :  { %v2784_v62 = vpop.permute.xlu1 %2783  ;;  %v2782_v40 = vpop.permute.xlu0 %2781 }
0x1030   :  { %v2792_v7 = vsub.f32 %v2752_v14, %v2784_v62  ;;  %v2791_v58 = vsub.f32 %v2750_v11, %v2782_v40 }
0x1033   :  { %v2756_v22 = vpop.permute.xlu1 %2755  ;;  %v2754_v1 = vpop.permute.xlu0 %2753 }
0x1034   :  { %v2794_v2 = vmul.f32 %v2786_v60, %v2756_v22  ;;  %v2793_v45 = vmul.f32 %v2785_v44, %v2754_v1 }
0x1036   :  { %v2802_v0 = vsub.f32 %v2794_v2, %v9709_v38  ;;  %v2801_v50 = vsub.f32 %v2793_v45, %v9712_v12 }
0x1037   :  { %v2760_v59 = vpop.permute.xlu1 %2759  ;;  %v2758_v19 = vpop.permute.xlu0 %2757 }
0x1038   :  { %v9800_v57 = vadd.f32 8.0, %v2802_v0  ;;  %v9802_v54 = vadd.f32 8.0, %v2801_v50  ;;  %v2796_v17 = vmul.f32 %v2788_v23, %v2760_v59  ;;  %v2795_v29 = vmul.f32 %v2787_v25, %v2758_v19 }
0x103a   :  { %v2834_v49 = vmul.f32 0.025, %v9800_v57  ;;  %v2833_v52 = vmul.f32 0.025, %v9802_v54  ;;  %v2804_v31 = vsub.f32 %v2796_v17, %v9727_v33  ;;  %v2803_v38 = vsub.f32 %v2795_v29, %v9730_v51 }
0x103b   :  { %v2764_v10 = vpop.permute.xlu1 %2763  ;;  %v2762_v12 = vpop.permute.xlu0 %2761 }
0x103c   :  { %v2798_v28 = vmul.f32 %v2790_v20, %v2764_v10  ;;  %v2797_v35 = vmul.f32 %v2789_v36, %v2762_v12  ;;  %v9808_v47 = vadd.f32 8.0, %v2804_v31  ;;  %v9810_v13 = vadd.f32 8.0, %v2803_v38 }
0x103d   :  { %v9813_v15 = vadd.f32 %v2834_v49, %v9613_v8  ;;  %v9816_v4 = vadd.f32 %v2833_v52, %v9616_v39 }
0x103e   :  { %v2806_v33 = vsub.f32 %v2798_v28, %v9745_v42  ;;  %v2805_v51 = vsub.f32 %v2797_v35, %v9748_v48  ;;  %v2836_v30 = vmul.f32 0.025, %v9808_v47  ;;  %v2835_v53 = vmul.f32 0.025, %v9810_v13 }
0x103f   :  { %2851 = vrot.lane.b32.xlu1 %v9813_v15, %s7033_s6  ;;  %2849 = vrot.lane.b32.xlu0 %v9816_v4, %s7033_s6  ;;  %v2768_v63 = vpop.permute.xlu1 %2767  ;;  %v2766_v27 = vpop.permute.xlu0 %2765 }
0x1040   :  { %v9826_v56 = vadd.f32 8.0, %v2806_v33  ;;  %v9828_v14 = vadd.f32 8.0, %v2805_v51  ;;  %v2800_v11 = vmul.f32 %v2792_v7, %v2768_v63  ;;  %v2799_v42 = vmul.f32 %v2791_v58, %v2766_v27 }
0x1041   :  { %v9831_v48 = vadd.f32 %v2836_v30, %v9627_v46  ;;  %v9834_v3 = vadd.f32 %v2835_v53, %v9630_v32  ;;  %v2818_v33 = vmul.f32 2.0, %v9800_v57  ;;  %v2817_v51 = vmul.f32 2.0, %v9802_v54 }
0x1042   :  { %v2838_v62 = vmul.f32 0.025, %v9826_v56  ;;  %v2837_v40 = vmul.f32 0.025, %v9828_v14  ;;  %v2808_v60 = vsub.f32 %v2800_v11, %v9757_v6  ;;  %v2807_v44 = vsub.f32 %v2799_v42, %v9760_v26 }
0x1043   :  { %2855 = vrot.lane.b32.xlu1 %v9831_v48, %s7033_s6  ;;  %2853 = vrot.lane.b32.xlu0 %v9834_v3, %s7033_s6  ;;  %v2820_v30 = vmul.f32 2.0, %v9808_v47  ;;  %v2819_v53 = vmul.f32 2.0, %v9810_v13  ;;  %v2826_v54 = vadd.f32 %v2818_v33, %v9696_v61  ;;  %v2825_v47 = vadd.f32 %v2817_v51, %v9698_v41 }
0x1044   :  { %v9845_v22 = vadd.f32 %v2838_v62, %v9643_v55  ;;  %v9848_v1 = vadd.f32 %v2837_v40, %v9646_v21  ;;  %v9850_v2 = vadd.f32 8.0, %v2808_v60  ;;  %v9852_v45 = vadd.f32 8.0, %v2807_v44 }
0x1045   :  { %v2822_v62 = vmul.f32 2.0, %v9826_v56  ;;  %v2821_v40 = vmul.f32 2.0, %v9828_v14  ;;  %v2828_v13 = vadd.f32 %v2820_v30, %v9704_v16 }
0x1046   :  { %v2840_v6 = vmul.f32 0.025, %v9850_v2  ;;  %v2839_v26 = vmul.f32 0.025, %v9852_v45  ;;  %v2824_v16 = vmul.f32 2.0, %v9850_v2 }
0x1047   :  { %2859 = vrot.lane.b32.xlu1 %v9845_v22, %s7033_s6  ;;  %2857 = vrot.lane.b32.xlu0 %v9848_v1, %s7033_s6 }
0x1048   :  { %v9861_v23 = vadd.f32 %v2840_v6, %v9653_v5  ;;  %v9864_v25 = vadd.f32 %v2839_v26, %v9656_v34  ;;  %v2827_v26 = vadd.f32 %v2819_v53, %v9706_v37 }
0x104b   :  { %2863 = vrot.lane.b32.xlu1 %v9861_v23, %s7033_s6  ;;  %2861 = vrot.lane.b32.xlu0 %v9864_v25, %s7033_s6 }
0x104f   :  { %2883 = vrot.lane.b32.xlu1 %v9813_v15, %s7034_s1  ;;  %2881 = vrot.lane.b32.xlu0 %v9816_v4, %s7034_s1 }
0x1053   :  { %2887 = vrot.lane.b32.xlu1 %v9831_v48, %s7034_s1  ;;  %2885 = vrot.lane.b32.xlu0 %v9834_v3, %s7034_s1 }
0x1057   :  { %2891 = vrot.lane.b32.xlu1 %v9845_v22, %s7034_s1  ;;  %2889 = vrot.lane.b32.xlu0 %v9848_v1, %s7034_s1 }
0x105b   :  { %2895 = vrot.lane.b32.xlu1 %v9861_v23, %s7034_s1  ;;  %2893 = vrot.lane.b32.xlu0 %v9864_v25, %s7034_s1 }
0x105f   :  { %2867 = vrot.lane.b32.xlu1 %v9813_v15, %s7035_s7  ;;  %2865 = vrot.lane.b32.xlu0 %v9816_v4, %s7035_s7 }
0x1063   :  { %2871 = vrot.lane.b32.xlu1 %v9831_v48, %s7035_s7  ;;  %2869 = vrot.lane.b32.xlu0 %v9834_v3, %s7035_s7 }
0x1067   :  { %2875 = vrot.lane.b32.xlu1 %v9845_v22, %s7035_s7  ;;  %2873 = vrot.lane.b32.xlu0 %v9848_v1, %s7035_s7 }
0x106b   :  { %2879 = vrot.lane.b32.xlu1 %v9861_v23, %s7035_s7  ;;  %2877 = vrot.lane.b32.xlu0 %v9864_v25, %s7035_s7 }
0x10b1   :  { %v2852_v0 = vpop.permute.xlu1 %2851  ;;  %v2850_v50 = vpop.permute.xlu0 %2849 }
0x10b5   :  { %v2856_v59 = vpop.permute.xlu1 %2855  ;;  %v2854_v19 = vpop.permute.xlu0 %2853 }
0x10b9   :  { %v2860_v17 = vpop.permute.xlu1 %2859  ;;  %v2858_v29 = vpop.permute.xlu0 %2857 }
0x10bd   :  { %v9902_v20 = vpop.permute.xlu1 %2863  ;;  %v9904_v36 = vpop.permute.xlu0 %2861 }
0x10c1   :  { %v2884_v49 = vpop.permute.xlu1 %2883  ;;  %v2882_v52 = vpop.permute.xlu0 %2881 }
0x10c2   :  { %v2898_v7 = vsub.f32 %v2852_v0, %v2884_v49  ;;  %v2897_v58 = vsub.f32 %v2850_v50, %v2882_v52 }
0x10c5   :  { %v2888_v31 = vpop.permute.xlu1 %2887  ;;  %v2886_v38 = vpop.permute.xlu0 %2885 }
0x10c6   :  { %v2900_v60 = vsub.f32 %v2856_v59, %v2888_v31  ;;  %v2899_v44 = vsub.f32 %v2854_v19, %v2886_v38  ;;  %v2830_v59 = vadd.f32 %v2822_v62, %v9722_v9 }
0x10c9   :  { %v2892_v10 = vpop.permute.xlu1 %2891  ;;  %v2890_v12 = vpop.permute.xlu0 %2889 }
0x10ca   :  { %v2902_v19 = vsub.f32 %v2860_v17, %v2892_v10 }
0x10cd   :  { %v9906_v28 = vpop.permute.xlu1 %2895  ;;  %v9908_v35 = vpop.permute.xlu0 %2893 }
0x10ce   :  { %v2904_v37 = vsub.f32 %v9902_v20, %v9906_v28 }
0x10d1   :  { %v2868_v63 = vpop.permute.xlu1 %2867  ;;  %v2866_v27 = vpop.permute.xlu0 %2865 }
0x10d2   :  { %v2906_v11 = vmul.f32 %v2898_v7, %v2868_v63  ;;  %v2905_v42 = vmul.f32 %v2897_v58, %v2866_v27 }
0x10d4   :  { %v2914_v6 = vsub.f32 %v2906_v11, %v9813_v15  ;;  %v2913_v57 = vsub.f32 %v2905_v42, %v9816_v4  ;;  %v2829_v15 = vadd.f32 %v2821_v40, %v9724_v24  ;;  %v2901_v4 = vsub.f32 %v2858_v29, %v2890_v12 }
0x10d5   :  { %v2872_v0 = vpop.permute.xlu1 %2871  ;;  %v2870_v50 = vpop.permute.xlu0 %2869 }
0x10d6   :  { %v2922_v49 = vadd.f32 8.0, %v2914_v6  ;;  %v2921_v56 = vadd.f32 8.0, %v2913_v57  ;;  %v2908_v52 = vmul.f32 %v2900_v60, %v2872_v0  ;;  %v2907_v14 = vmul.f32 %v2899_v44, %v2870_v50 }
0x10d8   :  { %v2930_v31 = vmul.f32 2.0, %v2922_v49  ;;  %v2946_v61 = vmul.f32 0.05, %v2922_v49  ;;  %v2929_v38 = vmul.f32 2.0, %v2921_v56  ;;  %v2945_v41 = vmul.f32 0.05, %v2921_v56 }
0x10d9   :  { %v2916_v7 = vsub.f32 %v2908_v52, %v9831_v48  ;;  %v2915_v58 = vsub.f32 %v2907_v14, %v9834_v3  ;;  %v2876_v33 = vpop.permute.xlu1 %2875  ;;  %v2874_v51 = vpop.permute.xlu0 %2873  ;;  %v2823_v48 = vmul.f32 2.0, %v9852_v45  ;;  %v2903_v3 = vsub.f32 %v9904_v36, %v9908_v35 }
0x10da   :  { %v2910_v9 = vmul.f32 %v2902_v19, %v2876_v33  ;;  %v2909_v30 = vmul.f32 %v2901_v4, %v2874_v51  ;;  %v9930_v24 = vadd.f32 %v2946_v61, %v9613_v8  ;;  %v9933_v17 = vadd.f32 %v2945_v41, %v9616_v39 }
0x10db   :  { %v2924_v29 = vadd.f32 8.0, %v2916_v7  ;;  %v2923_v10 = vadd.f32 8.0, %v2915_v58  ;;  %v9935_v2 = vadd.f32 %v2930_v31, %v2826_v54  ;;  %v9937_v12 = vadd.f32 %v2929_v38, %v2825_v47 }
0x10dc   :  { %v2918_v20 = vsub.f32 %v2910_v9, %v9845_v22  ;;  %v2917_v28 = vsub.f32 %v2909_v30, %v9848_v1  ;;  %2963 = vrot.lane.b32.xlu1 %v9930_v24, %s7033_s6  ;;  %2961 = vrot.lane.b32.xlu0 %v9933_v17, %s7033_s6  ;;  %v2831_v14 = vadd.f32 %v2823_v48, %v9742_v18 }
0x10dd   :  { %v2932_v53 = vmul.f32 2.0, %v2924_v29  ;;  %v2948_v63 = vmul.f32 0.05, %v2924_v29  ;;  %v2931_v27 = vmul.f32 2.0, %v2923_v10  ;;  %v2947_v11 = vmul.f32 0.05, %v2923_v10  ;;  %v2880_v42 = vpop.permute.xlu1 %2879  ;;  %v2878_v62 = vpop.permute.xlu0 %2877 }
0x10de   :  { %v2926_v45 = vadd.f32 8.0, %v2918_v20  ;;  %v2925_v40 = vadd.f32 8.0, %v2917_v28  ;;  %v2912_v60 = vmul.f32 %v2904_v37, %v2880_v42  ;;  %v2911_v36 = vmul.f32 %v2903_v3, %v2878_v62 }
0x10df   :  { %v9949_v22 = vadd.f32 %v2948_v63, %v9627_v46  ;;  %v9952_v1 = vadd.f32 %v2947_v11, %v9630_v32  ;;  %v9954_v35 = vadd.f32 %v2932_v53, %v2828_v13  ;;  %v9956_v44 = vadd.f32 %v2931_v27, %v2827_v26 }
0x10e0   :  { %v2934_v6 = vmul.f32 2.0, %v2926_v45  ;;  %v2950_v57 = vmul.f32 0.05, %v2926_v45  ;;  %v2933_v54 = vmul.f32 2.0, %v2925_v40  ;;  %v2949_v47 = vmul.f32 0.05, %v2925_v40 }
0x10e1   :  { %v2920_v0 = vsub.f32 %v2912_v60, %v9861_v23  ;;  %v2919_v50 = vsub.f32 %v2911_v36, %v9864_v25  ;;  %2967 = vrot.lane.b32.xlu1 %v9949_v22, %s7033_s6  ;;  %2965 = vrot.lane.b32.xlu0 %v9952_v1, %s7033_s6  ;;  %v2832_v25 = vadd.f32 %v2824_v16, %v9740_v43 }
0x10e2   :  { %v9965_v49 = vadd.f32 %v2950_v57, %v9643_v55  ;;  %v9968_v13 = vadd.f32 %v2949_v47, %v9646_v21  ;;  %v9970_v26 = vadd.f32 %v2934_v6, %v2830_v59  ;;  %v9972_v56 = vadd.f32 %v2933_v54, %v2829_v15 }
0x10e3   :  { %v2928_v52 = vadd.f32 8.0, %v2920_v0  ;;  %v2927_v23 = vadd.f32 8.0, %v2919_v50 }
0x10e5   :  { %v2936_v19 = vmul.f32 2.0, %v2928_v52  ;;  %v2952_v4 = vmul.f32 0.05, %v2928_v52  ;;  %v2935_v31 = vmul.f32 2.0, %v2927_v23  ;;  %v2951_v61 = vmul.f32 0.05, %v2927_v23  ;;  %2971 = vrot.lane.b32.xlu1 %v9965_v49, %s7033_s6  ;;  %2969 = vrot.lane.b32.xlu0 %v9968_v13, %s7033_s6 }
0x10e7   :  { %v9981_v59 = vadd.f32 %v2952_v4, %v9653_v5  ;;  %v9984_v15 = vadd.f32 %v2951_v61, %v9656_v34  ;;  %v9986_v38 = vadd.f32 %v2936_v19, %v2832_v25  ;;  %v9988_v43 = vadd.f32 %v2935_v31, %v2831_v14 }
0x10e9   :  { %2975 = vrot.lane.b32.xlu1 %v9981_v59, %s7033_s6  ;;  %2973 = vrot.lane.b32.xlu0 %v9984_v15, %s7033_s6 }
0x10ed   :  { %2995 = vrot.lane.b32.xlu1 %v9930_v24, %s7034_s1  ;;  %2993 = vrot.lane.b32.xlu0 %v9933_v17, %s7034_s1 }
0x10f1   :  { %2999 = vrot.lane.b32.xlu1 %v9949_v22, %s7034_s1  ;;  %2997 = vrot.lane.b32.xlu0 %v9952_v1, %s7034_s1 }
0x10f5   :  { %3003 = vrot.lane.b32.xlu1 %v9965_v49, %s7034_s1  ;;  %3001 = vrot.lane.b32.xlu0 %v9968_v13, %s7034_s1 }
0x10f9   :  { %3007 = vrot.lane.b32.xlu1 %v9981_v59, %s7034_s1  ;;  %3005 = vrot.lane.b32.xlu0 %v9984_v15, %s7034_s1 }
0x10fd   :  { %2979 = vrot.lane.b32.xlu1 %v9930_v24, %s7035_s7  ;;  %2977 = vrot.lane.b32.xlu0 %v9933_v17, %s7035_s7 }
0x1101   :  { %2983 = vrot.lane.b32.xlu1 %v9949_v22, %s7035_s7  ;;  %2981 = vrot.lane.b32.xlu0 %v9952_v1, %s7035_s7 }
0x1105   :  { %2987 = vrot.lane.b32.xlu1 %v9965_v49, %s7035_s7  ;;  %2985 = vrot.lane.b32.xlu0 %v9968_v13, %s7035_s7 }
0x1109   :  { %2991 = vrot.lane.b32.xlu1 %v9981_v59, %s7035_s7  ;;  %2989 = vrot.lane.b32.xlu0 %v9984_v15, %s7035_s7 }
0x114e   :  { %v2964_v18 = vpop.permute.xlu1 %2963  ;;  %v2962_v41 = vpop.permute.xlu0 %2961 }
0x1153   :  { %v2968_v16 = vpop.permute.xlu1 %2967  ;;  %v2966_v37 = vpop.permute.xlu0 %2965 }
0x1157   :  { %v2972_v7 = vpop.permute.xlu1 %2971  ;;  %v2970_v58 = vpop.permute.xlu0 %2969 }
0x115b   :  { %v2976_v33 = vpop.permute.xlu1 %2975  ;;  %v2974_v51 = vpop.permute.xlu0 %2973 }
0x115f   :  { %v2996_v9 = vpop.permute.xlu1 %2995  ;;  %v2994_v30 = vpop.permute.xlu0 %2993 }
0x1160   :  { %v3010_v53 = vsub.f32 %v2964_v18, %v2996_v9  ;;  %v3009_v63 = vsub.f32 %v2962_v41, %v2994_v30 }
0x1163   :  { %v3000_v29 = vpop.permute.xlu1 %2999  ;;  %v2998_v10 = vpop.permute.xlu0 %2997 }
0x1164   :  { %v3012_v45 = vsub.f32 %v2968_v16, %v3000_v29  ;;  %v3011_v40 = vsub.f32 %v2966_v37, %v2998_v10 }
0x1167   :  { %v3004_v48 = vpop.permute.xlu1 %3003  ;;  %v3002_v3 = vpop.permute.xlu0 %3001 }
0x1168   :  { %v3014_v19 = vsub.f32 %v2972_v7, %v3004_v48  ;;  %v3013_v4 = vsub.f32 %v2970_v58, %v3002_v3 }
0x116b   :  { %v3008_v20 = vpop.permute.xlu1 %3007  ;;  %v3006_v28 = vpop.permute.xlu0 %3005 }
0x116c   :  { %v3016_v16 = vsub.f32 %v2976_v33, %v3008_v20  ;;  %v3015_v37 = vsub.f32 %v2974_v51, %v3006_v28 }
0x116f   :  { %v2980_v27 = vpop.permute.xlu1 %2979  ;;  %v2978_v11 = vpop.permute.xlu0 %2977 }
0x1170   :  { %v3018_v42 = vmul.f32 %v3010_v53, %v2980_v27  ;;  %v3017_v62 = vmul.f32 %v3009_v63, %v2978_v11 }
0x1172   :  { %v3026_v60 = vsub.f32 %v3018_v42, %v9930_v24  ;;  %v3025_v36 = vsub.f32 %v3017_v62, %v9933_v17 }
0x1173   :  { %v2984_v6 = vpop.permute.xlu1 %2983  ;;  %v2982_v57 = vpop.permute.xlu0 %2981 }
0x1174   :  { %v3034_v54 = vadd.f32 8.0, %v3026_v60  ;;  %v3033_v47 = vadd.f32 8.0, %v3025_v36  ;;  %v3020_v0 = vmul.f32 %v3012_v45, %v2984_v6  ;;  %v3019_v50 = vmul.f32 %v3011_v40, %v2982_v57 }
0x1176   :  { %v3042_v52 = vadd.f32 %v3034_v54, %v9935_v2  ;;  %v3041_v23 = vadd.f32 %v3033_v47, %v9937_v12  ;;  %v3028_v25 = vsub.f32 %v3020_v0, %v9949_v22  ;;  %v3027_v14 = vsub.f32 %v3019_v50, %v9952_v1 }
0x1177   :  { %v2988_v31 = vpop.permute.xlu1 %2987  ;;  %v2986_v24 = vpop.permute.xlu0 %2985 }
0x1178   :  { %v3050_v61 = vmul.f32 0.008333334, %v3042_v52  ;;  %v3049_v17 = vmul.f32 0.008333334, %v3041_v23  ;;  %v3036_v18 = vadd.f32 8.0, %v3028_v25  ;;  %v3035_v41 = vadd.f32 8.0, %v3027_v14 }
0x1179   :  { %v3022_v9 = vmul.f32 %v3014_v19, %v2988_v31  ;;  %v3021_v30 = vmul.f32 %v3013_v4, %v2986_v24 }
0x117a   :  { %v10033_v2 = vadd.f32 %v3050_v61, %v9613_v8  ;;  %v10036_v12 = vadd.f32 %v3049_v17, %v9616_v39  ;;  %v3044_v22 = vadd.f32 %v3036_v18, %v9954_v35  ;;  %v3043_v1 = vadd.f32 %v3035_v41, %v9956_v44 }
0x117b   :  { %v3030_v7 = vsub.f32 %v3022_v9, %v9965_v49  ;;  %v3029_v58 = vsub.f32 %v3021_v30, %v9968_v13  ;;  %v2992_v29 = vpop.permute.xlu1 %2991  ;;  %v2990_v10 = vpop.permute.xlu0 %2989 }
0x117c   :  { %v3052_v33 = vmul.f32 0.008333334, %v3044_v22  ;;  %v3051_v51 = vmul.f32 0.008333334, %v3043_v1  ;;  %v3024_v48 = vmul.f32 %v3016_v16, %v2992_v29  ;;  %v3023_v3 = vmul.f32 %v3015_v37, %v2990_v10  ;;  %3067 = vrot.lane.b32.xlu1 %v10033_v2, %s7033_s6  ;;  %3065 = vrot.lane.b32.xlu0 %v10036_v12, %s7033_s6 }
0x117d   :  { %v3038_v8 = vadd.f32 8.0, %v3030_v7  ;;  %v3037_v39 = vadd.f32 8.0, %v3029_v58 }
0x117e   :  { %v10047_v35 = vadd.f32 %v3052_v33, %v9627_v46  ;;  %v10050_v44 = vadd.f32 %v3051_v51, %v9630_v32  ;;  %v3032_v49 = vsub.f32 %v3024_v48, %v9981_v59  ;;  %v3031_v13 = vsub.f32 %v3023_v3, %v9984_v15 }
0x117f   :  { %v3046_v20 = vadd.f32 %v3038_v8, %v9970_v26  ;;  %v3045_v28 = vadd.f32 %v3037_v39, %v9972_v56 }
0x1180   :  { %v3040_v53 = vadd.f32 8.0, %v3032_v49  ;;  %v3039_v63 = vadd.f32 8.0, %v3031_v13  ;;  %3071 = vrot.lane.b32.xlu1 %v10047_v35, %s7033_s6  ;;  %3069 = vrot.lane.b32.xlu0 %v10050_v44, %s7033_s6 }
0x1181   :  { %v3054_v46 = vmul.f32 0.008333334, %v3046_v20  ;;  %v3053_v27 = vmul.f32 0.008333334, %v3045_v28 }
0x1182   :  { %v3048_v32 = vadd.f32 %v3040_v53, %v9986_v38  ;;  %v3047_v59 = vadd.f32 %v3039_v63, %v9988_v43 }
0x1183   :  { %v10063_v15 = vadd.f32 %v3054_v46, %v9643_v55  ;;  %v10066_v26 = vadd.f32 %v3053_v27, %v9646_v21 }
0x1184   :  { %v3056_v56 = vmul.f32 0.008333334, %v3048_v32  ;;  %v3055_v11 = vmul.f32 0.008333334, %v3047_v59 }
0x1185   :  { %3075 = vrot.lane.b32.xlu1 %v10063_v15, %s7033_s6  ;;  %3073 = vrot.lane.b32.xlu0 %v10066_v26, %s7033_s6 }
0x1186   :  { %v10073_v42 = vadd.f32 %v3056_v56, %v9653_v5  ;;  %v10076_v38 = vadd.f32 %v3055_v11, %v9656_v34 }
0x1189   :  { %3079 = vrot.lane.b32.xlu1 %v10073_v42, %s7033_s6  ;;  %3077 = vrot.lane.b32.xlu0 %v10076_v38, %s7033_s6 }
0x118d   :  { %3099 = vrot.lane.b32.xlu1 %v10033_v2, %s7034_s1  ;;  %3097 = vrot.lane.b32.xlu0 %v10036_v12, %s7034_s1 }
0x1191   :  { %3103 = vrot.lane.b32.xlu1 %v10047_v35, %s7034_s1  ;;  %3101 = vrot.lane.b32.xlu0 %v10050_v44, %s7034_s1 }
0x1195   :  { %3107 = vrot.lane.b32.xlu1 %v10063_v15, %s7034_s1  ;;  %3105 = vrot.lane.b32.xlu0 %v10066_v26, %s7034_s1 }
0x1199   :  { %3111 = vrot.lane.b32.xlu1 %v10073_v42, %s7034_s1  ;;  %3109 = vrot.lane.b32.xlu0 %v10076_v38, %s7034_s1 }
0x119d   :  { %3083 = vrot.lane.b32.xlu1 %v10033_v2, %s7035_s7  ;;  %3081 = vrot.lane.b32.xlu0 %v10036_v12, %s7035_s7 }
0x11a1   :  { %3087 = vrot.lane.b32.xlu1 %v10047_v35, %s7035_s7  ;;  %3085 = vrot.lane.b32.xlu0 %v10050_v44, %s7035_s7 }
0x11a5   :  { %3091 = vrot.lane.b32.xlu1 %v10063_v15, %s7035_s7  ;;  %3089 = vrot.lane.b32.xlu0 %v10066_v26, %s7035_s7 }
0x11a9   :  { %3095 = vrot.lane.b32.xlu1 %v10073_v42, %s7035_s7  ;;  %3093 = vrot.lane.b32.xlu0 %v10076_v38, %s7035_s7 }
0x11ee   :  { %v3068_v55 = vpop.permute.xlu1 %3067  ;;  %v3066_v21 = vpop.permute.xlu0 %3065 }
0x11f2   :  { %v3072_v5 = vpop.permute.xlu1 %3071  ;;  %v3070_v34 = vpop.permute.xlu0 %3069 }
0x11f7   :  { %v3076_v43 = vpop.permute.xlu1 %3075  ;;  %v3074_v62 = vpop.permute.xlu0 %3073 }
0x11fb   :  { %v3080_v45 = vpop.permute.xlu1 %3079  ;;  %v3078_v40 = vpop.permute.xlu0 %3077 }
0x11ff   :  { %v3100_v60 = vpop.permute.xlu1 %3099  ;;  %v3098_v36 = vpop.permute.xlu0 %3097 }
0x1200   :  { %v3114_v52 = vsub.f32 %v3068_v55, %v3100_v60  ;;  %v3113_v23 = vsub.f32 %v3066_v21, %v3098_v36 }
0x1203   :  { %v3104_v6 = vpop.permute.xlu1 %3103  ;;  %v3102_v57 = vpop.permute.xlu0 %3101 }
0x1204   :  { %v3116_v31 = vsub.f32 %v3072_v5, %v3104_v6  ;;  %v3115_v24 = vsub.f32 %v3070_v34, %v3102_v57 }
0x1207   :  { %v3108_v54 = vpop.permute.xlu1 %3107  ;;  %v3106_v47 = vpop.permute.xlu0 %3105 }
0x1208   :  { %v3118_v22 = vsub.f32 %v3076_v43, %v3108_v54  ;;  %v3117_v1 = vsub.f32 %v3074_v62, %v3106_v47 }
0x120b   :  { %v3112_v0 = vpop.permute.xlu1 %3111  ;;  %v3110_v50 = vpop.permute.xlu0 %3109 }
0x120c   :  { %v3120_v49 = vsub.f32 %v3080_v45, %v3112_v0  ;;  %v3119_v13 = vsub.f32 %v3078_v40, %v3110_v50 }
0x120f   :  { %v3084_v25 = vpop.permute.xlu1 %3083  ;;  %v3082_v14 = vpop.permute.xlu0 %3081 }
0x1210   :  { %v3122_v19 = vmul.f32 %v3114_v52, %v3084_v25  ;;  %v3121_v4 = vmul.f32 %v3113_v23, %v3082_v14 }
0x1212   :  { %v3130_v61 = vsub.f32 %v3122_v19, %v10033_v2  ;;  %v3129_v17 = vsub.f32 %v3121_v4, %v10036_v12 }
0x1213   :  { %v3088_v18 = vpop.permute.xlu1 %3087  ;;  %v3086_v41 = vpop.permute.xlu0 %3085 }
0x1214   :  { %v10116_v16 = vadd.f32 8.0, %v3130_v61  ;;  %v10118_v37 = vadd.f32 8.0, %v3129_v17  ;;  %v3124_v9 = vmul.f32 %v3116_v31, %v3088_v18  ;;  %v3123_v30 = vmul.f32 %v3115_v24, %v3086_v41 }
0x1216   :  { %v3146_v7 = vmul.f32 0.025, %v10116_v16  ;;  %v3145_v58 = vmul.f32 0.025, %v10118_v37  ;;  %v3132_v29 = vsub.f32 %v3124_v9, %v10047_v35  ;;  %v3131_v10 = vsub.f32 %v3123_v30, %v10050_v44 }
0x1217   :  { %v3092_v33 = vpop.permute.xlu1 %3091  ;;  %v3090_v51 = vpop.permute.xlu0 %3089 }
0x1218   :  { %v10124_v48 = vadd.f32 8.0, %v3132_v29  ;;  %v10126_v3 = vadd.f32 8.0, %v3131_v10  ;;  %v3126_v8 = vmul.f32 %v3118_v22, %v3092_v33  ;;  %v3125_v39 = vmul.f32 %v3117_v1, %v3090_v51 }
0x1219   :  { %v10129_v20 = vadd.f32 %v3146_v7, %v10033_v2  ;;  %v10132_v28 = vadd.f32 %v3145_v58, %v10036_v12 }
0x121a   :  { %v3148_v53 = vmul.f32 0.025, %v10124_v48  ;;  %v3147_v63 = vmul.f32 0.025, %v10126_v3  ;;  %v3134_v46 = vsub.f32 %v3126_v8, %v10063_v15  ;;  %v3133_v27 = vsub.f32 %v3125_v39, %v10066_v26 }
0x121b   :  { %3163 = vrot.lane.b32.xlu1 %v10129_v20, %s7033_s6  ;;  %3161 = vrot.lane.b32.xlu0 %v10132_v28, %s7033_s6  ;;  %v3096_v32 = vpop.permute.xlu1 %3095  ;;  %v3094_v59 = vpop.permute.xlu0 %3093 }
0x121c   :  { %v10142_v56 = vadd.f32 8.0, %v3134_v46  ;;  %v10144_v11 = vadd.f32 8.0, %v3133_v27  ;;  %v3128_v55 = vmul.f32 %v3120_v49, %v3096_v32  ;;  %v3127_v21 = vmul.f32 %v3119_v13, %v3094_v59 }
0x121d   :  { %v10147_v5 = vadd.f32 %v3148_v53, %v10047_v35  ;;  %v10150_v34 = vadd.f32 %v3147_v63, %v10050_v44 }
0x121e   :  { %v3150_v43 = vmul.f32 0.025, %v10142_v56  ;;  %v3149_v62 = vmul.f32 0.025, %v10144_v11  ;;  %v3136_v45 = vsub.f32 %v3128_v55, %v10073_v42  ;;  %v3135_v40 = vsub.f32 %v3127_v21, %v10076_v38 }
0x121f   :  { %3167 = vrot.lane.b32.xlu1 %v10147_v5, %s7033_s6  ;;  %3165 = vrot.lane.b32.xlu0 %v10150_v34, %s7033_s6 }
0x1220   :  { %v10160_v60 = vadd.f32 8.0, %v3136_v45  ;;  %v10162_v36 = vadd.f32 8.0, %v3135_v40  ;;  %v10165_v6 = vadd.f32 %v3150_v43, %v10063_v15  ;;  %v10168_v57 = vadd.f32 %v3149_v62, %v10066_v26 }
0x1222   :  { %v3152_v54 = vmul.f32 0.025, %v10160_v60  ;;  %v3151_v47 = vmul.f32 0.025, %v10162_v36 }
0x1223   :  { %3171 = vrot.lane.b32.xlu1 %v10165_v6, %s7033_s6  ;;  %3169 = vrot.lane.b32.xlu0 %v10168_v57, %s7033_s6 }
0x1224   :  { %v10177_v0 = vadd.f32 %v3152_v54, %v10073_v42  ;;  %v10180_v50 = vadd.f32 %v3151_v47, %v10076_v38 }
0x1227   :  { %3175 = vrot.lane.b32.xlu1 %v10177_v0, %s7033_s6  ;;  %3173 = vrot.lane.b32.xlu0 %v10180_v50, %s7033_s6 }
0x122b   :  { %3195 = vrot.lane.b32.xlu1 %v10129_v20, %s7034_s1  ;;  %3193 = vrot.lane.b32.xlu0 %v10132_v28, %s7034_s1 }
0x122f   :  { %3199 = vrot.lane.b32.xlu1 %v10147_v5, %s7034_s1  ;;  %3197 = vrot.lane.b32.xlu0 %v10150_v34, %s7034_s1 }
0x1233   :  { %3203 = vrot.lane.b32.xlu1 %v10165_v6, %s7034_s1  ;;  %3201 = vrot.lane.b32.xlu0 %v10168_v57, %s7034_s1 }
0x1237   :  { %3207 = vrot.lane.b32.xlu1 %v10177_v0, %s7034_s1  ;;  %3205 = vrot.lane.b32.xlu0 %v10180_v50, %s7034_s1 }
0x123b   :  { %3179 = vrot.lane.b32.xlu1 %v10129_v20, %s7035_s7  ;;  %3177 = vrot.lane.b32.xlu0 %v10132_v28, %s7035_s7 }
0x123f   :  { %3183 = vrot.lane.b32.xlu1 %v10147_v5, %s7035_s7  ;;  %3181 = vrot.lane.b32.xlu0 %v10150_v34, %s7035_s7 }
0x1243   :  { %3187 = vrot.lane.b32.xlu1 %v10165_v6, %s7035_s7  ;;  %3185 = vrot.lane.b32.xlu0 %v10168_v57, %s7035_s7 }
0x1247   :  { %3191 = vrot.lane.b32.xlu1 %v10177_v0, %s7035_s7  ;;  %3189 = vrot.lane.b32.xlu0 %v10180_v50, %s7035_s7 }
0x128d   :  { %v3164_v52 = vpop.permute.xlu1 %3163  ;;  %v3162_v23 = vpop.permute.xlu0 %3161 }
0x1291   :  { %v3168_v25 = vpop.permute.xlu1 %3167  ;;  %v3166_v14 = vpop.permute.xlu0 %3165 }
0x1295   :  { %v3172_v19 = vpop.permute.xlu1 %3171  ;;  %v3170_v4 = vpop.permute.xlu0 %3169 }
0x1299   :  { %v3176_v31 = vpop.permute.xlu1 %3175  ;;  %v3174_v24 = vpop.permute.xlu0 %3173 }
0x129d   :  { %v3196_v61 = vpop.permute.xlu1 %3195  ;;  %v3194_v17 = vpop.permute.xlu0 %3193 }
0x129e   :  { %v3210_v7 = vsub.f32 %v3164_v52, %v3196_v61  ;;  %v3209_v58 = vsub.f32 %v3162_v23, %v3194_v17 }
0x12a1   :  { %v3200_v18 = vpop.permute.xlu1 %3199  ;;  %v3198_v41 = vpop.permute.xlu0 %3197 }
0x12a2   :  { %v3212_v8 = vsub.f32 %v3168_v25, %v3200_v18  ;;  %v3211_v39 = vsub.f32 %v3166_v14, %v3198_v41 }
0x12a5   :  { %v3204_v9 = vpop.permute.xlu1 %3203  ;;  %v3202_v30 = vpop.permute.xlu0 %3201 }
0x12a6   :  { %v3214_v55 = vsub.f32 %v3172_v19, %v3204_v9  ;;  %v3213_v21 = vsub.f32 %v3170_v4, %v3202_v30 }
0x12a9   :  { %v3208_v22 = vpop.permute.xlu1 %3207  ;;  %v3206_v1 = vpop.permute.xlu0 %3205 }
0x12aa   :  { %v3216_v19 = vsub.f32 %v3176_v31, %v3208_v22  ;;  %v3215_v4 = vsub.f32 %v3174_v24, %v3206_v1 }
0x12ad   :  { %v3180_v29 = vpop.permute.xlu1 %3179  ;;  %v3178_v10 = vpop.permute.xlu0 %3177 }
0x12ae   :  { %v3218_v33 = vmul.f32 %v3210_v7, %v3180_v29  ;;  %v3217_v51 = vmul.f32 %v3209_v58, %v3178_v10 }
0x12b0   :  { %v3226_v49 = vsub.f32 %v3218_v33, %v10129_v20  ;;  %v3225_v13 = vsub.f32 %v3217_v51, %v10132_v28 }
0x12b1   :  { %v3184_v53 = vpop.permute.xlu1 %3183  ;;  %v3182_v63 = vpop.permute.xlu0 %3181 }
0x12b2   :  { %v10220_v46 = vadd.f32 8.0, %v3226_v49  ;;  %v10222_v27 = vadd.f32 8.0, %v3225_v13  ;;  %v3220_v32 = vmul.f32 %v3212_v8, %v3184_v53  ;;  %v3219_v59 = vmul.f32 %v3211_v39, %v3182_v63 }
0x12b4   :  { %v3258_v43 = vmul.f32 0.025, %v10220_v46  ;;  %v3257_v62 = vmul.f32 0.025, %v10222_v27  ;;  %v3228_v45 = vsub.f32 %v3220_v32, %v10147_v5  ;;  %v3227_v20 = vsub.f32 %v3219_v59, %v10150_v34 }
0x12b5   :  { %v3188_v40 = vpop.permute.xlu1 %3187  ;;  %v3186_v28 = vpop.permute.xlu0 %3185 }
0x12b6   :  { %v3222_v54 = vmul.f32 %v3214_v55, %v3188_v40  ;;  %v3221_v47 = vmul.f32 %v3213_v21, %v3186_v28  ;;  %v10228_v52 = vadd.f32 8.0, %v3228_v45  ;;  %v10230_v23 = vadd.f32 8.0, %v3227_v20 }
0x12b7   :  { %v10233_v25 = vadd.f32 %v3258_v43, %v10033_v2  ;;  %v10236_v14 = vadd.f32 %v3257_v62, %v10036_v12 }
0x12b8   :  { %v3230_v5 = vsub.f32 %v3222_v54, %v10165_v6  ;;  %v3229_v34 = vsub.f32 %v3221_v47, %v10168_v57  ;;  %v3260_v61 = vmul.f32 0.025, %v10228_v52  ;;  %v3259_v17 = vmul.f32 0.025, %v10230_v23 }
0x12b9   :  { %3275 = vrot.lane.b32.xlu1 %v10233_v25, %s7033_s6  ;;  %3273 = vrot.lane.b32.xlu0 %v10236_v14, %s7033_s6  ;;  %v3192_v18 = vpop.permute.xlu1 %3191  ;;  %v3190_v41 = vpop.permute.xlu0 %3189 }
0x12ba   :  { %v10246_v9 = vadd.f32 8.0, %v3230_v5  ;;  %v10248_v31 = vadd.f32 8.0, %v3229_v34  ;;  %v3224_v24 = vmul.f32 %v3216_v19, %v3192_v18  ;;  %v3223_v6 = vmul.f32 %v3215_v4, %v3190_v41 }
0x12bb   :  { %v10251_v57 = vadd.f32 %v3260_v61, %v10047_v35  ;;  %v10254_v30 = vadd.f32 %v3259_v17, %v10050_v44  ;;  %v3242_v5 = vmul.f32 2.0, %v10220_v46  ;;  %v3241_v34 = vmul.f32 2.0, %v10222_v27 }
0x12bc   :  { %v3262_v22 = vmul.f32 0.025, %v10246_v9  ;;  %v3261_v1 = vmul.f32 0.025, %v10248_v31  ;;  %v3232_v7 = vsub.f32 %v3224_v24, %v10177_v0  ;;  %v3231_v58 = vsub.f32 %v3223_v6, %v10180_v50 }
0x12bd   :  { %3279 = vrot.lane.b32.xlu1 %v10251_v57, %s7033_s6  ;;  %3277 = vrot.lane.b32.xlu0 %v10254_v30, %s7033_s6  ;;  %v3244_v61 = vmul.f32 2.0, %v10228_v52  ;;  %v3243_v17 = vmul.f32 2.0, %v10230_v23  ;;  %v3250_v27 = vadd.f32 %v3242_v5, %v10116_v16  ;;  %v3249_v52 = vadd.f32 %v3241_v34, %v10118_v37 }
0x12be   :  { %v10265_v29 = vadd.f32 %v3262_v22, %v10063_v15  ;;  %v10268_v10 = vadd.f32 %v3261_v1, %v10066_v26  ;;  %v10270_v33 = vadd.f32 8.0, %v3232_v7  ;;  %v10272_v51 = vadd.f32 8.0, %v3231_v58 }
0x12bf   :  { %v3246_v22 = vmul.f32 2.0, %v10246_v9  ;;  %v3245_v1 = vmul.f32 2.0, %v10248_v31  ;;  %v3252_v23 = vadd.f32 %v3244_v61, %v10124_v48 }
0x12c0   :  { %v3264_v0 = vmul.f32 0.025, %v10270_v33  ;;  %v3263_v50 = vmul.f32 0.025, %v10272_v51  ;;  %v3248_v48 = vmul.f32 2.0, %v10270_v33 }
0x12c1   :  { %3283 = vrot.lane.b32.xlu1 %v10265_v29, %s7033_s6  ;;  %3281 = vrot.lane.b32.xlu0 %v10268_v10, %s7033_s6 }
0x12c2   :  { %v10281_v8 = vadd.f32 %v3264_v0, %v10073_v42  ;;  %v10284_v39 = vadd.f32 %v3263_v50, %v10076_v38  ;;  %v3251_v50 = vadd.f32 %v3243_v17, %v10126_v3 }
0x12c5   :  { %3287 = vrot.lane.b32.xlu1 %v10281_v8, %s7033_s6  ;;  %3285 = vrot.lane.b32.xlu0 %v10284_v39, %s7033_s6 }
0x12c9   :  { %3307 = vrot.lane.b32.xlu1 %v10233_v25, %s7034_s1  ;;  %3305 = vrot.lane.b32.xlu0 %v10236_v14, %s7034_s1 }
0x12cd   :  { %3311 = vrot.lane.b32.xlu1 %v10251_v57, %s7034_s1  ;;  %3309 = vrot.lane.b32.xlu0 %v10254_v30, %s7034_s1 }
0x12d1   :  { %3315 = vrot.lane.b32.xlu1 %v10265_v29, %s7034_s1  ;;  %3313 = vrot.lane.b32.xlu0 %v10268_v10, %s7034_s1 }
0x12d5   :  { %3319 = vrot.lane.b32.xlu1 %v10281_v8, %s7034_s1  ;;  %3317 = vrot.lane.b32.xlu0 %v10284_v39, %s7034_s1 }
0x12d9   :  { %3291 = vrot.lane.b32.xlu1 %v10233_v25, %s7035_s7  ;;  %3289 = vrot.lane.b32.xlu0 %v10236_v14, %s7035_s7 }
0x12dd   :  { %3295 = vrot.lane.b32.xlu1 %v10251_v57, %s7035_s7  ;;  %3293 = vrot.lane.b32.xlu0 %v10254_v30, %s7035_s7 }
0x12e1   :  { %3299 = vrot.lane.b32.xlu1 %v10265_v29, %s7035_s7  ;;  %3297 = vrot.lane.b32.xlu0 %v10268_v10, %s7035_s7 }
0x12e5   :  { %3303 = vrot.lane.b32.xlu1 %v10281_v8, %s7035_s7  ;;  %3301 = vrot.lane.b32.xlu0 %v10284_v39, %s7035_s7 }
0x132b   :  { %v3276_v49 = vpop.permute.xlu1 %3275  ;;  %v3274_v13 = vpop.permute.xlu0 %3273 }
0x132f   :  { %v3280_v53 = vpop.permute.xlu1 %3279  ;;  %v3278_v63 = vpop.permute.xlu0 %3277 }
0x1333   :  { %v3284_v32 = vpop.permute.xlu1 %3283  ;;  %v3282_v59 = vpop.permute.xlu0 %3281 }
0x1337   :  { %v10322_v55 = vpop.permute.xlu1 %3287  ;;  %v10324_v21 = vpop.permute.xlu0 %3285 }
0x133b   :  { %v3308_v43 = vpop.permute.xlu1 %3307  ;;  %v3306_v62 = vpop.permute.xlu0 %3305 }
0x133c   :  { %v3322_v19 = vsub.f32 %v3276_v49, %v3308_v43  ;;  %v3321_v4 = vsub.f32 %v3274_v13, %v3306_v62 }
0x133f   :  { %v3312_v45 = vpop.permute.xlu1 %3311  ;;  %v3310_v20 = vpop.permute.xlu0 %3309 }
0x1340   :  { %v3324_v7 = vsub.f32 %v3280_v53, %v3312_v45  ;;  %v3323_v58 = vsub.f32 %v3278_v63, %v3310_v20  ;;  %v3254_v53 = vadd.f32 %v3246_v22, %v10142_v56 }
0x1343   :  { %v3316_v40 = vpop.permute.xlu1 %3315  ;;  %v3314_v28 = vpop.permute.xlu0 %3313 }
0x1344   :  { %v3326_v63 = vsub.f32 %v3284_v32, %v3316_v40 }
0x1347   :  { %v10326_v54 = vpop.permute.xlu1 %3319  ;;  %v10328_v47 = vpop.permute.xlu0 %3317 }
0x1348   :  { %v3328_v3 = vsub.f32 %v10322_v55, %v10326_v54 }
0x134b   :  { %v3292_v18 = vpop.permute.xlu1 %3291  ;;  %v3290_v41 = vpop.permute.xlu0 %3289 }
0x134c   :  { %v3330_v24 = vmul.f32 %v3322_v19, %v3292_v18  ;;  %v3329_v6 = vmul.f32 %v3321_v4, %v3290_v41 }
0x134e   :  { %v3338_v0 = vsub.f32 %v3330_v24, %v10233_v25  ;;  %v3337_v46 = vsub.f32 %v3329_v6, %v10236_v14  ;;  %v3253_v25 = vadd.f32 %v3245_v1, %v10144_v11  ;;  %v3325_v14 = vsub.f32 %v3282_v59, %v3314_v28 }
0x134f   :  { %v3296_v49 = vpop.permute.xlu1 %3295  ;;  %v3294_v13 = vpop.permute.xlu0 %3293 }
0x1350   :  { %v3346_v43 = vadd.f32 8.0, %v3338_v0  ;;  %v3345_v9 = vadd.f32 8.0, %v3337_v46  ;;  %v3332_v62 = vmul.f32 %v3324_v7, %v3296_v49  ;;  %v3331_v31 = vmul.f32 %v3323_v58, %v3294_v13 }
0x1352   :  { %v3354_v45 = vmul.f32 2.0, %v3346_v43  ;;  %v3370_v16 = vmul.f32 0.05, %v3346_v43  ;;  %v3353_v20 = vmul.f32 2.0, %v3345_v9  ;;  %v3369_v37 = vmul.f32 0.05, %v3345_v9 }
0x1353   :  { %v3340_v19 = vsub.f32 %v3332_v62, %v10251_v57  ;;  %v3339_v4 = vsub.f32 %v3331_v31, %v10254_v30  ;;  %v3300_v5 = vpop.permute.xlu1 %3299  ;;  %v3298_v34 = vpop.permute.xlu0 %3297  ;;  %v3247_v57 = vmul.f32 2.0, %v10272_v51  ;;  %v3327_v30 = vsub.f32 %v10324_v21, %v10328_v47 }
0x1354   :  { %v3334_v56 = vmul.f32 %v3326_v63, %v3300_v5  ;;  %v3333_v61 = vmul.f32 %v3325_v14, %v3298_v34  ;;  %v10350_v11 = vadd.f32 %v3370_v16, %v10033_v2  ;;  %v10353_v32 = vadd.f32 %v3369_v37, %v10036_v12 }
0x1355   :  { %v3348_v59 = vadd.f32 8.0, %v3340_v19  ;;  %v3347_v40 = vadd.f32 8.0, %v3339_v4  ;;  %v10355_v33 = vadd.f32 %v3354_v45, %v3250_v27  ;;  %v10357_v28 = vadd.f32 %v3353_v20, %v3249_v52 }
0x1356   :  { %v3342_v55 = vsub.f32 %v3334_v56, %v10265_v29  ;;  %v3341_v54 = vsub.f32 %v3333_v61, %v10268_v10  ;;  %3387 = vrot.lane.b32.xlu1 %v10350_v11, %s7033_s6  ;;  %3385 = vrot.lane.b32.xlu0 %v10353_v32, %s7033_s6  ;;  %v3255_v31 = vadd.f32 %v3247_v57, %v10162_v36 }
0x1357   :  { %v3356_v17 = vmul.f32 2.0, %v3348_v59  ;;  %v3372_v18 = vmul.f32 0.05, %v3348_v59  ;;  %v3355_v41 = vmul.f32 2.0, %v3347_v40  ;;  %v3371_v24 = vmul.f32 0.05, %v3347_v40  ;;  %v3304_v6 = vpop.permute.xlu1 %3303  ;;  %v3302_v22 = vpop.permute.xlu0 %3301 }
0x1358   :  { %v3350_v51 = vadd.f32 8.0, %v3342_v55  ;;  %v3349_v1 = vadd.f32 8.0, %v3341_v54  ;;  %v3336_v7 = vmul.f32 %v3328_v3, %v3304_v6  ;;  %v3335_v21 = vmul.f32 %v3327_v30, %v3302_v22 }
0x1359   :  { %v10369_v29 = vadd.f32 %v3372_v18, %v10047_v35  ;;  %v10372_v10 = vadd.f32 %v3371_v24, %v10050_v44  ;;  %v10374_v47 = vadd.f32 %v3356_v17, %v3252_v23  ;;  %v10376_v58 = vadd.f32 %v3355_v41, %v3251_v50 }
0x135a   :  { %v3358_v0 = vmul.f32 2.0, %v3350_v51  ;;  %v3374_v46 = vmul.f32 0.05, %v3350_v51  ;;  %v3357_v27 = vmul.f32 2.0, %v3349_v1  ;;  %v3373_v52 = vmul.f32 0.05, %v3349_v1 }
0x135b   :  { %v3344_v49 = vsub.f32 %v3336_v7, %v10281_v8  ;;  %v3343_v13 = vsub.f32 %v3335_v21, %v10284_v39  ;;  %3391 = vrot.lane.b32.xlu1 %v10369_v29, %s7033_s6  ;;  %3389 = vrot.lane.b32.xlu0 %v10372_v10, %s7033_s6  ;;  %v3256_v39 = vadd.f32 %v3248_v48, %v10160_v60 }
0x135c   :  { %v10385_v43 = vadd.f32 %v3374_v46, %v10063_v15  ;;  %v10388_v23 = vadd.f32 %v3373_v52, %v10066_v26  ;;  %v10390_v50 = vadd.f32 %v3358_v0, %v3254_v53  ;;  %v10392_v9 = vadd.f32 %v3357_v27, %v3253_v25 }
0x135d   :  { %v3352_v62 = vadd.f32 8.0, %v3344_v49  ;;  %v3351_v8 = vadd.f32 8.0, %v3343_v13 }
0x135f   :  { %v3360_v63 = vmul.f32 2.0, %v3352_v62  ;;  %v3376_v14 = vmul.f32 0.05, %v3352_v62  ;;  %v3359_v45 = vmul.f32 2.0, %v3351_v8  ;;  %v3375_v16 = vmul.f32 0.05, %v3351_v8  ;;  %3395 = vrot.lane.b32.xlu1 %v10385_v43, %s7033_s6  ;;  %3393 = vrot.lane.b32.xlu0 %v10388_v23, %s7033_s6 }
0x1361   :  { %v10401_v53 = vadd.f32 %v3376_v14, %v10073_v42  ;;  %v10404_v25 = vadd.f32 %v3375_v16, %v10076_v38  ;;  %v10406_v20 = vadd.f32 %v3360_v63, %v3256_v39  ;;  %v10408_v60 = vadd.f32 %v3359_v45, %v3255_v31 }
0x1363   :  { %3399 = vrot.lane.b32.xlu1 %v10401_v53, %s7033_s6  ;;  %3397 = vrot.lane.b32.xlu0 %v10404_v25, %s7033_s6 }
0x1367   :  { %3419 = vrot.lane.b32.xlu1 %v10350_v11, %s7034_s1  ;;  %3417 = vrot.lane.b32.xlu0 %v10353_v32, %s7034_s1 }
0x136b   :  { %3423 = vrot.lane.b32.xlu1 %v10369_v29, %s7034_s1  ;;  %3421 = vrot.lane.b32.xlu0 %v10372_v10, %s7034_s1 }
0x136f   :  { %3427 = vrot.lane.b32.xlu1 %v10385_v43, %s7034_s1  ;;  %3425 = vrot.lane.b32.xlu0 %v10388_v23, %s7034_s1 }
0x1373   :  { %3431 = vrot.lane.b32.xlu1 %v10401_v53, %s7034_s1  ;;  %3429 = vrot.lane.b32.xlu0 %v10404_v25, %s7034_s1 }
0x1377   :  { %3403 = vrot.lane.b32.xlu1 %v10350_v11, %s7035_s7  ;;  %3401 = vrot.lane.b32.xlu0 %v10353_v32, %s7035_s7 }
0x137b   :  { %3407 = vrot.lane.b32.xlu1 %v10369_v29, %s7035_s7  ;;  %3405 = vrot.lane.b32.xlu0 %v10372_v10, %s7035_s7 }
0x137f   :  { %3411 = vrot.lane.b32.xlu1 %v10385_v43, %s7035_s7  ;;  %3409 = vrot.lane.b32.xlu0 %v10388_v23, %s7035_s7 }
0x1383   :  { %3415 = vrot.lane.b32.xlu1 %v10401_v53, %s7035_s7  ;;  %3413 = vrot.lane.b32.xlu0 %v10404_v25, %s7035_s7 }
0x13c8   :  { %v3388_v36 = vpop.permute.xlu1 %3387  ;;  %v3386_v37 = vpop.permute.xlu0 %3385 }
0x13cd   :  { %v3392_v48 = vpop.permute.xlu1 %3391  ;;  %v3390_v3 = vpop.permute.xlu0 %3389 }
0x13d1   :  { %v3396_v19 = vpop.permute.xlu1 %3395  ;;  %v3394_v4 = vpop.permute.xlu0 %3393 }
0x13d5   :  { %v3400_v5 = vpop.permute.xlu1 %3399  ;;  %v3398_v34 = vpop.permute.xlu0 %3397 }
0x13d9   :  { %v3420_v56 = vpop.permute.xlu1 %3419  ;;  %v3418_v61 = vpop.permute.xlu0 %3417 }
0x13da   :  { %v3434_v17 = vsub.f32 %v3388_v36, %v3420_v56  ;;  %v3433_v18 = vsub.f32 %v3386_v37, %v3418_v61 }
0x13dd   :  { %v3424_v59 = vpop.permute.xlu1 %3423  ;;  %v3422_v40 = vpop.permute.xlu0 %3421 }
0x13de   :  { %v3436_v51 = vsub.f32 %v3392_v48, %v3424_v59  ;;  %v3435_v1 = vsub.f32 %v3390_v3, %v3422_v40 }
0x13e1   :  { %v3428_v57 = vpop.permute.xlu1 %3427  ;;  %v3426_v30 = vpop.permute.xlu0 %3425 }
0x13e2   :  { %v3438_v63 = vsub.f32 %v3396_v19, %v3428_v57  ;;  %v3437_v14 = vsub.f32 %v3394_v4, %v3426_v30 }
0x13e5   :  { %v3432_v55 = vpop.permute.xlu1 %3431  ;;  %v3430_v54 = vpop.permute.xlu0 %3429 }
0x13e6   :  { %v3440_v48 = vsub.f32 %v3400_v5, %v3432_v55  ;;  %v3439_v3 = vsub.f32 %v3398_v34, %v3430_v54 }
0x13e9   :  { %v3404_v41 = vpop.permute.xlu1 %3403  ;;  %v3402_v24 = vpop.permute.xlu0 %3401 }
0x13ea   :  { %v3442_v6 = vmul.f32 %v3434_v17, %v3404_v41  ;;  %v3441_v22 = vmul.f32 %v3433_v18, %v3402_v24 }
0x13ec   :  { %v3450_v7 = vsub.f32 %v3442_v6, %v10350_v11  ;;  %v3449_v21 = vsub.f32 %v3441_v22, %v10353_v32 }
0x13ed   :  { %v3408_v0 = vpop.permute.xlu1 %3407  ;;  %v3406_v46 = vpop.permute.xlu0 %3405 }
0x13ee   :  { %v3458_v27 = vadd.f32 8.0, %v3450_v7  ;;  %v3457_v52 = vadd.f32 8.0, %v3449_v21  ;;  %v3444_v49 = vmul.f32 %v3436_v51, %v3408_v0  ;;  %v3443_v13 = vmul.f32 %v3435_v1, %v3406_v46 }
0x13f0   :  { %v3466_v62 = vadd.f32 %v3458_v27, %v10355_v33  ;;  %v3465_v8 = vadd.f32 %v3457_v52, %v10357_v28  ;;  %v3452_v39 = vsub.f32 %v3444_v49, %v10369_v29  ;;  %v3451_v31 = vsub.f32 %v3443_v13, %v10372_v10 }
0x13f1   :  { %v3412_v45 = vpop.permute.xlu1 %3411  ;;  %v3410_v11 = vpop.permute.xlu0 %3409 }
0x13f2   :  { %v3474_v16 = vmul.f32 0.008333334, %v3466_v62  ;;  %v3473_v32 = vmul.f32 0.008333334, %v3465_v8  ;;  %v3460_v36 = vadd.f32 8.0, %v3452_v39  ;;  %v3459_v37 = vadd.f32 8.0, %v3451_v31 }
0x13f3   :  { %v3446_v56 = vmul.f32 %v3438_v63, %v3412_v45  ;;  %v3445_v61 = vmul.f32 %v3437_v14, %v3410_v11 }
0x13f4   :  { %v10453_v33 = vadd.f32 %v3474_v16, %v10033_v2  ;;  %v10456_v28 = vadd.f32 %v3473_v32, %v10036_v12  ;;  %v3468_v29 = vadd.f32 %v3460_v36, %v10374_v47  ;;  %v3467_v10 = vadd.f32 %v3459_v37, %v10376_v58 }
0x13f5   :  { %v3454_v19 = vsub.f32 %v3446_v56, %v10385_v43  ;;  %v3453_v4 = vsub.f32 %v3445_v61, %v10388_v23  ;;  %v3416_v59 = vpop.permute.xlu1 %3415  ;;  %v3414_v40 = vpop.permute.xlu0 %3413 }
0x13f6   :  { %v3476_v5 = vmul.f32 0.008333334, %v3468_v29  ;;  %v3475_v34 = vmul.f32 0.008333334, %v3467_v10  ;;  %v3448_v57 = vmul.f32 %v3440_v48, %v3416_v59  ;;  %v3447_v30 = vmul.f32 %v3439_v3, %v3414_v40  ;;  %3491 = vrot.lane.b32.xlu1 %v10453_v33, %s7033_s6  ;;  %3489 = vrot.lane.b32.xlu0 %v10456_v28, %s7033_s6 }
0x13f7   :  { %v3462_v2 = vadd.f32 8.0, %v3454_v19  ;;  %v3461_v12 = vadd.f32 8.0, %v3453_v4 }
0x13f8   :  { %v10467_v47 = vadd.f32 %v3476_v5, %v10047_v35  ;;  %v10470_v58 = vadd.f32 %v3475_v34, %v10050_v44  ;;  %v3456_v43 = vsub.f32 %v3448_v57, %v10401_v53  ;;  %v3455_v23 = vsub.f32 %v3447_v30, %v10404_v25 }
0x13f9   :  { %v3470_v55 = vadd.f32 %v3462_v2, %v10390_v50  ;;  %v3469_v54 = vadd.f32 %v3461_v12, %v10392_v9 }
0x13fa   :  { %v3464_v17 = vadd.f32 8.0, %v3456_v43  ;;  %v3463_v18 = vadd.f32 8.0, %v3455_v23  ;;  %3495 = vrot.lane.b32.xlu1 %v10467_v47, %s7033_s6  ;;  %3493 = vrot.lane.b32.xlu0 %v10470_v58, %s7033_s6 }
0x13fb   :  { %v3478_v35 = vmul.f32 0.008333334, %v3470_v55  ;;  %v3477_v41 = vmul.f32 0.008333334, %v3469_v54 }
0x13fc   :  { %v3472_v44 = vadd.f32 %v3464_v17, %v10406_v20  ;;  %v3471_v53 = vadd.f32 %v3463_v18, %v10408_v60 }
0x13fd   :  { %v10483_v25 = vadd.f32 %v3478_v35, %v10063_v15  ;;  %v10486_v50 = vadd.f32 %v3477_v41, %v10066_v26 }
0x13fe   :  { %v3480_v9 = vmul.f32 0.008333334, %v3472_v44  ;;  %v3479_v24 = vmul.f32 0.008333334, %v3471_v53 }
0x13ff   :  { %3499 = vrot.lane.b32.xlu1 %v10483_v25, %s7033_s6  ;;  %3497 = vrot.lane.b32.xlu0 %v10486_v50, %s7033_s6 }
0x1400   :  { %v10493_v6 = vadd.f32 %v3480_v9, %v10073_v42  ;;  %v10496_v20 = vadd.f32 %v3479_v24, %v10076_v38 }
0x1403   :  { %3503 = vrot.lane.b32.xlu1 %v10493_v6, %s7033_s6  ;;  %3501 = vrot.lane.b32.xlu0 %v10496_v20, %s7033_s6 }
0x1407   :  { %3523 = vrot.lane.b32.xlu1 %v10453_v33, %s7034_s1  ;;  %3521 = vrot.lane.b32.xlu0 %v10456_v28, %s7034_s1 }
0x140b   :  { %3527 = vrot.lane.b32.xlu1 %v10467_v47, %s7034_s1  ;;  %3525 = vrot.lane.b32.xlu0 %v10470_v58, %s7034_s1 }
0x140f   :  { %3531 = vrot.lane.b32.xlu1 %v10483_v25, %s7034_s1  ;;  %3529 = vrot.lane.b32.xlu0 %v10486_v50, %s7034_s1 }
0x1413   :  { %3535 = vrot.lane.b32.xlu1 %v10493_v6, %s7034_s1  ;;  %3533 = vrot.lane.b32.xlu0 %v10496_v20, %s7034_s1 }
0x1417   :  { %3507 = vrot.lane.b32.xlu1 %v10453_v33, %s7035_s7  ;;  %3505 = vrot.lane.b32.xlu0 %v10456_v28, %s7035_s7 }
0x141b   :  { %3511 = vrot.lane.b32.xlu1 %v10467_v47, %s7035_s7  ;;  %3509 = vrot.lane.b32.xlu0 %v10470_v58, %s7035_s7 }
0x141f   :  { %3515 = vrot.lane.b32.xlu1 %v10483_v25, %s7035_s7  ;;  %3513 = vrot.lane.b32.xlu0 %v10486_v50, %s7035_s7 }
0x1423   :  { %3519 = vrot.lane.b32.xlu1 %v10493_v6, %s7035_s7  ;;  %3517 = vrot.lane.b32.xlu0 %v10496_v20, %s7035_s7 }
0x1468   :  { %v3492_v15 = vpop.permute.xlu1 %3491  ;;  %v3490_v26 = vpop.permute.xlu0 %3489 }
0x146c   :  { %v3496_v42 = vpop.permute.xlu1 %3495  ;;  %v3494_v38 = vpop.permute.xlu0 %3493 }
0x1471   :  { %v3500_v60 = vpop.permute.xlu1 %3499  ;;  %v3498_v22 = vpop.permute.xlu0 %3497 }
0x1475   :  { %v3504_v51 = vpop.permute.xlu1 %3503  ;;  %v3502_v1 = vpop.permute.xlu0 %3501 }
0x1479   :  { %v3524_v7 = vpop.permute.xlu1 %3523  ;;  %v3522_v21 = vpop.permute.xlu0 %3521 }
0x147a   :  { %v3538_v62 = vsub.f32 %v3492_v15, %v3524_v7  ;;  %v3537_v8 = vsub.f32 %v3490_v26, %v3522_v21 }
0x147d   :  { %v3528_v0 = vpop.permute.xlu1 %3527  ;;  %v3526_v46 = vpop.permute.xlu0 %3525 }
0x147e   :  { %v3540_v45 = vsub.f32 %v3496_v42, %v3528_v0  ;;  %v3539_v11 = vsub.f32 %v3494_v38, %v3526_v46 }
0x1481   :  { %v3532_v27 = vpop.permute.xlu1 %3531  ;;  %v3530_v52 = vpop.permute.xlu0 %3529 }
0x1482   :  { %v3542_v29 = vsub.f32 %v3500_v60, %v3532_v27  ;;  %v3541_v10 = vsub.f32 %v3498_v22, %v3530_v52 }
0x1485   :  { %v3536_v49 = vpop.permute.xlu1 %3535  ;;  %v3534_v13 = vpop.permute.xlu0 %3533 }
0x1486   :  { %v3544_v43 = vsub.f32 %v3504_v51, %v3536_v49  ;;  %v3543_v23 = vsub.f32 %v3502_v1, %v3534_v13 }
0x1489   :  { %v3508_v39 = vpop.permute.xlu1 %3507  ;;  %v3506_v31 = vpop.permute.xlu0 %3505 }
0x148a   :  { %v3546_v63 = vmul.f32 %v3538_v62, %v3508_v39  ;;  %v3545_v14 = vmul.f32 %v3537_v8, %v3506_v31 }
0x148c   :  { %v3554_v16 = vsub.f32 %v3546_v63, %v10453_v33  ;;  %v3553_v32 = vsub.f32 %v3545_v14, %v10456_v28 }
0x148d   :  { %v3512_v36 = vpop.permute.xlu1 %3511  ;;  %v3510_v37 = vpop.permute.xlu0 %3509 }
0x148e   :  { %v10536_v48 = vadd.f32 8.0, %v3554_v16  ;;  %v10538_v3 = vadd.f32 8.0, %v3553_v32  ;;  %v3548_v56 = vmul.f32 %v3540_v45, %v3512_v36  ;;  %v3547_v61 = vmul.f32 %v3539_v11, %v3510_v37 }
0x1490   :  { %v3570_v19 = vmul.f32 0.025, %v10536_v48  ;;  %v3569_v4 = vmul.f32 0.025, %v10538_v3  ;;  %v3556_v59 = vsub.f32 %v3548_v56, %v10467_v47  ;;  %v3555_v40 = vsub.f32 %v3547_v61, %v10470_v58 }
0x1491   :  { %v3516_v5 = vpop.permute.xlu1 %3515  ;;  %v3514_v34 = vpop.permute.xlu0 %3513 }
0x1492   :  { %v10544_v57 = vadd.f32 8.0, %v3556_v59  ;;  %v10546_v30 = vadd.f32 8.0, %v3555_v40  ;;  %v3550_v2 = vmul.f32 %v3542_v29, %v3516_v5  ;;  %v3549_v12 = vmul.f32 %v3541_v10, %v3514_v34 }
0x1493   :  { %v10549_v55 = vadd.f32 %v3570_v19, %v10453_v33  ;;  %v10552_v54 = vadd.f32 %v3569_v4, %v10456_v28 }
0x1494   :  { %v3572_v17 = vmul.f32 0.025, %v10544_v57  ;;  %v3571_v18 = vmul.f32 0.025, %v10546_v30  ;;  %v3558_v35 = vsub.f32 %v3550_v2, %v10483_v25  ;;  %v3557_v41 = vsub.f32 %v3549_v12, %v10486_v50 }
0x1495   :  { %3587 = vrot.lane.b32.xlu1 %v10549_v55, %s7033_s6  ;;  %3585 = vrot.lane.b32.xlu0 %v10552_v54, %s7033_s6  ;;  %v3520_v44 = vpop.permute.xlu1 %3519  ;;  %v3518_v53 = vpop.permute.xlu0 %3517 }
0x1496   :  { %v10562_v9 = vadd.f32 8.0, %v3558_v35  ;;  %v10564_v24 = vadd.f32 8.0, %v3557_v41  ;;  %v3552_v15 = vmul.f32 %v3544_v43, %v3520_v44  ;;  %v3551_v26 = vmul.f32 %v3543_v23, %v3518_v53 }
0x1497   :  { %v10567_v42 = vadd.f32 %v3572_v17, %v10467_v47  ;;  %v10570_v38 = vadd.f32 %v3571_v18, %v10470_v58 }
0x1498   :  { %v3574_v60 = vmul.f32 0.025, %v10562_v9  ;;  %v3573_v22 = vmul.f32 0.025, %v10564_v24  ;;  %v3560_v51 = vsub.f32 %v3552_v15, %v10493_v6  ;;  %v3559_v1 = vsub.f32 %v3551_v26, %v10496_v20 }
0x1499   :  { %3591 = vrot.lane.b32.xlu1 %v10567_v42, %s7033_s6  ;;  %3589 = vrot.lane.b32.xlu0 %v10570_v38, %s7033_s6 }
0x149a   :  { %v10580_v7 = vadd.f32 8.0, %v3560_v51  ;;  %v10582_v21 = vadd.f32 8.0, %v3559_v1  ;;  %v10585_v0 = vadd.f32 %v3574_v60, %v10483_v25  ;;  %v10588_v46 = vadd.f32 %v3573_v22, %v10486_v50 }
0x149c   :  { %v3576_v27 = vmul.f32 0.025, %v10580_v7  ;;  %v3575_v52 = vmul.f32 0.025, %v10582_v21 }
0x149d   :  { %3595 = vrot.lane.b32.xlu1 %v10585_v0, %s7033_s6  ;;  %3593 = vrot.lane.b32.xlu0 %v10588_v46, %s7033_s6 }
0x149e   :  { %v10597_v49 = vadd.f32 %v3576_v27, %v10493_v6  ;;  %v10600_v13 = vadd.f32 %v3575_v52, %v10496_v20 }
0x14a1   :  { %3599 = vrot.lane.b32.xlu1 %v10597_v49, %s7033_s6  ;;  %3597 = vrot.lane.b32.xlu0 %v10600_v13, %s7033_s6 }
0x14a5   :  { %3619 = vrot.lane.b32.xlu1 %v10549_v55, %s7034_s1  ;;  %3617 = vrot.lane.b32.xlu0 %v10552_v54, %s7034_s1 }
0x14a9   :  { %3623 = vrot.lane.b32.xlu1 %v10567_v42, %s7034_s1  ;;  %3621 = vrot.lane.b32.xlu0 %v10570_v38, %s7034_s1 }
0x14ad   :  { %3627 = vrot.lane.b32.xlu1 %v10585_v0, %s7034_s1  ;;  %3625 = vrot.lane.b32.xlu0 %v10588_v46, %s7034_s1 }
0x14b1   :  { %3631 = vrot.lane.b32.xlu1 %v10597_v49, %s7034_s1  ;;  %3629 = vrot.lane.b32.xlu0 %v10600_v13, %s7034_s1 }
0x14b5   :  { %3603 = vrot.lane.b32.xlu1 %v10549_v55, %s7035_s7  ;;  %3601 = vrot.lane.b32.xlu0 %v10552_v54, %s7035_s7 }
0x14b9   :  { %3607 = vrot.lane.b32.xlu1 %v10567_v42, %s7035_s7  ;;  %3605 = vrot.lane.b32.xlu0 %v10570_v38, %s7035_s7 }
0x14bd   :  { %3611 = vrot.lane.b32.xlu1 %v10585_v0, %s7035_s7  ;;  %3609 = vrot.lane.b32.xlu0 %v10588_v46, %s7035_s7 }
0x14c1   :  { %3615 = vrot.lane.b32.xlu1 %v10597_v49, %s7035_s7  ;;  %3613 = vrot.lane.b32.xlu0 %v10600_v13, %s7035_s7 }
0x1507   :  { %v3588_v62 = vpop.permute.xlu1 %3587  ;;  %v3586_v8 = vpop.permute.xlu0 %3585 }
0x150b   :  { %v3592_v39 = vpop.permute.xlu1 %3591  ;;  %v3590_v31 = vpop.permute.xlu0 %3589 }
0x150f   :  { %v3596_v63 = vpop.permute.xlu1 %3595  ;;  %v3594_v14 = vpop.permute.xlu0 %3593 }
0x1513   :  { %v3600_v45 = vpop.permute.xlu1 %3599  ;;  %v3598_v11 = vpop.permute.xlu0 %3597 }
0x1517   :  { %v3620_v16 = vpop.permute.xlu1 %3619  ;;  %v3618_v32 = vpop.permute.xlu0 %3617 }
0x1518   :  { %v3634_v19 = vsub.f32 %v3588_v62, %v3620_v16  ;;  %v3633_v4 = vsub.f32 %v3586_v8, %v3618_v32 }
0x151b   :  { %v3624_v36 = vpop.permute.xlu1 %3623  ;;  %v3622_v37 = vpop.permute.xlu0 %3621 }
0x151c   :  { %v3636_v2 = vsub.f32 %v3592_v39, %v3624_v36  ;;  %v3635_v12 = vsub.f32 %v3590_v31, %v3622_v37 }
0x151f   :  { %v3628_v56 = vpop.permute.xlu1 %3627  ;;  %v3626_v61 = vpop.permute.xlu0 %3625 }
0x1520   :  { %v3638_v15 = vsub.f32 %v3596_v63, %v3628_v56  ;;  %v3637_v26 = vsub.f32 %v3594_v14, %v3626_v61 }
0x1523   :  { %v3632_v29 = vpop.permute.xlu1 %3631  ;;  %v3630_v10 = vpop.permute.xlu0 %3629 }
0x1524   :  { %v3640_v63 = vsub.f32 %v3600_v45, %v3632_v29  ;;  %v3639_v14 = vsub.f32 %v3598_v11, %v3630_v10 }
0x1527   :  { %v3604_v59 = vpop.permute.xlu1 %3603  ;;  %v3602_v40 = vpop.permute.xlu0 %3601 }
0x1528   :  { %v3642_v5 = vmul.f32 %v3634_v19, %v3604_v59  ;;  %v3641_v34 = vmul.f32 %v3633_v4, %v3602_v40 }
0x152a   :  { %v3650_v43 = vsub.f32 %v3642_v5, %v10549_v55  ;;  %v3649_v23 = vsub.f32 %v3641_v34, %v10552_v54 }
0x152b   :  { %v3608_v17 = vpop.permute.xlu1 %3607  ;;  %v3606_v18 = vpop.permute.xlu0 %3605 }
0x152c   :  { %v10640_v35 = vadd.f32 8.0, %v3650_v43  ;;  %v10642_v41 = vadd.f32 8.0, %v3649_v23  ;;  %v3644_v44 = vmul.f32 %v3636_v2, %v3608_v17  ;;  %v3643_v53 = vmul.f32 %v3635_v12, %v3606_v18 }
0x152e   :  { %v3682_v60 = vmul.f32 0.025, %v10640_v35  ;;  %v3681_v22 = vmul.f32 0.025, %v10642_v41  ;;  %v3652_v51 = vsub.f32 %v3644_v44, %v10567_v42  ;;  %v3651_v55 = vsub.f32 %v3643_v53, %v10570_v38 }
0x152f   :  { %v3612_v1 = vpop.permute.xlu1 %3611  ;;  %v3610_v54 = vpop.permute.xlu0 %3609 }
0x1530   :  { %v3646_v27 = vmul.f32 %v3638_v15, %v3612_v1  ;;  %v3645_v52 = vmul.f32 %v3637_v26, %v3610_v54  ;;  %v10648_v62 = vadd.f32 8.0, %v3652_v51  ;;  %v10650_v8 = vadd.f32 8.0, %v3651_v55 }
0x1531   :  { %v10653_v39 = vadd.f32 %v3682_v60, %v10453_v33  ;;  %v10656_v31 = vadd.f32 %v3681_v22, %v10456_v28 }
0x1532   :  { %v3654_v42 = vsub.f32 %v3646_v27, %v10585_v0  ;;  %v3653_v38 = vsub.f32 %v3645_v52, %v10588_v46  ;;  %v3684_v16 = vmul.f32 0.025, %v10648_v62  ;;  %v3683_v32 = vmul.f32 0.025, %v10650_v8 }
0x1533   :  { %3699 = vrot.lane.b32.xlu1 %v10653_v39, %s7033_s6  ;;  %3697 = vrot.lane.b32.xlu0 %v10656_v31, %s7033_s6  ;;  %v3616_v36 = vpop.permute.xlu1 %3615  ;;  %v3614_v37 = vpop.permute.xlu0 %3613 }
0x1534   :  { %v10666_v56 = vadd.f32 8.0, %v3654_v42  ;;  %v10668_v45 = vadd.f32 8.0, %v3653_v38  ;;  %v3648_v11 = vmul.f32 %v3640_v63, %v3616_v36  ;;  %v3647_v0 = vmul.f32 %v3639_v14, %v3614_v37 }
0x1535   :  { %v10671_v46 = vadd.f32 %v3684_v16, %v10467_v47  ;;  %v10674_v61 = vadd.f32 %v3683_v32, %v10470_v58  ;;  %v3666_v42 = vmul.f32 2.0, %v10640_v35  ;;  %v3665_v38 = vmul.f32 2.0, %v10642_v41 }
0x1536   :  { %v3686_v29 = vmul.f32 0.025, %v10666_v56  ;;  %v3685_v10 = vmul.f32 0.025, %v10668_v45  ;;  %v3656_v19 = vsub.f32 %v3648_v11, %v10597_v49  ;;  %v3655_v4 = vsub.f32 %v3647_v0, %v10600_v13 }
0x1537   :  { %3703 = vrot.lane.b32.xlu1 %v10671_v46, %s7033_s6  ;;  %3701 = vrot.lane.b32.xlu0 %v10674_v61, %s7033_s6  ;;  %v3668_v16 = vmul.f32 2.0, %v10648_v62  ;;  %v3667_v32 = vmul.f32 2.0, %v10650_v8  ;;  %v3674_v41 = vadd.f32 %v3666_v42, %v10536_v48  ;;  %v3673_v62 = vadd.f32 %v3665_v38, %v10538_v3 }
0x1538   :  { %v10685_v59 = vadd.f32 %v3686_v29, %v10483_v25  ;;  %v10688_v40 = vadd.f32 %v3685_v10, %v10486_v50  ;;  %v10690_v5 = vadd.f32 8.0, %v3656_v19  ;;  %v10692_v34 = vadd.f32 8.0, %v3655_v4 }
0x1539   :  { %v3670_v29 = vmul.f32 2.0, %v10666_v56  ;;  %v3669_v10 = vmul.f32 2.0, %v10668_v45  ;;  %v3676_v8 = vadd.f32 %v3668_v16, %v10544_v57 }
0x153a   :  { %v3688_v49 = vmul.f32 0.025, %v10690_v5  ;;  %v3687_v13 = vmul.f32 0.025, %v10692_v34  ;;  %v3672_v57 = vmul.f32 2.0, %v10690_v5 }
0x153b   :  { %3707 = vrot.lane.b32.xlu1 %v10685_v59, %s7033_s6  ;;  %3705 = vrot.lane.b32.xlu0 %v10688_v40, %s7033_s6 }
0x153c   :  { %v10701_v2 = vadd.f32 %v3688_v49, %v10493_v6  ;;  %v10704_v12 = vadd.f32 %v3687_v13, %v10496_v20  ;;  %v3675_v13 = vadd.f32 %v3667_v32, %v10546_v30 }
0x153f   :  { %3711 = vrot.lane.b32.xlu1 %v10701_v2, %s7033_s6  ;;  %3709 = vrot.lane.b32.xlu0 %v10704_v12, %s7033_s6 }
0x1543   :  { %3731 = vrot.lane.b32.xlu1 %v10653_v39, %s7034_s1  ;;  %3729 = vrot.lane.b32.xlu0 %v10656_v31, %s7034_s1 }
0x1547   :  { %3735 = vrot.lane.b32.xlu1 %v10671_v46, %s7034_s1  ;;  %3733 = vrot.lane.b32.xlu0 %v10674_v61, %s7034_s1 }
0x154b   :  { %3739 = vrot.lane.b32.xlu1 %v10685_v59, %s7034_s1  ;;  %3737 = vrot.lane.b32.xlu0 %v10688_v40, %s7034_s1 }
0x154f   :  { %3743 = vrot.lane.b32.xlu1 %v10701_v2, %s7034_s1  ;;  %3741 = vrot.lane.b32.xlu0 %v10704_v12, %s7034_s1 }
0x1553   :  { %3715 = vrot.lane.b32.xlu1 %v10653_v39, %s7035_s7  ;;  %3713 = vrot.lane.b32.xlu0 %v10656_v31, %s7035_s7 }
0x1557   :  { %3719 = vrot.lane.b32.xlu1 %v10671_v46, %s7035_s7  ;;  %3717 = vrot.lane.b32.xlu0 %v10674_v61, %s7035_s7 }
0x155b   :  { %3723 = vrot.lane.b32.xlu1 %v10685_v59, %s7035_s7  ;;  %3721 = vrot.lane.b32.xlu0 %v10688_v40, %s7035_s7 }
0x155f   :  { %3727 = vrot.lane.b32.xlu1 %v10701_v2, %s7035_s7  ;;  %3725 = vrot.lane.b32.xlu0 %v10704_v12, %s7035_s7 }
0x15a5   :  { %v3700_v43 = vpop.permute.xlu1 %3699  ;;  %v3698_v23 = vpop.permute.xlu0 %3697 }
0x15a9   :  { %v3704_v17 = vpop.permute.xlu1 %3703  ;;  %v3702_v18 = vpop.permute.xlu0 %3701 }
0x15ad   :  { %v3708_v44 = vpop.permute.xlu1 %3707  ;;  %v3706_v53 = vpop.permute.xlu0 %3705 }
0x15b1   :  { %v10742_v15 = vpop.permute.xlu1 %3711  ;;  %v10744_v26 = vpop.permute.xlu0 %3709 }
0x15b5   :  { %v3732_v60 = vpop.permute.xlu1 %3731  ;;  %v3730_v22 = vpop.permute.xlu0 %3729 }
0x15b6   :  { %v3746_v63 = vsub.f32 %v3700_v43, %v3732_v60  ;;  %v3745_v14 = vsub.f32 %v3698_v23, %v3730_v22 }
0x15b9   :  { %v3736_v51 = vpop.permute.xlu1 %3735  ;;  %v3734_v55 = vpop.permute.xlu0 %3733 }
0x15ba   :  { %v3748_v19 = vsub.f32 %v3704_v17, %v3736_v51  ;;  %v3747_v4 = vsub.f32 %v3702_v18, %v3734_v55  ;;  %v3678_v17 = vadd.f32 %v3670_v29, %v10562_v9 }
0x15bd   :  { %v3740_v1 = vpop.permute.xlu1 %3739  ;;  %v3738_v54 = vpop.permute.xlu0 %3737 }
0x15be   :  { %v3750_v18 = vsub.f32 %v3708_v44, %v3740_v1 }
0x15c1   :  { %v10746_v27 = vpop.permute.xlu1 %3743  ;;  %v10748_v52 = vpop.permute.xlu0 %3741 }
0x15c2   :  { %v3752_v30 = vsub.f32 %v10742_v15, %v10746_v27 }
0x15c5   :  { %v3716_v36 = vpop.permute.xlu1 %3715  ;;  %v3714_v37 = vpop.permute.xlu0 %3713 }
0x15c6   :  { %v3754_v11 = vmul.f32 %v3746_v63, %v3716_v36  ;;  %v3753_v0 = vmul.f32 %v3745_v14, %v3714_v37 }
0x15c8   :  { %v3762_v49 = vsub.f32 %v3754_v11, %v10653_v39  ;;  %v3761_v35 = vsub.f32 %v3753_v0, %v10656_v31  ;;  %v3677_v39 = vadd.f32 %v3669_v10, %v10564_v24  ;;  %v3749_v31 = vsub.f32 %v3706_v53, %v3738_v54 }
0x15c9   :  { %v3720_v43 = vpop.permute.xlu1 %3719  ;;  %v3718_v23 = vpop.permute.xlu0 %3717 }
0x15ca   :  { %v3770_v60 = vadd.f32 8.0, %v3762_v49  ;;  %v3769_v56 = vadd.f32 8.0, %v3761_v35  ;;  %v3756_v22 = vmul.f32 %v3748_v19, %v3720_v43  ;;  %v3755_v45 = vmul.f32 %v3747_v4, %v3718_v23 }
0x15cc   :  { %v3778_v51 = vmul.f32 2.0, %v3770_v60  ;;  %v3794_v48 = vmul.f32 0.05, %v3770_v60  ;;  %v3777_v55 = vmul.f32 2.0, %v3769_v56  ;;  %v3793_v3 = vmul.f32 0.05, %v3769_v56 }
0x15cd   :  { %v3764_v63 = vsub.f32 %v3756_v22, %v10671_v46  ;;  %v3763_v14 = vsub.f32 %v3755_v45, %v10674_v61  ;;  %v3724_v42 = vpop.permute.xlu1 %3723  ;;  %v3722_v38 = vpop.permute.xlu0 %3721  ;;  %v3671_v46 = vmul.f32 2.0, %v10692_v34  ;;  %v3751_v61 = vsub.f32 %v10744_v26, %v10748_v52 }
0x15ce   :  { %v3758_v9 = vmul.f32 %v3750_v18, %v3724_v42  ;;  %v3757_v16 = vmul.f32 %v3749_v31, %v3722_v38  ;;  %v10770_v24 = vadd.f32 %v3794_v48, %v10453_v33  ;;  %v10773_v44 = vadd.f32 %v3793_v3, %v10456_v28 }
0x15cf   :  { %v3772_v53 = vadd.f32 8.0, %v3764_v63  ;;  %v3771_v1 = vadd.f32 8.0, %v3763_v14  ;;  %v10775_v5 = vadd.f32 %v3778_v51, %v3674_v41  ;;  %v10777_v54 = vadd.f32 %v3777_v55, %v3673_v62 }
0x15d0   :  { %v3766_v15 = vsub.f32 %v3758_v9, %v10685_v59  ;;  %v3765_v27 = vsub.f32 %v3757_v16, %v10688_v40  ;;  %3811 = vrot.lane.b32.xlu1 %v10770_v24, %s7033_s6  ;;  %3809 = vrot.lane.b32.xlu0 %v10773_v44, %s7033_s6  ;;  %v3679_v45 = vadd.f32 %v3671_v46, %v10582_v21 }
0x15d1   :  { %v3780_v32 = vmul.f32 2.0, %v3772_v53  ;;  %v3796_v36 = vmul.f32 0.05, %v3772_v53  ;;  %v3779_v37 = vmul.f32 2.0, %v3771_v1  ;;  %v3795_v11 = vmul.f32 0.05, %v3771_v1  ;;  %v3728_v0 = vpop.permute.xlu1 %3727  ;;  %v3726_v29 = vpop.permute.xlu0 %3725 }
0x15d2   :  { %v3774_v34 = vadd.f32 8.0, %v3766_v15  ;;  %v3773_v10 = vadd.f32 8.0, %v3765_v27  ;;  %v3760_v19 = vmul.f32 %v3752_v30, %v3728_v0  ;;  %v3759_v26 = vmul.f32 %v3751_v61, %v3726_v29 }
0x15d3   :  { %v10789_v59 = vadd.f32 %v3796_v36, %v10467_v47  ;;  %v10792_v40 = vadd.f32 %v3795_v11, %v10470_v58  ;;  %v10794_v52 = vadd.f32 %v3780_v32, %v3676_v8  ;;  %v10796_v4 = vadd.f32 %v3779_v37, %v3675_v13 }
0x15d4   :  { %v3782_v49 = vmul.f32 2.0, %v3774_v34  ;;  %v3798_v35 = vmul.f32 0.05, %v3774_v34  ;;  %v3781_v41 = vmul.f32 2.0, %v3773_v10  ;;  %v3797_v62 = vmul.f32 0.05, %v3773_v10 }
0x15d5   :  { %v3768_v43 = vsub.f32 %v3760_v19, %v10701_v2  ;;  %v3767_v23 = vsub.f32 %v3759_v26, %v10704_v12  ;;  %3815 = vrot.lane.b32.xlu1 %v10789_v59, %s7033_s6  ;;  %3813 = vrot.lane.b32.xlu0 %v10792_v40, %s7033_s6  ;;  %v3680_v12 = vadd.f32 %v3672_v57, %v10580_v7 }
0x15d6   :  { %v10805_v60 = vadd.f32 %v3798_v35, %v10483_v25  ;;  %v10808_v8 = vadd.f32 %v3797_v62, %v10486_v50  ;;  %v10810_v13 = vadd.f32 %v3782_v49, %v3678_v17  ;;  %v10812_v56 = vadd.f32 %v3781_v41, %v3677_v39 }
0x15d7   :  { %v3776_v22 = vadd.f32 8.0, %v3768_v43  ;;  %v3775_v2 = vadd.f32 8.0, %v3767_v23 }
0x15d9   :  { %v3784_v18 = vmul.f32 2.0, %v3776_v22  ;;  %v3800_v31 = vmul.f32 0.05, %v3776_v22  ;;  %v3783_v51 = vmul.f32 2.0, %v3775_v2  ;;  %v3799_v48 = vmul.f32 0.05, %v3775_v2  ;;  %3819 = vrot.lane.b32.xlu1 %v10805_v60, %s7033_s6  ;;  %3817 = vrot.lane.b32.xlu0 %v10808_v8, %s7033_s6 }
0x15db   :  { %v10821_v17 = vadd.f32 %v3800_v31, %v10493_v6  ;;  %v10824_v39 = vadd.f32 %v3799_v48, %v10496_v20  ;;  %v10826_v55 = vadd.f32 %v3784_v18, %v3680_v12  ;;  %v10828_v7 = vadd.f32 %v3783_v51, %v3679_v45 }
0x15dd   :  { %3823 = vrot.lane.b32.xlu1 %v10821_v17, %s7033_s6  ;;  %3821 = vrot.lane.b32.xlu0 %v10824_v39, %s7033_s6 }
0x15e1   :  { %3843 = vrot.lane.b32.xlu1 %v10770_v24, %s7034_s1  ;;  %3841 = vrot.lane.b32.xlu0 %v10773_v44, %s7034_s1 }
0x15e5   :  { %3847 = vrot.lane.b32.xlu1 %v10789_v59, %s7034_s1  ;;  %3845 = vrot.lane.b32.xlu0 %v10792_v40, %s7034_s1 }
0x15e9   :  { %3851 = vrot.lane.b32.xlu1 %v10805_v60, %s7034_s1  ;;  %3849 = vrot.lane.b32.xlu0 %v10808_v8, %s7034_s1 }
0x15ed   :  { %3855 = vrot.lane.b32.xlu1 %v10821_v17, %s7034_s1  ;;  %3853 = vrot.lane.b32.xlu0 %v10824_v39, %s7034_s1 }
0x15f1   :  { %3827 = vrot.lane.b32.xlu1 %v10770_v24, %s7035_s7  ;;  %3825 = vrot.lane.b32.xlu0 %v10773_v44, %s7035_s7 }
0x15f5   :  { %3831 = vrot.lane.b32.xlu1 %v10789_v59, %s7035_s7  ;;  %3829 = vrot.lane.b32.xlu0 %v10792_v40, %s7035_s7 }
0x15f9   :  { %3835 = vrot.lane.b32.xlu1 %v10805_v60, %s7035_s7  ;;  %3833 = vrot.lane.b32.xlu0 %v10808_v8, %s7035_s7 }
0x15fd   :  { %3839 = vrot.lane.b32.xlu1 %v10821_v17, %s7035_s7  ;;  %3837 = vrot.lane.b32.xlu0 %v10824_v39, %s7035_s7 }
0x1642   :  { %v3812_v21 = vpop.permute.xlu1 %3811  ;;  %v3810_v3 = vpop.permute.xlu0 %3809 }
0x1647   :  { %v3816_v57 = vpop.permute.xlu1 %3815  ;;  %v3814_v30 = vpop.permute.xlu0 %3813 }
0x164b   :  { %v3820_v63 = vpop.permute.xlu1 %3819  ;;  %v3818_v14 = vpop.permute.xlu0 %3817 }
0x164f   :  { %v10866_v42 = vpop.permute.xlu1 %3823  ;;  %v10868_v38 = vpop.permute.xlu0 %3821 }
0x1653   :  { %v3844_v9 = vpop.permute.xlu1 %3843  ;;  %v3842_v16 = vpop.permute.xlu0 %3841 }
0x1654   :  { %v3858_v32 = vsub.f32 %v3812_v21, %v3844_v9  ;;  %v3857_v36 = vsub.f32 %v3810_v3, %v3842_v16 }
0x1657   :  { %v3848_v53 = vpop.permute.xlu1 %3847  ;;  %v3846_v1 = vpop.permute.xlu0 %3845 }
0x1658   :  { %v3860_v34 = vsub.f32 %v3816_v57, %v3848_v53  ;;  %v3859_v10 = vsub.f32 %v3814_v30, %v3846_v1  ;;  %v3914_v57 = vld [vmem:[#allocation5 + $0x8] sm:$0xff]  ;;  %v3913_v30 = vld [vmem:[#allocation5] sm:$0xff] }
0x165b   :  { %v3852_v46 = vpop.permute.xlu1 %3851  ;;  %v3850_v61 = vpop.permute.xlu0 %3849 }
0x165c   :  { %v3862_v18 = vsub.f32 %v3820_v63, %v3852_v46  ;;  %v3861_v31 = vsub.f32 %v3818_v14, %v3850_v61 }
0x165f   :  { %v3856_v15 = vpop.permute.xlu1 %3855  ;;  %v3854_v27 = vpop.permute.xlu0 %3853 }
0x1660   :  { %v3864_v63 = vsub.f32 %v10866_v42, %v3856_v15  ;;  %v3863_v14 = vsub.f32 %v10868_v38, %v3854_v27 }
0x1663   :  { %v3828_v37 = vpop.permute.xlu1 %3827  ;;  %v3826_v11 = vpop.permute.xlu0 %3825 }
0x1664   :  { %v3866_v0 = vmul.f32 %v3858_v32, %v3828_v37  ;;  %v3865_v29 = vmul.f32 %v3857_v36, %v3826_v11 }
0x1666   :  { %v3874_v19 = vsub.f32 %v3866_v0, %v10770_v24  ;;  %v3873_v26 = vsub.f32 %v3865_v29, %v10773_v44 }
0x1667   :  { %v3832_v49 = vpop.permute.xlu1 %3831  ;;  %v3830_v35 = vpop.permute.xlu0 %3829 }
0x1668   :  { %v3882_v41 = vadd.f32 8.0, %v3874_v19  ;;  %v3881_v62 = vadd.f32 8.0, %v3873_v26  ;;  %v3868_v43 = vmul.f32 %v3860_v34, %v3832_v49  ;;  %v3867_v23 = vmul.f32 %v3859_v10, %v3830_v35 }
0x166a   :  { %v3890_v22 = vadd.f32 %v3882_v41, %v10775_v5  ;;  %v3889_v2 = vadd.f32 %v3881_v62, %v10777_v54  ;;  %v3876_v12 = vsub.f32 %v3868_v43, %v10789_v59  ;;  %v3875_v45 = vsub.f32 %v3867_v23, %v10792_v40 }
0x166b   :  { %v3836_v51 = vpop.permute.xlu1 %3835  ;;  %v3834_v24 = vpop.permute.xlu0 %3833 }
0x166c   :  { %v3898_v48 = vmul.f32 0.008333334, %v3890_v22  ;;  %v3897_v44 = vmul.f32 0.008333334, %v3889_v2  ;;  %v3884_v21 = vadd.f32 8.0, %v3876_v12  ;;  %v3883_v3 = vadd.f32 8.0, %v3875_v45 }
0x166d   :  { %v3870_v9 = vmul.f32 %v3862_v18, %v3836_v51  ;;  %v3869_v16 = vmul.f32 %v3861_v31, %v3834_v24  ;;  %v3919_v22 = vld [vmem:[#allocation5 + $0x30] sm:$0xff] }
0x166e   :  { %v10877_v5 = vadd.f32 %v3898_v48, %v10453_v33  ;;  %v10880_v54 = vadd.f32 %v3897_v44, %v10456_v28  ;;  %v3892_v59 = vadd.f32 %v3884_v21, %v10794_v52  ;;  %v3891_v40 = vadd.f32 %v3883_v3, %v10796_v4  ;;  %v3916_v52 = vld [vmem:[#allocation5 + $0x18] sm:$0xff]  ;;  %v3915_v4 = vld [vmem:[#allocation5 + $0x10] sm:$0xff] }
0x166f   :  { %v3878_v53 = vsub.f32 %v3870_v9, %v10805_v60  ;;  %v3877_v1 = vsub.f32 %v3869_v16, %v10808_v8  ;;  %v3840_v46 = vpop.permute.xlu1 %3839  ;;  %v3838_v61 = vpop.permute.xlu0 %3837 }
0x1670   :  { %v3922_v33 = vmul.f32 %v3914_v57, %v10877_v5  ;;  %v3921_v32 = vmul.f32 %v3913_v30, %v10880_v54  ;;  %v3900_v28 = vmul.f32 0.008333334, %v3892_v59  ;;  %v3899_v36 = vmul.f32 0.008333334, %v3891_v40  ;;  %3940 = vrot.lane.b32.xlu1 %v10877_v5, %s7033_s6  ;;  %3938 = vrot.lane.b32.xlu0 %v10880_v54, %s7033_s6 }
0x1671   :  { %v3886_v42 = vadd.f32 8.0, %v3878_v53  ;;  %v3885_v60 = vadd.f32 8.0, %v3877_v1  ;;  %v3872_v38 = vmul.f32 %v3864_v63, %v3840_v46  ;;  %v3871_v8 = vmul.f32 %v3863_v14, %v3838_v61 }
0x1672   :  { %3931 = vst [vmem:[#allocation7 + $0x88] sm:$0xff] %v3922_v33  ;;  %3930 = vst [vmem:[#allocation7 + $0x80] sm:$0xff] %v3921_v32  ;;  %v10895_v15 = vadd.f32 %v3900_v28, %v10467_v47  ;;  %v10898_v27 = vadd.f32 %v3899_v36, %v10470_v58 }
0x1673   :  { %v3894_v37 = vadd.f32 %v3886_v42, %v10810_v13  ;;  %v3893_v11 = vadd.f32 %v3885_v60, %v10812_v56  ;;  %v3880_v0 = vsub.f32 %v3872_v38, %v10821_v17  ;;  %v3879_v29 = vsub.f32 %v3871_v8, %v10824_v39  ;;  %v3918_v56 = vld [vmem:[#allocation5 + $0x28] sm:$0xff]  ;;  %v3917_v17 = vld [vmem:[#allocation5 + $0x20] sm:$0xff] }
0x1674   :  { %v3924_v34 = vmul.f32 %v3916_v52, %v10895_v15  ;;  %v3923_v10 = vmul.f32 %v3915_v4, %v10898_v27  ;;  %3944 = vrot.lane.b32.xlu1 %v10895_v15, %s7033_s6  ;;  %3942 = vrot.lane.b32.xlu0 %v10898_v27, %s7033_s6 }
0x1675   :  { %v3902_v47 = vmul.f32 0.008333334, %v3894_v37  ;;  %v3901_v58 = vmul.f32 0.008333334, %v3893_v11  ;;  %v3888_v19 = vadd.f32 8.0, %v3880_v0  ;;  %v3887_v13 = vadd.f32 8.0, %v3879_v29 }
0x1676   :  { %3933 = vst [vmem:[#allocation7 + $0x98] sm:$0xff] %v3924_v34  ;;  %3932 = vst [vmem:[#allocation7 + $0x90] sm:$0xff] %v3923_v10 }
0x1677   :  { %v10911_v39 = vadd.f32 %v3902_v47, %v10483_v25  ;;  %v10914_v26 = vadd.f32 %v3901_v58, %v10486_v50  ;;  %v3896_v49 = vadd.f32 %v3888_v19, %v10826_v55  ;;  %v3895_v35 = vadd.f32 %v3887_v13, %v10828_v7  ;;  %v3920_v25 = vld [vmem:[#allocation5 + $0x38] sm:$0xff] }
0x1679   :  { %v3926_v41 = vmul.f32 %v3918_v56, %v10911_v39  ;;  %v3925_v62 = vmul.f32 %v3917_v17, %v10914_v26  ;;  %v3904_v43 = vmul.f32 0.008333334, %v3896_v49  ;;  %v3903_v23 = vmul.f32 0.008333334, %v3895_v35  ;;  %3948 = vrot.lane.b32.xlu1 %v10911_v39, %s7033_s6  ;;  %3946 = vrot.lane.b32.xlu0 %v10914_v26, %s7033_s6 }
0x167b   :  { %3935 = vst [vmem:[#allocation7 + $0xa8] sm:$0xff] %v3926_v41  ;;  %3934 = vst [vmem:[#allocation7 + $0xa0] sm:$0xff] %v3925_v62  ;;  %v10925_v50 = vadd.f32 %v3904_v43, %v10493_v6  ;;  %v10928_v55 = vadd.f32 %v3903_v23, %v10496_v20 }
0x167d   :  { %v3928_v7 = vmul.f32 %v3920_v25, %v10925_v50  ;;  %v3927_v2 = vmul.f32 %v3919_v22, %v10928_v55  ;;  %3952 = vrot.lane.b32.xlu1 %v10925_v50, %s7033_s6  ;;  %3950 = vrot.lane.b32.xlu0 %v10928_v55, %s7033_s6 }
0x167f   :  { %3937 = vst [vmem:[#allocation7 + $0xb8] sm:$0xff] %v3928_v7  ;;  %3936 = vst [vmem:[#allocation7 + $0xb0] sm:$0xff] %v3927_v2 }
0x1681   :  { %3972 = vrot.lane.b32.xlu1 %v10877_v5, %s7034_s1  ;;  %3970 = vrot.lane.b32.xlu0 %v10880_v54, %s7034_s1 }
0x1685   :  { %3976 = vrot.lane.b32.xlu1 %v10895_v15, %s7034_s1  ;;  %3974 = vrot.lane.b32.xlu0 %v10898_v27, %s7034_s1 }
0x1689   :  { %3980 = vrot.lane.b32.xlu1 %v10911_v39, %s7034_s1  ;;  %3978 = vrot.lane.b32.xlu0 %v10914_v26, %s7034_s1 }
0x168d   :  { %3984 = vrot.lane.b32.xlu1 %v10925_v50, %s7034_s1  ;;  %3982 = vrot.lane.b32.xlu0 %v10928_v55, %s7034_s1 }
0x1691   :  { %3956 = vrot.lane.b32.xlu1 %v10877_v5, %s7035_s7  ;;  %3954 = vrot.lane.b32.xlu0 %v10880_v54, %s7035_s7 }
0x1695   :  { %3960 = vrot.lane.b32.xlu1 %v10895_v15, %s7035_s7  ;;  %3958 = vrot.lane.b32.xlu0 %v10898_v27, %s7035_s7 }
0x1699   :  { %3964 = vrot.lane.b32.xlu1 %v10911_v39, %s7035_s7  ;;  %3962 = vrot.lane.b32.xlu0 %v10914_v26, %s7035_s7 }
0x169d   :  { %3968 = vrot.lane.b32.xlu1 %v10925_v50, %s7035_s7  ;;  %3966 = vrot.lane.b32.xlu0 %v10928_v55, %s7035_s7 }
0x16e2   :  { %v3941_v6 = vpop.permute.xlu1 %3940  ;;  %v3939_v20 = vpop.permute.xlu0 %3938 }
0x16e6   :  { %v3945_v12 = vpop.permute.xlu1 %3944  ;;  %v3943_v45 = vpop.permute.xlu0 %3942 }
0x16eb   :  { %v3949_v18 = vpop.permute.xlu1 %3948  ;;  %v3947_v31 = vpop.permute.xlu0 %3946 }
0x16ef   :  { %v3953_v51 = vpop.permute.xlu1 %3952  ;;  %v3951_v24 = vpop.permute.xlu0 %3950 }
0x16f3   :  { %v3973_v48 = vpop.permute.xlu1 %3972  ;;  %v3971_v44 = vpop.permute.xlu0 %3970 }
0x16f4   :  { %v3987_v59 = vsub.f32 %v3941_v6, %v3973_v48  ;;  %v3986_v40 = vsub.f32 %v3939_v20, %v3971_v44 }
0x16f7   :  { %v3977_v21 = vpop.permute.xlu1 %3976  ;;  %v3975_v3 = vpop.permute.xlu0 %3974 }
0x16f8   :  { %v3989_v46 = vsub.f32 %v3945_v12, %v3977_v21  ;;  %v3988_v61 = vsub.f32 %v3943_v45, %v3975_v3 }
0x16fb   :  { %v3981_v57 = vpop.permute.xlu1 %3980  ;;  %v3979_v30 = vpop.permute.xlu0 %3978 }
0x16fc   :  { %v3991_v38 = vsub.f32 %v3949_v18, %v3981_v57  ;;  %v3990_v8 = vsub.f32 %v3947_v31, %v3979_v30 }
0x16ff   :  { %v3985_v9 = vpop.permute.xlu1 %3984  ;;  %v3983_v16 = vpop.permute.xlu0 %3982 }
0x1700   :  { %v3993_v56 = vsub.f32 %v3953_v51, %v3985_v9  ;;  %v3992_v17 = vsub.f32 %v3951_v24, %v3983_v16 }
0x1703   :  { %v3957_v63 = vpop.permute.xlu1 %3956  ;;  %v3955_v14 = vpop.permute.xlu0 %3954 }
0x1704   :  { %v3995_v53 = vmul.f32 %v3987_v59, %v3957_v63  ;;  %v3994_v1 = vmul.f32 %v3986_v40, %v3955_v14 }
0x1706   :  { %v4003_v33 = vsub.f32 %v3995_v53, %v10877_v5  ;;  %v4002_v32 = vsub.f32 %v3994_v1, %v10880_v54 }
0x1707   :  { %v3961_v28 = vpop.permute.xlu1 %3960  ;;  %v3959_v36 = vpop.permute.xlu0 %3958 }
0x1708   :  { %v10970_v52 = vadd.f32 8.0, %v4003_v33  ;;  %v10972_v4 = vadd.f32 8.0, %v4002_v32  ;;  %v3997_v42 = vmul.f32 %v3989_v46, %v3961_v28  ;;  %v3996_v60 = vmul.f32 %v3988_v61, %v3959_v36 }
0x170a   :  { %v4019_v37 = vmul.f32 0.025, %v10970_v52  ;;  %v4018_v11 = vmul.f32 0.025, %v10972_v4  ;;  %v4005_v0 = vsub.f32 %v3997_v42, %v10895_v15  ;;  %v4004_v29 = vsub.f32 %v3996_v60, %v10898_v27 }
0x170b   :  { %v3965_v34 = vpop.permute.xlu1 %3964  ;;  %v3963_v10 = vpop.permute.xlu0 %3962 }
0x170c   :  { %v10978_v47 = vadd.f32 8.0, %v4005_v0  ;;  %v10980_v58 = vadd.f32 8.0, %v4004_v29  ;;  %v3999_v19 = vmul.f32 %v3991_v38, %v3965_v34  ;;  %v3998_v13 = vmul.f32 %v3990_v8, %v3963_v10 }
0x170d   :  { %v10983_v49 = vadd.f32 %v4019_v37, %v10877_v5  ;;  %v10986_v35 = vadd.f32 %v4018_v11, %v10880_v54 }
0x170e   :  { %v4021_v41 = vmul.f32 0.025, %v10978_v47  ;;  %v4020_v62 = vmul.f32 0.025, %v10980_v58  ;;  %v4007_v43 = vsub.f32 %v3999_v19, %v10911_v39  ;;  %v4006_v23 = vsub.f32 %v3998_v13, %v10914_v26 }
0x170f   :  { %4036 = vrot.lane.b32.xlu1 %v10983_v49, %s7033_s6  ;;  %4034 = vrot.lane.b32.xlu0 %v10986_v35, %s7033_s6  ;;  %v3969_v25 = vpop.permute.xlu1 %3968  ;;  %v3967_v22 = vpop.permute.xlu0 %3966 }
0x1710   :  { %v10996_v7 = vadd.f32 8.0, %v4007_v43  ;;  %v10998_v2 = vadd.f32 8.0, %v4006_v23  ;;  %v4001_v6 = vmul.f32 %v3993_v56, %v3969_v25  ;;  %v4000_v20 = vmul.f32 %v3992_v17, %v3967_v22 }
0x1711   :  { %v11001_v12 = vadd.f32 %v4021_v41, %v10895_v15  ;;  %v11004_v45 = vadd.f32 %v4020_v62, %v10898_v27 }
0x1712   :  { %v4023_v18 = vmul.f32 0.025, %v10996_v7  ;;  %v4022_v31 = vmul.f32 0.025, %v10998_v2  ;;  %v4009_v51 = vsub.f32 %v4001_v6, %v10925_v50  ;;  %v4008_v24 = vsub.f32 %v4000_v20, %v10928_v55 }
0x1713   :  { %4040 = vrot.lane.b32.xlu1 %v11001_v12, %s7033_s6  ;;  %4038 = vrot.lane.b32.xlu0 %v11004_v45, %s7033_s6 }
0x1714   :  { %v11014_v48 = vadd.f32 8.0, %v4009_v51  ;;  %v11016_v44 = vadd.f32 8.0, %v4008_v24  ;;  %v11019_v21 = vadd.f32 %v4023_v18, %v10911_v39  ;;  %v11022_v3 = vadd.f32 %v4022_v31, %v10914_v26 }
0x1716   :  { %v4025_v57 = vmul.f32 0.025, %v11014_v48  ;;  %v4024_v30 = vmul.f32 0.025, %v11016_v44 }
0x1717   :  { %4044 = vrot.lane.b32.xlu1 %v11019_v21, %s7033_s6  ;;  %4042 = vrot.lane.b32.xlu0 %v11022_v3, %s7033_s6 }
0x1718   :  { %v11031_v9 = vadd.f32 %v4025_v57, %v10925_v50  ;;  %v11034_v16 = vadd.f32 %v4024_v30, %v10928_v55 }
0x171b   :  { %4048 = vrot.lane.b32.xlu1 %v11031_v9, %s7033_s6  ;;  %4046 = vrot.lane.b32.xlu0 %v11034_v16, %s7033_s6 }
0x171f   :  { %4068 = vrot.lane.b32.xlu1 %v10983_v49, %s7034_s1  ;;  %4066 = vrot.lane.b32.xlu0 %v10986_v35, %s7034_s1 }
0x1723   :  { %4072 = vrot.lane.b32.xlu1 %v11001_v12, %s7034_s1  ;;  %4070 = vrot.lane.b32.xlu0 %v11004_v45, %s7034_s1 }
0x1727   :  { %4076 = vrot.lane.b32.xlu1 %v11019_v21, %s7034_s1  ;;  %4074 = vrot.lane.b32.xlu0 %v11022_v3, %s7034_s1 }
0x172b   :  { %4080 = vrot.lane.b32.xlu1 %v11031_v9, %s7034_s1  ;;  %4078 = vrot.lane.b32.xlu0 %v11034_v16, %s7034_s1 }
0x172f   :  { %4052 = vrot.lane.b32.xlu1 %v10983_v49, %s7035_s7  ;;  %4050 = vrot.lane.b32.xlu0 %v10986_v35, %s7035_s7 }
0x1733   :  { %4056 = vrot.lane.b32.xlu1 %v11001_v12, %s7035_s7  ;;  %4054 = vrot.lane.b32.xlu0 %v11004_v45, %s7035_s7 }
0x1737   :  { %4060 = vrot.lane.b32.xlu1 %v11019_v21, %s7035_s7  ;;  %4058 = vrot.lane.b32.xlu0 %v11022_v3, %s7035_s7 }
0x173b   :  { %4064 = vrot.lane.b32.xlu1 %v11031_v9, %s7035_s7  ;;  %4062 = vrot.lane.b32.xlu0 %v11034_v16, %s7035_s7 }
0x1781   :  { %v4037_v59 = vpop.permute.xlu1 %4036  ;;  %v4035_v40 = vpop.permute.xlu0 %4034 }
0x1785   :  { %v4041_v63 = vpop.permute.xlu1 %4040  ;;  %v4039_v14 = vpop.permute.xlu0 %4038 }
0x1789   :  { %v4045_v53 = vpop.permute.xlu1 %4044  ;;  %v4043_v1 = vpop.permute.xlu0 %4042 }
0x178d   :  { %v4049_v46 = vpop.permute.xlu1 %4048  ;;  %v4047_v61 = vpop.permute.xlu0 %4046 }
0x1791   :  { %v4069_v33 = vpop.permute.xlu1 %4068  ;;  %v4067_v32 = vpop.permute.xlu0 %4066 }
0x1792   :  { %v4083_v37 = vsub.f32 %v4037_v59, %v4069_v33  ;;  %v4082_v11 = vsub.f32 %v4035_v40, %v4067_v32 }
0x1795   :  { %v4073_v28 = vpop.permute.xlu1 %4072  ;;  %v4071_v36 = vpop.permute.xlu0 %4070 }
0x1796   :  { %v4085_v19 = vsub.f32 %v4041_v63, %v4073_v28  ;;  %v4084_v13 = vsub.f32 %v4039_v14, %v4071_v36 }
0x1799   :  { %v4077_v42 = vpop.permute.xlu1 %4076  ;;  %v4075_v60 = vpop.permute.xlu0 %4074 }
0x179a   :  { %v4087_v6 = vsub.f32 %v4045_v53, %v4077_v42  ;;  %v4086_v20 = vsub.f32 %v4043_v1, %v4075_v60 }
0x179d   :  { %v4081_v38 = vpop.permute.xlu1 %4080  ;;  %v4079_v8 = vpop.permute.xlu0 %4078 }
0x179e   :  { %v4089_v53 = vsub.f32 %v4049_v46, %v4081_v38  ;;  %v4088_v1 = vsub.f32 %v4047_v61, %v4079_v8 }
0x17a1   :  { %v4053_v0 = vpop.permute.xlu1 %4052  ;;  %v4051_v29 = vpop.permute.xlu0 %4050 }
0x17a2   :  { %v4091_v34 = vmul.f32 %v4083_v37, %v4053_v0  ;;  %v4090_v10 = vmul.f32 %v4082_v11, %v4051_v29 }
0x17a4   :  { %v4099_v56 = vsub.f32 %v4091_v34, %v10983_v49  ;;  %v4098_v17 = vsub.f32 %v4090_v10, %v10986_v35 }
0x17a5   :  { %v4057_v41 = vpop.permute.xlu1 %4056  ;;  %v4055_v62 = vpop.permute.xlu0 %4054 }
0x17a6   :  { %v11074_v43 = vadd.f32 8.0, %v4099_v56  ;;  %v11076_v23 = vadd.f32 8.0, %v4098_v17  ;;  %v4093_v25 = vmul.f32 %v4085_v19, %v4057_v41  ;;  %v4092_v22 = vmul.f32 %v4084_v13, %v4055_v62 }
0x17a8   :  { %v4131_v18 = vmul.f32 0.025, %v11074_v43  ;;  %v4130_v31 = vmul.f32 0.025, %v11076_v23  ;;  %v4101_v51 = vsub.f32 %v4093_v25, %v11001_v12  ;;  %v4100_v49 = vsub.f32 %v4092_v22, %v11004_v45 }
0x17a9   :  { %v4061_v24 = vpop.permute.xlu1 %4060  ;;  %v4059_v35 = vpop.permute.xlu0 %4058 }
0x17aa   :  { %v4095_v57 = vmul.f32 %v4087_v6, %v4061_v24  ;;  %v4094_v30 = vmul.f32 %v4086_v20, %v4059_v35  ;;  %v11082_v59 = vadd.f32 8.0, %v4101_v51  ;;  %v11084_v40 = vadd.f32 8.0, %v4100_v49 }
0x17ab   :  { %v11087_v63 = vadd.f32 %v4131_v18, %v10877_v5  ;;  %v11090_v14 = vadd.f32 %v4130_v31, %v10880_v54 }
0x17ac   :  { %v4103_v12 = vsub.f32 %v4095_v57, %v11019_v21  ;;  %v4102_v45 = vsub.f32 %v4094_v30, %v11022_v3  ;;  %v4133_v33 = vmul.f32 0.025, %v11082_v59  ;;  %v4132_v32 = vmul.f32 0.025, %v11084_v40 }
0x17ad   :  { %4148 = vrot.lane.b32.xlu1 %v11087_v63, %s7033_s6  ;;  %4146 = vrot.lane.b32.xlu0 %v11090_v14, %s7033_s6  ;;  %v4065_v28 = vpop.permute.xlu1 %4064  ;;  %v4063_v36 = vpop.permute.xlu0 %4062 }
0x17ae   :  { %v11100_v42 = vadd.f32 8.0, %v4103_v12  ;;  %v11102_v46 = vadd.f32 8.0, %v4102_v45  ;;  %v4097_v61 = vmul.f32 %v4089_v53, %v4065_v28  ;;  %v4096_v21 = vmul.f32 %v4088_v1, %v4063_v36 }
0x17af   :  { %v11105_v3 = vadd.f32 %v4133_v33, %v10895_v15  ;;  %v11108_v60 = vadd.f32 %v4132_v32, %v10898_v27  ;;  %v4115_v12 = vmul.f32 2.0, %v11074_v43  ;;  %v4114_v45 = vmul.f32 2.0, %v11076_v23 }
0x17b0   :  { %v4135_v38 = vmul.f32 0.025, %v11100_v42  ;;  %v4134_v8 = vmul.f32 0.025, %v11102_v46  ;;  %v4105_v37 = vsub.f32 %v4097_v61, %v11031_v9  ;;  %v4104_v11 = vsub.f32 %v4096_v21, %v11034_v16 }
0x17b1   :  { %4152 = vrot.lane.b32.xlu1 %v11105_v3, %s7033_s6  ;;  %4150 = vrot.lane.b32.xlu0 %v11108_v60, %s7033_s6  ;;  %v4117_v33 = vmul.f32 2.0, %v11082_v59  ;;  %v4116_v32 = vmul.f32 2.0, %v11084_v40  ;;  %v4123_v23 = vadd.f32 %v4115_v12, %v10970_v52  ;;  %v4122_v59 = vadd.f32 %v4114_v45, %v10972_v4 }
0x17b2   :  { %v11119_v0 = vadd.f32 %v4135_v38, %v10911_v39  ;;  %v11122_v29 = vadd.f32 %v4134_v8, %v10914_v26  ;;  %v11124_v34 = vadd.f32 8.0, %v4105_v37  ;;  %v11126_v10 = vadd.f32 8.0, %v4104_v11 }
0x17b3   :  { %v4119_v38 = vmul.f32 2.0, %v11100_v42  ;;  %v4118_v8 = vmul.f32 2.0, %v11102_v46  ;;  %v4125_v40 = vadd.f32 %v4117_v33, %v10978_v47 }
0x17b4   :  { %v4137_v9 = vmul.f32 0.025, %v11124_v34  ;;  %v4136_v16 = vmul.f32 0.025, %v11126_v10  ;;  %v4121_v47 = vmul.f32 2.0, %v11124_v34 }
0x17b5   :  { %4156 = vrot.lane.b32.xlu1 %v11119_v0, %s7033_s6  ;;  %4154 = vrot.lane.b32.xlu0 %v11122_v29, %s7033_s6 }
0x17b6   :  { %v11135_v19 = vadd.f32 %v4137_v9, %v10925_v50  ;;  %v11138_v13 = vadd.f32 %v4136_v16, %v10928_v55  ;;  %v4124_v16 = vadd.f32 %v4116_v32, %v10980_v58 }
0x17b9   :  { %4160 = vrot.lane.b32.xlu1 %v11135_v19, %s7033_s6  ;;  %4158 = vrot.lane.b32.xlu0 %v11138_v13, %s7033_s6 }
0x17bd   :  { %4180 = vrot.lane.b32.xlu1 %v11087_v63, %s7034_s1  ;;  %4178 = vrot.lane.b32.xlu0 %v11090_v14, %s7034_s1 }
0x17c1   :  { %4184 = vrot.lane.b32.xlu1 %v11105_v3, %s7034_s1  ;;  %4182 = vrot.lane.b32.xlu0 %v11108_v60, %s7034_s1 }
0x17c5   :  { %4188 = vrot.lane.b32.xlu1 %v11119_v0, %s7034_s1  ;;  %4186 = vrot.lane.b32.xlu0 %v11122_v29, %s7034_s1 }
0x17c9   :  { %4192 = vrot.lane.b32.xlu1 %v11135_v19, %s7034_s1  ;;  %4190 = vrot.lane.b32.xlu0 %v11138_v13, %s7034_s1 }
0x17cd   :  { %4164 = vrot.lane.b32.xlu1 %v11087_v63, %s7035_s7  ;;  %4162 = vrot.lane.b32.xlu0 %v11090_v14, %s7035_s7 }
0x17d1   :  { %4168 = vrot.lane.b32.xlu1 %v11105_v3, %s7035_s7  ;;  %4166 = vrot.lane.b32.xlu0 %v11108_v60, %s7035_s7 }
0x17d5   :  { %4172 = vrot.lane.b32.xlu1 %v11119_v0, %s7035_s7  ;;  %4170 = vrot.lane.b32.xlu0 %v11122_v29, %s7035_s7 }
0x17d9   :  { %4176 = vrot.lane.b32.xlu1 %v11135_v19, %s7035_s7  ;;  %4174 = vrot.lane.b32.xlu0 %v11138_v13, %s7035_s7 }
0x181f   :  { %v4149_v56 = vpop.permute.xlu1 %4148  ;;  %v4147_v17 = vpop.permute.xlu0 %4146 }
0x1823   :  { %v4153_v41 = vpop.permute.xlu1 %4152  ;;  %v4151_v62 = vpop.permute.xlu0 %4150 }
0x1827   :  { %v4157_v25 = vpop.permute.xlu1 %4156  ;;  %v4155_v22 = vpop.permute.xlu0 %4154 }
0x182b   :  { %v11176_v6 = vpop.permute.xlu1 %4160  ;;  %v11178_v20 = vpop.permute.xlu0 %4158 }
0x182f   :  { %v4181_v18 = vpop.permute.xlu1 %4180  ;;  %v4179_v31 = vpop.permute.xlu0 %4178 }
0x1830   :  { %v4195_v53 = vsub.f32 %v4149_v56, %v4181_v18  ;;  %v4194_v1 = vsub.f32 %v4147_v17, %v4179_v31 }
0x1833   :  { %v4185_v51 = vpop.permute.xlu1 %4184  ;;  %v4183_v49 = vpop.permute.xlu0 %4182 }
0x1834   :  { %v4197_v37 = vsub.f32 %v4153_v41, %v4185_v51  ;;  %v4196_v11 = vsub.f32 %v4151_v62, %v4183_v49  ;;  %v4127_v41 = vadd.f32 %v4119_v38, %v10996_v7 }
0x1837   :  { %v4189_v24 = vpop.permute.xlu1 %4188  ;;  %v4187_v35 = vpop.permute.xlu0 %4186 }
0x1838   :  { %v4199_v62 = vsub.f32 %v4157_v25, %v4189_v24 }
0x183b   :  { %v11180_v57 = vpop.permute.xlu1 %4192  ;;  %v11182_v30 = vpop.permute.xlu0 %4190 }
0x183c   :  { %v4201_v58 = vsub.f32 %v11176_v6, %v11180_v57 }
0x183f   :  { %v4165_v28 = vpop.permute.xlu1 %4164  ;;  %v4163_v36 = vpop.permute.xlu0 %4162 }
0x1840   :  { %v4203_v61 = vmul.f32 %v4195_v53, %v4165_v28  ;;  %v4202_v21 = vmul.f32 %v4194_v1, %v4163_v36 }
0x1842   :  { %v4211_v9 = vsub.f32 %v4203_v61, %v11087_v63  ;;  %v4210_v43 = vsub.f32 %v4202_v21, %v11090_v14  ;;  %v4126_v63 = vadd.f32 %v4118_v8, %v10998_v2  ;;  %v4198_v14 = vsub.f32 %v4155_v22, %v4187_v35 }
0x1843   :  { %v4169_v56 = vpop.permute.xlu1 %4168  ;;  %v4167_v17 = vpop.permute.xlu0 %4166 }
0x1844   :  { %v4219_v18 = vadd.f32 8.0, %v4211_v9  ;;  %v4218_v42 = vadd.f32 8.0, %v4210_v43  ;;  %v4205_v31 = vmul.f32 %v4197_v37, %v4169_v56  ;;  %v4204_v46 = vmul.f32 %v4196_v11, %v4167_v17 }
0x1846   :  { %v4227_v51 = vmul.f32 2.0, %v4219_v18  ;;  %v4243_v52 = vmul.f32 0.05, %v4219_v18  ;;  %v4226_v49 = vmul.f32 2.0, %v4218_v42  ;;  %v4242_v4 = vmul.f32 0.05, %v4218_v42 }
0x1847   :  { %v4213_v53 = vsub.f32 %v4205_v31, %v11105_v3  ;;  %v4212_v1 = vsub.f32 %v4204_v46, %v11108_v60  ;;  %v4173_v12 = vpop.permute.xlu1 %4172  ;;  %v4171_v45 = vpop.permute.xlu0 %4170  ;;  %v4120_v3 = vmul.f32 2.0, %v11126_v10  ;;  %v4200_v60 = vsub.f32 %v11178_v20, %v11182_v30 }
0x1848   :  { %v4207_v7 = vmul.f32 %v4199_v62, %v4173_v12  ;;  %v4206_v33 = vmul.f32 %v4198_v14, %v4171_v45  ;;  %v11204_v2 = vadd.f32 %v4243_v52, %v10877_v5  ;;  %v11207_v25 = vadd.f32 %v4242_v4, %v10880_v54 }
0x1849   :  { %v4221_v22 = vadd.f32 8.0, %v4213_v53  ;;  %v4220_v24 = vadd.f32 8.0, %v4212_v1  ;;  %v11209_v34 = vadd.f32 %v4227_v51, %v4123_v23  ;;  %v11211_v35 = vadd.f32 %v4226_v49, %v4122_v59 }
0x184a   :  { %v4215_v6 = vsub.f32 %v4207_v7, %v11119_v0  ;;  %v4214_v57 = vsub.f32 %v4206_v33, %v11122_v29  ;;  %4260 = vrot.lane.b32.xlu1 %v11204_v2, %s7033_s6  ;;  %4258 = vrot.lane.b32.xlu0 %v11207_v25, %s7033_s6  ;;  %v4128_v46 = vadd.f32 %v4120_v3, %v11016_v44 }
0x184b   :  { %v4229_v32 = vmul.f32 2.0, %v4221_v22  ;;  %v4245_v28 = vmul.f32 0.05, %v4221_v22  ;;  %v4228_v36 = vmul.f32 2.0, %v4220_v24  ;;  %v4244_v61 = vmul.f32 0.05, %v4220_v24  ;;  %v4177_v21 = vpop.permute.xlu1 %4176  ;;  %v4175_v38 = vpop.permute.xlu0 %4174 }
0x184c   :  { %v4223_v10 = vadd.f32 8.0, %v4215_v6  ;;  %v4222_v8 = vadd.f32 8.0, %v4214_v57  ;;  %v4209_v37 = vmul.f32 %v4201_v58, %v4177_v21  ;;  %v4208_v20 = vmul.f32 %v4200_v60, %v4175_v38 }
0x184d   :  { %v11223_v0 = vadd.f32 %v4245_v28, %v10895_v15  ;;  %v11226_v29 = vadd.f32 %v4244_v61, %v10898_v27  ;;  %v11228_v30 = vadd.f32 %v4229_v32, %v4125_v40  ;;  %v11230_v11 = vadd.f32 %v4228_v36, %v4124_v16 }
0x184e   :  { %v4231_v9 = vmul.f32 2.0, %v4223_v10  ;;  %v4247_v43 = vmul.f32 0.05, %v4223_v10  ;;  %v4230_v23 = vmul.f32 2.0, %v4222_v8  ;;  %v4246_v59 = vmul.f32 0.05, %v4222_v8 }
0x184f   :  { %v4217_v56 = vsub.f32 %v4209_v37, %v11135_v19  ;;  %v4216_v17 = vsub.f32 %v4208_v20, %v11138_v13  ;;  %4264 = vrot.lane.b32.xlu1 %v11223_v0, %s7033_s6  ;;  %4262 = vrot.lane.b32.xlu0 %v11226_v29, %s7033_s6  ;;  %v4129_v13 = vadd.f32 %v4121_v47, %v11014_v48 }
0x1850   :  { %v11239_v18 = vadd.f32 %v4247_v43, %v10911_v39  ;;  %v11242_v40 = vadd.f32 %v4246_v59, %v10914_v26  ;;  %v11244_v16 = vadd.f32 %v4231_v9, %v4127_v41  ;;  %v11246_v42 = vadd.f32 %v4230_v23, %v4126_v63 }
0x1851   :  { %v4225_v31 = vadd.f32 8.0, %v4217_v56  ;;  %v4224_v19 = vadd.f32 8.0, %v4216_v17 }
0x1853   :  { %v4233_v62 = vmul.f32 2.0, %v4225_v31  ;;  %v4249_v14 = vmul.f32 0.05, %v4225_v31  ;;  %v4232_v51 = vmul.f32 2.0, %v4224_v19  ;;  %v4248_v52 = vmul.f32 0.05, %v4224_v19  ;;  %4268 = vrot.lane.b32.xlu1 %v11239_v18, %s7033_s6  ;;  %4266 = vrot.lane.b32.xlu0 %v11242_v40, %s7033_s6 }
0x1855   :  { %v11255_v41 = vadd.f32 %v4249_v14, %v10925_v50  ;;  %v11258_v63 = vadd.f32 %v4248_v52, %v10928_v55  ;;  %v11260_v49 = vadd.f32 %v4233_v62, %v4129_v13  ;;  %v11262_v48 = vadd.f32 %v4232_v51, %v4128_v46 }
0x1857   :  { %4272 = vrot.lane.b32.xlu1 %v11255_v41, %s7033_s6  ;;  %4270 = vrot.lane.b32.xlu0 %v11258_v63, %s7033_s6 }
0x185b   :  { %4292 = vrot.lane.b32.xlu1 %v11204_v2, %s7034_s1  ;;  %4290 = vrot.lane.b32.xlu0 %v11207_v25, %s7034_s1 }
0x185f   :  { %4296 = vrot.lane.b32.xlu1 %v11223_v0, %s7034_s1  ;;  %4294 = vrot.lane.b32.xlu0 %v11226_v29, %s7034_s1 }
0x1863   :  { %4300 = vrot.lane.b32.xlu1 %v11239_v18, %s7034_s1  ;;  %4298 = vrot.lane.b32.xlu0 %v11242_v40, %s7034_s1 }
0x1867   :  { %4304 = vrot.lane.b32.xlu1 %v11255_v41, %s7034_s1  ;;  %4302 = vrot.lane.b32.xlu0 %v11258_v63, %s7034_s1 }
0x186b   :  { %4276 = vrot.lane.b32.xlu1 %v11204_v2, %s7035_s7  ;;  %4274 = vrot.lane.b32.xlu0 %v11207_v25, %s7035_s7 }
0x186f   :  { %4280 = vrot.lane.b32.xlu1 %v11223_v0, %s7035_s7  ;;  %4278 = vrot.lane.b32.xlu0 %v11226_v29, %s7035_s7 }
0x1873   :  { %4284 = vrot.lane.b32.xlu1 %v11239_v18, %s7035_s7  ;;  %4282 = vrot.lane.b32.xlu0 %v11242_v40, %s7035_s7 }
0x1877   :  { %4288 = vrot.lane.b32.xlu1 %v11255_v41, %s7035_s7  ;;  %4286 = vrot.lane.b32.xlu0 %v11258_v63, %s7035_s7 }
0x18bc   :  { %v4261_v44 = vpop.permute.xlu1 %4260  ;;  %v4259_v4 = vpop.permute.xlu0 %4258 }
0x18c1   :  { %v4265_v47 = vpop.permute.xlu1 %4264  ;;  %v4263_v58 = vpop.permute.xlu0 %4262 }
0x18c5   :  { %v4269_v53 = vpop.permute.xlu1 %4268  ;;  %v4267_v1 = vpop.permute.xlu0 %4266 }
0x18c9   :  { %v4273_v12 = vpop.permute.xlu1 %4272  ;;  %v4271_v45 = vpop.permute.xlu0 %4270 }
0x18cd   :  { %v4293_v7 = vpop.permute.xlu1 %4292  ;;  %v4291_v33 = vpop.permute.xlu0 %4290 }
0x18ce   :  { %v4307_v32 = vsub.f32 %v4261_v44, %v4293_v7  ;;  %v4306_v28 = vsub.f32 %v4259_v4, %v4291_v33 }
0x18d1   :  { %v4297_v22 = vpop.permute.xlu1 %4296  ;;  %v4295_v24 = vpop.permute.xlu0 %4294 }
0x18d2   :  { %v4309_v10 = vsub.f32 %v4265_v47, %v4297_v22  ;;  %v4308_v8 = vsub.f32 %v4263_v58, %v4295_v24 }
0x18d5   :  { %v4301_v3 = vpop.permute.xlu1 %4300  ;;  %v4299_v60 = vpop.permute.xlu0 %4298 }
0x18d6   :  { %v4311_v62 = vsub.f32 %v4269_v53, %v4301_v3  ;;  %v4310_v14 = vsub.f32 %v4267_v1, %v4299_v60 }
0x18d9   :  { %v4305_v6 = vpop.permute.xlu1 %4304  ;;  %v4303_v57 = vpop.permute.xlu0 %4302 }
0x18da   :  { %v4313_v47 = vsub.f32 %v4273_v12, %v4305_v6  ;;  %v4312_v58 = vsub.f32 %v4271_v45, %v4303_v57 }
0x18dd   :  { %v4277_v36 = vpop.permute.xlu1 %4276  ;;  %v4275_v61 = vpop.permute.xlu0 %4274 }
0x18de   :  { %v4315_v21 = vmul.f32 %v4307_v32, %v4277_v36  ;;  %v4314_v38 = vmul.f32 %v4306_v28, %v4275_v61 }
0x18e0   :  { %v4323_v37 = vsub.f32 %v4315_v21, %v11204_v2  ;;  %v4322_v20 = vsub.f32 %v4314_v38, %v11207_v25 }
0x18e1   :  { %v4281_v9 = vpop.permute.xlu1 %4280  ;;  %v4279_v43 = vpop.permute.xlu0 %4278 }
0x18e2   :  { %v4331_v23 = vadd.f32 8.0, %v4323_v37  ;;  %v4330_v59 = vadd.f32 8.0, %v4322_v20  ;;  %v4317_v56 = vmul.f32 %v4309_v10, %v4281_v9  ;;  %v4316_v17 = vmul.f32 %v4308_v8, %v4279_v43 }
0x18e4   :  { %v4339_v31 = vadd.f32 %v4331_v23, %v11209_v34  ;;  %v4338_v19 = vadd.f32 %v4330_v59, %v11211_v35  ;;  %v4325_v13 = vsub.f32 %v4317_v56, %v11223_v0  ;;  %v4324_v46 = vsub.f32 %v4316_v17, %v11226_v29 }
0x18e5   :  { %v4285_v51 = vpop.permute.xlu1 %4284  ;;  %v4283_v2 = vpop.permute.xlu0 %4282 }
0x18e6   :  { %v4347_v52 = vmul.f32 0.008333334, %v4339_v31  ;;  %v4346_v25 = vmul.f32 0.008333334, %v4338_v19  ;;  %v4333_v44 = vadd.f32 8.0, %v4325_v13  ;;  %v4332_v4 = vadd.f32 8.0, %v4324_v46 }
0x18e7   :  { %v4319_v7 = vmul.f32 %v4311_v62, %v4285_v51  ;;  %v4318_v33 = vmul.f32 %v4310_v14, %v4283_v2 }
0x18e8   :  { %v11307_v34 = vadd.f32 %v4347_v52, %v10877_v5  ;;  %v11310_v35 = vadd.f32 %v4346_v25, %v10880_v54  ;;  %v4341_v0 = vadd.f32 %v4333_v44, %v11228_v30  ;;  %v4340_v29 = vadd.f32 %v4332_v4, %v11230_v11 }
0x18e9   :  { %v4327_v53 = vsub.f32 %v4319_v7, %v11239_v18  ;;  %v4326_v1 = vsub.f32 %v4318_v33, %v11242_v40  ;;  %v4289_v22 = vpop.permute.xlu1 %4288  ;;  %v4287_v24 = vpop.permute.xlu0 %4286 }
0x18ea   :  { %v4349_v12 = vmul.f32 0.008333334, %v4341_v0  ;;  %v4348_v45 = vmul.f32 0.008333334, %v4340_v29  ;;  %v4321_v3 = vmul.f32 %v4313_v47, %v4289_v22  ;;  %v4320_v60 = vmul.f32 %v4312_v58, %v4287_v24  ;;  %4364 = vrot.lane.b32.xlu1 %v11307_v34, %s7033_s6  ;;  %4362 = vrot.lane.b32.xlu0 %v11310_v35, %s7033_s6 }
0x18eb   :  { %v4335_v5 = vadd.f32 8.0, %v4327_v53  ;;  %v4334_v54 = vadd.f32 8.0, %v4326_v1 }
0x18ec   :  { %v11321_v30 = vadd.f32 %v4349_v12, %v10895_v15  ;;  %v11324_v11 = vadd.f32 %v4348_v45, %v10898_v27  ;;  %v4329_v18 = vsub.f32 %v4321_v3, %v11255_v41  ;;  %v4328_v40 = vsub.f32 %v4320_v60, %v11258_v63 }
0x18ed   :  { %v4343_v6 = vadd.f32 %v4335_v5, %v11244_v16  ;;  %v4342_v57 = vadd.f32 %v4334_v54, %v11246_v42 }
0x18ee   :  { %v4337_v32 = vadd.f32 8.0, %v4329_v18  ;;  %v4336_v28 = vadd.f32 8.0, %v4328_v40  ;;  %4368 = vrot.lane.b32.xlu1 %v11321_v30, %s7033_s6  ;;  %4366 = vrot.lane.b32.xlu0 %v11324_v11, %s7033_s6 }
0x18ef   :  { %v4351_v15 = vmul.f32 0.008333334, %v4343_v6  ;;  %v4350_v36 = vmul.f32 0.008333334, %v4342_v57 }
0x18f0   :  { %v4345_v27 = vadd.f32 %v4337_v32, %v11260_v49  ;;  %v4344_v41 = vadd.f32 %v4336_v28, %v11262_v48 }
0x18f1   :  { %v11337_v63 = vadd.f32 %v4351_v15, %v10911_v39  ;;  %v11340_v16 = vadd.f32 %v4350_v36, %v10914_v26 }
0x18f2   :  { %v4353_v42 = vmul.f32 0.008333334, %v4345_v27  ;;  %v4352_v61 = vmul.f32 0.008333334, %v4344_v41 }
0x18f3   :  { %4372 = vrot.lane.b32.xlu1 %v11337_v63, %s7033_s6  ;;  %4370 = vrot.lane.b32.xlu0 %v11340_v16, %s7033_s6 }
0x18f4   :  { %v11347_v21 = vadd.f32 %v4353_v42, %v10925_v50  ;;  %v11350_v49 = vadd.f32 %v4352_v61, %v10928_v55 }
0x18f7   :  { %4376 = vrot.lane.b32.xlu1 %v11347_v21, %s7033_s6  ;;  %4374 = vrot.lane.b32.xlu0 %v11350_v49, %s7033_s6 }
0x18fb   :  { %4396 = vrot.lane.b32.xlu1 %v11307_v34, %s7034_s1  ;;  %4394 = vrot.lane.b32.xlu0 %v11310_v35, %s7034_s1 }
0x18ff   :  { %4400 = vrot.lane.b32.xlu1 %v11321_v30, %s7034_s1  ;;  %4398 = vrot.lane.b32.xlu0 %v11324_v11, %s7034_s1 }
0x1903   :  { %4404 = vrot.lane.b32.xlu1 %v11337_v63, %s7034_s1  ;;  %4402 = vrot.lane.b32.xlu0 %v11340_v16, %s7034_s1 }
0x1907   :  { %4408 = vrot.lane.b32.xlu1 %v11347_v21, %s7034_s1  ;;  %4406 = vrot.lane.b32.xlu0 %v11350_v49, %s7034_s1 }
0x190b   :  { %4380 = vrot.lane.b32.xlu1 %v11307_v34, %s7035_s7  ;;  %4378 = vrot.lane.b32.xlu0 %v11310_v35, %s7035_s7 }
0x190f   :  { %4384 = vrot.lane.b32.xlu1 %v11321_v30, %s7035_s7  ;;  %4382 = vrot.lane.b32.xlu0 %v11324_v11, %s7035_s7 }
0x1913   :  { %4388 = vrot.lane.b32.xlu1 %v11337_v63, %s7035_s7  ;;  %4386 = vrot.lane.b32.xlu0 %v11340_v16, %s7035_s7 }
0x1917   :  { %4392 = vrot.lane.b32.xlu1 %v11347_v21, %s7035_s7  ;;  %4390 = vrot.lane.b32.xlu0 %v11350_v49, %s7035_s7 }
0x195c   :  { %v4365_v39 = vpop.permute.xlu1 %4364  ;;  %v4363_v26 = vpop.permute.xlu0 %4362 }
0x1960   :  { %v4369_v50 = vpop.permute.xlu1 %4368  ;;  %v4367_v55 = vpop.permute.xlu0 %4366 }
0x1965   :  { %v4373_v48 = vpop.permute.xlu1 %4372  ;;  %v4371_v38 = vpop.permute.xlu0 %4370 }
0x1969   :  { %v4377_v10 = vpop.permute.xlu1 %4376  ;;  %v4375_v8 = vpop.permute.xlu0 %4374 }
0x196d   :  { %v4397_v37 = vpop.permute.xlu1 %4396  ;;  %v4395_v20 = vpop.permute.xlu0 %4394 }
0x196e   :  { %v4411_v31 = vsub.f32 %v4365_v39, %v4397_v37  ;;  %v4410_v19 = vsub.f32 %v4363_v26, %v4395_v20 }
0x1971   :  { %v4401_v9 = vpop.permute.xlu1 %4400  ;;  %v4399_v43 = vpop.permute.xlu0 %4398 }
0x1972   :  { %v4413_v51 = vsub.f32 %v4369_v50, %v4401_v9  ;;  %v4412_v2 = vsub.f32 %v4367_v55, %v4399_v43 }
0x1975   :  { %v4405_v23 = vpop.permute.xlu1 %4404  ;;  %v4403_v59 = vpop.permute.xlu0 %4402 }
0x1976   :  { %v4415_v0 = vsub.f32 %v4373_v48, %v4405_v23  ;;  %v4414_v29 = vsub.f32 %v4371_v38, %v4403_v59 }
0x1979   :  { %v4409_v56 = vpop.permute.xlu1 %4408  ;;  %v4407_v17 = vpop.permute.xlu0 %4406 }
0x197a   :  { %v4417_v18 = vsub.f32 %v4377_v10, %v4409_v56  ;;  %v4416_v40 = vsub.f32 %v4375_v8, %v4407_v17 }
0x197d   :  { %v4381_v13 = vpop.permute.xlu1 %4380  ;;  %v4379_v46 = vpop.permute.xlu0 %4378 }
0x197e   :  { %v4419_v62 = vmul.f32 %v4411_v31, %v4381_v13  ;;  %v4418_v14 = vmul.f32 %v4410_v19, %v4379_v46 }
0x1980   :  { %v4427_v52 = vsub.f32 %v4419_v62, %v11307_v34  ;;  %v4426_v25 = vsub.f32 %v4418_v14, %v11310_v35 }
0x1981   :  { %v4385_v44 = vpop.permute.xlu1 %4384  ;;  %v4383_v4 = vpop.permute.xlu0 %4382 }
0x1982   :  { %v11390_v47 = vadd.f32 8.0, %v4427_v52  ;;  %v11392_v58 = vadd.f32 8.0, %v4426_v25  ;;  %v4421_v7 = vmul.f32 %v4413_v51, %v4385_v44  ;;  %v4420_v33 = vmul.f32 %v4412_v2, %v4383_v4 }
0x1984   :  { %v4443_v53 = vmul.f32 0.025, %v11390_v47  ;;  %v4442_v1 = vmul.f32 0.025, %v11392_v58  ;;  %v4429_v22 = vsub.f32 %v4421_v7, %v11321_v30  ;;  %v4428_v24 = vsub.f32 %v4420_v33, %v11324_v11 }
0x1985   :  { %v4389_v12 = vpop.permute.xlu1 %4388  ;;  %v4387_v45 = vpop.permute.xlu0 %4386 }
0x1986   :  { %v11398_v3 = vadd.f32 8.0, %v4429_v22  ;;  %v11400_v60 = vadd.f32 8.0, %v4428_v24  ;;  %v4423_v5 = vmul.f32 %v4415_v0, %v4389_v12  ;;  %v4422_v54 = vmul.f32 %v4414_v29, %v4387_v45 }
0x1987   :  { %v11403_v6 = vadd.f32 %v4443_v53, %v11307_v34  ;;  %v11406_v57 = vadd.f32 %v4442_v1, %v11310_v35 }
0x1988   :  { %v4445_v32 = vmul.f32 0.025, %v11398_v3  ;;  %v4444_v28 = vmul.f32 0.025, %v11400_v60  ;;  %v4431_v15 = vsub.f32 %v4423_v5, %v11337_v63  ;;  %v4430_v36 = vsub.f32 %v4422_v54, %v11340_v16 }
0x1989   :  { %4460 = vrot.lane.b32.xlu1 %v11403_v6, %s7033_s6  ;;  %4458 = vrot.lane.b32.xlu0 %v11406_v57, %s7033_s6  ;;  %v4393_v27 = vpop.permute.xlu1 %4392  ;;  %v4391_v41 = vpop.permute.xlu0 %4390 }
0x198a   :  { %v11416_v42 = vadd.f32 8.0, %v4431_v15  ;;  %v11418_v61 = vadd.f32 8.0, %v4430_v36  ;;  %v4425_v39 = vmul.f32 %v4417_v18, %v4393_v27  ;;  %v4424_v26 = vmul.f32 %v4416_v40, %v4391_v41 }
0x198b   :  { %v11421_v50 = vadd.f32 %v4445_v32, %v11321_v30  ;;  %v11424_v55 = vadd.f32 %v4444_v28, %v11324_v11 }
0x198c   :  { %v4447_v48 = vmul.f32 0.025, %v11416_v42  ;;  %v4446_v38 = vmul.f32 0.025, %v11418_v61  ;;  %v4433_v10 = vsub.f32 %v4425_v39, %v11347_v21  ;;  %v4432_v8 = vsub.f32 %v4424_v26, %v11350_v49 }
0x198d   :  { %4464 = vrot.lane.b32.xlu1 %v11421_v50, %s7033_s6  ;;  %4462 = vrot.lane.b32.xlu0 %v11424_v55, %s7033_s6 }
0x198e   :  { %v11434_v37 = vadd.f32 8.0, %v4433_v10  ;;  %v11436_v20 = vadd.f32 8.0, %v4432_v8  ;;  %v11439_v9 = vadd.f32 %v4447_v48, %v11337_v63  ;;  %v11442_v43 = vadd.f32 %v4446_v38, %v11340_v16 }
0x1990   :  { %v4449_v23 = vmul.f32 0.025, %v11434_v37  ;;  %v4448_v59 = vmul.f32 0.025, %v11436_v20 }
0x1991   :  { %4468 = vrot.lane.b32.xlu1 %v11439_v9, %s7033_s6  ;;  %4466 = vrot.lane.b32.xlu0 %v11442_v43, %s7033_s6 }
0x1992   :  { %v11451_v56 = vadd.f32 %v4449_v23, %v11347_v21  ;;  %v11454_v17 = vadd.f32 %v4448_v59, %v11350_v49 }
0x1995   :  { %4472 = vrot.lane.b32.xlu1 %v11451_v56, %s7033_s6  ;;  %4470 = vrot.lane.b32.xlu0 %v11454_v17, %s7033_s6 }
0x1999   :  { %4492 = vrot.lane.b32.xlu1 %v11403_v6, %s7034_s1  ;;  %4490 = vrot.lane.b32.xlu0 %v11406_v57, %s7034_s1 }
0x199d   :  { %4496 = vrot.lane.b32.xlu1 %v11421_v50, %s7034_s1  ;;  %4494 = vrot.lane.b32.xlu0 %v11424_v55, %s7034_s1 }
0x19a1   :  { %4500 = vrot.lane.b32.xlu1 %v11439_v9, %s7034_s1  ;;  %4498 = vrot.lane.b32.xlu0 %v11442_v43, %s7034_s1 }
0x19a5   :  { %4504 = vrot.lane.b32.xlu1 %v11451_v56, %s7034_s1  ;;  %4502 = vrot.lane.b32.xlu0 %v11454_v17, %s7034_s1 }
0x19a9   :  { %4476 = vrot.lane.b32.xlu1 %v11403_v6, %s7035_s7  ;;  %4474 = vrot.lane.b32.xlu0 %v11406_v57, %s7035_s7 }
0x19ad   :  { %4480 = vrot.lane.b32.xlu1 %v11421_v50, %s7035_s7  ;;  %4478 = vrot.lane.b32.xlu0 %v11424_v55, %s7035_s7 }
0x19b1   :  { %4484 = vrot.lane.b32.xlu1 %v11439_v9, %s7035_s7  ;;  %4482 = vrot.lane.b32.xlu0 %v11442_v43, %s7035_s7 }
0x19b5   :  { %4488 = vrot.lane.b32.xlu1 %v11451_v56, %s7035_s7  ;;  %4486 = vrot.lane.b32.xlu0 %v11454_v17, %s7035_s7 }
0x19fb   :  { %v4461_v31 = vpop.permute.xlu1 %4460  ;;  %v4459_v19 = vpop.permute.xlu0 %4458 }
0x19ff   :  { %v4465_v13 = vpop.permute.xlu1 %4464  ;;  %v4463_v46 = vpop.permute.xlu0 %4462 }
0x1a03   :  { %v4469_v62 = vpop.permute.xlu1 %4468  ;;  %v4467_v14 = vpop.permute.xlu0 %4466 }
0x1a07   :  { %v4473_v51 = vpop.permute.xlu1 %4472  ;;  %v4471_v2 = vpop.permute.xlu0 %4470 }
0x1a0b   :  { %v4493_v52 = vpop.permute.xlu1 %4492  ;;  %v4491_v25 = vpop.permute.xlu0 %4490 }
0x1a0c   :  { %v4507_v53 = vsub.f32 %v4461_v31, %v4493_v52  ;;  %v4506_v1 = vsub.f32 %v4459_v19, %v4491_v25 }
0x1a0f   :  { %v4497_v44 = vpop.permute.xlu1 %4496  ;;  %v4495_v4 = vpop.permute.xlu0 %4494 }
0x1a10   :  { %v4509_v5 = vsub.f32 %v4465_v13, %v4497_v44  ;;  %v4508_v54 = vsub.f32 %v4463_v46, %v4495_v4 }
0x1a13   :  { %v4501_v7 = vpop.permute.xlu1 %4500  ;;  %v4499_v33 = vpop.permute.xlu0 %4498 }
0x1a14   :  { %v4511_v39 = vsub.f32 %v4469_v62, %v4501_v7  ;;  %v4510_v26 = vsub.f32 %v4467_v14, %v4499_v33 }
0x1a17   :  { %v4505_v0 = vpop.permute.xlu1 %4504  ;;  %v4503_v29 = vpop.permute.xlu0 %4502 }
0x1a18   :  { %v4513_v62 = vsub.f32 %v4473_v51, %v4505_v0  ;;  %v4512_v14 = vsub.f32 %v4471_v2, %v4503_v29 }
0x1a1b   :  { %v4477_v22 = vpop.permute.xlu1 %4476  ;;  %v4475_v24 = vpop.permute.xlu0 %4474 }
0x1a1c   :  { %v4515_v12 = vmul.f32 %v4507_v53, %v4477_v22  ;;  %v4514_v45 = vmul.f32 %v4506_v1, %v4475_v24 }
0x1a1e   :  { %v4523_v18 = vsub.f32 %v4515_v12, %v11403_v6  ;;  %v4522_v40 = vsub.f32 %v4514_v45, %v11406_v57 }
0x1a1f   :  { %v4481_v32 = vpop.permute.xlu1 %4480  ;;  %v4479_v28 = vpop.permute.xlu0 %4478 }
0x1a20   :  { %v11494_v15 = vadd.f32 8.0, %v4523_v18  ;;  %v11496_v36 = vadd.f32 8.0, %v4522_v40  ;;  %v4517_v27 = vmul.f32 %v4509_v5, %v4481_v32  ;;  %v4516_v41 = vmul.f32 %v4508_v54, %v4479_v28 }
0x1a22   :  { %v4555_v48 = vmul.f32 0.025, %v11494_v15  ;;  %v4554_v38 = vmul.f32 0.025, %v11496_v36  ;;  %v4525_v10 = vsub.f32 %v4517_v27, %v11421_v50  ;;  %v4524_v6 = vsub.f32 %v4516_v41, %v11424_v55 }
0x1a23   :  { %v4485_v8 = vpop.permute.xlu1 %4484  ;;  %v4483_v57 = vpop.permute.xlu0 %4482 }
0x1a24   :  { %v4519_v23 = vmul.f32 %v4511_v39, %v4485_v8  ;;  %v4518_v59 = vmul.f32 %v4510_v26, %v4483_v57  ;;  %v11502_v31 = vadd.f32 8.0, %v4525_v10  ;;  %v11504_v19 = vadd.f32 8.0, %v4524_v6 }
0x1a25   :  { %v11507_v13 = vadd.f32 %v4555_v48, %v11307_v34  ;;  %v11510_v46 = vadd.f32 %v4554_v38, %v11310_v35 }
0x1a26   :  { %v4527_v50 = vsub.f32 %v4519_v23, %v11439_v9  ;;  %v4526_v55 = vsub.f32 %v4518_v59, %v11442_v43  ;;  %v4557_v52 = vmul.f32 0.025, %v11502_v31  ;;  %v4556_v25 = vmul.f32 0.025, %v11504_v19 }
0x1a27   :  { %4572 = vrot.lane.b32.xlu1 %v11507_v13, %s7033_s6  ;;  %4570 = vrot.lane.b32.xlu0 %v11510_v46, %s7033_s6  ;;  %v4489_v44 = vpop.permute.xlu1 %4488  ;;  %v4487_v4 = vpop.permute.xlu0 %4486 }
0x1a28   :  { %v11520_v7 = vadd.f32 8.0, %v4527_v50  ;;  %v11522_v51 = vadd.f32 8.0, %v4526_v55  ;;  %v4521_v2 = vmul.f32 %v4513_v62, %v4489_v44  ;;  %v4520_v9 = vmul.f32 %v4512_v14, %v4487_v4 }
0x1a29   :  { %v11525_v43 = vadd.f32 %v4557_v52, %v11321_v30  ;;  %v11528_v33 = vadd.f32 %v4556_v25, %v11324_v11  ;;  %v4539_v50 = vmul.f32 2.0, %v11494_v15  ;;  %v4538_v55 = vmul.f32 2.0, %v11496_v36 }
0x1a2a   :  { %v4559_v0 = vmul.f32 0.025, %v11520_v7  ;;  %v4558_v29 = vmul.f32 0.025, %v11522_v51  ;;  %v4529_v53 = vsub.f32 %v4521_v2, %v11451_v56  ;;  %v4528_v1 = vsub.f32 %v4520_v9, %v11454_v17 }
0x1a2b   :  { %4576 = vrot.lane.b32.xlu1 %v11525_v43, %s7033_s6  ;;  %4574 = vrot.lane.b32.xlu0 %v11528_v33, %s7033_s6  ;;  %v4541_v52 = vmul.f32 2.0, %v11502_v31  ;;  %v4540_v25 = vmul.f32 2.0, %v11504_v19  ;;  %v4547_v36 = vadd.f32 %v4539_v50, %v11390_v47  ;;  %v4546_v31 = vadd.f32 %v4538_v55, %v11392_v58 }
0x1a2c   :  { %v11539_v22 = vadd.f32 %v4559_v0, %v11337_v63  ;;  %v11542_v24 = vadd.f32 %v4558_v29, %v11340_v16  ;;  %v11544_v12 = vadd.f32 8.0, %v4529_v53  ;;  %v11546_v45 = vadd.f32 8.0, %v4528_v1 }
0x1a2d   :  { %v4543_v0 = vmul.f32 2.0, %v11520_v7  ;;  %v4542_v29 = vmul.f32 2.0, %v11522_v51  ;;  %v4549_v19 = vadd.f32 %v4541_v52, %v11398_v3 }
0x1a2e   :  { %v4561_v56 = vmul.f32 0.025, %v11544_v12  ;;  %v4560_v17 = vmul.f32 0.025, %v11546_v45  ;;  %v4545_v3 = vmul.f32 2.0, %v11544_v12 }
0x1a2f   :  { %4580 = vrot.lane.b32.xlu1 %v11539_v22, %s7033_s6  ;;  %4578 = vrot.lane.b32.xlu0 %v11542_v24, %s7033_s6 }
0x1a30   :  { %v11555_v5 = vadd.f32 %v4561_v56, %v11347_v21  ;;  %v11558_v54 = vadd.f32 %v4560_v17, %v11350_v49  ;;  %v4548_v17 = vadd.f32 %v4540_v25, %v11400_v60 }
0x1a33   :  { %4584 = vrot.lane.b32.xlu1 %v11555_v5, %s7033_s6  ;;  %4582 = vrot.lane.b32.xlu0 %v11558_v54, %s7033_s6 }
0x1a37   :  { %4604 = vrot.lane.b32.xlu1 %v11507_v13, %s7034_s1  ;;  %4602 = vrot.lane.b32.xlu0 %v11510_v46, %s7034_s1 }
0x1a3b   :  { %4608 = vrot.lane.b32.xlu1 %v11525_v43, %s7034_s1  ;;  %4606 = vrot.lane.b32.xlu0 %v11528_v33, %s7034_s1 }
0x1a3f   :  { %4612 = vrot.lane.b32.xlu1 %v11539_v22, %s7034_s1  ;;  %4610 = vrot.lane.b32.xlu0 %v11542_v24, %s7034_s1 }
0x1a43   :  { %4616 = vrot.lane.b32.xlu1 %v11555_v5, %s7034_s1  ;;  %4614 = vrot.lane.b32.xlu0 %v11558_v54, %s7034_s1 }
0x1a47   :  { %4588 = vrot.lane.b32.xlu1 %v11507_v13, %s7035_s7  ;;  %4586 = vrot.lane.b32.xlu0 %v11510_v46, %s7035_s7 }
0x1a4b   :  { %4592 = vrot.lane.b32.xlu1 %v11525_v43, %s7035_s7  ;;  %4590 = vrot.lane.b32.xlu0 %v11528_v33, %s7035_s7 }
0x1a4f   :  { %4596 = vrot.lane.b32.xlu1 %v11539_v22, %s7035_s7  ;;  %4594 = vrot.lane.b32.xlu0 %v11542_v24, %s7035_s7 }
0x1a53   :  { %4600 = vrot.lane.b32.xlu1 %v11555_v5, %s7035_s7  ;;  %4598 = vrot.lane.b32.xlu0 %v11558_v54, %s7035_s7 }
0x1a99   :  { %v4573_v18 = vpop.permute.xlu1 %4572  ;;  %v4571_v40 = vpop.permute.xlu0 %4570 }
0x1a9d   :  { %v4577_v32 = vpop.permute.xlu1 %4576  ;;  %v4575_v28 = vpop.permute.xlu0 %4574 }
0x1aa1   :  { %v4581_v27 = vpop.permute.xlu1 %4580  ;;  %v4579_v41 = vpop.permute.xlu0 %4578 }
0x1aa5   :  { %v11596_v39 = vpop.permute.xlu1 %4584  ;;  %v11598_v26 = vpop.permute.xlu0 %4582 }
0x1aa9   :  { %v4605_v48 = vpop.permute.xlu1 %4604  ;;  %v4603_v38 = vpop.permute.xlu0 %4602 }
0x1aaa   :  { %v4619_v62 = vsub.f32 %v4573_v18, %v4605_v48  ;;  %v4618_v14 = vsub.f32 %v4571_v40, %v4603_v38 }
0x1aad   :  { %v4609_v10 = vpop.permute.xlu1 %4608  ;;  %v4607_v6 = vpop.permute.xlu0 %4606 }
0x1aae   :  { %v4621_v53 = vsub.f32 %v4577_v32, %v4609_v10  ;;  %v4620_v1 = vsub.f32 %v4575_v28, %v4607_v6  ;;  %v4551_v32 = vadd.f32 %v4543_v0, %v11416_v42 }
0x1ab1   :  { %v4613_v8 = vpop.permute.xlu1 %4612  ;;  %v4611_v57 = vpop.permute.xlu0 %4610 }
0x1ab2   :  { %v4623_v28 = vsub.f32 %v4581_v27, %v4613_v8 }
0x1ab5   :  { %v11600_v23 = vpop.permute.xlu1 %4616  ;;  %v11602_v59 = vpop.permute.xlu0 %4614 }
0x1ab6   :  { %v4625_v60 = vsub.f32 %v11596_v39, %v11600_v23 }
0x1ab9   :  { %v4589_v44 = vpop.permute.xlu1 %4588  ;;  %v4587_v4 = vpop.permute.xlu0 %4586 }
0x1aba   :  { %v4627_v2 = vmul.f32 %v4619_v62, %v4589_v44  ;;  %v4626_v9 = vmul.f32 %v4618_v14, %v4587_v4 }
0x1abc   :  { %v4635_v56 = vsub.f32 %v4627_v2, %v11507_v13  ;;  %v4634_v15 = vsub.f32 %v4626_v9, %v11510_v46  ;;  %v4550_v13 = vadd.f32 %v4542_v29, %v11418_v61  ;;  %v4622_v46 = vsub.f32 %v4579_v41, %v4611_v57 }
0x1abd   :  { %v4593_v18 = vpop.permute.xlu1 %4592  ;;  %v4591_v40 = vpop.permute.xlu0 %4590 }
0x1abe   :  { %v4643_v48 = vadd.f32 8.0, %v4635_v56  ;;  %v4642_v7 = vadd.f32 8.0, %v4634_v15  ;;  %v4629_v38 = vmul.f32 %v4621_v53, %v4593_v18  ;;  %v4628_v51 = vmul.f32 %v4620_v1, %v4591_v40 }
0x1ac0   :  { %v4651_v10 = vmul.f32 2.0, %v4643_v48  ;;  %v4667_v47 = vmul.f32 0.05, %v4643_v48  ;;  %v4650_v6 = vmul.f32 2.0, %v4642_v7  ;;  %v4666_v58 = vmul.f32 0.05, %v4642_v7 }
0x1ac1   :  { %v4637_v62 = vsub.f32 %v4629_v38, %v11525_v43  ;;  %v4636_v14 = vsub.f32 %v4628_v51, %v11528_v33  ;;  %v4597_v50 = vpop.permute.xlu1 %4596  ;;  %v4595_v55 = vpop.permute.xlu0 %4594  ;;  %v4544_v43 = vmul.f32 2.0, %v11546_v45  ;;  %v4624_v33 = vsub.f32 %v11598_v26, %v11602_v59 }
0x1ac2   :  { %v4631_v42 = vmul.f32 %v4623_v28, %v4597_v50  ;;  %v4630_v52 = vmul.f32 %v4622_v46, %v4595_v55  ;;  %v11624_v61 = vadd.f32 %v4667_v47, %v11307_v34  ;;  %v11627_v27 = vadd.f32 %v4666_v58, %v11310_v35 }
0x1ac3   :  { %v4645_v41 = vadd.f32 8.0, %v4637_v62  ;;  %v4644_v8 = vadd.f32 8.0, %v4636_v14  ;;  %v11629_v12 = vadd.f32 %v4651_v10, %v4547_v36  ;;  %v11631_v57 = vadd.f32 %v4650_v6, %v4546_v31 }
0x1ac4   :  { %v4639_v39 = vsub.f32 %v4631_v42, %v11539_v22  ;;  %v4638_v23 = vsub.f32 %v4630_v52, %v11542_v24  ;;  %4684 = vrot.lane.b32.xlu1 %v11624_v61, %s7033_s6  ;;  %4682 = vrot.lane.b32.xlu0 %v11627_v27, %s7033_s6  ;;  %v4552_v51 = vadd.f32 %v4544_v43, %v11436_v20 }
0x1ac5   :  { %v4653_v25 = vmul.f32 2.0, %v4645_v41  ;;  %v4669_v44 = vmul.f32 0.05, %v4645_v41  ;;  %v4652_v4 = vmul.f32 2.0, %v4644_v8  ;;  %v4668_v2 = vmul.f32 0.05, %v4644_v8  ;;  %v4601_v9 = vpop.permute.xlu1 %4600  ;;  %v4599_v0 = vpop.permute.xlu0 %4598 }
0x1ac6   :  { %v4647_v45 = vadd.f32 8.0, %v4639_v39  ;;  %v4646_v29 = vadd.f32 8.0, %v4638_v23  ;;  %v4633_v53 = vmul.f32 %v4625_v60, %v4601_v9  ;;  %v4632_v26 = vmul.f32 %v4624_v33, %v4599_v0 }
0x1ac7   :  { %v11643_v22 = vadd.f32 %v4669_v44, %v11321_v30  ;;  %v11646_v24 = vadd.f32 %v4668_v2, %v11324_v11  ;;  %v11648_v59 = vadd.f32 %v4653_v25, %v4549_v19  ;;  %v11650_v1 = vadd.f32 %v4652_v4, %v4548_v17 }
0x1ac8   :  { %v4655_v56 = vmul.f32 2.0, %v4647_v45  ;;  %v4671_v15 = vmul.f32 0.05, %v4647_v45  ;;  %v4654_v36 = vmul.f32 2.0, %v4646_v29  ;;  %v4670_v31 = vmul.f32 0.05, %v4646_v29 }
0x1ac9   :  { %v4641_v18 = vsub.f32 %v4633_v53, %v11555_v5  ;;  %v4640_v40 = vsub.f32 %v4632_v26, %v11558_v54  ;;  %4688 = vrot.lane.b32.xlu1 %v11643_v22, %s7033_s6  ;;  %4686 = vrot.lane.b32.xlu0 %v11646_v24, %s7033_s6  ;;  %v4553_v54 = vadd.f32 %v4545_v3, %v11434_v37 }
0x1aca   :  { %v11659_v48 = vadd.f32 %v4671_v15, %v11337_v63  ;;  %v11662_v19 = vadd.f32 %v4670_v31, %v11340_v16  ;;  %v11664_v17 = vadd.f32 %v4655_v56, %v4551_v32  ;;  %v11666_v7 = vadd.f32 %v4654_v36, %v4550_v13 }
0x1acb   :  { %v4649_v38 = vadd.f32 8.0, %v4641_v18  ;;  %v4648_v5 = vadd.f32 8.0, %v4640_v40 }
0x1acd   :  { %v4657_v28 = vmul.f32 2.0, %v4649_v38  ;;  %v4673_v46 = vmul.f32 0.05, %v4649_v38  ;;  %v4656_v10 = vmul.f32 2.0, %v4648_v5  ;;  %v4672_v47 = vmul.f32 0.05, %v4648_v5  ;;  %4692 = vrot.lane.b32.xlu1 %v11659_v48, %s7033_s6  ;;  %4690 = vrot.lane.b32.xlu0 %v11662_v19, %s7033_s6 }
0x1acf   :  { %v11675_v32 = vadd.f32 %v4673_v46, %v11347_v21  ;;  %v11678_v13 = vadd.f32 %v4672_v47, %v11350_v49  ;;  %v11680_v6 = vadd.f32 %v4657_v28, %v4553_v54  ;;  %v11682_v37 = vadd.f32 %v4656_v10, %v4552_v51 }
0x1ad1   :  { %4696 = vrot.lane.b32.xlu1 %v11675_v32, %s7033_s6  ;;  %4694 = vrot.lane.b32.xlu0 %v11678_v13, %s7033_s6 }
0x1ad5   :  { %4716 = vrot.lane.b32.xlu1 %v11624_v61, %s7034_s1  ;;  %4714 = vrot.lane.b32.xlu0 %v11627_v27, %s7034_s1 }
0x1ad9   :  { %4720 = vrot.lane.b32.xlu1 %v11643_v22, %s7034_s1  ;;  %4718 = vrot.lane.b32.xlu0 %v11646_v24, %s7034_s1 }
0x1add   :  { %4724 = vrot.lane.b32.xlu1 %v11659_v48, %s7034_s1  ;;  %4722 = vrot.lane.b32.xlu0 %v11662_v19, %s7034_s1 }
0x1ae1   :  { %4728 = vrot.lane.b32.xlu1 %v11675_v32, %s7034_s1  ;;  %4726 = vrot.lane.b32.xlu0 %v11678_v13, %s7034_s1 }
0x1ae5   :  { %4700 = vrot.lane.b32.xlu1 %v11624_v61, %s7035_s7  ;;  %4698 = vrot.lane.b32.xlu0 %v11627_v27, %s7035_s7 }
0x1ae9   :  { %4704 = vrot.lane.b32.xlu1 %v11643_v22, %s7035_s7  ;;  %4702 = vrot.lane.b32.xlu0 %v11646_v24, %s7035_s7 }
0x1aed   :  { %4708 = vrot.lane.b32.xlu1 %v11659_v48, %s7035_s7  ;;  %4706 = vrot.lane.b32.xlu0 %v11662_v19, %s7035_s7 }
0x1af1   :  { %4712 = vrot.lane.b32.xlu1 %v11675_v32, %s7035_s7  ;;  %4710 = vrot.lane.b32.xlu0 %v11678_v13, %s7035_s7 }
0x1b36   :  { %v4685_v20 = vpop.permute.xlu1 %4684  ;;  %v4683_v58 = vpop.permute.xlu0 %4682 }
0x1b3b   :  { %v4689_v3 = vpop.permute.xlu1 %4688  ;;  %v4687_v60 = vpop.permute.xlu0 %4686 }
0x1b3f   :  { %v4693_v62 = vpop.permute.xlu1 %4692  ;;  %v4691_v14 = vpop.permute.xlu0 %4690 }
0x1b43   :  { %v4697_v50 = vpop.permute.xlu1 %4696  ;;  %v4695_v55 = vpop.permute.xlu0 %4694 }
0x1b47   :  { %v4717_v42 = vpop.permute.xlu1 %4716  ;;  %v4715_v52 = vpop.permute.xlu0 %4714 }
0x1b48   :  { %v4731_v25 = vsub.f32 %v4685_v20, %v4717_v42  ;;  %v4730_v44 = vsub.f32 %v4683_v58, %v4715_v52 }
0x1b4b   :  { %v4721_v41 = vpop.permute.xlu1 %4720  ;;  %v4719_v8 = vpop.permute.xlu0 %4718 }
0x1b4c   :  { %v4733_v45 = vsub.f32 %v4689_v3, %v4721_v41  ;;  %v4732_v29 = vsub.f32 %v4687_v60, %v4719_v8 }
0x1b4f   :  { %v4725_v43 = vpop.permute.xlu1 %4724  ;;  %v4723_v33 = vpop.permute.xlu0 %4722 }
0x1b50   :  { %v4735_v28 = vsub.f32 %v4693_v62, %v4725_v43  ;;  %v4734_v46 = vsub.f32 %v4691_v14, %v4723_v33 }
0x1b53   :  { %v4729_v39 = vpop.permute.xlu1 %4728  ;;  %v4727_v23 = vpop.permute.xlu0 %4726 }
0x1b54   :  { %v4737_v3 = vsub.f32 %v4697_v50, %v4729_v39  ;;  %v4736_v60 = vsub.f32 %v4695_v55, %v4727_v23 }
0x1b57   :  { %v4701_v4 = vpop.permute.xlu1 %4700  ;;  %v4699_v2 = vpop.permute.xlu0 %4698 }
0x1b58   :  { %v4739_v9 = vmul.f32 %v4731_v25, %v4701_v4  ;;  %v4738_v0 = vmul.f32 %v4730_v44, %v4699_v2 }
0x1b5a   :  { %v4747_v53 = vsub.f32 %v4739_v9, %v11624_v61  ;;  %v4746_v26 = vsub.f32 %v4738_v0, %v11627_v27 }
0x1b5b   :  { %v4705_v56 = vpop.permute.xlu1 %4704  ;;  %v4703_v15 = vpop.permute.xlu0 %4702 }
0x1b5c   :  { %v4755_v36 = vadd.f32 8.0, %v4747_v53  ;;  %v4754_v31 = vadd.f32 8.0, %v4746_v26  ;;  %v4741_v18 = vmul.f32 %v4733_v45, %v4705_v56  ;;  %v4740_v40 = vmul.f32 %v4732_v29, %v4703_v15 }
0x1b5e   :  { %v4763_v38 = vadd.f32 %v4755_v36, %v11629_v12  ;;  %v4762_v5 = vadd.f32 %v4754_v31, %v11631_v57  ;;  %v4749_v54 = vsub.f32 %v4741_v18, %v11643_v22  ;;  %v4748_v51 = vsub.f32 %v4740_v40, %v11646_v24 }
0x1b5f   :  { %v4709_v10 = vpop.permute.xlu1 %4708  ;;  %v4707_v61 = vpop.permute.xlu0 %4706 }
0x1b60   :  { %v4771_v47 = vmul.f32 0.008333334, %v4763_v38  ;;  %v4770_v27 = vmul.f32 0.008333334, %v4762_v5  ;;  %v4757_v20 = vadd.f32 8.0, %v4749_v54  ;;  %v4756_v58 = vadd.f32 8.0, %v4748_v51 }
0x1b61   :  { %v4743_v42 = vmul.f32 %v4735_v28, %v4709_v10  ;;  %v4742_v52 = vmul.f32 %v4734_v46, %v4707_v61 }
0x1b62   :  { %v11727_v12 = vadd.f32 %v4771_v47, %v11307_v34  ;;  %v11730_v57 = vadd.f32 %v4770_v27, %v11310_v35  ;;  %v4765_v22 = vadd.f32 %v4757_v20, %v11648_v59  ;;  %v4764_v24 = vadd.f32 %v4756_v58, %v11650_v1 }
0x1b63   :  { %v4751_v62 = vsub.f32 %v4743_v42, %v11659_v48  ;;  %v4750_v14 = vsub.f32 %v4742_v52, %v11662_v19  ;;  %v4713_v41 = vpop.permute.xlu1 %4712  ;;  %v4711_v8 = vpop.permute.xlu0 %4710 }
0x1b64   :  { %v4773_v50 = vmul.f32 0.008333334, %v4765_v22  ;;  %v4772_v55 = vmul.f32 0.008333334, %v4764_v24  ;;  %v4745_v43 = vmul.f32 %v4737_v3, %v4713_v41  ;;  %v4744_v33 = vmul.f32 %v4736_v60, %v4711_v8  ;;  %4788 = vrot.lane.b32.xlu1 %v11727_v12, %s7033_s6  ;;  %4786 = vrot.lane.b32.xlu0 %v11730_v57, %s7033_s6 }
0x1b65   :  { %v4759_v34 = vadd.f32 8.0, %v4751_v62  ;;  %v4758_v35 = vadd.f32 8.0, %v4750_v14 }
0x1b66   :  { %v11741_v59 = vadd.f32 %v4773_v50, %v11321_v30  ;;  %v11744_v1 = vadd.f32 %v4772_v55, %v11324_v11  ;;  %v4753_v48 = vsub.f32 %v4745_v43, %v11675_v32  ;;  %v4752_v19 = vsub.f32 %v4744_v33, %v11678_v13 }
0x1b67   :  { %v4767_v39 = vadd.f32 %v4759_v34, %v11664_v17  ;;  %v4766_v23 = vadd.f32 %v4758_v35, %v11666_v7 }
0x1b68   :  { %v4761_v25 = vadd.f32 8.0, %v4753_v48  ;;  %v4760_v44 = vadd.f32 8.0, %v4752_v19  ;;  %4792 = vrot.lane.b32.xlu1 %v11741_v59, %s7033_s6  ;;  %4790 = vrot.lane.b32.xlu0 %v11744_v1, %s7033_s6 }
0x1b69   :  { %v4775_v30 = vmul.f32 0.008333334, %v4767_v39  ;;  %v4774_v4 = vmul.f32 0.008333334, %v4766_v23 }
0x1b6a   :  { %v4769_v11 = vadd.f32 %v4761_v25, %v11680_v6  ;;  %v4768_v32 = vadd.f32 %v4760_v44, %v11682_v37 }
0x1b6b   :  { %v11757_v13 = vadd.f32 %v4775_v30, %v11337_v63  ;;  %v11760_v17 = vadd.f32 %v4774_v4, %v11340_v16 }
0x1b6c   :  { %v4777_v7 = vmul.f32 0.008333334, %v4769_v11  ;;  %v4776_v2 = vmul.f32 0.008333334, %v4768_v32 }
0x1b6d   :  { %4796 = vrot.lane.b32.xlu1 %v11757_v13, %s7033_s6  ;;  %4794 = vrot.lane.b32.xlu0 %v11760_v17, %s7033_s6 }
0x1b6e   :  { %v11767_v9 = vadd.f32 %v4777_v7, %v11347_v21  ;;  %v11770_v6 = vadd.f32 %v4776_v2, %v11350_v49 }
0x1b71   :  { %4800 = vrot.lane.b32.xlu1 %v11767_v9, %s7033_s6  ;;  %4798 = vrot.lane.b32.xlu0 %v11770_v6, %s7033_s6 }
0x1b75   :  { %4820 = vrot.lane.b32.xlu1 %v11727_v12, %s7034_s1  ;;  %4818 = vrot.lane.b32.xlu0 %v11730_v57, %s7034_s1 }
0x1b79   :  { %4824 = vrot.lane.b32.xlu1 %v11741_v59, %s7034_s1  ;;  %4822 = vrot.lane.b32.xlu0 %v11744_v1, %s7034_s1 }
0x1b7d   :  { %4828 = vrot.lane.b32.xlu1 %v11757_v13, %s7034_s1  ;;  %4826 = vrot.lane.b32.xlu0 %v11760_v17, %s7034_s1 }
0x1b81   :  { %4832 = vrot.lane.b32.xlu1 %v11767_v9, %s7034_s1  ;;  %4830 = vrot.lane.b32.xlu0 %v11770_v6, %s7034_s1 }
0x1b85   :  { %4804 = vrot.lane.b32.xlu1 %v11727_v12, %s7035_s7  ;;  %4802 = vrot.lane.b32.xlu0 %v11730_v57, %s7035_s7 }
0x1b89   :  { %4808 = vrot.lane.b32.xlu1 %v11741_v59, %s7035_s7  ;;  %4806 = vrot.lane.b32.xlu0 %v11744_v1, %s7035_s7 }
0x1b8d   :  { %4812 = vrot.lane.b32.xlu1 %v11757_v13, %s7035_s7  ;;  %4810 = vrot.lane.b32.xlu0 %v11760_v17, %s7035_s7 }
0x1b91   :  { %4816 = vrot.lane.b32.xlu1 %v11767_v9, %s7035_s7  ;;  %4814 = vrot.lane.b32.xlu0 %v11770_v6, %s7035_s7 }
0x1bd6   :  { %v4789_v63 = vpop.permute.xlu1 %4788  ;;  %v4787_v16 = vpop.permute.xlu0 %4786 }
0x1bda   :  { %v4793_v21 = vpop.permute.xlu1 %4792  ;;  %v4791_v49 = vpop.permute.xlu0 %4790 }
0x1bdf   :  { %v4797_v37 = vpop.permute.xlu1 %4796  ;;  %v4795_v0 = vpop.permute.xlu0 %4794 }
0x1be3   :  { %v4801_v45 = vpop.permute.xlu1 %4800  ;;  %v4799_v29 = vpop.permute.xlu0 %4798 }
0x1be7   :  { %v4821_v53 = vpop.permute.xlu1 %4820  ;;  %v4819_v26 = vpop.permute.xlu0 %4818 }
0x1be8   :  { %v4835_v38 = vsub.f32 %v4789_v63, %v4821_v53  ;;  %v4834_v5 = vsub.f32 %v4787_v16, %v4819_v26 }
0x1beb   :  { %v4825_v56 = vpop.permute.xlu1 %4824  ;;  %v4823_v15 = vpop.permute.xlu0 %4822 }
0x1bec   :  { %v4837_v10 = vsub.f32 %v4793_v21, %v4825_v56  ;;  %v4836_v61 = vsub.f32 %v4791_v49, %v4823_v15 }
0x1bef   :  { %v4829_v36 = vpop.permute.xlu1 %4828  ;;  %v4827_v31 = vpop.permute.xlu0 %4826 }
0x1bf0   :  { %v4839_v22 = vsub.f32 %v4797_v37, %v4829_v36  ;;  %v4838_v24 = vsub.f32 %v4795_v0, %v4827_v31 }
0x1bf3   :  { %v4833_v18 = vpop.permute.xlu1 %4832  ;;  %v4831_v40 = vpop.permute.xlu0 %4830 }
0x1bf4   :  { %v4841_v48 = vsub.f32 %v4801_v45, %v4833_v18  ;;  %v4840_v19 = vsub.f32 %v4799_v29, %v4831_v40 }
0x1bf7   :  { %v4805_v54 = vpop.permute.xlu1 %4804  ;;  %v4803_v51 = vpop.permute.xlu0 %4802 }
0x1bf8   :  { %v4843_v28 = vmul.f32 %v4835_v38, %v4805_v54  ;;  %v4842_v46 = vmul.f32 %v4834_v5, %v4803_v51 }
0x1bfa   :  { %v4851_v47 = vsub.f32 %v4843_v28, %v11727_v12  ;;  %v4850_v27 = vsub.f32 %v4842_v46, %v11730_v57 }
0x1bfb   :  { %v4809_v20 = vpop.permute.xlu1 %4808  ;;  %v4807_v58 = vpop.permute.xlu0 %4806 }
0x1bfc   :  { %v11810_v3 = vadd.f32 8.0, %v4851_v47  ;;  %v11812_v60 = vadd.f32 8.0, %v4850_v27  ;;  %v4845_v42 = vmul.f32 %v4837_v10, %v4809_v20  ;;  %v4844_v52 = vmul.f32 %v4836_v61, %v4807_v58 }
0x1bfe   :  { %v4867_v62 = vmul.f32 0.025, %v11810_v3  ;;  %v4866_v14 = vmul.f32 0.025, %v11812_v60  ;;  %v4853_v41 = vsub.f32 %v4845_v42, %v11741_v59  ;;  %v4852_v8 = vsub.f32 %v4844_v52, %v11744_v1 }
0x1bff   :  { %v4813_v50 = vpop.permute.xlu1 %4812  ;;  %v4811_v55 = vpop.permute.xlu0 %4810 }
0x1c00   :  { %v11818_v43 = vadd.f32 8.0, %v4853_v41  ;;  %v11820_v33 = vadd.f32 8.0, %v4852_v8  ;;  %v4847_v34 = vmul.f32 %v4839_v22, %v4813_v50  ;;  %v4846_v35 = vmul.f32 %v4838_v24, %v4811_v55 }
0x1c01   :  { %v11823_v39 = vadd.f32 %v4867_v62, %v11727_v12  ;;  %v11826_v23 = vadd.f32 %v4866_v14, %v11730_v57 }
0x1c02   :  { %v4869_v25 = vmul.f32 0.025, %v11818_v43  ;;  %v4868_v44 = vmul.f32 0.025, %v11820_v33  ;;  %v4855_v30 = vsub.f32 %v4847_v34, %v11757_v13  ;;  %v4854_v4 = vsub.f32 %v4846_v35, %v11760_v17 }
0x1c03   :  { %4884 = vrot.lane.b32.xlu1 %v11823_v39, %s7033_s6  ;;  %4882 = vrot.lane.b32.xlu0 %v11826_v23, %s7033_s6  ;;  %v4817_v11 = vpop.permute.xlu1 %4816  ;;  %v4815_v32 = vpop.permute.xlu0 %4814 }
0x1c04   :  { %v11836_v7 = vadd.f32 8.0, %v4855_v30  ;;  %v11838_v2 = vadd.f32 8.0, %v4854_v4  ;;  %v4849_v63 = vmul.f32 %v4841_v48, %v4817_v11  ;;  %v4848_v16 = vmul.f32 %v4840_v19, %v4815_v32 }
0x1c05   :  { %v11841_v21 = vadd.f32 %v4869_v25, %v11741_v59  ;;  %v11844_v49 = vadd.f32 %v4868_v44, %v11744_v1 }
0x1c06   :  { %v4871_v37 = vmul.f32 0.025, %v11836_v7  ;;  %v4870_v0 = vmul.f32 0.025, %v11838_v2  ;;  %v4857_v45 = vsub.f32 %v4849_v63, %v11767_v9  ;;  %v4856_v29 = vsub.f32 %v4848_v16, %v11770_v6 }
0x1c07   :  { %4888 = vrot.lane.b32.xlu1 %v11841_v21, %s7033_s6  ;;  %4886 = vrot.lane.b32.xlu0 %v11844_v49, %s7033_s6 }
0x1c08   :  { %v11854_v53 = vadd.f32 8.0, %v4857_v45  ;;  %v11856_v26 = vadd.f32 8.0, %v4856_v29  ;;  %v11859_v56 = vadd.f32 %v4871_v37, %v11757_v13  ;;  %v11862_v15 = vadd.f32 %v4870_v0, %v11760_v17 }
0x1c0a   :  { %v4873_v36 = vmul.f32 0.025, %v11854_v53  ;;  %v4872_v31 = vmul.f32 0.025, %v11856_v26 }
0x1c0b   :  { %4892 = vrot.lane.b32.xlu1 %v11859_v56, %s7033_s6  ;;  %4890 = vrot.lane.b32.xlu0 %v11862_v15, %s7033_s6 }
0x1c0c   :  { %v11871_v18 = vadd.f32 %v4873_v36, %v11767_v9  ;;  %v11874_v40 = vadd.f32 %v4872_v31, %v11770_v6 }
0x1c0f   :  { %4896 = vrot.lane.b32.xlu1 %v11871_v18, %s7033_s6  ;;  %4894 = vrot.lane.b32.xlu0 %v11874_v40, %s7033_s6 }
0x1c13   :  { %4916 = vrot.lane.b32.xlu1 %v11823_v39, %s7034_s1  ;;  %4914 = vrot.lane.b32.xlu0 %v11826_v23, %s7034_s1 }
0x1c17   :  { %4920 = vrot.lane.b32.xlu1 %v11841_v21, %s7034_s1  ;;  %4918 = vrot.lane.b32.xlu0 %v11844_v49, %s7034_s1 }
0x1c1b   :  { %4924 = vrot.lane.b32.xlu1 %v11859_v56, %s7034_s1  ;;  %4922 = vrot.lane.b32.xlu0 %v11862_v15, %s7034_s1 }
0x1c1f   :  { %4928 = vrot.lane.b32.xlu1 %v11871_v18, %s7034_s1  ;;  %4926 = vrot.lane.b32.xlu0 %v11874_v40, %s7034_s1 }
0x1c23   :  { %4900 = vrot.lane.b32.xlu1 %v11823_v39, %s7035_s7  ;;  %4898 = vrot.lane.b32.xlu0 %v11826_v23, %s7035_s7 }
0x1c27   :  { %4904 = vrot.lane.b32.xlu1 %v11841_v21, %s7035_s7  ;;  %4902 = vrot.lane.b32.xlu0 %v11844_v49, %s7035_s7 }
0x1c2b   :  { %4908 = vrot.lane.b32.xlu1 %v11859_v56, %s7035_s7  ;;  %4906 = vrot.lane.b32.xlu0 %v11862_v15, %s7035_s7 }
0x1c2f   :  { %4912 = vrot.lane.b32.xlu1 %v11871_v18, %s7035_s7  ;;  %4910 = vrot.lane.b32.xlu0 %v11874_v40, %s7035_s7 }
0x1c75   :  { %v4885_v38 = vpop.permute.xlu1 %4884  ;;  %v4883_v5 = vpop.permute.xlu0 %4882 }
0x1c79   :  { %v4889_v54 = vpop.permute.xlu1 %4888  ;;  %v4887_v51 = vpop.permute.xlu0 %4886 }
0x1c7d   :  { %v4893_v28 = vpop.permute.xlu1 %4892  ;;  %v4891_v46 = vpop.permute.xlu0 %4890 }
0x1c81   :  { %v4897_v10 = vpop.permute.xlu1 %4896  ;;  %v4895_v61 = vpop.permute.xlu0 %4894 }
0x1c85   :  { %v4917_v47 = vpop.permute.xlu1 %4916  ;;  %v4915_v27 = vpop.permute.xlu0 %4914 }
0x1c86   :  { %v4931_v62 = vsub.f32 %v4885_v38, %v4917_v47  ;;  %v4930_v14 = vsub.f32 %v4883_v5, %v4915_v27 }
0x1c89   :  { %v4921_v20 = vpop.permute.xlu1 %4920  ;;  %v4919_v58 = vpop.permute.xlu0 %4918 }
0x1c8a   :  { %v4933_v34 = vsub.f32 %v4889_v54, %v4921_v20  ;;  %v4932_v35 = vsub.f32 %v4887_v51, %v4919_v58 }
0x1c8d   :  { %v4925_v42 = vpop.permute.xlu1 %4924  ;;  %v4923_v52 = vpop.permute.xlu0 %4922 }
0x1c8e   :  { %v4935_v63 = vsub.f32 %v4893_v28, %v4925_v42  ;;  %v4934_v16 = vsub.f32 %v4891_v46, %v4923_v52 }
0x1c91   :  { %v4929_v22 = vpop.permute.xlu1 %4928  ;;  %v4927_v24 = vpop.permute.xlu0 %4926 }
0x1c92   :  { %v4937_v28 = vsub.f32 %v4897_v10, %v4929_v22  ;;  %v4936_v46 = vsub.f32 %v4895_v61, %v4927_v24 }
0x1c95   :  { %v4901_v41 = vpop.permute.xlu1 %4900  ;;  %v4899_v8 = vpop.permute.xlu0 %4898 }
0x1c96   :  { %v4939_v50 = vmul.f32 %v4931_v62, %v4901_v41  ;;  %v4938_v55 = vmul.f32 %v4930_v14, %v4899_v8 }
0x1c98   :  { %v4947_v48 = vsub.f32 %v4939_v50, %v11823_v39  ;;  %v4946_v19 = vsub.f32 %v4938_v55, %v11826_v23 }
0x1c99   :  { %v4905_v25 = vpop.permute.xlu1 %4904  ;;  %v4903_v44 = vpop.permute.xlu0 %4902 }
0x1c9a   :  { %v11914_v30 = vadd.f32 8.0, %v4947_v48  ;;  %v11916_v4 = vadd.f32 8.0, %v4946_v19  ;;  %v4941_v11 = vmul.f32 %v4933_v34, %v4905_v25  ;;  %v4940_v32 = vmul.f32 %v4932_v35, %v4903_v44 }
0x1c9c   :  { %v4979_v37 = vmul.f32 0.025, %v11914_v30  ;;  %v4978_v0 = vmul.f32 0.025, %v11916_v4  ;;  %v4949_v45 = vsub.f32 %v4941_v11, %v11841_v21  ;;  %v4948_v39 = vsub.f32 %v4940_v32, %v11844_v49 }
0x1c9d   :  { %v4909_v29 = vpop.permute.xlu1 %4908  ;;  %v4907_v23 = vpop.permute.xlu0 %4906 }
0x1c9e   :  { %v4943_v36 = vmul.f32 %v4935_v63, %v4909_v29  ;;  %v4942_v31 = vmul.f32 %v4934_v16, %v4907_v23  ;;  %v11922_v38 = vadd.f32 8.0, %v4949_v45  ;;  %v11924_v5 = vadd.f32 8.0, %v4948_v39 }
0x1c9f   :  { %v11927_v54 = vadd.f32 %v4979_v37, %v11727_v12  ;;  %v11930_v51 = vadd.f32 %v4978_v0, %v11730_v57 }
0x1ca0   :  { %v4951_v21 = vsub.f32 %v4943_v36, %v11859_v56  ;;  %v4950_v49 = vsub.f32 %v4942_v31, %v11862_v15  ;;  %v4981_v47 = vmul.f32 0.025, %v11922_v38  ;;  %v4980_v27 = vmul.f32 0.025, %v11924_v5 }
0x1ca1   :  { %4996 = vrot.lane.b32.xlu1 %v11927_v54, %s7033_s6  ;;  %4994 = vrot.lane.b32.xlu0 %v11930_v51, %s7033_s6  ;;  %v4913_v20 = vpop.permute.xlu1 %4912  ;;  %v4911_v58 = vpop.permute.xlu0 %4910 }
0x1ca2   :  { %v11940_v42 = vadd.f32 8.0, %v4951_v21  ;;  %v11942_v10 = vadd.f32 8.0, %v4950_v49  ;;  %v4945_v61 = vmul.f32 %v4937_v28, %v4913_v20  ;;  %v4944_v56 = vmul.f32 %v4936_v46, %v4911_v58 }
0x1ca3   :  { %v11945_v15 = vadd.f32 %v4981_v47, %v11741_v59  ;;  %v11948_v52 = vadd.f32 %v4980_v27, %v11744_v1  ;;  %v4963_v21 = vmul.f32 2.0, %v11914_v30  ;;  %v4962_v49 = vmul.f32 2.0, %v11916_v4 }
0x1ca4   :  { %v4983_v22 = vmul.f32 0.025, %v11940_v42  ;;  %v4982_v24 = vmul.f32 0.025, %v11942_v10  ;;  %v4953_v62 = vsub.f32 %v4945_v61, %v11871_v18  ;;  %v4952_v14 = vsub.f32 %v4944_v56, %v11874_v40 }
0x1ca5   :  { %5000 = vrot.lane.b32.xlu1 %v11945_v15, %s7033_s6  ;;  %4998 = vrot.lane.b32.xlu0 %v11948_v52, %s7033_s6  ;;  %v4965_v47 = vmul.f32 2.0, %v11922_v38  ;;  %v4964_v27 = vmul.f32 2.0, %v11924_v5  ;;  %v4971_v4 = vadd.f32 %v4963_v21, %v11810_v3  ;;  %v4970_v38 = vadd.f32 %v4962_v49, %v11812_v60 }
0x1ca6   :  { %v11959_v41 = vadd.f32 %v4983_v22, %v11757_v13  ;;  %v11962_v8 = vadd.f32 %v4982_v24, %v11760_v17  ;;  %v11964_v50 = vadd.f32 8.0, %v4953_v62  ;;  %v11966_v55 = vadd.f32 8.0, %v4952_v14 }
0x1ca7   :  { %v4967_v22 = vmul.f32 2.0, %v11940_v42  ;;  %v4966_v24 = vmul.f32 2.0, %v11942_v10  ;;  %v4973_v5 = vadd.f32 %v4965_v47, %v11818_v43 }
0x1ca8   :  { %v4985_v18 = vmul.f32 0.025, %v11964_v50  ;;  %v4984_v40 = vmul.f32 0.025, %v11966_v55  ;;  %v4969_v43 = vmul.f32 2.0, %v11964_v50 }
0x1ca9   :  { %5004 = vrot.lane.b32.xlu1 %v11959_v41, %s7033_s6  ;;  %5002 = vrot.lane.b32.xlu0 %v11962_v8, %s7033_s6 }
0x1caa   :  { %v11975_v34 = vadd.f32 %v4985_v18, %v11767_v9  ;;  %v11978_v35 = vadd.f32 %v4984_v40, %v11770_v6  ;;  %v4972_v40 = vadd.f32 %v4964_v27, %v11820_v33 }
0x1cad   :  { %5008 = vrot.lane.b32.xlu1 %v11975_v34, %s7033_s6  ;;  %5006 = vrot.lane.b32.xlu0 %v11978_v35, %s7033_s6 }
0x1cb1   :  { %5028 = vrot.lane.b32.xlu1 %v11927_v54, %s7034_s1  ;;  %5026 = vrot.lane.b32.xlu0 %v11930_v51, %s7034_s1 }
0x1cb5   :  { %5032 = vrot.lane.b32.xlu1 %v11945_v15, %s7034_s1  ;;  %5030 = vrot.lane.b32.xlu0 %v11948_v52, %s7034_s1 }
0x1cb9   :  { %5036 = vrot.lane.b32.xlu1 %v11959_v41, %s7034_s1  ;;  %5034 = vrot.lane.b32.xlu0 %v11962_v8, %s7034_s1 }
0x1cbd   :  { %5040 = vrot.lane.b32.xlu1 %v11975_v34, %s7034_s1  ;;  %5038 = vrot.lane.b32.xlu0 %v11978_v35, %s7034_s1 }
0x1cc1   :  { %5012 = vrot.lane.b32.xlu1 %v11927_v54, %s7035_s7  ;;  %5010 = vrot.lane.b32.xlu0 %v11930_v51, %s7035_s7 }
0x1cc5   :  { %5016 = vrot.lane.b32.xlu1 %v11945_v15, %s7035_s7  ;;  %5014 = vrot.lane.b32.xlu0 %v11948_v52, %s7035_s7 }
0x1cc9   :  { %5020 = vrot.lane.b32.xlu1 %v11959_v41, %s7035_s7  ;;  %5018 = vrot.lane.b32.xlu0 %v11962_v8, %s7035_s7 }
0x1ccd   :  { %5024 = vrot.lane.b32.xlu1 %v11975_v34, %s7035_s7  ;;  %5022 = vrot.lane.b32.xlu0 %v11978_v35, %s7035_s7 }
0x1d13   :  { %v4997_v48 = vpop.permute.xlu1 %4996  ;;  %v4995_v19 = vpop.permute.xlu0 %4994 }
0x1d17   :  { %v5001_v25 = vpop.permute.xlu1 %5000  ;;  %v4999_v44 = vpop.permute.xlu0 %4998 }
0x1d1b   :  { %v5005_v11 = vpop.permute.xlu1 %5004  ;;  %v5003_v32 = vpop.permute.xlu0 %5002 }
0x1d1f   :  { %v12016_v63 = vpop.permute.xlu1 %5008  ;;  %v12018_v16 = vpop.permute.xlu0 %5006 }
0x1d23   :  { %v5029_v37 = vpop.permute.xlu1 %5028  ;;  %v5027_v0 = vpop.permute.xlu0 %5026 }
0x1d24   :  { %v5043_v28 = vsub.f32 %v4997_v48, %v5029_v37  ;;  %v5042_v46 = vsub.f32 %v4995_v19, %v5027_v0 }
0x1d27   :  { %v5033_v45 = vpop.permute.xlu1 %5032  ;;  %v5031_v39 = vpop.permute.xlu0 %5030 }
0x1d28   :  { %v5045_v62 = vsub.f32 %v5001_v25, %v5033_v45  ;;  %v5044_v14 = vsub.f32 %v4999_v44, %v5031_v39  ;;  %v4975_v25 = vadd.f32 %v4967_v22, %v11836_v7 }
0x1d2b   :  { %v5037_v29 = vpop.permute.xlu1 %5036  ;;  %v5035_v23 = vpop.permute.xlu0 %5034 }
0x1d2c   :  { %v5047_v44 = vsub.f32 %v5005_v11, %v5037_v29 }
0x1d2f   :  { %v12020_v36 = vpop.permute.xlu1 %5040  ;;  %v12022_v31 = vpop.permute.xlu0 %5038 }
0x1d30   :  { %v5049_v33 = vsub.f32 %v12016_v63, %v12020_v36 }
0x1d33   :  { %v5013_v20 = vpop.permute.xlu1 %5012  ;;  %v5011_v58 = vpop.permute.xlu0 %5010 }
0x1d34   :  { %v5051_v61 = vmul.f32 %v5043_v28, %v5013_v20  ;;  %v5050_v56 = vmul.f32 %v5042_v46, %v5011_v58 }
0x1d36   :  { %v5059_v18 = vsub.f32 %v5051_v61, %v11927_v54  ;;  %v5058_v30 = vsub.f32 %v5050_v56, %v11930_v51  ;;  %v4974_v54 = vadd.f32 %v4966_v24, %v11838_v2  ;;  %v5046_v51 = vsub.f32 %v5003_v32, %v5035_v23 }
0x1d37   :  { %v5017_v48 = vpop.permute.xlu1 %5016  ;;  %v5015_v19 = vpop.permute.xlu0 %5014 }
0x1d38   :  { %v5067_v37 = vadd.f32 8.0, %v5059_v18  ;;  %v5066_v42 = vadd.f32 8.0, %v5058_v30  ;;  %v5053_v0 = vmul.f32 %v5045_v62, %v5017_v48  ;;  %v5052_v10 = vmul.f32 %v5044_v14, %v5015_v19 }
0x1d3a   :  { %v5075_v45 = vmul.f32 2.0, %v5067_v37  ;;  %v5091_v3 = vmul.f32 0.05, %v5067_v37  ;;  %v5074_v39 = vmul.f32 2.0, %v5066_v42  ;;  %v5090_v60 = vmul.f32 0.05, %v5066_v42 }
0x1d3b   :  { %v5061_v28 = vsub.f32 %v5053_v0, %v11945_v15  ;;  %v5060_v46 = vsub.f32 %v5052_v10, %v11948_v52  ;;  %v5021_v21 = vpop.permute.xlu1 %5020  ;;  %v5019_v49 = vpop.permute.xlu0 %5018  ;;  %v4968_v15 = vmul.f32 2.0, %v11966_v55  ;;  %v5048_v52 = vsub.f32 %v12018_v16, %v12022_v31 }
0x1d3c   :  { %v5055_v7 = vmul.f32 %v5047_v44, %v5021_v21  ;;  %v5054_v47 = vmul.f32 %v5046_v51, %v5019_v49  ;;  %v12044_v2 = vadd.f32 %v5091_v3, %v11727_v12  ;;  %v12047_v11 = vadd.f32 %v5090_v60, %v11730_v57 }
0x1d3d   :  { %v5069_v32 = vadd.f32 8.0, %v5061_v28  ;;  %v5068_v29 = vadd.f32 8.0, %v5060_v46  ;;  %v12049_v50 = vadd.f32 %v5075_v45, %v4971_v4  ;;  %v12051_v23 = vadd.f32 %v5074_v39, %v4970_v38 }
0x1d3e   :  { %v5063_v63 = vsub.f32 %v5055_v7, %v11959_v41  ;;  %v5062_v36 = vsub.f32 %v5054_v47, %v11962_v8  ;;  %5108 = vrot.lane.b32.xlu1 %v12044_v2, %s7033_s6  ;;  %5106 = vrot.lane.b32.xlu0 %v12047_v11, %s7033_s6  ;;  %v4976_v10 = vadd.f32 %v4968_v15, %v11856_v26 }
0x1d3f   :  { %v5077_v27 = vmul.f32 2.0, %v5069_v32  ;;  %v5093_v20 = vmul.f32 0.05, %v5069_v32  ;;  %v5076_v58 = vmul.f32 2.0, %v5068_v29  ;;  %v5092_v61 = vmul.f32 0.05, %v5068_v29  ;;  %v5025_v56 = vpop.permute.xlu1 %5024  ;;  %v5023_v22 = vpop.permute.xlu0 %5022 }
0x1d40   :  { %v5071_v55 = vadd.f32 8.0, %v5063_v63  ;;  %v5070_v24 = vadd.f32 8.0, %v5062_v36  ;;  %v5057_v62 = vmul.f32 %v5049_v33, %v5025_v56  ;;  %v5056_v16 = vmul.f32 %v5048_v52, %v5023_v22 }
0x1d41   :  { %v12063_v41 = vadd.f32 %v5093_v20, %v11741_v59  ;;  %v12066_v8 = vadd.f32 %v5092_v61, %v11744_v1  ;;  %v12068_v31 = vadd.f32 %v5077_v27, %v4973_v5  ;;  %v12070_v14 = vadd.f32 %v5076_v58, %v4972_v40 }
0x1d42   :  { %v5079_v18 = vmul.f32 2.0, %v5071_v55  ;;  %v5095_v30 = vmul.f32 0.05, %v5071_v55  ;;  %v5078_v4 = vmul.f32 2.0, %v5070_v24  ;;  %v5094_v38 = vmul.f32 0.05, %v5070_v24 }
0x1d43   :  { %v5065_v48 = vsub.f32 %v5057_v62, %v11975_v34  ;;  %v5064_v19 = vsub.f32 %v5056_v16, %v11978_v35  ;;  %5112 = vrot.lane.b32.xlu1 %v12063_v41, %s7033_s6  ;;  %5110 = vrot.lane.b32.xlu0 %v12066_v8, %s7033_s6  ;;  %v4977_v35 = vadd.f32 %v4969_v43, %v11854_v53 }
0x1d44   :  { %v12079_v37 = vadd.f32 %v5095_v30, %v11757_v13  ;;  %v12082_v5 = vadd.f32 %v5094_v38, %v11760_v17  ;;  %v12084_v40 = vadd.f32 %v5079_v18, %v4975_v25  ;;  %v12086_v42 = vadd.f32 %v5078_v4, %v4974_v54 }
0x1d45   :  { %v5073_v0 = vadd.f32 8.0, %v5065_v48  ;;  %v5072_v34 = vadd.f32 8.0, %v5064_v19 }
0x1d47   :  { %v5081_v44 = vmul.f32 2.0, %v5073_v0  ;;  %v5097_v51 = vmul.f32 0.05, %v5073_v0  ;;  %v5080_v45 = vmul.f32 2.0, %v5072_v34  ;;  %v5096_v3 = vmul.f32 0.05, %v5072_v34  ;;  %5116 = vrot.lane.b32.xlu1 %v12079_v37, %s7033_s6  ;;  %5114 = vrot.lane.b32.xlu0 %v12082_v5, %s7033_s6 }
0x1d49   :  { %v12095_v25 = vadd.f32 %v5097_v51, %v11767_v9  ;;  %v12098_v54 = vadd.f32 %v5096_v3, %v11770_v6  ;;  %v12100_v39 = vadd.f32 %v5081_v44, %v4977_v35  ;;  %v12102_v53 = vadd.f32 %v5080_v45, %v4976_v10 }
0x1d4b   :  { %5120 = vrot.lane.b32.xlu1 %v12095_v25, %s7033_s6  ;;  %5118 = vrot.lane.b32.xlu0 %v12098_v54, %s7033_s6 }
0x1d4f   :  { %5140 = vrot.lane.b32.xlu1 %v12044_v2, %s7034_s1  ;;  %5138 = vrot.lane.b32.xlu0 %v12047_v11, %s7034_s1 }
0x1d53   :  { %5144 = vrot.lane.b32.xlu1 %v12063_v41, %s7034_s1  ;;  %5142 = vrot.lane.b32.xlu0 %v12066_v8, %s7034_s1 }
0x1d57   :  { %5148 = vrot.lane.b32.xlu1 %v12079_v37, %s7034_s1  ;;  %5146 = vrot.lane.b32.xlu0 %v12082_v5, %s7034_s1 }
0x1d5b   :  { %5152 = vrot.lane.b32.xlu1 %v12095_v25, %s7034_s1  ;;  %5150 = vrot.lane.b32.xlu0 %v12098_v54, %s7034_s1 }
0x1d5f   :  { %5124 = vrot.lane.b32.xlu1 %v12044_v2, %s7035_s7  ;;  %5122 = vrot.lane.b32.xlu0 %v12047_v11, %s7035_s7 }
0x1d63   :  { %5128 = vrot.lane.b32.xlu1 %v12063_v41, %s7035_s7  ;;  %5126 = vrot.lane.b32.xlu0 %v12066_v8, %s7035_s7 }
0x1d67   :  { %5132 = vrot.lane.b32.xlu1 %v12079_v37, %s7035_s7  ;;  %5130 = vrot.lane.b32.xlu0 %v12082_v5, %s7035_s7 }
0x1d6b   :  { %5136 = vrot.lane.b32.xlu1 %v12095_v25, %s7035_s7  ;;  %5134 = vrot.lane.b32.xlu0 %v12098_v54, %s7035_s7 }
0x1db0   :  { %v5109_v26 = vpop.permute.xlu1 %5108  ;;  %v5107_v60 = vpop.permute.xlu0 %5106 }
0x1db5   :  { %v5113_v43 = vpop.permute.xlu1 %5112  ;;  %v5111_v33 = vpop.permute.xlu0 %5110 }
0x1db9   :  { %v5117_v28 = vpop.permute.xlu1 %5116  ;;  %v5115_v46 = vpop.permute.xlu0 %5114 }
0x1dbd   :  { %v5121_v21 = vpop.permute.xlu1 %5120  ;;  %v5119_v49 = vpop.permute.xlu0 %5118 }
0x1dc1   :  { %v5141_v7 = vpop.permute.xlu1 %5140  ;;  %v5139_v47 = vpop.permute.xlu0 %5138 }
0x1dc2   :  { %v5155_v27 = vsub.f32 %v5109_v26, %v5141_v7  ;;  %v5154_v20 = vsub.f32 %v5107_v60, %v5139_v47 }
0x1dc5   :  { %v5145_v32 = vpop.permute.xlu1 %5144  ;;  %v5143_v29 = vpop.permute.xlu0 %5142 }
0x1dc6   :  { %v5157_v55 = vsub.f32 %v5113_v43, %v5145_v32  ;;  %v5156_v24 = vsub.f32 %v5111_v33, %v5143_v29 }
0x1dc9   :  { %v5149_v15 = vpop.permute.xlu1 %5148  ;;  %v5147_v52 = vpop.permute.xlu0 %5146 }
0x1dca   :  { %v5159_v44 = vsub.f32 %v5117_v28, %v5149_v15  ;;  %v5158_v51 = vsub.f32 %v5115_v46, %v5147_v52 }
0x1dcd   :  { %v5153_v63 = vpop.permute.xlu1 %5152  ;;  %v5151_v36 = vpop.permute.xlu0 %5150 }
0x1dce   :  { %v5161_v43 = vsub.f32 %v5121_v21, %v5153_v63  ;;  %v5160_v33 = vsub.f32 %v5119_v49, %v5151_v36 }
0x1dd1   :  { %v5125_v58 = vpop.permute.xlu1 %5124  ;;  %v5123_v61 = vpop.permute.xlu0 %5122 }
0x1dd2   :  { %v5163_v56 = vmul.f32 %v5155_v27, %v5125_v58  ;;  %v5162_v22 = vmul.f32 %v5154_v20, %v5123_v61 }
0x1dd4   :  { %v5171_v62 = vsub.f32 %v5163_v56, %v12044_v2  ;;  %v5170_v16 = vsub.f32 %v5162_v22, %v12047_v11 }
0x1dd5   :  { %v5129_v18 = vpop.permute.xlu1 %5128  ;;  %v5127_v30 = vpop.permute.xlu0 %5126 }
0x1dd6   :  { %v5179_v4 = vadd.f32 8.0, %v5171_v62  ;;  %v5178_v38 = vadd.f32 8.0, %v5170_v16  ;;  %v5165_v48 = vmul.f32 %v5157_v55, %v5129_v18  ;;  %v5164_v19 = vmul.f32 %v5156_v24, %v5127_v30 }
0x1dd8   :  { %v5187_v0 = vadd.f32 %v5179_v4, %v12049_v50  ;;  %v5186_v34 = vadd.f32 %v5178_v38, %v12051_v23  ;;  %v5173_v35 = vsub.f32 %v5165_v48, %v12063_v41  ;;  %v5172_v10 = vsub.f32 %v5164_v19, %v12066_v8 }
0x1dd9   :  { %v5133_v45 = vpop.permute.xlu1 %5132  ;;  %v5131_v2 = vpop.permute.xlu0 %5130 }
0x1dda   :  { %v5195_v3 = vmul.f32 0.008333334, %v5187_v0  ;;  %v5194_v11 = vmul.f32 0.008333334, %v5186_v34  ;;  %v5181_v26 = vadd.f32 8.0, %v5173_v35  ;;  %v5180_v60 = vadd.f32 8.0, %v5172_v10 }
0x1ddb   :  { %v5167_v7 = vmul.f32 %v5159_v44, %v5133_v45  ;;  %v5166_v47 = vmul.f32 %v5158_v51, %v5131_v2 }
0x1ddc   :  { %v12147_v50 = vadd.f32 %v5195_v3, %v11727_v12  ;;  %v12150_v23 = vadd.f32 %v5194_v11, %v11730_v57  ;;  %v5189_v41 = vadd.f32 %v5181_v26, %v12068_v31  ;;  %v5188_v8 = vadd.f32 %v5180_v60, %v12070_v14 }
0x1ddd   :  { %v5175_v28 = vsub.f32 %v5167_v7, %v12079_v37  ;;  %v5174_v46 = vsub.f32 %v5166_v47, %v12082_v5  ;;  %v5137_v32 = vpop.permute.xlu1 %5136  ;;  %v5135_v29 = vpop.permute.xlu0 %5134 }
0x1dde   :  { %v5197_v21 = vmul.f32 0.008333334, %v5189_v41  ;;  %v5196_v49 = vmul.f32 0.008333334, %v5188_v8  ;;  %v5169_v15 = vmul.f32 %v5161_v43, %v5137_v32  ;;  %v5168_v52 = vmul.f32 %v5160_v33, %v5135_v29  ;;  %5212 = vrot.lane.b32.xlu1 %v12147_v50, %s7033_s6  ;;  %5210 = vrot.lane.b32.xlu0 %v12150_v23, %s7033_s6 }
0x1ddf   :  { %v5183_v12 = vadd.f32 8.0, %v5175_v28  ;;  %v5182_v57 = vadd.f32 8.0, %v5174_v46 }
0x1de0   :  { %v12161_v31 = vadd.f32 %v5197_v21, %v11741_v59  ;;  %v12164_v14 = vadd.f32 %v5196_v49, %v11744_v1  ;;  %v5177_v37 = vsub.f32 %v5169_v15, %v12095_v25  ;;  %v5176_v5 = vsub.f32 %v5168_v52, %v12098_v54 }
0x1de1   :  { %v5191_v63 = vadd.f32 %v5183_v12, %v12084_v40  ;;  %v5190_v36 = vadd.f32 %v5182_v57, %v12086_v42 }
0x1de2   :  { %v5185_v27 = vadd.f32 8.0, %v5177_v37  ;;  %v5184_v20 = vadd.f32 8.0, %v5176_v5  ;;  %5216 = vrot.lane.b32.xlu1 %v12161_v31, %s7033_s6  ;;  %5214 = vrot.lane.b32.xlu0 %v12164_v14, %s7033_s6 }
0x1de3   :  { %v5199_v59 = vmul.f32 0.008333334, %v5191_v63  ;;  %v5198_v58 = vmul.f32 0.008333334, %v5190_v36 }
0x1de4   :  { %v5193_v1 = vadd.f32 %v5185_v27, %v12100_v39  ;;  %v5192_v25 = vadd.f32 %v5184_v20, %v12102_v53 }
0x1de5   :  { %v12177_v54 = vadd.f32 %v5199_v59, %v11757_v13  ;;  %v12180_v40 = vadd.f32 %v5198_v58, %v11760_v17 }
0x1de6   :  { %v5201_v42 = vmul.f32 0.008333334, %v5193_v1  ;;  %v5200_v61 = vmul.f32 0.008333334, %v5192_v25 }
0x1de7   :  { %5220 = vrot.lane.b32.xlu1 %v12177_v54, %s7033_s6  ;;  %5218 = vrot.lane.b32.xlu0 %v12180_v40, %s7033_s6 }
0x1de8   :  { %v12187_v56 = vadd.f32 %v5201_v42, %v11767_v9  ;;  %v12190_v39 = vadd.f32 %v5200_v61, %v11770_v6 }
0x1deb   :  { %5224 = vrot.lane.b32.xlu1 %v12187_v56, %s7033_s6  ;;  %5222 = vrot.lane.b32.xlu0 %v12190_v39, %s7033_s6 }
0x1def   :  { %5244 = vrot.lane.b32.xlu1 %v12147_v50, %s7034_s1  ;;  %5242 = vrot.lane.b32.xlu0 %v12150_v23, %s7034_s1 }
0x1df3   :  { %5248 = vrot.lane.b32.xlu1 %v12161_v31, %s7034_s1  ;;  %5246 = vrot.lane.b32.xlu0 %v12164_v14, %s7034_s1 }
0x1df7   :  { %5252 = vrot.lane.b32.xlu1 %v12177_v54, %s7034_s1  ;;  %5250 = vrot.lane.b32.xlu0 %v12180_v40, %s7034_s1 }
0x1dfb   :  { %5256 = vrot.lane.b32.xlu1 %v12187_v56, %s7034_s1  ;;  %5254 = vrot.lane.b32.xlu0 %v12190_v39, %s7034_s1 }
0x1dff   :  { %5228 = vrot.lane.b32.xlu1 %v12147_v50, %s7035_s7  ;;  %5226 = vrot.lane.b32.xlu0 %v12150_v23, %s7035_s7 }
0x1e03   :  { %5232 = vrot.lane.b32.xlu1 %v12161_v31, %s7035_s7  ;;  %5230 = vrot.lane.b32.xlu0 %v12164_v14, %s7035_s7 }
0x1e07   :  { %5236 = vrot.lane.b32.xlu1 %v12177_v54, %s7035_s7  ;;  %5234 = vrot.lane.b32.xlu0 %v12180_v40, %s7035_s7 }
0x1e0b   :  { %5240 = vrot.lane.b32.xlu1 %v12187_v56, %s7035_s7  ;;  %5238 = vrot.lane.b32.xlu0 %v12190_v39, %s7035_s7 }
0x1e50   :  { %v5213_v13 = vpop.permute.xlu1 %5212  ;;  %v5211_v17 = vpop.permute.xlu0 %5210 }
0x1e54   :  { %v5217_v9 = vpop.permute.xlu1 %5216  ;;  %v5215_v6 = vpop.permute.xlu0 %5214 }
0x1e59   :  { %v5221_v53 = vpop.permute.xlu1 %5220  ;;  %v5219_v22 = vpop.permute.xlu0 %5218 }
0x1e5d   :  { %v5225_v55 = vpop.permute.xlu1 %5224  ;;  %v5223_v24 = vpop.permute.xlu0 %5222 }
0x1e61   :  { %v5245_v62 = vpop.permute.xlu1 %5244  ;;  %v5243_v16 = vpop.permute.xlu0 %5242 }
0x1e62   :  { %v5259_v0 = vsub.f32 %v5213_v13, %v5245_v62  ;;  %v5258_v34 = vsub.f32 %v5211_v17, %v5243_v16 }
0x1e65   :  { %v5249_v18 = vpop.permute.xlu1 %5248  ;;  %v5247_v30 = vpop.permute.xlu0 %5246 }
0x1e66   :  { %v5261_v45 = vsub.f32 %v5217_v9, %v5249_v18  ;;  %v5260_v2 = vsub.f32 %v5215_v6, %v5247_v30 }
0x1e69   :  { %v5253_v4 = vpop.permute.xlu1 %5252  ;;  %v5251_v38 = vpop.permute.xlu0 %5250 }
0x1e6a   :  { %v5263_v41 = vsub.f32 %v5221_v53, %v5253_v4  ;;  %v5262_v8 = vsub.f32 %v5219_v22, %v5251_v38 }
0x1e6d   :  { %v5257_v48 = vpop.permute.xlu1 %5256  ;;  %v5255_v19 = vpop.permute.xlu0 %5254 }
0x1e6e   :  { %v5265_v37 = vsub.f32 %v5225_v55, %v5257_v48  ;;  %v5264_v5 = vsub.f32 %v5223_v24, %v5255_v19 }
0x1e71   :  { %v5229_v35 = vpop.permute.xlu1 %5228  ;;  %v5227_v10 = vpop.permute.xlu0 %5226 }
0x1e72   :  { %v5267_v44 = vmul.f32 %v5259_v0, %v5229_v35  ;;  %v5266_v51 = vmul.f32 %v5258_v34, %v5227_v10 }
0x1e74   :  { %v5275_v3 = vsub.f32 %v5267_v44, %v12147_v50  ;;  %v5274_v11 = vsub.f32 %v5266_v51, %v12150_v23 }
0x1e75   :  { %v5233_v26 = vpop.permute.xlu1 %5232  ;;  %v5231_v60 = vpop.permute.xlu0 %5230 }
0x1e76   :  { %v12230_v43 = vadd.f32 8.0, %v5275_v3  ;;  %v12232_v33 = vadd.f32 8.0, %v5274_v11  ;;  %v5269_v7 = vmul.f32 %v5261_v45, %v5233_v26  ;;  %v5268_v47 = vmul.f32 %v5260_v2, %v5231_v60 }
0x1e78   :  { %v5291_v28 = vmul.f32 0.025, %v12230_v43  ;;  %v5290_v46 = vmul.f32 0.025, %v12232_v33  ;;  %v5277_v32 = vsub.f32 %v5269_v7, %v12161_v31  ;;  %v5276_v29 = vsub.f32 %v5268_v47, %v12164_v14 }
0x1e79   :  { %v5237_v21 = vpop.permute.xlu1 %5236  ;;  %v5235_v49 = vpop.permute.xlu0 %5234 }
0x1e7a   :  { %v12238_v15 = vadd.f32 8.0, %v5277_v32  ;;  %v12240_v52 = vadd.f32 8.0, %v5276_v29  ;;  %v5271_v12 = vmul.f32 %v5263_v41, %v5237_v21  ;;  %v5270_v57 = vmul.f32 %v5262_v8, %v5235_v49 }
0x1e7b   :  { %v12243_v63 = vadd.f32 %v5291_v28, %v12147_v50  ;;  %v12246_v36 = vadd.f32 %v5290_v46, %v12150_v23 }
0x1e7c   :  { %v5293_v27 = vmul.f32 0.025, %v12238_v15  ;;  %v5292_v20 = vmul.f32 0.025, %v12240_v52  ;;  %v5279_v59 = vsub.f32 %v5271_v12, %v12177_v54  ;;  %v5278_v58 = vsub.f32 %v5270_v57, %v12180_v40 }
0x1e7d   :  { %5308 = vrot.lane.b32.xlu1 %v12243_v63, %s7033_s6  ;;  %5306 = vrot.lane.b32.xlu0 %v12246_v36, %s7033_s6  ;;  %v5241_v1 = vpop.permute.xlu1 %5240  ;;  %v5239_v25 = vpop.permute.xlu0 %5238 }
0x1e7e   :  { %v12256_v42 = vadd.f32 8.0, %v5279_v59  ;;  %v12258_v61 = vadd.f32 8.0, %v5278_v58  ;;  %v5273_v13 = vmul.f32 %v5265_v37, %v5241_v1  ;;  %v5272_v17 = vmul.f32 %v5264_v5, %v5239_v25 }
0x1e7f   :  { %v12261_v9 = vadd.f32 %v5293_v27, %v12161_v31  ;;  %v12264_v6 = vadd.f32 %v5292_v20, %v12164_v14 }
0x1e80   :  { %v5295_v53 = vmul.f32 0.025, %v12256_v42  ;;  %v5294_v22 = vmul.f32 0.025, %v12258_v61  ;;  %v5281_v55 = vsub.f32 %v5273_v13, %v12187_v56  ;;  %v5280_v24 = vsub.f32 %v5272_v17, %v12190_v39 }
0x1e81   :  { %5312 = vrot.lane.b32.xlu1 %v12261_v9, %s7033_s6  ;;  %5310 = vrot.lane.b32.xlu0 %v12264_v6, %s7033_s6 }
0x1e82   :  { %v12274_v62 = vadd.f32 8.0, %v5281_v55  ;;  %v12276_v16 = vadd.f32 8.0, %v5280_v24  ;;  %v12279_v18 = vadd.f32 %v5295_v53, %v12177_v54  ;;  %v12282_v30 = vadd.f32 %v5294_v22, %v12180_v40 }
0x1e84   :  { %v5297_v4 = vmul.f32 0.025, %v12274_v62  ;;  %v5296_v38 = vmul.f32 0.025, %v12276_v16 }
0x1e85   :  { %5316 = vrot.lane.b32.xlu1 %v12279_v18, %s7033_s6  ;;  %5314 = vrot.lane.b32.xlu0 %v12282_v30, %s7033_s6 }
0x1e86   :  { %v12291_v48 = vadd.f32 %v5297_v4, %v12187_v56  ;;  %v12294_v19 = vadd.f32 %v5296_v38, %v12190_v39 }
0x1e89   :  { %5320 = vrot.lane.b32.xlu1 %v12291_v48, %s7033_s6  ;;  %5318 = vrot.lane.b32.xlu0 %v12294_v19, %s7033_s6 }
0x1e8d   :  { %5340 = vrot.lane.b32.xlu1 %v12243_v63, %s7034_s1  ;;  %5338 = vrot.lane.b32.xlu0 %v12246_v36, %s7034_s1 }
0x1e91   :  { %5344 = vrot.lane.b32.xlu1 %v12261_v9, %s7034_s1  ;;  %5342 = vrot.lane.b32.xlu0 %v12264_v6, %s7034_s1 }
0x1e95   :  { %5348 = vrot.lane.b32.xlu1 %v12279_v18, %s7034_s1  ;;  %5346 = vrot.lane.b32.xlu0 %v12282_v30, %s7034_s1 }
0x1e99   :  { %5352 = vrot.lane.b32.xlu1 %v12291_v48, %s7034_s1  ;;  %5350 = vrot.lane.b32.xlu0 %v12294_v19, %s7034_s1 }
0x1e9d   :  { %5324 = vrot.lane.b32.xlu1 %v12243_v63, %s7035_s7  ;;  %5322 = vrot.lane.b32.xlu0 %v12246_v36, %s7035_s7 }
0x1ea1   :  { %5328 = vrot.lane.b32.xlu1 %v12261_v9, %s7035_s7  ;;  %5326 = vrot.lane.b32.xlu0 %v12264_v6, %s7035_s7 }
0x1ea5   :  { %5332 = vrot.lane.b32.xlu1 %v12279_v18, %s7035_s7  ;;  %5330 = vrot.lane.b32.xlu0 %v12282_v30, %s7035_s7 }
0x1ea9   :  { %5336 = vrot.lane.b32.xlu1 %v12291_v48, %s7035_s7  ;;  %5334 = vrot.lane.b32.xlu0 %v12294_v19, %s7035_s7 }
0x1eef   :  { %v5309_v0 = vpop.permute.xlu1 %5308  ;;  %v5307_v34 = vpop.permute.xlu0 %5306 }
0x1ef3   :  { %v5313_v35 = vpop.permute.xlu1 %5312  ;;  %v5311_v10 = vpop.permute.xlu0 %5310 }
0x1ef7   :  { %v5317_v44 = vpop.permute.xlu1 %5316  ;;  %v5315_v51 = vpop.permute.xlu0 %5314 }
0x1efb   :  { %v5321_v45 = vpop.permute.xlu1 %5320  ;;  %v5319_v2 = vpop.permute.xlu0 %5318 }
0x1eff   :  { %v5341_v3 = vpop.permute.xlu1 %5340  ;;  %v5339_v11 = vpop.permute.xlu0 %5338 }
0x1f00   :  { %v5355_v28 = vsub.f32 %v5309_v0, %v5341_v3  ;;  %v5354_v46 = vsub.f32 %v5307_v34, %v5339_v11 }
0x1f03   :  { %v5345_v26 = vpop.permute.xlu1 %5344  ;;  %v5343_v60 = vpop.permute.xlu0 %5342 }
0x1f04   :  { %v5357_v12 = vsub.f32 %v5313_v35, %v5345_v26  ;;  %v5356_v57 = vsub.f32 %v5311_v10, %v5343_v60 }
0x1f07   :  { %v5349_v7 = vpop.permute.xlu1 %5348  ;;  %v5347_v47 = vpop.permute.xlu0 %5346 }
0x1f08   :  { %v5359_v13 = vsub.f32 %v5317_v44, %v5349_v7  ;;  %v5358_v17 = vsub.f32 %v5315_v51, %v5347_v47 }
0x1f0b   :  { %v5353_v41 = vpop.permute.xlu1 %5352  ;;  %v5351_v8 = vpop.permute.xlu0 %5350 }
0x1f0c   :  { %v5361_v44 = vsub.f32 %v5321_v45, %v5353_v41  ;;  %v5360_v51 = vsub.f32 %v5319_v2, %v5351_v8 }
0x1f0f   :  { %v5325_v32 = vpop.permute.xlu1 %5324  ;;  %v5323_v29 = vpop.permute.xlu0 %5322 }
0x1f10   :  { %v5363_v21 = vmul.f32 %v5355_v28, %v5325_v32  ;;  %v5362_v49 = vmul.f32 %v5354_v46, %v5323_v29 }
0x1f12   :  { %v5371_v37 = vsub.f32 %v5363_v21, %v12243_v63  ;;  %v5370_v5 = vsub.f32 %v5362_v49, %v12246_v36 }
0x1f13   :  { %v5329_v27 = vpop.permute.xlu1 %5328  ;;  %v5327_v20 = vpop.permute.xlu0 %5326 }
0x1f14   :  { %v12334_v59 = vadd.f32 8.0, %v5371_v37  ;;  %v12336_v58 = vadd.f32 8.0, %v5370_v5  ;;  %v5365_v1 = vmul.f32 %v5357_v12, %v5329_v27  ;;  %v5364_v25 = vmul.f32 %v5356_v57, %v5327_v20 }
0x1f16   :  { %v5403_v53 = vmul.f32 0.025, %v12334_v59  ;;  %v5402_v22 = vmul.f32 0.025, %v12336_v58  ;;  %v5373_v55 = vsub.f32 %v5365_v1, %v12261_v9  ;;  %v5372_v63 = vsub.f32 %v5364_v25, %v12264_v6 }
0x1f17   :  { %v5333_v24 = vpop.permute.xlu1 %5332  ;;  %v5331_v36 = vpop.permute.xlu0 %5330 }
0x1f18   :  { %v5367_v4 = vmul.f32 %v5359_v13, %v5333_v24  ;;  %v5366_v38 = vmul.f32 %v5358_v17, %v5331_v36  ;;  %v12342_v0 = vadd.f32 8.0, %v5373_v55  ;;  %v12344_v34 = vadd.f32 8.0, %v5372_v63 }
0x1f19   :  { %v12347_v35 = vadd.f32 %v5403_v53, %v12147_v50  ;;  %v12350_v10 = vadd.f32 %v5402_v22, %v12150_v23 }
0x1f1a   :  { %v5375_v9 = vsub.f32 %v5367_v4, %v12279_v18  ;;  %v5374_v6 = vsub.f32 %v5366_v38, %v12282_v30  ;;  %v5405_v3 = vmul.f32 0.025, %v12342_v0  ;;  %v5404_v11 = vmul.f32 0.025, %v12344_v34 }
0x1f1b   :  { %5420 = vrot.lane.b32.xlu1 %v12347_v35, %s7033_s6  ;;  %5418 = vrot.lane.b32.xlu0 %v12350_v10, %s7033_s6  ;;  %v5337_v26 = vpop.permute.xlu1 %5336  ;;  %v5335_v60 = vpop.permute.xlu0 %5334 }
0x1f1c   :  { %v12360_v7 = vadd.f32 8.0, %v5375_v9  ;;  %v12362_v45 = vadd.f32 8.0, %v5374_v6  ;;  %v5369_v2 = vmul.f32 %v5361_v44, %v5337_v26  ;;  %v5368_v18 = vmul.f32 %v5360_v51, %v5335_v60 }
0x1f1d   :  { %v12365_v30 = vadd.f32 %v5405_v3, %v12161_v31  ;;  %v12368_v47 = vadd.f32 %v5404_v11, %v12164_v14  ;;  %v5387_v9 = vmul.f32 2.0, %v12334_v59  ;;  %v5386_v6 = vmul.f32 2.0, %v12336_v58 }
0x1f1e   :  { %v5407_v41 = vmul.f32 0.025, %v12360_v7  ;;  %v5406_v8 = vmul.f32 0.025, %v12362_v45  ;;  %v5377_v28 = vsub.f32 %v5369_v2, %v12291_v48  ;;  %v5376_v46 = vsub.f32 %v5368_v18, %v12294_v19 }
0x1f1f   :  { %5424 = vrot.lane.b32.xlu1 %v12365_v30, %s7033_s6  ;;  %5422 = vrot.lane.b32.xlu0 %v12368_v47, %s7033_s6  ;;  %v5389_v3 = vmul.f32 2.0, %v12342_v0  ;;  %v5388_v11 = vmul.f32 2.0, %v12344_v34  ;;  %v5395_v58 = vadd.f32 %v5387_v9, %v12230_v43  ;;  %v5394_v0 = vadd.f32 %v5386_v6, %v12232_v33 }
0x1f20   :  { %v12379_v32 = vadd.f32 %v5407_v41, %v12177_v54  ;;  %v12382_v29 = vadd.f32 %v5406_v8, %v12180_v40  ;;  %v12384_v21 = vadd.f32 8.0, %v5377_v28  ;;  %v12386_v49 = vadd.f32 8.0, %v5376_v46 }
0x1f21   :  { %v5391_v41 = vmul.f32 2.0, %v12360_v7  ;;  %v5390_v8 = vmul.f32 2.0, %v12362_v45  ;;  %v5397_v34 = vadd.f32 %v5389_v3, %v12238_v15 }
0x1f22   :  { %v5409_v48 = vmul.f32 0.025, %v12384_v21  ;;  %v5408_v19 = vmul.f32 0.025, %v12386_v49  ;;  %v5393_v15 = vmul.f32 2.0, %v12384_v21 }
0x1f23   :  { %5428 = vrot.lane.b32.xlu1 %v12379_v32, %s7033_s6  ;;  %5426 = vrot.lane.b32.xlu0 %v12382_v29, %s7033_s6 }
0x1f24   :  { %v12395_v12 = vadd.f32 %v5409_v48, %v12187_v56  ;;  %v12398_v57 = vadd.f32 %v5408_v19, %v12190_v39  ;;  %v5396_v19 = vadd.f32 %v5388_v11, %v12240_v52 }
0x1f27   :  { %5432 = vrot.lane.b32.xlu1 %v12395_v12, %s7033_s6  ;;  %5430 = vrot.lane.b32.xlu0 %v12398_v57, %s7033_s6 }
0x1f2b   :  { %5452 = vrot.lane.b32.xlu1 %v12347_v35, %s7034_s1  ;;  %5450 = vrot.lane.b32.xlu0 %v12350_v10, %s7034_s1 }
0x1f2f   :  { %5456 = vrot.lane.b32.xlu1 %v12365_v30, %s7034_s1  ;;  %5454 = vrot.lane.b32.xlu0 %v12368_v47, %s7034_s1 }
0x1f33   :  { %5460 = vrot.lane.b32.xlu1 %v12379_v32, %s7034_s1  ;;  %5458 = vrot.lane.b32.xlu0 %v12382_v29, %s7034_s1 }
0x1f37   :  { %5464 = vrot.lane.b32.xlu1 %v12395_v12, %s7034_s1  ;;  %5462 = vrot.lane.b32.xlu0 %v12398_v57, %s7034_s1 }
0x1f3b   :  { %5436 = vrot.lane.b32.xlu1 %v12347_v35, %s7035_s7  ;;  %5434 = vrot.lane.b32.xlu0 %v12350_v10, %s7035_s7 }
0x1f3f   :  { %5440 = vrot.lane.b32.xlu1 %v12365_v30, %s7035_s7  ;;  %5438 = vrot.lane.b32.xlu0 %v12368_v47, %s7035_s7 }
0x1f43   :  { %5444 = vrot.lane.b32.xlu1 %v12379_v32, %s7035_s7  ;;  %5442 = vrot.lane.b32.xlu0 %v12382_v29, %s7035_s7 }
0x1f47   :  { %5448 = vrot.lane.b32.xlu1 %v12395_v12, %s7035_s7  ;;  %5446 = vrot.lane.b32.xlu0 %v12398_v57, %s7035_s7 }
0x1f8d   :  { %v5421_v37 = vpop.permute.xlu1 %5420  ;;  %v5419_v5 = vpop.permute.xlu0 %5418 }
0x1f91   :  { %v5425_v27 = vpop.permute.xlu1 %5424  ;;  %v5423_v20 = vpop.permute.xlu0 %5422 }
0x1f95   :  { %v5429_v1 = vpop.permute.xlu1 %5428  ;;  %v5427_v25 = vpop.permute.xlu0 %5426 }
0x1f99   :  { %v12436_v13 = vpop.permute.xlu1 %5432  ;;  %v12438_v17 = vpop.permute.xlu0 %5430 }
0x1f9d   :  { %v5453_v53 = vpop.permute.xlu1 %5452  ;;  %v5451_v22 = vpop.permute.xlu0 %5450 }
0x1f9e   :  { %v5467_v44 = vsub.f32 %v5421_v37, %v5453_v53  ;;  %v5466_v51 = vsub.f32 %v5419_v5, %v5451_v22 }
0x1fa1   :  { %v5457_v55 = vpop.permute.xlu1 %5456  ;;  %v5455_v63 = vpop.permute.xlu0 %5454 }
0x1fa2   :  { %v5469_v28 = vsub.f32 %v5425_v27, %v5457_v55  ;;  %v5468_v46 = vsub.f32 %v5423_v20, %v5455_v63  ;;  %v5399_v27 = vadd.f32 %v5391_v41, %v12256_v42 }
0x1fa5   :  { %v5461_v24 = vpop.permute.xlu1 %5460  ;;  %v5459_v36 = vpop.permute.xlu0 %5458 }
0x1fa6   :  { %v5471_v20 = vsub.f32 %v5429_v1, %v5461_v24 }
0x1fa9   :  { %v12440_v4 = vpop.permute.xlu1 %5464  ;;  %v12442_v38 = vpop.permute.xlu0 %5462 }
0x1faa   :  { %v5473_v52 = vsub.f32 %v12436_v13, %v12440_v4 }
0x1fad   :  { %v5437_v26 = vpop.permute.xlu1 %5436  ;;  %v5435_v60 = vpop.permute.xlu0 %5434 }
0x1fae   :  { %v5475_v2 = vmul.f32 %v5467_v44, %v5437_v26  ;;  %v5474_v18 = vmul.f32 %v5466_v51, %v5435_v60 }
0x1fb0   :  { %v5483_v48 = vsub.f32 %v5475_v2, %v12347_v35  ;;  %v5482_v59 = vsub.f32 %v5474_v18, %v12350_v10  ;;  %v5398_v35 = vadd.f32 %v5390_v8, %v12258_v61  ;;  %v5470_v10 = vsub.f32 %v5427_v25, %v5459_v36 }
0x1fb1   :  { %v5441_v37 = vpop.permute.xlu1 %5440  ;;  %v5439_v5 = vpop.permute.xlu0 %5438 }
0x1fb2   :  { %v5491_v53 = vadd.f32 8.0, %v5483_v48  ;;  %v5490_v7 = vadd.f32 8.0, %v5482_v59  ;;  %v5477_v22 = vmul.f32 %v5469_v28, %v5441_v37  ;;  %v5476_v45 = vmul.f32 %v5468_v46, %v5439_v5 }
0x1fb4   :  { %v5499_v55 = vmul.f32 2.0, %v5491_v53  ;;  %v5515_v43 = vmul.f32 0.05, %v5491_v53  ;;  %v5498_v63 = vmul.f32 2.0, %v5490_v7  ;;  %v5514_v33 = vmul.f32 0.05, %v5490_v7 }
0x1fb5   :  { %v5485_v44 = vsub.f32 %v5477_v22, %v12365_v30  ;;  %v5484_v51 = vsub.f32 %v5476_v45, %v12368_v47  ;;  %v5445_v9 = vpop.permute.xlu1 %5444  ;;  %v5443_v6 = vpop.permute.xlu0 %5442  ;;  %v5392_v30 = vmul.f32 2.0, %v12386_v49  ;;  %v5472_v47 = vsub.f32 %v12438_v17, %v12442_v38 }
0x1fb6   :  { %v5479_v42 = vmul.f32 %v5471_v20, %v5445_v9  ;;  %v5478_v3 = vmul.f32 %v5470_v10, %v5443_v6  ;;  %v12464_v61 = vadd.f32 %v5515_v43, %v12147_v50  ;;  %v12467_v1 = vadd.f32 %v5514_v33, %v12150_v23 }
0x1fb7   :  { %v5493_v25 = vadd.f32 8.0, %v5485_v44  ;;  %v5492_v24 = vadd.f32 8.0, %v5484_v51  ;;  %v12469_v21 = vadd.f32 %v5499_v55, %v5395_v58  ;;  %v12471_v36 = vadd.f32 %v5498_v63, %v5394_v0 }
0x1fb8   :  { %v5487_v13 = vsub.f32 %v5479_v42, %v12379_v32  ;;  %v5486_v4 = vsub.f32 %v5478_v3, %v12382_v29  ;;  %5532 = vrot.lane.b32.xlu1 %v12464_v61, %s7033_s6  ;;  %5530 = vrot.lane.b32.xlu0 %v12467_v1, %s7033_s6  ;;  %v5400_v45 = vadd.f32 %v5392_v30, %v12276_v16 }
0x1fb9   :  { %v5501_v11 = vmul.f32 2.0, %v5493_v25  ;;  %v5517_v26 = vmul.f32 0.05, %v5493_v25  ;;  %v5500_v60 = vmul.f32 2.0, %v5492_v24  ;;  %v5516_v2 = vmul.f32 0.05, %v5492_v24  ;;  %v5449_v18 = vpop.permute.xlu1 %5448  ;;  %v5447_v41 = vpop.permute.xlu0 %5446 }
0x1fba   :  { %v5495_v49 = vadd.f32 8.0, %v5487_v13  ;;  %v5494_v8 = vadd.f32 8.0, %v5486_v4  ;;  %v5481_v28 = vmul.f32 %v5473_v52, %v5449_v18  ;;  %v5480_v17 = vmul.f32 %v5472_v47, %v5447_v41 }
0x1fbb   :  { %v12483_v32 = vadd.f32 %v5517_v26, %v12161_v31  ;;  %v12486_v29 = vadd.f32 %v5516_v2, %v12164_v14  ;;  %v12488_v38 = vadd.f32 %v5501_v11, %v5397_v34  ;;  %v12490_v46 = vadd.f32 %v5500_v60, %v5396_v19 }
0x1fbc   :  { %v5503_v48 = vmul.f32 2.0, %v5495_v49  ;;  %v5519_v59 = vmul.f32 0.05, %v5495_v49  ;;  %v5502_v58 = vmul.f32 2.0, %v5494_v8  ;;  %v5518_v0 = vmul.f32 0.05, %v5494_v8 }
0x1fbd   :  { %v5489_v37 = vsub.f32 %v5481_v28, %v12395_v12  ;;  %v5488_v5 = vsub.f32 %v5480_v17, %v12398_v57  ;;  %5536 = vrot.lane.b32.xlu1 %v12483_v32, %s7033_s6  ;;  %5534 = vrot.lane.b32.xlu0 %v12486_v29, %s7033_s6  ;;  %v5401_v57 = vadd.f32 %v5393_v15, %v12274_v62 }
0x1fbe   :  { %v12499_v53 = vadd.f32 %v5519_v59, %v12177_v54  ;;  %v12502_v34 = vadd.f32 %v5518_v0, %v12180_v40  ;;  %v12504_v19 = vadd.f32 %v5503_v48, %v5399_v27  ;;  %v12506_v7 = vadd.f32 %v5502_v58, %v5398_v35 }
0x1fbf   :  { %v5497_v22 = vadd.f32 8.0, %v5489_v37  ;;  %v5496_v12 = vadd.f32 8.0, %v5488_v5 }
0x1fc1   :  { %v5505_v20 = vmul.f32 2.0, %v5497_v22  ;;  %v5521_v10 = vmul.f32 0.05, %v5497_v22  ;;  %v5504_v55 = vmul.f32 2.0, %v5496_v12  ;;  %v5520_v43 = vmul.f32 0.05, %v5496_v12  ;;  %5540 = vrot.lane.b32.xlu1 %v12499_v53, %s7033_s6  ;;  %5538 = vrot.lane.b32.xlu0 %v12502_v34, %s7033_s6 }
0x1fc3   :  { %v12515_v27 = vadd.f32 %v5521_v10, %v12187_v56  ;;  %v12518_v35 = vadd.f32 %v5520_v43, %v12190_v39  ;;  %v12520_v63 = vadd.f32 %v5505_v20, %v5401_v57  ;;  %v12522_v62 = vadd.f32 %v5504_v55, %v5400_v45 }
0x1fc5   :  { %5544 = vrot.lane.b32.xlu1 %v12515_v27, %s7033_s6  ;;  %5542 = vrot.lane.b32.xlu0 %v12518_v35, %s7033_s6 }
0x1fc9   :  { %5564 = vrot.lane.b32.xlu1 %v12464_v61, %s7034_s1  ;;  %5562 = vrot.lane.b32.xlu0 %v12467_v1, %s7034_s1 }
0x1fcd   :  { %5568 = vrot.lane.b32.xlu1 %v12483_v32, %s7034_s1  ;;  %5566 = vrot.lane.b32.xlu0 %v12486_v29, %s7034_s1 }
0x1fd1   :  { %5572 = vrot.lane.b32.xlu1 %v12499_v53, %s7034_s1  ;;  %5570 = vrot.lane.b32.xlu0 %v12502_v34, %s7034_s1 }
0x1fd5   :  { %5576 = vrot.lane.b32.xlu1 %v12515_v27, %s7034_s1  ;;  %5574 = vrot.lane.b32.xlu0 %v12518_v35, %s7034_s1 }
0x1fd9   :  { %5548 = vrot.lane.b32.xlu1 %v12464_v61, %s7035_s7  ;;  %5546 = vrot.lane.b32.xlu0 %v12467_v1, %s7035_s7 }
0x1fdd   :  { %5552 = vrot.lane.b32.xlu1 %v12483_v32, %s7035_s7  ;;  %5550 = vrot.lane.b32.xlu0 %v12486_v29, %s7035_s7 }
0x1fe1   :  { %5556 = vrot.lane.b32.xlu1 %v12499_v53, %s7035_s7  ;;  %5554 = vrot.lane.b32.xlu0 %v12502_v34, %s7035_s7 }
0x1fe5   :  { %5560 = vrot.lane.b32.xlu1 %v12515_v27, %s7035_s7  ;;  %5558 = vrot.lane.b32.xlu0 %v12518_v35, %s7035_s7 }
0x202a   :  { %v5533_v16 = vpop.permute.xlu1 %5532  ;;  %v5531_v33 = vpop.permute.xlu0 %5530 }
0x202f   :  { %v5537_v15 = vpop.permute.xlu1 %5536  ;;  %v5535_v52 = vpop.permute.xlu0 %5534 }
0x2033   :  { %v5541_v44 = vpop.permute.xlu1 %5540  ;;  %v5539_v51 = vpop.permute.xlu0 %5538 }
0x2037   :  { %v5545_v9 = vpop.permute.xlu1 %5544  ;;  %v5543_v6 = vpop.permute.xlu0 %5542 }
0x203b   :  { %v5565_v42 = vpop.permute.xlu1 %5564  ;;  %v5563_v3 = vpop.permute.xlu0 %5562 }
0x203c   :  { %v5579_v11 = vsub.f32 %v5533_v16, %v5565_v42  ;;  %v5578_v26 = vsub.f32 %v5531_v33, %v5563_v3 }
0x203f   :  { %v5569_v25 = vpop.permute.xlu1 %5568  ;;  %v5567_v24 = vpop.permute.xlu0 %5566 }
0x2040   :  { %v5581_v49 = vsub.f32 %v5537_v15, %v5569_v25  ;;  %v5580_v8 = vsub.f32 %v5535_v52, %v5567_v24 }
0x2043   :  { %v5573_v30 = vpop.permute.xlu1 %5572  ;;  %v5571_v47 = vpop.permute.xlu0 %5570 }
0x2044   :  { %v5583_v20 = vsub.f32 %v5541_v44, %v5573_v30  ;;  %v5582_v10 = vsub.f32 %v5539_v51, %v5571_v47 }
0x2047   :  { %v5577_v13 = vpop.permute.xlu1 %5576  ;;  %v5575_v4 = vpop.permute.xlu0 %5574 }
0x2048   :  { %v5585_v15 = vsub.f32 %v5545_v9, %v5577_v13  ;;  %v5584_v52 = vsub.f32 %v5543_v6, %v5575_v4 }
0x204b   :  { %v5549_v60 = vpop.permute.xlu1 %5548  ;;  %v5547_v2 = vpop.permute.xlu0 %5546 }
0x204c   :  { %v5587_v18 = vmul.f32 %v5579_v11, %v5549_v60  ;;  %v5586_v41 = vmul.f32 %v5578_v26, %v5547_v2 }
0x204e   :  { %v5595_v28 = vsub.f32 %v5587_v18, %v12464_v61  ;;  %v5594_v17 = vsub.f32 %v5586_v41, %v12467_v1 }
0x204f   :  { %v5553_v48 = vpop.permute.xlu1 %5552  ;;  %v5551_v59 = vpop.permute.xlu0 %5550 }
0x2050   :  { %v5603_v58 = vadd.f32 8.0, %v5595_v28  ;;  %v5602_v0 = vadd.f32 8.0, %v5594_v17  ;;  %v5589_v37 = vmul.f32 %v5581_v49, %v5553_v48  ;;  %v5588_v5 = vmul.f32 %v5580_v8, %v5551_v59 }
0x2052   :  { %v5611_v22 = vadd.f32 %v5603_v58, %v12469_v21  ;;  %v5610_v12 = vadd.f32 %v5602_v0, %v12471_v36  ;;  %v5597_v57 = vsub.f32 %v5589_v37, %v12483_v32  ;;  %v5596_v45 = vsub.f32 %v5588_v5, %v12486_v29 }
0x2053   :  { %v5557_v55 = vpop.permute.xlu1 %5556  ;;  %v5555_v61 = vpop.permute.xlu0 %5554 }
0x2054   :  { %v5619_v43 = vmul.f32 0.008333334, %v5611_v22  ;;  %v5618_v1 = vmul.f32 0.008333334, %v5610_v12  ;;  %v5605_v16 = vadd.f32 8.0, %v5597_v57  ;;  %v5604_v33 = vadd.f32 8.0, %v5596_v45 }
0x2055   :  { %v5591_v42 = vmul.f32 %v5583_v20, %v5557_v55  ;;  %v5590_v3 = vmul.f32 %v5582_v10, %v5555_v61 }
0x2056   :  { %v12567_v21 = vadd.f32 %v5619_v43, %v12147_v50  ;;  %v12570_v36 = vadd.f32 %v5618_v1, %v12150_v23  ;;  %v5613_v32 = vadd.f32 %v5605_v16, %v12488_v38  ;;  %v5612_v29 = vadd.f32 %v5604_v33, %v12490_v46 }
0x2057   :  { %v5599_v44 = vsub.f32 %v5591_v42, %v12499_v53  ;;  %v5598_v51 = vsub.f32 %v5590_v3, %v12502_v34  ;;  %v5561_v25 = vpop.permute.xlu1 %5560  ;;  %v5559_v24 = vpop.permute.xlu0 %5558 }
0x2058   :  { %v5621_v9 = vmul.f32 0.008333334, %v5613_v32  ;;  %v5620_v6 = vmul.f32 0.008333334, %v5612_v29  ;;  %v5593_v30 = vmul.f32 %v5585_v15, %v5561_v25  ;;  %v5592_v47 = vmul.f32 %v5584_v52, %v5559_v24  ;;  %5636 = vrot.lane.b32.xlu1 %v12567_v21, %s7033_s6  ;;  %5634 = vrot.lane.b32.xlu0 %v12570_v36, %s7033_s6 }
0x2059   :  { %v5607_v50 = vadd.f32 8.0, %v5599_v44  ;;  %v5606_v23 = vadd.f32 8.0, %v5598_v51 }
0x205a   :  { %v12581_v38 = vadd.f32 %v5621_v9, %v12161_v31  ;;  %v12584_v46 = vadd.f32 %v5620_v6, %v12164_v14  ;;  %v5601_v53 = vsub.f32 %v5593_v30, %v12515_v27  ;;  %v5600_v34 = vsub.f32 %v5592_v47, %v12518_v35 }
0x205b   :  { %v5615_v13 = vadd.f32 %v5607_v50, %v12504_v19  ;;  %v5614_v4 = vadd.f32 %v5606_v23, %v12506_v7 }
0x205c   :  { %v5609_v11 = vadd.f32 8.0, %v5601_v53  ;;  %v5608_v26 = vadd.f32 8.0, %v5600_v34  ;;  %5640 = vrot.lane.b32.xlu1 %v12581_v38, %s7033_s6  ;;  %5638 = vrot.lane.b32.xlu0 %v12584_v46, %s7033_s6 }
0x205d   :  { %v5623_v31 = vmul.f32 0.008333334, %v5615_v13  ;;  %v5622_v60 = vmul.f32 0.008333334, %v5614_v4 }
0x205e   :  { %v5617_v14 = vadd.f32 %v5609_v11, %v12520_v63  ;;  %v5616_v27 = vadd.f32 %v5608_v26, %v12522_v62 }
0x205f   :  { %v12597_v35 = vadd.f32 %v5623_v31, %v12177_v54  ;;  %v12600_v19 = vadd.f32 %v5622_v60, %v12180_v40 }
0x2060   :  { %v5625_v7 = vmul.f32 0.008333334, %v5617_v14  ;;  %v5624_v2 = vmul.f32 0.008333334, %v5616_v27 }
0x2061   :  { %5644 = vrot.lane.b32.xlu1 %v12597_v35, %s7033_s6  ;;  %5642 = vrot.lane.b32.xlu0 %v12600_v19, %s7033_s6 }
0x2062   :  { %v12607_v18 = vadd.f32 %v5625_v7, %v12187_v56  ;;  %v12610_v63 = vadd.f32 %v5624_v2, %v12190_v39 }
0x2065   :  { %5648 = vrot.lane.b32.xlu1 %v12607_v18, %s7033_s6  ;;  %5646 = vrot.lane.b32.xlu0 %v12610_v63, %s7033_s6 }
0x2069   :  { %5668 = vrot.lane.b32.xlu1 %v12567_v21, %s7034_s1  ;;  %5666 = vrot.lane.b32.xlu0 %v12570_v36, %s7034_s1 }
0x206d   :  { %5672 = vrot.lane.b32.xlu1 %v12581_v38, %s7034_s1  ;;  %5670 = vrot.lane.b32.xlu0 %v12584_v46, %s7034_s1 }
0x2071   :  { %5676 = vrot.lane.b32.xlu1 %v12597_v35, %s7034_s1  ;;  %5674 = vrot.lane.b32.xlu0 %v12600_v19, %s7034_s1 }
0x2075   :  { %5680 = vrot.lane.b32.xlu1 %v12607_v18, %s7034_s1  ;;  %5678 = vrot.lane.b32.xlu0 %v12610_v63, %s7034_s1 }
0x2079   :  { %5652 = vrot.lane.b32.xlu1 %v12567_v21, %s7035_s7  ;;  %5650 = vrot.lane.b32.xlu0 %v12570_v36, %s7035_s7 }
0x207d   :  { %5656 = vrot.lane.b32.xlu1 %v12581_v38, %s7035_s7  ;;  %5654 = vrot.lane.b32.xlu0 %v12584_v46, %s7035_s7 }
0x2081   :  { %5660 = vrot.lane.b32.xlu1 %v12597_v35, %s7035_s7  ;;  %5658 = vrot.lane.b32.xlu0 %v12600_v19, %s7035_s7 }
0x2085   :  { %5664 = vrot.lane.b32.xlu1 %v12607_v18, %s7035_s7  ;;  %5662 = vrot.lane.b32.xlu0 %v12610_v63, %s7035_s7 }
0x20ca   :  { %v5637_v54 = vpop.permute.xlu1 %5636  ;;  %v5635_v40 = vpop.permute.xlu0 %5634 }
0x20ce   :  { %v5641_v56 = vpop.permute.xlu1 %5640  ;;  %v5639_v39 = vpop.permute.xlu0 %5638 }
0x20d3   :  { %v5645_v62 = vpop.permute.xlu1 %5644  ;;  %v5643_v41 = vpop.permute.xlu0 %5642 }
0x20d7   :  { %v5649_v49 = vpop.permute.xlu1 %5648  ;;  %v5647_v8 = vpop.permute.xlu0 %5646 }
0x20db   :  { %v5669_v28 = vpop.permute.xlu1 %5668  ;;  %v5667_v17 = vpop.permute.xlu0 %5666 }
0x20dc   :  { %v5683_v22 = vsub.f32 %v5637_v54, %v5669_v28  ;;  %v5682_v12 = vsub.f32 %v5635_v40, %v5667_v17 }
0x20df   :  { %v5673_v48 = vpop.permute.xlu1 %5672  ;;  %v5671_v59 = vpop.permute.xlu0 %5670 }
0x20e0   :  { %v5685_v55 = vsub.f32 %v5641_v56, %v5673_v48  ;;  %v5684_v61 = vsub.f32 %v5639_v39, %v5671_v59 }
0x20e3   :  { %v5677_v58 = vpop.permute.xlu1 %5676  ;;  %v5675_v0 = vpop.permute.xlu0 %5674 }
0x20e4   :  { %v5687_v32 = vsub.f32 %v5645_v62, %v5677_v58  ;;  %v5686_v29 = vsub.f32 %v5643_v41, %v5675_v0 }
0x20e7   :  { %v5681_v37 = vpop.permute.xlu1 %5680  ;;  %v5679_v5 = vpop.permute.xlu0 %5678 }
0x20e8   :  { %v5689_v53 = vsub.f32 %v5649_v49, %v5681_v37  ;;  %v5688_v34 = vsub.f32 %v5647_v8, %v5679_v5 }
0x20eb   :  { %v5653_v57 = vpop.permute.xlu1 %5652  ;;  %v5651_v45 = vpop.permute.xlu0 %5650 }
0x20ec   :  { %v5691_v20 = vmul.f32 %v5683_v22, %v5653_v57  ;;  %v5690_v10 = vmul.f32 %v5682_v12, %v5651_v45 }
0x20ee   :  { %v5699_v43 = vsub.f32 %v5691_v20, %v12567_v21  ;;  %v5698_v1 = vsub.f32 %v5690_v10, %v12570_v36 }
0x20ef   :  { %v5657_v16 = vpop.permute.xlu1 %5656  ;;  %v5655_v33 = vpop.permute.xlu0 %5654 }
0x20f0   :  { %v12650_v15 = vadd.f32 8.0, %v5699_v43  ;;  %v12652_v52 = vadd.f32 8.0, %v5698_v1  ;;  %v5693_v42 = vmul.f32 %v5685_v55, %v5657_v16  ;;  %v5692_v3 = vmul.f32 %v5684_v61, %v5655_v33 }
0x20f2   :  { %v5715_v44 = vmul.f32 0.025, %v12650_v15  ;;  %v5714_v51 = vmul.f32 0.025, %v12652_v52  ;;  %v5701_v25 = vsub.f32 %v5693_v42, %v12581_v38  ;;  %v5700_v24 = vsub.f32 %v5692_v3, %v12584_v46 }
0x20f3   :  { %v5661_v9 = vpop.permute.xlu1 %5660  ;;  %v5659_v6 = vpop.permute.xlu0 %5658 }
0x20f4   :  { %v12658_v30 = vadd.f32 8.0, %v5701_v25  ;;  %v12660_v47 = vadd.f32 8.0, %v5700_v24  ;;  %v5695_v50 = vmul.f32 %v5687_v32, %v5661_v9  ;;  %v5694_v23 = vmul.f32 %v5686_v29, %v5659_v6 }
0x20f5   :  { %v12663_v13 = vadd.f32 %v5715_v44, %v12567_v21  ;;  %v12666_v4 = vadd.f32 %v5714_v51, %v12570_v36 }
0x20f6   :  { %v5717_v11 = vmul.f32 0.025, %v12658_v30  ;;  %v5716_v26 = vmul.f32 0.025, %v12660_v47  ;;  %v5703_v31 = vsub.f32 %v5695_v50, %v12597_v35  ;;  %v5702_v60 = vsub.f32 %v5694_v23, %v12600_v19 }
0x20f7   :  { %5732 = vrot.lane.b32.xlu1 %v12663_v13, %s7033_s6  ;;  %5730 = vrot.lane.b32.xlu0 %v12666_v4, %s7033_s6  ;;  %v5665_v14 = vpop.permute.xlu1 %5664  ;;  %v5663_v27 = vpop.permute.xlu0 %5662 }
0x20f8   :  { %v12676_v7 = vadd.f32 8.0, %v5703_v31  ;;  %v12678_v2 = vadd.f32 8.0, %v5702_v60  ;;  %v5697_v54 = vmul.f32 %v5689_v53, %v5665_v14  ;;  %v5696_v40 = vmul.f32 %v5688_v34, %v5663_v27 }
0x20f9   :  { %v12681_v56 = vadd.f32 %v5717_v11, %v12581_v38  ;;  %v12684_v39 = vadd.f32 %v5716_v26, %v12584_v46 }
0x20fa   :  { %v5719_v62 = vmul.f32 0.025, %v12676_v7  ;;  %v5718_v41 = vmul.f32 0.025, %v12678_v2  ;;  %v5705_v49 = vsub.f32 %v5697_v54, %v12607_v18  ;;  %v5704_v8 = vsub.f32 %v5696_v40, %v12610_v63 }
0x20fb   :  { %5736 = vrot.lane.b32.xlu1 %v12681_v56, %s7033_s6  ;;  %5734 = vrot.lane.b32.xlu0 %v12684_v39, %s7033_s6 }
0x20fc   :  { %v12694_v28 = vadd.f32 8.0, %v5705_v49  ;;  %v12696_v17 = vadd.f32 8.0, %v5704_v8  ;;  %v12699_v48 = vadd.f32 %v5719_v62, %v12597_v35  ;;  %v12702_v59 = vadd.f32 %v5718_v41, %v12600_v19 }
0x20fe   :  { %v5721_v58 = vmul.f32 0.025, %v12694_v28  ;;  %v5720_v0 = vmul.f32 0.025, %v12696_v17 }
0x20ff   :  { %5740 = vrot.lane.b32.xlu1 %v12699_v48, %s7033_s6  ;;  %5738 = vrot.lane.b32.xlu0 %v12702_v59, %s7033_s6 }
0x2100   :  { %v12711_v37 = vadd.f32 %v5721_v58, %v12607_v18  ;;  %v12714_v5 = vadd.f32 %v5720_v0, %v12610_v63 }
0x2103   :  { %5744 = vrot.lane.b32.xlu1 %v12711_v37, %s7033_s6  ;;  %5742 = vrot.lane.b32.xlu0 %v12714_v5, %s7033_s6 }
0x2107   :  { %5764 = vrot.lane.b32.xlu1 %v12663_v13, %s7034_s1  ;;  %5762 = vrot.lane.b32.xlu0 %v12666_v4, %s7034_s1 }
0x210b   :  { %5768 = vrot.lane.b32.xlu1 %v12681_v56, %s7034_s1  ;;  %5766 = vrot.lane.b32.xlu0 %v12684_v39, %s7034_s1 }
0x210f   :  { %5772 = vrot.lane.b32.xlu1 %v12699_v48, %s7034_s1  ;;  %5770 = vrot.lane.b32.xlu0 %v12702_v59, %s7034_s1 }
0x2113   :  { %5776 = vrot.lane.b32.xlu1 %v12711_v37, %s7034_s1  ;;  %5774 = vrot.lane.b32.xlu0 %v12714_v5, %s7034_s1 }
0x2117   :  { %5748 = vrot.lane.b32.xlu1 %v12663_v13, %s7035_s7  ;;  %5746 = vrot.lane.b32.xlu0 %v12666_v4, %s7035_s7 }
0x211b   :  { %5752 = vrot.lane.b32.xlu1 %v12681_v56, %s7035_s7  ;;  %5750 = vrot.lane.b32.xlu0 %v12684_v39, %s7035_s7 }
0x211f   :  { %5756 = vrot.lane.b32.xlu1 %v12699_v48, %s7035_s7  ;;  %5754 = vrot.lane.b32.xlu0 %v12702_v59, %s7035_s7 }
0x2123   :  { %5760 = vrot.lane.b32.xlu1 %v12711_v37, %s7035_s7  ;;  %5758 = vrot.lane.b32.xlu0 %v12714_v5, %s7035_s7 }
0x2169   :  { %v5733_v22 = vpop.permute.xlu1 %5732  ;;  %v5731_v12 = vpop.permute.xlu0 %5730 }
0x216d   :  { %v5737_v57 = vpop.permute.xlu1 %5736  ;;  %v5735_v45 = vpop.permute.xlu0 %5734 }
0x2171   :  { %v5741_v20 = vpop.permute.xlu1 %5740  ;;  %v5739_v10 = vpop.permute.xlu0 %5738 }
0x2175   :  { %v5745_v55 = vpop.permute.xlu1 %5744  ;;  %v5743_v61 = vpop.permute.xlu0 %5742 }
0x2179   :  { %v5765_v43 = vpop.permute.xlu1 %5764  ;;  %v5763_v1 = vpop.permute.xlu0 %5762 }
0x217a   :  { %v5779_v44 = vsub.f32 %v5733_v22, %v5765_v43  ;;  %v5778_v51 = vsub.f32 %v5731_v12, %v5763_v1 }
0x217d   :  { %v5769_v16 = vpop.permute.xlu1 %5768  ;;  %v5767_v33 = vpop.permute.xlu0 %5766 }
0x217e   :  { %v5781_v50 = vsub.f32 %v5737_v57, %v5769_v16  ;;  %v5780_v23 = vsub.f32 %v5735_v45, %v5767_v33 }
0x2181   :  { %v5773_v42 = vpop.permute.xlu1 %5772  ;;  %v5771_v3 = vpop.permute.xlu0 %5770 }
0x2182   :  { %v5783_v54 = vsub.f32 %v5741_v20, %v5773_v42  ;;  %v5782_v40 = vsub.f32 %v5739_v10, %v5771_v3 }
0x2185   :  { %v5777_v32 = vpop.permute.xlu1 %5776  ;;  %v5775_v29 = vpop.permute.xlu0 %5774 }
0x2186   :  { %v5785_v20 = vsub.f32 %v5745_v55, %v5777_v32  ;;  %v5784_v10 = vsub.f32 %v5743_v61, %v5775_v29 }
0x2189   :  { %v5749_v25 = vpop.permute.xlu1 %5748  ;;  %v5747_v24 = vpop.permute.xlu0 %5746 }
0x218a   :  { %v5787_v9 = vmul.f32 %v5779_v44, %v5749_v25  ;;  %v5786_v6 = vmul.f32 %v5778_v51, %v5747_v24 }
0x218c   :  { %v5795_v53 = vsub.f32 %v5787_v9, %v12663_v13  ;;  %v5794_v34 = vsub.f32 %v5786_v6, %v12666_v4 }
0x218d   :  { %v5753_v11 = vpop.permute.xlu1 %5752  ;;  %v5751_v26 = vpop.permute.xlu0 %5750 }
0x218e   :  { %v12754_v31 = vadd.f32 8.0, %v5795_v53  ;;  %v12756_v60 = vadd.f32 8.0, %v5794_v34  ;;  %v5789_v14 = vmul.f32 %v5781_v50, %v5753_v11  ;;  %v5788_v27 = vmul.f32 %v5780_v23, %v5751_v26 }
0x2190   :  { %v5827_v62 = vmul.f32 0.025, %v12754_v31  ;;  %v5826_v41 = vmul.f32 0.025, %v12756_v60  ;;  %v5797_v49 = vsub.f32 %v5789_v14, %v12681_v56  ;;  %v5796_v13 = vsub.f32 %v5788_v27, %v12684_v39 }
0x2191   :  { %v5757_v8 = vpop.permute.xlu1 %5756  ;;  %v5755_v4 = vpop.permute.xlu0 %5754 }
0x2192   :  { %v5791_v58 = vmul.f32 %v5783_v54, %v5757_v8  ;;  %v5790_v0 = vmul.f32 %v5782_v40, %v5755_v4  ;;  %v12762_v22 = vadd.f32 8.0, %v5797_v49  ;;  %v12764_v12 = vadd.f32 8.0, %v5796_v13 }
0x2193   :  { %v12767_v57 = vadd.f32 %v5827_v62, %v12567_v21  ;;  %v12770_v45 = vadd.f32 %v5826_v41, %v12570_v36 }
0x2194   :  { %v5799_v56 = vsub.f32 %v5791_v58, %v12699_v48  ;;  %v5798_v39 = vsub.f32 %v5790_v0, %v12702_v59  ;;  %v5829_v43 = vmul.f32 0.025, %v12762_v22  ;;  %v5828_v1 = vmul.f32 0.025, %v12764_v12 }
0x2195   :  { %5844 = vrot.lane.b32.xlu1 %v12767_v57, %s7033_s6  ;;  %5842 = vrot.lane.b32.xlu0 %v12770_v45, %s7033_s6  ;;  %v5761_v16 = vpop.permute.xlu1 %5760  ;;  %v5759_v33 = vpop.permute.xlu0 %5758 }
0x2196   :  { %v12780_v42 = vadd.f32 8.0, %v5799_v56  ;;  %v12782_v55 = vadd.f32 8.0, %v5798_v39  ;;  %v5793_v61 = vmul.f32 %v5785_v20, %v5761_v16  ;;  %v5792_v48 = vmul.f32 %v5784_v10, %v5759_v33 }
0x2197   :  { %v12785_v59 = vadd.f32 %v5829_v43, %v12581_v38  ;;  %v12788_v3 = vadd.f32 %v5828_v1, %v12584_v46  ;;  %v5811_v56 = vmul.f32 2.0, %v12754_v31  ;;  %v5810_v39 = vmul.f32 2.0, %v12756_v60 }
0x2198   :  { %v5831_v32 = vmul.f32 0.025, %v12780_v42  ;;  %v5830_v29 = vmul.f32 0.025, %v12782_v55  ;;  %v5801_v44 = vsub.f32 %v5793_v61, %v12711_v37  ;;  %v5800_v51 = vsub.f32 %v5792_v48, %v12714_v5 }
0x2199   :  { %5848 = vrot.lane.b32.xlu1 %v12785_v59, %s7033_s6  ;;  %5846 = vrot.lane.b32.xlu0 %v12788_v3, %s7033_s6  ;;  %v5813_v43 = vmul.f32 2.0, %v12762_v22  ;;  %v5812_v1 = vmul.f32 2.0, %v12764_v12  ;;  %v5819_v60 = vadd.f32 %v5811_v56, %v12650_v15  ;;  %v5818_v22 = vadd.f32 %v5810_v39, %v12652_v52 }
0x219a   :  { %v12799_v25 = vadd.f32 %v5831_v32, %v12597_v35  ;;  %v12802_v24 = vadd.f32 %v5830_v29, %v12600_v19  ;;  %v12804_v9 = vadd.f32 8.0, %v5801_v44  ;;  %v12806_v6 = vadd.f32 8.0, %v5800_v51 }
0x219b   :  { %v5815_v32 = vmul.f32 2.0, %v12780_v42  ;;  %v5814_v29 = vmul.f32 2.0, %v12782_v55  ;;  %v5821_v12 = vadd.f32 %v5813_v43, %v12658_v30 }
0x219c   :  { %v5833_v37 = vmul.f32 0.025, %v12804_v9  ;;  %v5832_v5 = vmul.f32 0.025, %v12806_v6  ;;  %v5817_v30 = vmul.f32 2.0, %v12804_v9 }
0x219d   :  { %5852 = vrot.lane.b32.xlu1 %v12799_v25, %s7033_s6  ;;  %5850 = vrot.lane.b32.xlu0 %v12802_v24, %s7033_s6 }
0x219e   :  { %v12815_v50 = vadd.f32 %v5833_v37, %v12607_v18  ;;  %v12818_v23 = vadd.f32 %v5832_v5, %v12610_v63  ;;  %v5820_v5 = vadd.f32 %v5812_v1, %v12660_v47 }
0x21a1   :  { %5856 = vrot.lane.b32.xlu1 %v12815_v50, %s7033_s6  ;;  %5854 = vrot.lane.b32.xlu0 %v12818_v23, %s7033_s6 }
0x21a5   :  { %5876 = vrot.lane.b32.xlu1 %v12767_v57, %s7034_s1  ;;  %5874 = vrot.lane.b32.xlu0 %v12770_v45, %s7034_s1 }
0x21a9   :  { %5880 = vrot.lane.b32.xlu1 %v12785_v59, %s7034_s1  ;;  %5878 = vrot.lane.b32.xlu0 %v12788_v3, %s7034_s1 }
0x21ad   :  { %5884 = vrot.lane.b32.xlu1 %v12799_v25, %s7034_s1  ;;  %5882 = vrot.lane.b32.xlu0 %v12802_v24, %s7034_s1 }
0x21b1   :  { %5888 = vrot.lane.b32.xlu1 %v12815_v50, %s7034_s1  ;;  %5886 = vrot.lane.b32.xlu0 %v12818_v23, %s7034_s1 }
0x21b5   :  { %5860 = vrot.lane.b32.xlu1 %v12767_v57, %s7035_s7  ;;  %5858 = vrot.lane.b32.xlu0 %v12770_v45, %s7035_s7 }
0x21b9   :  { %5864 = vrot.lane.b32.xlu1 %v12785_v59, %s7035_s7  ;;  %5862 = vrot.lane.b32.xlu0 %v12788_v3, %s7035_s7 }
0x21bd   :  { %5868 = vrot.lane.b32.xlu1 %v12799_v25, %s7035_s7  ;;  %5866 = vrot.lane.b32.xlu0 %v12802_v24, %s7035_s7 }
0x21c1   :  { %5872 = vrot.lane.b32.xlu1 %v12815_v50, %s7035_s7  ;;  %5870 = vrot.lane.b32.xlu0 %v12818_v23, %s7035_s7 }
0x2207   :  { %v5845_v53 = vpop.permute.xlu1 %5844  ;;  %v5843_v34 = vpop.permute.xlu0 %5842 }
0x220b   :  { %v5849_v11 = vpop.permute.xlu1 %5848  ;;  %v5847_v26 = vpop.permute.xlu0 %5846 }
0x220f   :  { %v5853_v14 = vpop.permute.xlu1 %5852  ;;  %v5851_v27 = vpop.permute.xlu0 %5850 }
0x2213   :  { %v12856_v54 = vpop.permute.xlu1 %5856  ;;  %v12858_v40 = vpop.permute.xlu0 %5854 }
0x2217   :  { %v5877_v62 = vpop.permute.xlu1 %5876  ;;  %v5875_v41 = vpop.permute.xlu0 %5874 }
0x2218   :  { %v5891_v20 = vsub.f32 %v5845_v53, %v5877_v62  ;;  %v5890_v10 = vsub.f32 %v5843_v34, %v5875_v41 }
0x221b   :  { %v5881_v49 = vpop.permute.xlu1 %5880  ;;  %v5879_v13 = vpop.permute.xlu0 %5878 }
0x221c   :  { %v5893_v44 = vsub.f32 %v5849_v11, %v5881_v49  ;;  %v5892_v51 = vsub.f32 %v5847_v26, %v5879_v13  ;;  %v5823_v11 = vadd.f32 %v5815_v32, %v12676_v7 }
0x221f   :  { %v5885_v8 = vpop.permute.xlu1 %5884  ;;  %v5883_v4 = vpop.permute.xlu0 %5882 }
0x2220   :  { %v5895_v26 = vsub.f32 %v5853_v14, %v5885_v8 }
0x2223   :  { %v12860_v58 = vpop.permute.xlu1 %5888  ;;  %v12862_v0 = vpop.permute.xlu0 %5886 }
0x2224   :  { %v5897_v47 = vsub.f32 %v12856_v54, %v12860_v58 }
0x2227   :  { %v5861_v16 = vpop.permute.xlu1 %5860  ;;  %v5859_v33 = vpop.permute.xlu0 %5858 }
0x2228   :  { %v5899_v61 = vmul.f32 %v5891_v20, %v5861_v16  ;;  %v5898_v48 = vmul.f32 %v5890_v10, %v5859_v33 }
0x222a   :  { %v5907_v37 = vsub.f32 %v5899_v61, %v12767_v57  ;;  %v5906_v31 = vsub.f32 %v5898_v48, %v12770_v45  ;;  %v5822_v57 = vadd.f32 %v5814_v29, %v12678_v2  ;;  %v5894_v45 = vsub.f32 %v5851_v27, %v5883_v4 }
0x222b   :  { %v5865_v53 = vpop.permute.xlu1 %5864  ;;  %v5863_v34 = vpop.permute.xlu0 %5862 }
0x222c   :  { %v5915_v62 = vadd.f32 8.0, %v5907_v37  ;;  %v5914_v42 = vadd.f32 8.0, %v5906_v31  ;;  %v5901_v41 = vmul.f32 %v5893_v44, %v5865_v53  ;;  %v5900_v55 = vmul.f32 %v5892_v51, %v5863_v34 }
0x222e   :  { %v5923_v49 = vmul.f32 2.0, %v5915_v62  ;;  %v5939_v15 = vmul.f32 0.05, %v5915_v62  ;;  %v5922_v13 = vmul.f32 2.0, %v5914_v42  ;;  %v5938_v52 = vmul.f32 0.05, %v5914_v42 }
0x222f   :  { %v5909_v20 = vsub.f32 %v5901_v41, %v12785_v59  ;;  %v5908_v10 = vsub.f32 %v5900_v55, %v12788_v3  ;;  %v5869_v56 = vpop.permute.xlu1 %5868  ;;  %v5867_v39 = vpop.permute.xlu0 %5866  ;;  %v5816_v59 = vmul.f32 2.0, %v12806_v6  ;;  %v5896_v3 = vsub.f32 %v12858_v40, %v12862_v0 }
0x2230   :  { %v5903_v7 = vmul.f32 %v5895_v26, %v5869_v56  ;;  %v5902_v43 = vmul.f32 %v5894_v45, %v5867_v39  ;;  %v12884_v2 = vadd.f32 %v5939_v15, %v12567_v21  ;;  %v12887_v14 = vadd.f32 %v5938_v52, %v12570_v36 }
0x2231   :  { %v5917_v27 = vadd.f32 8.0, %v5909_v20  ;;  %v5916_v8 = vadd.f32 8.0, %v5908_v10  ;;  %v12889_v9 = vadd.f32 %v5923_v49, %v5819_v60  ;;  %v12891_v4 = vadd.f32 %v5922_v13, %v5818_v22 }
0x2232   :  { %v5911_v54 = vsub.f32 %v5903_v7, %v12799_v25  ;;  %v5910_v58 = vsub.f32 %v5902_v43, %v12802_v24  ;;  %5956 = vrot.lane.b32.xlu1 %v12884_v2, %s7033_s6  ;;  %5954 = vrot.lane.b32.xlu0 %v12887_v14, %s7033_s6  ;;  %v5824_v55 = vadd.f32 %v5816_v59, %v12696_v17 }
0x2233   :  { %v5925_v1 = vmul.f32 2.0, %v5917_v27  ;;  %v5941_v16 = vmul.f32 0.05, %v5917_v27  ;;  %v5924_v33 = vmul.f32 2.0, %v5916_v8  ;;  %v5940_v61 = vmul.f32 0.05, %v5916_v8  ;;  %v5873_v48 = vpop.permute.xlu1 %5872  ;;  %v5871_v32 = vpop.permute.xlu0 %5870 }
0x2234   :  { %v5919_v6 = vadd.f32 8.0, %v5911_v54  ;;  %v5918_v29 = vadd.f32 8.0, %v5910_v58  ;;  %v5905_v44 = vmul.f32 %v5897_v47, %v5873_v48  ;;  %v5904_v40 = vmul.f32 %v5896_v3, %v5871_v32 }
0x2235   :  { %v12903_v25 = vadd.f32 %v5941_v16, %v12581_v38  ;;  %v12906_v24 = vadd.f32 %v5940_v61, %v12584_v46  ;;  %v12908_v0 = vadd.f32 %v5925_v1, %v5821_v12  ;;  %v12910_v51 = vadd.f32 %v5924_v33, %v5820_v5 }
0x2236   :  { %v5927_v37 = vmul.f32 2.0, %v5919_v6  ;;  %v5943_v31 = vmul.f32 0.05, %v5919_v6  ;;  %v5926_v60 = vmul.f32 2.0, %v5918_v29  ;;  %v5942_v22 = vmul.f32 0.05, %v5918_v29 }
0x2237   :  { %v5913_v53 = vsub.f32 %v5905_v44, %v12815_v50  ;;  %v5912_v34 = vsub.f32 %v5904_v40, %v12818_v23  ;;  %5960 = vrot.lane.b32.xlu1 %v12903_v25, %s7033_s6  ;;  %5958 = vrot.lane.b32.xlu0 %v12906_v24, %s7033_s6  ;;  %v5825_v23 = vadd.f32 %v5817_v30, %v12694_v28 }
0x2238   :  { %v12919_v62 = vadd.f32 %v5943_v31, %v12597_v35  ;;  %v12922_v12 = vadd.f32 %v5942_v22, %v12600_v19  ;;  %v12924_v5 = vadd.f32 %v5927_v37, %v5823_v11  ;;  %v12926_v42 = vadd.f32 %v5926_v60, %v5822_v57 }
0x2239   :  { %v5921_v41 = vadd.f32 8.0, %v5913_v53  ;;  %v5920_v50 = vadd.f32 8.0, %v5912_v34 }
0x223b   :  { %v5929_v26 = vmul.f32 2.0, %v5921_v41  ;;  %v5945_v45 = vmul.f32 0.05, %v5921_v41  ;;  %v5928_v49 = vmul.f32 2.0, %v5920_v50  ;;  %v5944_v15 = vmul.f32 0.05, %v5920_v50  ;;  %5964 = vrot.lane.b32.xlu1 %v12919_v62, %s7033_s6  ;;  %5962 = vrot.lane.b32.xlu0 %v12922_v12, %s7033_s6 }
0x223d   :  { %v12935_v11 = vadd.f32 %v5945_v45, %v12607_v18  ;;  %v12938_v57 = vadd.f32 %v5944_v15, %v12610_v63  ;;  %v12940_v13 = vadd.f32 %v5929_v26, %v5825_v23  ;;  %v12942_v28 = vadd.f32 %v5928_v49, %v5824_v55 }
0x223f   :  { %5968 = vrot.lane.b32.xlu1 %v12935_v11, %s7033_s6  ;;  %5966 = vrot.lane.b32.xlu0 %v12938_v57, %s7033_s6 }
0x2243   :  { %5988 = vrot.lane.b32.xlu1 %v12884_v2, %s7034_s1  ;;  %5986 = vrot.lane.b32.xlu0 %v12887_v14, %s7034_s1 }
0x2247   :  { %5992 = vrot.lane.b32.xlu1 %v12903_v25, %s7034_s1  ;;  %5990 = vrot.lane.b32.xlu0 %v12906_v24, %s7034_s1 }
0x224b   :  { %5996 = vrot.lane.b32.xlu1 %v12919_v62, %s7034_s1  ;;  %5994 = vrot.lane.b32.xlu0 %v12922_v12, %s7034_s1 }
0x224f   :  { %6000 = vrot.lane.b32.xlu1 %v12935_v11, %s7034_s1  ;;  %5998 = vrot.lane.b32.xlu0 %v12938_v57, %s7034_s1 }
0x2253   :  { %5972 = vrot.lane.b32.xlu1 %v12884_v2, %s7035_s7  ;;  %5970 = vrot.lane.b32.xlu0 %v12887_v14, %s7035_s7 }
0x2257   :  { %5976 = vrot.lane.b32.xlu1 %v12903_v25, %s7035_s7  ;;  %5974 = vrot.lane.b32.xlu0 %v12906_v24, %s7035_s7 }
0x225b   :  { %5980 = vrot.lane.b32.xlu1 %v12919_v62, %s7035_s7  ;;  %5978 = vrot.lane.b32.xlu0 %v12922_v12, %s7035_s7 }
0x225f   :  { %5984 = vrot.lane.b32.xlu1 %v12935_v11, %s7035_s7  ;;  %5982 = vrot.lane.b32.xlu0 %v12938_v57, %s7035_s7 }
0x22a4   :  { %v5957_v17 = vpop.permute.xlu1 %5956  ;;  %v5955_v52 = vpop.permute.xlu0 %5954 }
0x22a9   :  { %v5961_v30 = vpop.permute.xlu1 %5960  ;;  %v5959_v47 = vpop.permute.xlu0 %5958 }
0x22ad   :  { %v5965_v20 = vpop.permute.xlu1 %5964  ;;  %v5963_v10 = vpop.permute.xlu0 %5962 }
0x22b1   :  { %v5969_v56 = vpop.permute.xlu1 %5968  ;;  %v5967_v39 = vpop.permute.xlu0 %5966 }
0x22b5   :  { %v5989_v7 = vpop.permute.xlu1 %5988  ;;  %v5987_v43 = vpop.permute.xlu0 %5986 }
0x22b6   :  { %v6003_v1 = vsub.f32 %v5957_v17, %v5989_v7  ;;  %v6002_v16 = vsub.f32 %v5955_v52, %v5987_v43 }
0x22b9   :  { %v5993_v27 = vpop.permute.xlu1 %5992  ;;  %v5991_v8 = vpop.permute.xlu0 %5990 }
0x22ba   :  { %v6005_v6 = vsub.f32 %v5961_v30, %v5993_v27  ;;  %v6004_v29 = vsub.f32 %v5959_v47, %v5991_v8 }
0x22bd   :  { %v5997_v59 = vpop.permute.xlu1 %5996  ;;  %v5995_v3 = vpop.permute.xlu0 %5994 }
0x22be   :  { %v6007_v26 = vsub.f32 %v5965_v20, %v5997_v59  ;;  %v6006_v45 = vsub.f32 %v5963_v10, %v5995_v3 }
0x22c1   :  { %v6001_v54 = vpop.permute.xlu1 %6000  ;;  %v5999_v58 = vpop.permute.xlu0 %5998 }
0x22c2   :  { %v6009_v30 = vsub.f32 %v5969_v56, %v6001_v54  ;;  %v6008_v47 = vsub.f32 %v5967_v39, %v5999_v58 }
0x22c5   :  { %v5973_v33 = vpop.permute.xlu1 %5972  ;;  %v5971_v61 = vpop.permute.xlu0 %5970 }
0x22c6   :  { %v6011_v48 = vmul.f32 %v6003_v1, %v5973_v33  ;;  %v6010_v32 = vmul.f32 %v6002_v16, %v5971_v61 }
0x22c8   :  { %v6019_v44 = vsub.f32 %v6011_v48, %v12884_v2  ;;  %v6018_v40 = vsub.f32 %v6010_v32, %v12887_v14 }
0x22c9   :  { %v5977_v37 = vpop.permute.xlu1 %5976  ;;  %v5975_v31 = vpop.permute.xlu0 %5974 }
0x22ca   :  { %v6027_v60 = vadd.f32 8.0, %v6019_v44  ;;  %v6026_v22 = vadd.f32 8.0, %v6018_v40  ;;  %v6013_v53 = vmul.f32 %v6005_v6, %v5977_v37  ;;  %v6012_v34 = vmul.f32 %v6004_v29, %v5975_v31 }
0x22cc   :  { %v6035_v41 = vadd.f32 %v6027_v60, %v12889_v9  ;;  %v6034_v50 = vadd.f32 %v6026_v22, %v12891_v4  ;;  %v6021_v23 = vsub.f32 %v6013_v53, %v12903_v25  ;;  %v6020_v55 = vsub.f32 %v6012_v34, %v12906_v24 }
0x22cd   :  { %v5981_v49 = vpop.permute.xlu1 %5980  ;;  %v5979_v2 = vpop.permute.xlu0 %5978 }
0x22ce   :  { %v6043_v15 = vmul.f32 0.008333334, %v6035_v41  ;;  %v6042_v14 = vmul.f32 0.008333334, %v6034_v50  ;;  %v6029_v17 = vadd.f32 8.0, %v6021_v23  ;;  %v6028_v52 = vadd.f32 8.0, %v6020_v55 }
0x22cf   :  { %v6015_v7 = vmul.f32 %v6007_v26, %v5981_v49  ;;  %v6014_v43 = vmul.f32 %v6006_v45, %v5979_v2 }
0x22d0   :  { %v12987_v9 = vadd.f32 %v6043_v15, %v12567_v21  ;;  %v12990_v4 = vadd.f32 %v6042_v14, %v12570_v36  ;;  %v6037_v25 = vadd.f32 %v6029_v17, %v12908_v0  ;;  %v6036_v24 = vadd.f32 %v6028_v52, %v12910_v51 }
0x22d1   :  { %v6023_v20 = vsub.f32 %v6015_v7, %v12919_v62  ;;  %v6022_v10 = vsub.f32 %v6014_v43, %v12922_v12  ;;  %v5985_v27 = vpop.permute.xlu1 %5984  ;;  %v5983_v8 = vpop.permute.xlu0 %5982 }
0x22d2   :  { %v6045_v56 = vmul.f32 0.008333334, %v6037_v25  ;;  %v6044_v39 = vmul.f32 0.008333334, %v6036_v24  ;;  %v6017_v59 = vmul.f32 %v6009_v30, %v5985_v27  ;;  %v6016_v3 = vmul.f32 %v6008_v47, %v5983_v8  ;;  %6060 = vrot.lane.b32.xlu1 %v12987_v9, %s7033_s6  ;;  %6058 = vrot.lane.b32.xlu0 %v12990_v4, %s7033_s6 }
0x22d3   :  { %v6031_v21 = vadd.f32 8.0, %v6023_v20  ;;  %v6030_v36 = vadd.f32 8.0, %v6022_v10 }
0x22d4   :  { %v13001_v0 = vadd.f32 %v6045_v56, %v12581_v38  ;;  %v13004_v51 = vadd.f32 %v6044_v39, %v12584_v46  ;;  %v6025_v62 = vsub.f32 %v6017_v59, %v12935_v11  ;;  %v6024_v12 = vsub.f32 %v6016_v3, %v12938_v57 }
0x22d5   :  { %v6039_v54 = vadd.f32 %v6031_v21, %v12924_v5  ;;  %v6038_v58 = vadd.f32 %v6030_v36, %v12926_v42 }
0x22d6   :  { %v6033_v1 = vadd.f32 8.0, %v6025_v62  ;;  %v6032_v16 = vadd.f32 8.0, %v6024_v12  ;;  %6064 = vrot.lane.b32.xlu1 %v13001_v0, %s7033_s6  ;;  %6062 = vrot.lane.b32.xlu0 %v13004_v51, %s7033_s6 }
0x22d7   :  { %v6047_v38 = vmul.f32 0.008333334, %v6039_v54  ;;  %v6046_v33 = vmul.f32 0.008333334, %v6038_v58 }
0x22d8   :  { %v6041_v46 = vadd.f32 %v6033_v1, %v12940_v13  ;;  %v6040_v11 = vadd.f32 %v6032_v16, %v12942_v28 }
0x22d9   :  { %v13017_v57 = vadd.f32 %v6047_v38, %v12597_v35  ;;  %v13020_v5 = vadd.f32 %v6046_v33, %v12600_v19 }
0x22da   :  { %v6049_v42 = vmul.f32 0.008333334, %v6041_v46  ;;  %v6048_v61 = vmul.f32 0.008333334, %v6040_v11 }
0x22db   :  { %6068 = vrot.lane.b32.xlu1 %v13017_v57, %s7033_s6  ;;  %6066 = vrot.lane.b32.xlu0 %v13020_v5, %s7033_s6 }
0x22dc   :  { %v13027_v48 = vadd.f32 %v6049_v42, %v12607_v18  ;;  %v13030_v13 = vadd.f32 %v6048_v61, %v12610_v63 }
0x22df   :  { %6072 = vrot.lane.b32.xlu1 %v13027_v48, %s7033_s6  ;;  %6070 = vrot.lane.b32.xlu0 %v13030_v13, %s7033_s6 }
0x22e3   :  { %6092 = vrot.lane.b32.xlu1 %v12987_v9, %s7034_s1  ;;  %6090 = vrot.lane.b32.xlu0 %v12990_v4, %s7034_s1 }
0x22e7   :  { %6096 = vrot.lane.b32.xlu1 %v13001_v0, %s7034_s1  ;;  %6094 = vrot.lane.b32.xlu0 %v13004_v51, %s7034_s1 }
0x22eb   :  { %6100 = vrot.lane.b32.xlu1 %v13017_v57, %s7034_s1  ;;  %6098 = vrot.lane.b32.xlu0 %v13020_v5, %s7034_s1 }
0x22ef   :  { %6104 = vrot.lane.b32.xlu1 %v13027_v48, %s7034_s1  ;;  %6102 = vrot.lane.b32.xlu0 %v13030_v13, %s7034_s1 }
0x22f3   :  { %6076 = vrot.lane.b32.xlu1 %v12987_v9, %s7035_s7  ;;  %6074 = vrot.lane.b32.xlu0 %v12990_v4, %s7035_s7 }
0x22f7   :  { %6080 = vrot.lane.b32.xlu1 %v13001_v0, %s7035_s7  ;;  %6078 = vrot.lane.b32.xlu0 %v13004_v51, %s7035_s7 }
0x22fb   :  { %6084 = vrot.lane.b32.xlu1 %v13017_v57, %s7035_s7  ;;  %6082 = vrot.lane.b32.xlu0 %v13020_v5, %s7035_s7 }
0x22ff   :  { %6088 = vrot.lane.b32.xlu1 %v13027_v48, %s7035_s7  ;;  %6086 = vrot.lane.b32.xlu0 %v13030_v13, %s7035_s7 }
0x2344   :  { %v6061_v35 = vpop.permute.xlu1 %6060  ;;  %v6059_v19 = vpop.permute.xlu0 %6058 }
0x2348   :  { %v6065_v18 = vpop.permute.xlu1 %6064  ;;  %v6063_v63 = vpop.permute.xlu0 %6062 }
0x234d   :  { %v6069_v28 = vpop.permute.xlu1 %6068  ;;  %v6067_v32 = vpop.permute.xlu0 %6066 }
0x2351   :  { %v6073_v6 = vpop.permute.xlu1 %6072  ;;  %v6071_v29 = vpop.permute.xlu0 %6070 }
0x2355   :  { %v6093_v44 = vpop.permute.xlu1 %6092  ;;  %v6091_v40 = vpop.permute.xlu0 %6090 }
0x2356   :  { %v6107_v41 = vsub.f32 %v6061_v35, %v6093_v44  ;;  %v6106_v50 = vsub.f32 %v6059_v19, %v6091_v40 }
0x2359   :  { %v6097_v37 = vpop.permute.xlu1 %6096  ;;  %v6095_v31 = vpop.permute.xlu0 %6094 }
0x235a   :  { %v6109_v49 = vsub.f32 %v6065_v18, %v6097_v37  ;;  %v6108_v2 = vsub.f32 %v6063_v63, %v6095_v31 }
0x235d   :  { %v6101_v60 = vpop.permute.xlu1 %6100  ;;  %v6099_v22 = vpop.permute.xlu0 %6098 }
0x235e   :  { %v6111_v25 = vsub.f32 %v6069_v28, %v6101_v60  ;;  %v6110_v24 = vsub.f32 %v6067_v32, %v6099_v22 }
0x2361   :  { %v6105_v53 = vpop.permute.xlu1 %6104  ;;  %v6103_v34 = vpop.permute.xlu0 %6102 }
0x2362   :  { %v6113_v62 = vsub.f32 %v6073_v6, %v6105_v53  ;;  %v6112_v12 = vsub.f32 %v6071_v29, %v6103_v34 }
0x2365   :  { %v6077_v23 = vpop.permute.xlu1 %6076  ;;  %v6075_v55 = vpop.permute.xlu0 %6074 }
0x2366   :  { %v6115_v26 = vmul.f32 %v6107_v41, %v6077_v23  ;;  %v6114_v45 = vmul.f32 %v6106_v50, %v6075_v55 }
0x2368   :  { %v6123_v15 = vsub.f32 %v6115_v26, %v12987_v9  ;;  %v6122_v14 = vsub.f32 %v6114_v45, %v12990_v4 }
0x2369   :  { %v6081_v17 = vpop.permute.xlu1 %6080  ;;  %v6079_v52 = vpop.permute.xlu0 %6078 }
0x236a   :  { %v13070_v30 = vadd.f32 8.0, %v6123_v15  ;;  %v13072_v47 = vadd.f32 8.0, %v6122_v14  ;;  %v6117_v7 = vmul.f32 %v6109_v49, %v6081_v17  ;;  %v6116_v43 = vmul.f32 %v6108_v2, %v6079_v52 }
0x236c   :  { %v6139_v20 = vmul.f32 0.025, %v13070_v30  ;;  %v6138_v10 = vmul.f32 0.025, %v13072_v47  ;;  %v6125_v27 = vsub.f32 %v6117_v7, %v13001_v0  ;;  %v6124_v8 = vsub.f32 %v6116_v43, %v13004_v51 }
0x236d   :  { %v6085_v56 = vpop.permute.xlu1 %6084  ;;  %v6083_v39 = vpop.permute.xlu0 %6082 }
0x236e   :  { %v13078_v59 = vadd.f32 8.0, %v6125_v27  ;;  %v13080_v3 = vadd.f32 8.0, %v6124_v8  ;;  %v6119_v21 = vmul.f32 %v6111_v25, %v6085_v56  ;;  %v6118_v36 = vmul.f32 %v6110_v24, %v6083_v39 }
0x236f   :  { %v13083_v54 = vadd.f32 %v6139_v20, %v12987_v9  ;;  %v13086_v58 = vadd.f32 %v6138_v10, %v12990_v4 }
0x2370   :  { %v6141_v1 = vmul.f32 0.025, %v13078_v59  ;;  %v6140_v16 = vmul.f32 0.025, %v13080_v3  ;;  %v6127_v38 = vsub.f32 %v6119_v21, %v13017_v57  ;;  %v6126_v33 = vsub.f32 %v6118_v36, %v13020_v5 }
0x2371   :  { %6156 = vrot.lane.b32.xlu1 %v13083_v54, %s7033_s6  ;;  %6154 = vrot.lane.b32.xlu0 %v13086_v58, %s7033_s6  ;;  %v6089_v46 = vpop.permute.xlu1 %6088  ;;  %v6087_v11 = vpop.permute.xlu0 %6086 }
0x2372   :  { %v13096_v42 = vadd.f32 8.0, %v6127_v38  ;;  %v13098_v61 = vadd.f32 8.0, %v6126_v33  ;;  %v6121_v35 = vmul.f32 %v6113_v62, %v6089_v46  ;;  %v6120_v19 = vmul.f32 %v6112_v12, %v6087_v11 }
0x2373   :  { %v13101_v18 = vadd.f32 %v6141_v1, %v13001_v0  ;;  %v13104_v63 = vadd.f32 %v6140_v16, %v13004_v51 }
0x2374   :  { %v6143_v28 = vmul.f32 0.025, %v13096_v42  ;;  %v6142_v32 = vmul.f32 0.025, %v13098_v61  ;;  %v6129_v6 = vsub.f32 %v6121_v35, %v13027_v48  ;;  %v6128_v29 = vsub.f32 %v6120_v19, %v13030_v13 }
0x2375   :  { %6160 = vrot.lane.b32.xlu1 %v13101_v18, %s7033_s6  ;;  %6158 = vrot.lane.b32.xlu0 %v13104_v63, %s7033_s6 }
0x2376   :  { %v13114_v44 = vadd.f32 8.0, %v6129_v6  ;;  %v13116_v40 = vadd.f32 8.0, %v6128_v29  ;;  %v13119_v37 = vadd.f32 %v6143_v28, %v13017_v57  ;;  %v13122_v31 = vadd.f32 %v6142_v32, %v13020_v5 }
0x2378   :  { %v6145_v60 = vmul.f32 0.025, %v13114_v44  ;;  %v6144_v22 = vmul.f32 0.025, %v13116_v40 }
0x2379   :  { %6164 = vrot.lane.b32.xlu1 %v13119_v37, %s7033_s6  ;;  %6162 = vrot.lane.b32.xlu0 %v13122_v31, %s7033_s6 }
0x237a   :  { %v13131_v53 = vadd.f32 %v6145_v60, %v13027_v48  ;;  %v13134_v34 = vadd.f32 %v6144_v22, %v13030_v13 }
0x237d   :  { %6168 = vrot.lane.b32.xlu1 %v13131_v53, %s7033_s6  ;;  %6166 = vrot.lane.b32.xlu0 %v13134_v34, %s7033_s6 }
0x2381   :  { %6188 = vrot.lane.b32.xlu1 %v13083_v54, %s7034_s1  ;;  %6186 = vrot.lane.b32.xlu0 %v13086_v58, %s7034_s1 }
0x2385   :  { %6192 = vrot.lane.b32.xlu1 %v13101_v18, %s7034_s1  ;;  %6190 = vrot.lane.b32.xlu0 %v13104_v63, %s7034_s1 }
0x2389   :  { %6196 = vrot.lane.b32.xlu1 %v13119_v37, %s7034_s1  ;;  %6194 = vrot.lane.b32.xlu0 %v13122_v31, %s7034_s1 }
0x238d   :  { %6200 = vrot.lane.b32.xlu1 %v13131_v53, %s7034_s1  ;;  %6198 = vrot.lane.b32.xlu0 %v13134_v34, %s7034_s1 }
0x2391   :  { %6172 = vrot.lane.b32.xlu1 %v13083_v54, %s7035_s7  ;;  %6170 = vrot.lane.b32.xlu0 %v13086_v58, %s7035_s7 }
0x2395   :  { %6176 = vrot.lane.b32.xlu1 %v13101_v18, %s7035_s7  ;;  %6174 = vrot.lane.b32.xlu0 %v13104_v63, %s7035_s7 }
0x2399   :  { %6180 = vrot.lane.b32.xlu1 %v13119_v37, %s7035_s7  ;;  %6178 = vrot.lane.b32.xlu0 %v13122_v31, %s7035_s7 }
0x239d   :  { %6184 = vrot.lane.b32.xlu1 %v13131_v53, %s7035_s7  ;;  %6182 = vrot.lane.b32.xlu0 %v13134_v34, %s7035_s7 }
0x23e3   :  { %v6157_v41 = vpop.permute.xlu1 %6156  ;;  %v6155_v50 = vpop.permute.xlu0 %6154 }
0x23e7   :  { %v6161_v23 = vpop.permute.xlu1 %6160  ;;  %v6159_v55 = vpop.permute.xlu0 %6158 }
0x23eb   :  { %v6165_v26 = vpop.permute.xlu1 %6164  ;;  %v6163_v45 = vpop.permute.xlu0 %6162 }
0x23ef   :  { %v6169_v49 = vpop.permute.xlu1 %6168  ;;  %v6167_v2 = vpop.permute.xlu0 %6166 }
0x23f3   :  { %v6189_v15 = vpop.permute.xlu1 %6188  ;;  %v6187_v14 = vpop.permute.xlu0 %6186 }
0x23f4   :  { %v6203_v20 = vsub.f32 %v6157_v41, %v6189_v15  ;;  %v6202_v10 = vsub.f32 %v6155_v50, %v6187_v14 }
0x23f7   :  { %v6193_v17 = vpop.permute.xlu1 %6192  ;;  %v6191_v52 = vpop.permute.xlu0 %6190 }
0x23f8   :  { %v6205_v21 = vsub.f32 %v6161_v23, %v6193_v17  ;;  %v6204_v36 = vsub.f32 %v6159_v55, %v6191_v52 }
0x23fb   :  { %v6197_v7 = vpop.permute.xlu1 %6196  ;;  %v6195_v43 = vpop.permute.xlu0 %6194 }
0x23fc   :  { %v6207_v35 = vsub.f32 %v6165_v26, %v6197_v7  ;;  %v6206_v19 = vsub.f32 %v6163_v45, %v6195_v43 }
0x23ff   :  { %v6201_v25 = vpop.permute.xlu1 %6200  ;;  %v6199_v24 = vpop.permute.xlu0 %6198 }
0x2400   :  { %v6209_v26 = vsub.f32 %v6169_v49, %v6201_v25  ;;  %v6208_v45 = vsub.f32 %v6167_v2, %v6199_v24 }
0x2403   :  { %v6173_v27 = vpop.permute.xlu1 %6172  ;;  %v6171_v8 = vpop.permute.xlu0 %6170 }
0x2404   :  { %v6211_v56 = vmul.f32 %v6203_v20, %v6173_v27  ;;  %v6210_v39 = vmul.f32 %v6202_v10, %v6171_v8 }
0x2406   :  { %v6219_v62 = vsub.f32 %v6211_v56, %v13083_v54  ;;  %v6218_v12 = vsub.f32 %v6210_v39, %v13086_v58 }
0x2407   :  { %v6177_v1 = vpop.permute.xlu1 %6176  ;;  %v6175_v16 = vpop.permute.xlu0 %6174 }
0x2408   :  { %v13174_v38 = vadd.f32 8.0, %v6219_v62  ;;  %v13176_v33 = vadd.f32 8.0, %v6218_v12  ;;  %v6213_v46 = vmul.f32 %v6205_v21, %v6177_v1  ;;  %v6212_v11 = vmul.f32 %v6204_v36, %v6175_v16 }
0x240a   :  { %v6251_v28 = vmul.f32 0.025, %v13174_v38  ;;  %v6250_v32 = vmul.f32 0.025, %v13176_v33  ;;  %v6221_v6 = vsub.f32 %v6213_v46, %v13101_v18  ;;  %v6220_v54 = vsub.f32 %v6212_v11, %v13104_v63 }
0x240b   :  { %v6181_v29 = vpop.permute.xlu1 %6180  ;;  %v6179_v58 = vpop.permute.xlu0 %6178 }
0x240c   :  { %v6215_v60 = vmul.f32 %v6207_v35, %v6181_v29  ;;  %v6214_v22 = vmul.f32 %v6206_v19, %v6179_v58  ;;  %v13182_v41 = vadd.f32 8.0, %v6221_v6  ;;  %v13184_v50 = vadd.f32 8.0, %v6220_v54 }
0x240d   :  { %v13187_v23 = vadd.f32 %v6251_v28, %v12987_v9  ;;  %v13190_v55 = vadd.f32 %v6250_v32, %v12990_v4 }
0x240e   :  { %v6223_v18 = vsub.f32 %v6215_v60, %v13119_v37  ;;  %v6222_v63 = vsub.f32 %v6214_v22, %v13122_v31  ;;  %v6253_v15 = vmul.f32 0.025, %v13182_v41  ;;  %v6252_v14 = vmul.f32 0.025, %v13184_v50 }
0x240f   :  { %6268 = vrot.lane.b32.xlu1 %v13187_v23, %s7033_s6  ;;  %6266 = vrot.lane.b32.xlu0 %v13190_v55, %s7033_s6  ;;  %v6185_v17 = vpop.permute.xlu1 %6184  ;;  %v6183_v52 = vpop.permute.xlu0 %6182 }
0x2410   :  { %v13200_v7 = vadd.f32 8.0, %v6223_v18  ;;  %v13202_v49 = vadd.f32 8.0, %v6222_v63  ;;  %v6217_v2 = vmul.f32 %v6209_v26, %v6185_v17  ;;  %v6216_v37 = vmul.f32 %v6208_v45, %v6183_v52 }
0x2411   :  { %v13205_v31 = vadd.f32 %v6253_v15, %v13001_v0  ;;  %v13208_v43 = vadd.f32 %v6252_v14, %v13004_v51  ;;  %v6235_v18 = vmul.f32 2.0, %v13174_v38  ;;  %v6234_v63 = vmul.f32 2.0, %v13176_v33 }
0x2412   :  { %v6255_v25 = vmul.f32 0.025, %v13200_v7  ;;  %v6254_v24 = vmul.f32 0.025, %v13202_v49  ;;  %v6225_v20 = vsub.f32 %v6217_v2, %v13131_v53  ;;  %v6224_v10 = vsub.f32 %v6216_v37, %v13134_v34 }
0x2413   :  { %6272 = vrot.lane.b32.xlu1 %v13205_v31, %s7033_s6  ;;  %6270 = vrot.lane.b32.xlu0 %v13208_v43, %s7033_s6  ;;  %v6237_v15 = vmul.f32 2.0, %v13182_v41  ;;  %v6236_v14 = vmul.f32 2.0, %v13184_v50  ;;  %v6243_v33 = vadd.f32 %v6235_v18, %v13070_v30  ;;  %v6242_v41 = vadd.f32 %v6234_v63, %v13072_v47 }
0x2414   :  { %v13219_v27 = vadd.f32 %v6255_v25, %v13017_v57  ;;  %v13222_v8 = vadd.f32 %v6254_v24, %v13020_v5  ;;  %v13224_v56 = vadd.f32 8.0, %v6225_v20  ;;  %v13226_v39 = vadd.f32 8.0, %v6224_v10 }
0x2415   :  { %v6239_v25 = vmul.f32 2.0, %v13200_v7  ;;  %v6238_v24 = vmul.f32 2.0, %v13202_v49  ;;  %v6245_v50 = vadd.f32 %v6237_v15, %v13078_v59 }
0x2416   :  { %v6257_v53 = vmul.f32 0.025, %v13224_v56  ;;  %v6256_v34 = vmul.f32 0.025, %v13226_v39  ;;  %v6241_v59 = vmul.f32 2.0, %v13224_v56 }
0x2417   :  { %6276 = vrot.lane.b32.xlu1 %v13219_v27, %s7033_s6  ;;  %6274 = vrot.lane.b32.xlu0 %v13222_v8, %s7033_s6 }
0x2418   :  { %v13235_v21 = vadd.f32 %v6257_v53, %v13027_v48  ;;  %v13238_v36 = vadd.f32 %v6256_v34, %v13030_v13  ;;  %v6244_v34 = vadd.f32 %v6236_v14, %v13080_v3 }
0x241b   :  { %6280 = vrot.lane.b32.xlu1 %v13235_v21, %s7033_s6  ;;  %6278 = vrot.lane.b32.xlu0 %v13238_v36, %s7033_s6 }
0x241f   :  { %6300 = vrot.lane.b32.xlu1 %v13187_v23, %s7034_s1  ;;  %6298 = vrot.lane.b32.xlu0 %v13190_v55, %s7034_s1 }
0x2423   :  { %6304 = vrot.lane.b32.xlu1 %v13205_v31, %s7034_s1  ;;  %6302 = vrot.lane.b32.xlu0 %v13208_v43, %s7034_s1 }
0x2427   :  { %6308 = vrot.lane.b32.xlu1 %v13219_v27, %s7034_s1  ;;  %6306 = vrot.lane.b32.xlu0 %v13222_v8, %s7034_s1 }
0x242b   :  { %6312 = vrot.lane.b32.xlu1 %v13235_v21, %s7034_s1  ;;  %6310 = vrot.lane.b32.xlu0 %v13238_v36, %s7034_s1 }
0x242f   :  { %6284 = vrot.lane.b32.xlu1 %v13187_v23, %s7035_s7  ;;  %6282 = vrot.lane.b32.xlu0 %v13190_v55, %s7035_s7 }
0x2433   :  { %6288 = vrot.lane.b32.xlu1 %v13205_v31, %s7035_s7  ;;  %6286 = vrot.lane.b32.xlu0 %v13208_v43, %s7035_s7 }
0x2437   :  { %6292 = vrot.lane.b32.xlu1 %v13219_v27, %s7035_s7  ;;  %6290 = vrot.lane.b32.xlu0 %v13222_v8, %s7035_s7 }
0x243b   :  { %6296 = vrot.lane.b32.xlu1 %v13235_v21, %s7035_s7  ;;  %6294 = vrot.lane.b32.xlu0 %v13238_v36, %s7035_s7 }
0x2481   :  { %v6269_v62 = vpop.permute.xlu1 %6268  ;;  %v6267_v12 = vpop.permute.xlu0 %6266 }
0x2485   :  { %v6273_v1 = vpop.permute.xlu1 %6272  ;;  %v6271_v16 = vpop.permute.xlu0 %6270 }
0x2489   :  { %v6277_v46 = vpop.permute.xlu1 %6276  ;;  %v6275_v11 = vpop.permute.xlu0 %6274 }
0x248d   :  { %v13276_v35 = vpop.permute.xlu1 %6280  ;;  %v13278_v19 = vpop.permute.xlu0 %6278 }
0x2491   :  { %v6301_v28 = vpop.permute.xlu1 %6300  ;;  %v6299_v32 = vpop.permute.xlu0 %6298 }
0x2492   :  { %v6315_v26 = vsub.f32 %v6269_v62, %v6301_v28  ;;  %v6314_v45 = vsub.f32 %v6267_v12, %v6299_v32 }
0x2495   :  { %v6305_v6 = vpop.permute.xlu1 %6304  ;;  %v6303_v54 = vpop.permute.xlu0 %6302 }
0x2496   :  { %v6317_v20 = vsub.f32 %v6273_v1, %v6305_v6  ;;  %v6316_v10 = vsub.f32 %v6271_v16, %v6303_v54  ;;  %v6247_v1 = vadd.f32 %v6239_v25, %v13096_v42 }
0x2499   :  { %v6309_v29 = vpop.permute.xlu1 %6308  ;;  %v6307_v58 = vpop.permute.xlu0 %6306 }
0x249a   :  { %v6319_v16 = vsub.f32 %v6277_v46, %v6309_v29 }
0x249d   :  { %v13280_v60 = vpop.permute.xlu1 %6312  ;;  %v13282_v22 = vpop.permute.xlu0 %6310 }
0x249e   :  { %v6321_v3 = vsub.f32 %v13276_v35, %v13280_v60 }
0x24a1   :  { %v6285_v17 = vpop.permute.xlu1 %6284  ;;  %v6283_v52 = vpop.permute.xlu0 %6282 }
0x24a2   :  { %v6323_v2 = vmul.f32 %v6315_v26, %v6285_v17  ;;  %v6322_v37 = vmul.f32 %v6314_v45, %v6283_v52 }
0x24a4   :  { %v6331_v53 = vsub.f32 %v6323_v2, %v13187_v23  ;;  %v6330_v38 = vsub.f32 %v6322_v37, %v13190_v55  ;;  %v6246_v23 = vadd.f32 %v6238_v24, %v13098_v61  ;;  %v6318_v55 = vsub.f32 %v6275_v11, %v6307_v58 }
0x24a5   :  { %v6289_v62 = vpop.permute.xlu1 %6288  ;;  %v6287_v12 = vpop.permute.xlu0 %6286 }
0x24a6   :  { %v6339_v28 = vadd.f32 8.0, %v6331_v53  ;;  %v6338_v7 = vadd.f32 8.0, %v6330_v38  ;;  %v6325_v32 = vmul.f32 %v6317_v20, %v6289_v62  ;;  %v6324_v49 = vmul.f32 %v6316_v10, %v6287_v12 }
0x24a8   :  { %v6347_v6 = vmul.f32 2.0, %v6339_v28  ;;  %v6363_v30 = vmul.f32 0.05, %v6339_v28  ;;  %v6346_v54 = vmul.f32 2.0, %v6338_v7  ;;  %v6362_v47 = vmul.f32 0.05, %v6338_v7 }
0x24a9   :  { %v6333_v26 = vsub.f32 %v6325_v32, %v13205_v31  ;;  %v6332_v45 = vsub.f32 %v6324_v49, %v13208_v43  ;;  %v6293_v18 = vpop.permute.xlu1 %6292  ;;  %v6291_v63 = vpop.permute.xlu0 %6290  ;;  %v6240_v31 = vmul.f32 2.0, %v13226_v39  ;;  %v6320_v43 = vsub.f32 %v13278_v19, %v13282_v22 }
0x24aa   :  { %v6327_v42 = vmul.f32 %v6319_v16, %v6293_v18  ;;  %v6326_v15 = vmul.f32 %v6318_v55, %v6291_v63  ;;  %v13304_v61 = vadd.f32 %v6363_v30, %v12987_v9  ;;  %v13307_v46 = vadd.f32 %v6362_v47, %v12990_v4 }
0x24ab   :  { %v6341_v11 = vadd.f32 8.0, %v6333_v26  ;;  %v6340_v29 = vadd.f32 8.0, %v6332_v45  ;;  %v13309_v56 = vadd.f32 %v6347_v6, %v6243_v33  ;;  %v13311_v58 = vadd.f32 %v6346_v54, %v6242_v41 }
0x24ac   :  { %v6335_v35 = vsub.f32 %v6327_v42, %v13219_v27  ;;  %v6334_v60 = vsub.f32 %v6326_v15, %v13222_v8  ;;  %6380 = vrot.lane.b32.xlu1 %v13304_v61, %s7033_s6  ;;  %6378 = vrot.lane.b32.xlu0 %v13307_v46, %s7033_s6  ;;  %v6248_v49 = vadd.f32 %v6240_v31, %v13116_v40 }
0x24ad   :  { %v6349_v14 = vmul.f32 2.0, %v6341_v11  ;;  %v6365_v17 = vmul.f32 0.05, %v6341_v11  ;;  %v6348_v52 = vmul.f32 2.0, %v6340_v29  ;;  %v6364_v2 = vmul.f32 0.05, %v6340_v29  ;;  %v6297_v37 = vpop.permute.xlu1 %6296  ;;  %v6295_v25 = vpop.permute.xlu0 %6294 }
0x24ae   :  { %v6343_v39 = vadd.f32 8.0, %v6335_v35  ;;  %v6342_v24 = vadd.f32 8.0, %v6334_v60  ;;  %v6329_v20 = vmul.f32 %v6321_v3, %v6297_v37  ;;  %v6328_v19 = vmul.f32 %v6320_v43, %v6295_v25 }
0x24af   :  { %v13323_v27 = vadd.f32 %v6365_v17, %v13001_v0  ;;  %v13326_v8 = vadd.f32 %v6364_v2, %v13004_v51  ;;  %v13328_v22 = vadd.f32 %v6349_v14, %v6245_v50  ;;  %v13330_v10 = vadd.f32 %v6348_v52, %v6244_v34 }
0x24b0   :  { %v6351_v53 = vmul.f32 2.0, %v6343_v39  ;;  %v6367_v38 = vmul.f32 0.05, %v6343_v39  ;;  %v6350_v33 = vmul.f32 2.0, %v6342_v24  ;;  %v6366_v41 = vmul.f32 0.05, %v6342_v24 }
0x24b1   :  { %v6337_v62 = vsub.f32 %v6329_v20, %v13235_v21  ;;  %v6336_v12 = vsub.f32 %v6328_v19, %v13238_v36  ;;  %6384 = vrot.lane.b32.xlu1 %v13323_v27, %s7033_s6  ;;  %6382 = vrot.lane.b32.xlu0 %v13326_v8, %s7033_s6  ;;  %v6249_v36 = vadd.f32 %v6241_v59, %v13114_v44 }
0x24b2   :  { %v13339_v28 = vadd.f32 %v6367_v38, %v13017_v57  ;;  %v13342_v50 = vadd.f32 %v6366_v41, %v13020_v5  ;;  %v13344_v34 = vadd.f32 %v6351_v53, %v6247_v1  ;;  %v13346_v7 = vadd.f32 %v6350_v33, %v6246_v23 }
0x24b3   :  { %v6345_v32 = vadd.f32 8.0, %v6337_v62  ;;  %v6344_v21 = vadd.f32 8.0, %v6336_v12 }
0x24b5   :  { %v6353_v16 = vmul.f32 2.0, %v6345_v32  ;;  %v6369_v55 = vmul.f32 0.05, %v6345_v32  ;;  %v6352_v6 = vmul.f32 2.0, %v6344_v21  ;;  %v6368_v30 = vmul.f32 0.05, %v6344_v21  ;;  %6388 = vrot.lane.b32.xlu1 %v13339_v28, %s7033_s6  ;;  %6386 = vrot.lane.b32.xlu0 %v13342_v50, %s7033_s6 }
0x24b7   :  { %v13355_v1 = vadd.f32 %v6369_v55, %v13027_v48  ;;  %v13358_v23 = vadd.f32 %v6368_v30, %v13030_v13  ;;  %v13360_v54 = vadd.f32 %v6353_v16, %v6249_v36  ;;  %v13362_v44 = vadd.f32 %v6352_v6, %v6248_v49 }
0x24b9   :  { %6392 = vrot.lane.b32.xlu1 %v13355_v1, %s7033_s6  ;;  %6390 = vrot.lane.b32.xlu0 %v13358_v23, %s7033_s6 }
0x24bd   :  { %6412 = vrot.lane.b32.xlu1 %v13304_v61, %s7034_s1  ;;  %6410 = vrot.lane.b32.xlu0 %v13307_v46, %s7034_s1 }
0x24c1   :  { %6416 = vrot.lane.b32.xlu1 %v13323_v27, %s7034_s1  ;;  %6414 = vrot.lane.b32.xlu0 %v13326_v8, %s7034_s1 }
0x24c5   :  { %6420 = vrot.lane.b32.xlu1 %v13339_v28, %s7034_s1  ;;  %6418 = vrot.lane.b32.xlu0 %v13342_v50, %s7034_s1 }
0x24c9   :  { %6424 = vrot.lane.b32.xlu1 %v13355_v1, %s7034_s1  ;;  %6422 = vrot.lane.b32.xlu0 %v13358_v23, %s7034_s1 }
0x24cd   :  { %6396 = vrot.lane.b32.xlu1 %v13304_v61, %s7035_s7  ;;  %6394 = vrot.lane.b32.xlu0 %v13307_v46, %s7035_s7 }
0x24d1   :  { %6400 = vrot.lane.b32.xlu1 %v13323_v27, %s7035_s7  ;;  %6398 = vrot.lane.b32.xlu0 %v13326_v8, %s7035_s7 }
0x24d5   :  { %6404 = vrot.lane.b32.xlu1 %v13339_v28, %s7035_s7  ;;  %6402 = vrot.lane.b32.xlu0 %v13342_v50, %s7035_s7 }
0x24d9   :  { %6408 = vrot.lane.b32.xlu1 %v13355_v1, %s7035_s7  ;;  %6406 = vrot.lane.b32.xlu0 %v13358_v23, %s7035_s7 }
0x251e   :  { %v6381_v40 = vpop.permute.xlu1 %6380  ;;  %v6379_v47 = vpop.permute.xlu0 %6378 }
0x2523   :  { %v6385_v59 = vpop.permute.xlu1 %6384  ;;  %v6383_v3 = vpop.permute.xlu0 %6382 }
0x2527   :  { %v6389_v26 = vpop.permute.xlu1 %6388  ;;  %v6387_v45 = vpop.permute.xlu0 %6386 }
0x252b   :  { %v6393_v18 = vpop.permute.xlu1 %6392  ;;  %v6391_v63 = vpop.permute.xlu0 %6390 }
0x252f   :  { %v6413_v42 = vpop.permute.xlu1 %6412  ;;  %v6411_v15 = vpop.permute.xlu0 %6410 }
0x2530   :  { %v6427_v14 = vsub.f32 %v6381_v40, %v6413_v42  ;;  %v6426_v17 = vsub.f32 %v6379_v47, %v6411_v15 }
0x2533   :  { %v6417_v11 = vpop.permute.xlu1 %6416  ;;  %v6415_v29 = vpop.permute.xlu0 %6414 }
0x2534   :  { %v6429_v39 = vsub.f32 %v6385_v59, %v6417_v11  ;;  %v6428_v24 = vsub.f32 %v6383_v3, %v6415_v29 }
0x2537   :  { %v6421_v31 = vpop.permute.xlu1 %6420  ;;  %v6419_v43 = vpop.permute.xlu0 %6418 }
0x2538   :  { %v6431_v16 = vsub.f32 %v6389_v26, %v6421_v31  ;;  %v6430_v55 = vsub.f32 %v6387_v45, %v6419_v43 }
0x253b   :  { %v6425_v35 = vpop.permute.xlu1 %6424  ;;  %v6423_v60 = vpop.permute.xlu0 %6422 }
0x253c   :  { %v6433_v59 = vsub.f32 %v6393_v18, %v6425_v35  ;;  %v6432_v3 = vsub.f32 %v6391_v63, %v6423_v60 }
0x253f   :  { %v6397_v52 = vpop.permute.xlu1 %6396  ;;  %v6395_v2 = vpop.permute.xlu0 %6394 }
0x2540   :  { %v6435_v37 = vmul.f32 %v6427_v14, %v6397_v52  ;;  %v6434_v25 = vmul.f32 %v6426_v17, %v6395_v2 }
0x2542   :  { %v6443_v20 = vsub.f32 %v6435_v37, %v13304_v61  ;;  %v6442_v19 = vsub.f32 %v6434_v25, %v13307_v46 }
0x2543   :  { %v6401_v53 = vpop.permute.xlu1 %6400  ;;  %v6399_v38 = vpop.permute.xlu0 %6398 }
0x2544   :  { %v6451_v33 = vadd.f32 8.0, %v6443_v20  ;;  %v6450_v41 = vadd.f32 8.0, %v6442_v19  ;;  %v6437_v62 = vmul.f32 %v6429_v39, %v6401_v53  ;;  %v6436_v12 = vmul.f32 %v6428_v24, %v6399_v38 }
0x2546   :  { %v6459_v32 = vadd.f32 %v6451_v33, %v13309_v56  ;;  %v6458_v21 = vadd.f32 %v6450_v41, %v13311_v58  ;;  %v6445_v36 = vsub.f32 %v6437_v62, %v13323_v27  ;;  %v6444_v49 = vsub.f32 %v6436_v12, %v13326_v8 }
0x2547   :  { %v6405_v6 = vpop.permute.xlu1 %6404  ;;  %v6403_v61 = vpop.permute.xlu0 %6402 }
0x2548   :  { %v6467_v30 = vmul.f32 0.008333334, %v6459_v32  ;;  %v6466_v46 = vmul.f32 0.008333334, %v6458_v21  ;;  %v6453_v40 = vadd.f32 8.0, %v6445_v36  ;;  %v6452_v47 = vadd.f32 8.0, %v6444_v49 }
0x2549   :  { %v6439_v42 = vmul.f32 %v6431_v16, %v6405_v6  ;;  %v6438_v15 = vmul.f32 %v6430_v55, %v6403_v61 }
0x254a   :  { %v13407_v56 = vadd.f32 %v6467_v30, %v12987_v9  ;;  %v13410_v58 = vadd.f32 %v6466_v46, %v12990_v4  ;;  %v6461_v27 = vadd.f32 %v6453_v40, %v13328_v22  ;;  %v6460_v8 = vadd.f32 %v6452_v47, %v13330_v10 }
0x254b   :  { %v6447_v26 = vsub.f32 %v6439_v42, %v13339_v28  ;;  %v6446_v45 = vsub.f32 %v6438_v15, %v13342_v50  ;;  %v6409_v11 = vpop.permute.xlu1 %6408  ;;  %v6407_v29 = vpop.permute.xlu0 %6406 }
0x254c   :  { %v6469_v18 = vmul.f32 0.008333334, %v6461_v27  ;;  %v6468_v63 = vmul.f32 0.008333334, %v6460_v8  ;;  %v6441_v31 = vmul.f32 %v6433_v59, %v6409_v11  ;;  %v6440_v43 = vmul.f32 %v6432_v3, %v6407_v29  ;;  %6484 = vrot.lane.b32.xlu1 %v13407_v56, %s7033_s6  ;;  %6482 = vrot.lane.b32.xlu0 %v13410_v58, %s7033_s6 }
0x254d   :  { %v6455_v9 = vadd.f32 8.0, %v6447_v26  ;;  %v6454_v4 = vadd.f32 8.0, %v6446_v45 }
0x254e   :  { %v13421_v22 = vadd.f32 %v6469_v18, %v13001_v0  ;;  %v13424_v10 = vadd.f32 %v6468_v63, %v13004_v51  ;;  %v6449_v28 = vsub.f32 %v6441_v31, %v13355_v1  ;;  %v6448_v50 = vsub.f32 %v6440_v43, %v13358_v23 }
0x254f   :  { %v6463_v35 = vadd.f32 %v6455_v9, %v13344_v34  ;;  %v6462_v60 = vadd.f32 %v6454_v4, %v13346_v7 }
0x2550   :  { %v6457_v14 = vadd.f32 8.0, %v6449_v28  ;;  %v6456_v17 = vadd.f32 8.0, %v6448_v50  ;;  %6488 = vrot.lane.b32.xlu1 %v13421_v22, %s7033_s6  ;;  %6486 = vrot.lane.b32.xlu0 %v13424_v10, %s7033_s6 }
0x2551   :  { %v6471_v0 = vmul.f32 0.008333334, %v6463_v35  ;;  %v6470_v52 = vmul.f32 0.008333334, %v6462_v60 }
0x2552   :  { %v6465_v51 = vadd.f32 %v6457_v14, %v13360_v54  ;;  %v6464_v1 = vadd.f32 %v6456_v17, %v13362_v44 }
0x2553   :  { %v13437_v23 = vadd.f32 %v6471_v0, %v13017_v57  ;;  %v13440_v34 = vadd.f32 %v6470_v52, %v13020_v5 }
0x2554   :  { %v6473_v7 = vmul.f32 0.008333334, %v6465_v51  ;;  %v6472_v2 = vmul.f32 0.008333334, %v6464_v1 }
0x2555   :  { %6492 = vrot.lane.b32.xlu1 %v13437_v23, %s7033_s6  ;;  %6490 = vrot.lane.b32.xlu0 %v13440_v34, %s7033_s6 }
0x2556   :  { %v13447_v37 = vadd.f32 %v6473_v7, %v13027_v48  ;;  %v13450_v54 = vadd.f32 %v6472_v2, %v13030_v13 }
0x2559   :  { %6496 = vrot.lane.b32.xlu1 %v13447_v37, %s7033_s6  ;;  %6494 = vrot.lane.b32.xlu0 %v13450_v54, %s7033_s6 }
0x255d   :  { %6516 = vrot.lane.b32.xlu1 %v13407_v56, %s7034_s1  ;;  %6514 = vrot.lane.b32.xlu0 %v13410_v58, %s7034_s1 }
0x2561   :  { %6520 = vrot.lane.b32.xlu1 %v13421_v22, %s7034_s1  ;;  %6518 = vrot.lane.b32.xlu0 %v13424_v10, %s7034_s1 }
0x2565   :  { %6524 = vrot.lane.b32.xlu1 %v13437_v23, %s7034_s1  ;;  %6522 = vrot.lane.b32.xlu0 %v13440_v34, %s7034_s1 }
0x2569   :  { %6528 = vrot.lane.b32.xlu1 %v13447_v37, %s7034_s1  ;;  %6526 = vrot.lane.b32.xlu0 %v13450_v54, %s7034_s1 }
0x256d   :  { %6500 = vrot.lane.b32.xlu1 %v13407_v56, %s7035_s7  ;;  %6498 = vrot.lane.b32.xlu0 %v13410_v58, %s7035_s7 }
0x2571   :  { %6504 = vrot.lane.b32.xlu1 %v13421_v22, %s7035_s7  ;;  %6502 = vrot.lane.b32.xlu0 %v13424_v10, %s7035_s7 }
0x2575   :  { %6508 = vrot.lane.b32.xlu1 %v13437_v23, %s7035_s7  ;;  %6506 = vrot.lane.b32.xlu0 %v13440_v34, %s7035_s7 }
0x2579   :  { %6512 = vrot.lane.b32.xlu1 %v13447_v37, %s7035_s7  ;;  %6510 = vrot.lane.b32.xlu0 %v13450_v54, %s7035_s7 }
0x25be   :  { %v6485_v57 = vpop.permute.xlu1 %6484  ;;  %v6483_v5 = vpop.permute.xlu0 %6482 }
0x25c2   :  { %v6489_v48 = vpop.permute.xlu1 %6488  ;;  %v6487_v13 = vpop.permute.xlu0 %6486 }
0x25c7   :  { %v6493_v44 = vpop.permute.xlu1 %6492  ;;  %v6491_v25 = vpop.permute.xlu0 %6490 }
0x25cb   :  { %v6497_v39 = vpop.permute.xlu1 %6496  ;;  %v6495_v24 = vpop.permute.xlu0 %6494 }
0x25cf   :  { %v6517_v20 = vpop.permute.xlu1 %6516  ;;  %v6515_v19 = vpop.permute.xlu0 %6514 }
0x25d0   :  { %v6531_v32 = vsub.f32 %v6485_v57, %v6517_v20  ;;  %v6530_v21 = vsub.f32 %v6483_v5, %v6515_v19 }
0x25d3   :  { %v6521_v53 = vpop.permute.xlu1 %6520  ;;  %v6519_v38 = vpop.permute.xlu0 %6518 }
0x25d4   :  { %v6533_v6 = vsub.f32 %v6489_v48, %v6521_v53  ;;  %v6532_v61 = vsub.f32 %v6487_v13, %v6519_v38 }
0x25d7   :  { %v6525_v33 = vpop.permute.xlu1 %6524  ;;  %v6523_v41 = vpop.permute.xlu0 %6522 }
0x25d8   :  { %v6535_v11 = vsub.f32 %v6493_v44, %v6525_v33  ;;  %v6534_v29 = vsub.f32 %v6491_v25, %v6523_v41 }
0x25db   :  { %v6529_v62 = vpop.permute.xlu1 %6528  ;;  %v6527_v12 = vpop.permute.xlu0 %6526 }
0x25dc   :  { %v6537_v35 = vsub.f32 %v6497_v39, %v6529_v62  ;;  %v6536_v60 = vsub.f32 %v6495_v24, %v6527_v12 }
0x25df   :  { %v6501_v36 = vpop.permute.xlu1 %6500  ;;  %v6499_v49 = vpop.permute.xlu0 %6498 }
0x25e0   :  { %v6539_v16 = vmul.f32 %v6531_v32, %v6501_v36  ;;  %v6538_v55 = vmul.f32 %v6530_v21, %v6499_v49 }
0x25e2   :  { %v6547_v30 = vsub.f32 %v6539_v16, %v13407_v56  ;;  %v6546_v46 = vsub.f32 %v6538_v55, %v13410_v58 }
0x25e3   :  { %v6505_v40 = vpop.permute.xlu1 %6504  ;;  %v6503_v47 = vpop.permute.xlu0 %6502 }
0x25e4   :  { %v13490_v59 = vadd.f32 8.0, %v6547_v30  ;;  %v13492_v3 = vadd.f32 8.0, %v6546_v46  ;;  %v6541_v42 = vmul.f32 %v6533_v6, %v6505_v40  ;;  %v6540_v15 = vmul.f32 %v6532_v61, %v6503_v47 }
0x25e6   :  { %v6563_v27 = vmul.f32 0.025, %v13490_v59  ;;  %v6562_v8 = vmul.f32 0.025, %v13492_v3  ;;  %v6549_v26 = vsub.f32 %v6541_v42, %v13421_v22  ;;  %v6548_v45 = vsub.f32 %v6540_v15, %v13424_v10 }
0x25e7   :  { %v6509_v18 = vpop.permute.xlu1 %6508  ;;  %v6507_v63 = vpop.permute.xlu0 %6506 }
0x25e8   :  { %v13499_v31 = vadd.f32 %v6563_v27, %v13407_v56  ;;  %v13502_v43 = vadd.f32 %v6562_v8, %v13410_v58  ;;  %v13504_v9 = vadd.f32 8.0, %v6549_v26  ;;  %v13506_v4 = vadd.f32 8.0, %v6548_v45 }
0x25e9   :  { %v6543_v28 = vmul.f32 %v6535_v11, %v6509_v18  ;;  %v6542_v50 = vmul.f32 %v6534_v29, %v6507_v63 }
0x25ea   :  { %v6565_v14 = vmul.f32 0.025, %v13504_v9  ;;  %v6564_v17 = vmul.f32 0.025, %v13506_v4  ;;  %6580 = vrot.lane.b32.xlu1 %v13499_v31, %s7033_s6  ;;  %6578 = vrot.lane.b32.xlu0 %v13502_v43, %s7033_s6 }
0x25eb   :  { %v6551_v0 = vsub.f32 %v6543_v28, %v13437_v23  ;;  %v6550_v52 = vsub.f32 %v6542_v50, %v13440_v34  ;;  %v6513_v51 = vpop.permute.xlu1 %6512  ;;  %v6511_v1 = vpop.permute.xlu0 %6510 }
0x25ec   :  { %v13517_v7 = vadd.f32 %v6565_v14, %v13421_v22  ;;  %v13520_v2 = vadd.f32 %v6564_v17, %v13424_v10  ;;  %v6545_v57 = vmul.f32 %v6537_v35, %v6513_v51  ;;  %v6544_v5 = vmul.f32 %v6536_v60, %v6511_v1 }
0x25ed   :  { %v13522_v48 = vadd.f32 8.0, %v6551_v0  ;;  %v13524_v13 = vadd.f32 8.0, %v6550_v52 }
0x25ee   :  { %v6553_v44 = vsub.f32 %v6545_v57, %v13447_v37  ;;  %v6552_v25 = vsub.f32 %v6544_v5, %v13450_v54  ;;  %6584 = vrot.lane.b32.xlu1 %v13517_v7, %s7033_s6  ;;  %6582 = vrot.lane.b32.xlu0 %v13520_v2, %s7033_s6 }
0x25ef   :  { %v6567_v39 = vmul.f32 0.025, %v13522_v48  ;;  %v6566_v24 = vmul.f32 0.025, %v13524_v13 }
0x25f0   :  { %v13534_v20 = vadd.f32 8.0, %v6553_v44  ;;  %v13536_v19 = vadd.f32 8.0, %v6552_v25 }
0x25f1   :  { %v13539_v53 = vadd.f32 %v6567_v39, %v13437_v23  ;;  %v13542_v38 = vadd.f32 %v6566_v24, %v13440_v34 }
0x25f2   :  { %v6569_v33 = vmul.f32 0.025, %v13534_v20  ;;  %v6568_v41 = vmul.f32 0.025, %v13536_v19 }
0x25f3   :  { %6588 = vrot.lane.b32.xlu1 %v13539_v53, %s7033_s6  ;;  %6586 = vrot.lane.b32.xlu0 %v13542_v38, %s7033_s6 }
0x25f4   :  { %v13551_v62 = vadd.f32 %v6569_v33, %v13447_v37  ;;  %v13554_v12 = vadd.f32 %v6568_v41, %v13450_v54 }
0x25f7   :  { %6592 = vrot.lane.b32.xlu1 %v13551_v62, %s7033_s6  ;;  %6590 = vrot.lane.b32.xlu0 %v13554_v12, %s7033_s6 }
0x25fb   :  { %6612 = vrot.lane.b32.xlu1 %v13499_v31, %s7034_s1  ;;  %6610 = vrot.lane.b32.xlu0 %v13502_v43, %s7034_s1 }
0x25ff   :  { %6616 = vrot.lane.b32.xlu1 %v13517_v7, %s7034_s1  ;;  %6614 = vrot.lane.b32.xlu0 %v13520_v2, %s7034_s1 }
0x2603   :  { %6620 = vrot.lane.b32.xlu1 %v13539_v53, %s7034_s1  ;;  %6618 = vrot.lane.b32.xlu0 %v13542_v38, %s7034_s1 }
0x2607   :  { %6624 = vrot.lane.b32.xlu1 %v13551_v62, %s7034_s1  ;;  %6622 = vrot.lane.b32.xlu0 %v13554_v12, %s7034_s1 }
0x260b   :  { %6596 = vrot.lane.b32.xlu1 %v13499_v31, %s7035_s7  ;;  %6594 = vrot.lane.b32.xlu0 %v13502_v43, %s7035_s7 }
0x260f   :  { %6600 = vrot.lane.b32.xlu1 %v13517_v7, %s7035_s7  ;;  %6598 = vrot.lane.b32.xlu0 %v13520_v2, %s7035_s7 }
0x2613   :  { %6604 = vrot.lane.b32.xlu1 %v13539_v53, %s7035_s7  ;;  %6602 = vrot.lane.b32.xlu0 %v13542_v38, %s7035_s7 }
0x2617   :  { %6608 = vrot.lane.b32.xlu1 %v13551_v62, %s7035_s7  ;;  %6606 = vrot.lane.b32.xlu0 %v13554_v12, %s7035_s7 }
0x265c   :  { %v6581_v32 = vpop.permute.xlu1 %6580  ;;  %v6579_v21 = vpop.permute.xlu0 %6578 }
0x2660   :  { %v6585_v36 = vpop.permute.xlu1 %6584  ;;  %v6583_v49 = vpop.permute.xlu0 %6582 }
0x2665   :  { %v6589_v16 = vpop.permute.xlu1 %6588  ;;  %v6587_v55 = vpop.permute.xlu0 %6586 }
0x2669   :  { %v6593_v6 = vpop.permute.xlu1 %6592  ;;  %v6591_v61 = vpop.permute.xlu0 %6590 }
0x266d   :  { %v6613_v30 = vpop.permute.xlu1 %6612  ;;  %v6611_v46 = vpop.permute.xlu0 %6610 }
0x266e   :  { %v6627_v26 = vsub.f32 %v6581_v32, %v6613_v30  ;;  %v6626_v45 = vsub.f32 %v6579_v21, %v6611_v46 }
0x2671   :  { %v6617_v40 = vpop.permute.xlu1 %6616  ;;  %v6615_v47 = vpop.permute.xlu0 %6614 }
0x2672   :  { %v6629_v28 = vsub.f32 %v6585_v36, %v6617_v40  ;;  %v6628_v50 = vsub.f32 %v6583_v49, %v6615_v47 }
0x2675   :  { %v6621_v42 = vpop.permute.xlu1 %6620  ;;  %v6619_v15 = vpop.permute.xlu0 %6618 }
0x2676   :  { %v6631_v44 = vsub.f32 %v6589_v16, %v6621_v42  ;;  %v6630_v25 = vsub.f32 %v6587_v55, %v6619_v15 }
0x2679   :  { %v6625_v27 = vpop.permute.xlu1 %6624  ;;  %v6623_v8 = vpop.permute.xlu0 %6622 }
0x267a   :  { %v6633_v16 = vsub.f32 %v6593_v6, %v6625_v27  ;;  %v6632_v55 = vsub.f32 %v6591_v61, %v6623_v8 }
0x267d   :  { %v6597_v11 = vpop.permute.xlu1 %6596  ;;  %v6595_v29 = vpop.permute.xlu0 %6594 }
0x267e   :  { %v6635_v18 = vmul.f32 %v6627_v26, %v6597_v11  ;;  %v6634_v63 = vmul.f32 %v6626_v45, %v6595_v29 }
0x2680   :  { %v6643_v35 = vsub.f32 %v6635_v18, %v13499_v31  ;;  %v6642_v60 = vsub.f32 %v6634_v63, %v13502_v43 }
0x2681   :  { %v6601_v14 = vpop.permute.xlu1 %6600  ;;  %v6599_v17 = vpop.permute.xlu0 %6598 }
0x2682   :  { %v13594_v0 = vadd.f32 8.0, %v6643_v35  ;;  %v13596_v52 = vadd.f32 8.0, %v6642_v60  ;;  %v6637_v51 = vmul.f32 %v6629_v28, %v6601_v14  ;;  %v6636_v1 = vmul.f32 %v6628_v50, %v6599_v17 }
0x2684   :  { %v6675_v57 = vmul.f32 0.025, %v13594_v0  ;;  %v6674_v5 = vmul.f32 0.025, %v13596_v52  ;;  %v6645_v39 = vsub.f32 %v6637_v51, %v13517_v7  ;;  %v6644_v31 = vsub.f32 %v6636_v1, %v13520_v2 }
0x2685   :  { %v6605_v24 = vpop.permute.xlu1 %6604  ;;  %v6603_v43 = vpop.permute.xlu0 %6602 }
0x2686   :  { %v13603_v33 = vadd.f32 %v6675_v57, %v13407_v56  ;;  %v13606_v41 = vadd.f32 %v6674_v5, %v13410_v58  ;;  %v13608_v32 = vadd.f32 8.0, %v6645_v39  ;;  %v13610_v21 = vadd.f32 8.0, %v6644_v31 }
0x2687   :  { %v6639_v36 = vmul.f32 %v6631_v44, %v6605_v24  ;;  %v6638_v49 = vmul.f32 %v6630_v25, %v6603_v43 }
0x2688   :  { %6692 = vrot.lane.b32.xlu1 %v13603_v33, %s7033_s6  ;;  %6690 = vrot.lane.b32.xlu0 %v13606_v41, %s7033_s6  ;;  %v6677_v7 = vmul.f32 0.025, %v13608_v32  ;;  %v6676_v2 = vmul.f32 0.025, %v13610_v21 }
0x2689   :  { %v6609_v30 = vpop.permute.xlu1 %6608  ;;  %v6607_v46 = vpop.permute.xlu0 %6606  ;;  %v6647_v40 = vsub.f32 %v6639_v36, %v13539_v53  ;;  %v6646_v47 = vsub.f32 %v6638_v49, %v13542_v38 }
0x268a   :  { %v6641_v42 = vmul.f32 %v6633_v16, %v6609_v30  ;;  %v6640_v15 = vmul.f32 %v6632_v55, %v6607_v46  ;;  %v13621_v6 = vadd.f32 %v6677_v7, %v13421_v22  ;;  %v13624_v61 = vadd.f32 %v6676_v2, %v13424_v10 }
0x268b   :  { %v6655_v27 = vadd.f32 8.0, %v6647_v40  ;;  %v6654_v8 = vadd.f32 8.0, %v6646_v47  ;;  %v6659_v7 = vmul.f32 2.0, %v13594_v0  ;;  %v6658_v2 = vmul.f32 2.0, %v13596_v52 }
0x268c   :  { %v6649_v26 = vsub.f32 %v6641_v42, %v13551_v62  ;;  %v6648_v45 = vsub.f32 %v6640_v15, %v13554_v12  ;;  %6696 = vrot.lane.b32.xlu1 %v13621_v6, %s7033_s6  ;;  %6694 = vrot.lane.b32.xlu0 %v13624_v61, %s7033_s6  ;;  %v6661_v30 = vmul.f32 2.0, %v13608_v32  ;;  %v6660_v46 = vmul.f32 2.0, %v13610_v21 }
0x268d   :  { %v6679_v53 = vmul.f32 0.025, %v6655_v27  ;;  %v6678_v38 = vmul.f32 0.025, %v6654_v8  ;;  %v6667_v0 = vadd.f32 %v6659_v7, %v13490_v59  ;;  %v6666_v52 = vadd.f32 %v6658_v2, %v13492_v3 }
0x268e   :  { %v13632_v11 = vadd.f32 8.0, %v6649_v26  ;;  %v13634_v29 = vadd.f32 8.0, %v6648_v45  ;;  %v6663_v26 = vmul.f32 2.0, %v6655_v27  ;;  %v6662_v45 = vmul.f32 2.0, %v6654_v8 }
0x268f   :  { %v13637_v18 = vadd.f32 %v6679_v53, %v13437_v23  ;;  %v13640_v63 = vadd.f32 %v6678_v38, %v13440_v34  ;;  %v6669_v32 = vadd.f32 %v6661_v30, %v13504_v9  ;;  %v6668_v21 = vadd.f32 %v6660_v46, %v13506_v4 }
0x2690   :  { %v6681_v62 = vmul.f32 0.025, %v13632_v11  ;;  %v6680_v12 = vmul.f32 0.025, %v13634_v29  ;;  %v6665_v9 = vmul.f32 2.0, %v13632_v11 }
0x2691   :  { %6700 = vrot.lane.b32.xlu1 %v13637_v18, %s7033_s6  ;;  %6698 = vrot.lane.b32.xlu0 %v13640_v63, %s7033_s6 }
0x2692   :  { %v13649_v28 = vadd.f32 %v6681_v62, %v13447_v37  ;;  %v13652_v50 = vadd.f32 %v6680_v12, %v13450_v54 }
0x2695   :  { %6704 = vrot.lane.b32.xlu1 %v13649_v28, %s7033_s6  ;;  %6702 = vrot.lane.b32.xlu0 %v13652_v50, %s7033_s6 }
0x2699   :  { %6724 = vrot.lane.b32.xlu1 %v13603_v33, %s7034_s1  ;;  %6722 = vrot.lane.b32.xlu0 %v13606_v41, %s7034_s1 }
0x269d   :  { %6728 = vrot.lane.b32.xlu1 %v13621_v6, %s7034_s1  ;;  %6726 = vrot.lane.b32.xlu0 %v13624_v61, %s7034_s1 }
0x26a1   :  { %6732 = vrot.lane.b32.xlu1 %v13637_v18, %s7034_s1  ;;  %6730 = vrot.lane.b32.xlu0 %v13640_v63, %s7034_s1 }
0x26a5   :  { %6736 = vrot.lane.b32.xlu1 %v13649_v28, %s7034_s1  ;;  %6734 = vrot.lane.b32.xlu0 %v13652_v50, %s7034_s1 }
0x26a9   :  { %6708 = vrot.lane.b32.xlu1 %v13603_v33, %s7035_s7  ;;  %6706 = vrot.lane.b32.xlu0 %v13606_v41, %s7035_s7 }
0x26ad   :  { %6712 = vrot.lane.b32.xlu1 %v13621_v6, %s7035_s7  ;;  %6710 = vrot.lane.b32.xlu0 %v13624_v61, %s7035_s7 }
0x26b1   :  { %6716 = vrot.lane.b32.xlu1 %v13637_v18, %s7035_s7  ;;  %6714 = vrot.lane.b32.xlu0 %v13640_v63, %s7035_s7 }
0x26b5   :  { %6720 = vrot.lane.b32.xlu1 %v13649_v28, %s7035_s7  ;;  %6718 = vrot.lane.b32.xlu0 %v13652_v50, %s7035_s7 }
0x26fa   :  { %v6693_v35 = vpop.permute.xlu1 %6692  ;;  %v6691_v60 = vpop.permute.xlu0 %6690 }
0x26fe   :  { %v6697_v14 = vpop.permute.xlu1 %6696  ;;  %v6695_v17 = vpop.permute.xlu0 %6694 }
0x2703   :  { %v6701_v51 = vpop.permute.xlu1 %6700  ;;  %v6699_v1 = vpop.permute.xlu0 %6698 }
0x2707   :  { %v13690_v57 = vpop.permute.xlu1 %6704  ;;  %v13692_v5 = vpop.permute.xlu0 %6702 }
0x270b   :  { %v6725_v44 = vpop.permute.xlu1 %6724  ;;  %v6723_v25 = vpop.permute.xlu0 %6722 }
0x270c   :  { %v6739_v16 = vsub.f32 %v6693_v35, %v6725_v44  ;;  %v6738_v55 = vsub.f32 %v6691_v60, %v6723_v25 }
0x270f   :  { %v6729_v39 = vpop.permute.xlu1 %6728  ;;  %v6727_v31 = vpop.permute.xlu0 %6726 }
0x2710   :  { %v6741_v53 = vsub.f32 %v6697_v14, %v6729_v39  ;;  %v6740_v38 = vsub.f32 %v6695_v17, %v6727_v31  ;;  %v6671_v14 = vadd.f32 %v6663_v26, %v13522_v48 }
0x2713   :  { %v6733_v24 = vpop.permute.xlu1 %6732  ;;  %v6731_v43 = vpop.permute.xlu0 %6730 }
0x2714   :  { %v6743_v17 = vsub.f32 %v6701_v51, %v6733_v24 }
0x2717   :  { %v13694_v36 = vpop.permute.xlu1 %6736  ;;  %v13696_v49 = vpop.permute.xlu0 %6734 }
0x2718   :  { %v6745_v4 = vsub.f32 %v13690_v57, %v13694_v36 }
0x271b   :  { %v6709_v40 = vpop.permute.xlu1 %6708  ;;  %v6707_v47 = vpop.permute.xlu0 %6706 }
0x271c   :  { %v6747_v42 = vmul.f32 %v6739_v16, %v6709_v40  ;;  %v6746_v15 = vmul.f32 %v6738_v55, %v6707_v47 }
0x271e   :  { %v6755_v62 = vsub.f32 %v6747_v42, %v13603_v33  ;;  %v6754_v12 = vsub.f32 %v6746_v15, %v13606_v41  ;;  %v6670_v33 = vadd.f32 %v6662_v45, %v13524_v13  ;;  %v6742_v41 = vsub.f32 %v6699_v1, %v6731_v43 }
0x271f   :  { %v6713_v35 = vpop.permute.xlu1 %6712  ;;  %v6711_v60 = vpop.permute.xlu0 %6710 }
0x2720   :  { %v6763_v44 = vadd.f32 8.0, %v6755_v62  ;;  %v6762_v25 = vadd.f32 8.0, %v6754_v12  ;;  %v6749_v27 = vmul.f32 %v6741_v53, %v6713_v35  ;;  %v6748_v8 = vmul.f32 %v6740_v38, %v6711_v60 }
0x2722   :  { %v6771_v39 = vmul.f32 2.0, %v6763_v44  ;;  %v6787_v59 = vmul.f32 0.05, %v6763_v44  ;;  %v6770_v31 = vmul.f32 2.0, %v6762_v25  ;;  %v6786_v3 = vmul.f32 0.05, %v6762_v25 }
0x2723   :  { %v6757_v16 = vsub.f32 %v6749_v27, %v13621_v6  ;;  %v6756_v55 = vsub.f32 %v6748_v8, %v13624_v61  ;;  %v6717_v7 = vpop.permute.xlu1 %6716  ;;  %v6715_v2 = vpop.permute.xlu0 %6714  ;;  %v6664_v6 = vmul.f32 2.0, %v13634_v29  ;;  %v6744_v61 = vsub.f32 %v13692_v5, %v13696_v49 }
0x2724   :  { %v13716_v48 = vadd.f32 %v6787_v59, %v13407_v56  ;;  %v13719_v13 = vadd.f32 %v6786_v3, %v13410_v58  ;;  %v6751_v51 = vmul.f32 %v6743_v17, %v6717_v7  ;;  %v6750_v1 = vmul.f32 %v6742_v41, %v6715_v2 }
0x2725   :  { %v6765_v24 = vadd.f32 8.0, %v6757_v16  ;;  %v6764_v43 = vadd.f32 8.0, %v6756_v55  ;;  %v13721_v11 = vadd.f32 %v6771_v39, %v6667_v0  ;;  %v13723_v30 = vadd.f32 %v6770_v31, %v6666_v52 }
0x2726   :  { %v6759_v57 = vsub.f32 %v6751_v51, %v13637_v18  ;;  %v6758_v36 = vsub.f32 %v6750_v1, %v13640_v63  ;;  %6804 = vrot.lane.b32.xlu1 %v13716_v48, %s7033_s6  ;;  %6802 = vrot.lane.b32.xlu0 %v13719_v13, %s7033_s6  ;;  %v6672_v8 = vadd.f32 %v6664_v6, %v13536_v19 }
0x2727   :  { %v6773_v46 = vmul.f32 2.0, %v6765_v24  ;;  %v6789_v40 = vmul.f32 0.05, %v6765_v24  ;;  %v6772_v47 = vmul.f32 2.0, %v6764_v43  ;;  %v6788_v42 = vmul.f32 0.05, %v6764_v43  ;;  %v6721_v15 = vpop.permute.xlu1 %6720  ;;  %v6719_v26 = vpop.permute.xlu0 %6718 }
0x2728   :  { %v6767_v29 = vadd.f32 8.0, %v6759_v57  ;;  %v6766_v45 = vadd.f32 8.0, %v6758_v36  ;;  %v6753_v53 = vmul.f32 %v6745_v4, %v6721_v15  ;;  %v6752_v5 = vmul.f32 %v6744_v61, %v6719_v26 }
0x2729   :  { %v13735_v18 = vadd.f32 %v6789_v40, %v13421_v22  ;;  %v13738_v63 = vadd.f32 %v6788_v42, %v13424_v10  ;;  %v13740_v49 = vadd.f32 %v6773_v46, %v6669_v32  ;;  %v13742_v38 = vadd.f32 %v6772_v47, %v6668_v21 }
0x272a   :  { %v6775_v62 = vmul.f32 2.0, %v6767_v29  ;;  %v6791_v12 = vmul.f32 0.05, %v6767_v29  ;;  %v6774_v0 = vmul.f32 2.0, %v6766_v45  ;;  %v6790_v52 = vmul.f32 0.05, %v6766_v45 }
0x272b   :  { %v6761_v35 = vsub.f32 %v6753_v53, %v13649_v28  ;;  %v6760_v60 = vsub.f32 %v6752_v5, %v13652_v50  ;;  %6808 = vrot.lane.b32.xlu1 %v13735_v18, %s7033_s6  ;;  %6806 = vrot.lane.b32.xlu0 %v13738_v63, %s7033_s6  ;;  %v6673_v50 = vadd.f32 %v6665_v9, %v13534_v20 }
0x272c   :  { %v13751_v44 = vadd.f32 %v6791_v12, %v13437_v23  ;;  %v13754_v32 = vadd.f32 %v6790_v52, %v13440_v34  ;;  %v13756_v21 = vadd.f32 %v6775_v62, %v6671_v14  ;;  %v13758_v25 = vadd.f32 %v6774_v0, %v6670_v33 }
0x272d   :  { %v6769_v27 = vadd.f32 8.0, %v6761_v35  ;;  %v6768_v28 = vadd.f32 8.0, %v6760_v60 }
0x272f   :  { %v6777_v17 = vmul.f32 2.0, %v6769_v27  ;;  %v6793_v41 = vmul.f32 0.05, %v6769_v27  ;;  %v6776_v39 = vmul.f32 2.0, %v6768_v28  ;;  %v6792_v59 = vmul.f32 0.05, %v6768_v28  ;;  %6812 = vrot.lane.b32.xlu1 %v13751_v44, %s7033_s6  ;;  %6810 = vrot.lane.b32.xlu0 %v13754_v32, %s7033_s6 }
0x2731   :  { %v13767_v14 = vadd.f32 %v6793_v41, %v13447_v37  ;;  %v13770_v33 = vadd.f32 %v6792_v59, %v13450_v54  ;;  %v13772_v31 = vadd.f32 %v6777_v17, %v6673_v50  ;;  %v13774_v20 = vadd.f32 %v6776_v39, %v6672_v8 }
0x2733   :  { %6816 = vrot.lane.b32.xlu1 %v13767_v14, %s7033_s6  ;;  %6814 = vrot.lane.b32.xlu0 %v13770_v33, %s7033_s6 }
0x2737   :  { %6836 = vrot.lane.b32.xlu1 %v13716_v48, %s7034_s1  ;;  %6834 = vrot.lane.b32.xlu0 %v13719_v13, %s7034_s1 }
0x273b   :  { %6840 = vrot.lane.b32.xlu1 %v13735_v18, %s7034_s1  ;;  %6838 = vrot.lane.b32.xlu0 %v13738_v63, %s7034_s1 }
0x273f   :  { %6844 = vrot.lane.b32.xlu1 %v13751_v44, %s7034_s1  ;;  %6842 = vrot.lane.b32.xlu0 %v13754_v32, %s7034_s1 }
0x2743   :  { %6848 = vrot.lane.b32.xlu1 %v13767_v14, %s7034_s1  ;;  %6846 = vrot.lane.b32.xlu0 %v13770_v33, %s7034_s1 }
0x2747   :  { %6820 = vrot.lane.b32.xlu1 %v13716_v48, %s7035_s7  ;;  %6818 = vrot.lane.b32.xlu0 %v13719_v13, %s7035_s7 }
0x274b   :  { %6824 = vrot.lane.b32.xlu1 %v13735_v18, %s7035_s7  ;;  %6822 = vrot.lane.b32.xlu0 %v13738_v63, %s7035_s7 }
0x274f   :  { %6828 = vrot.lane.b32.xlu1 %v13751_v44, %s7035_s7  ;;  %6826 = vrot.lane.b32.xlu0 %v13754_v32, %s7035_s7 }
0x2753   :  { %6832 = vrot.lane.b32.xlu1 %v13767_v14, %s7035_s7  ;;  %6830 = vrot.lane.b32.xlu0 %v13770_v33, %s7035_s7 }
0x2798   :  { %v6805_v19 = vpop.permute.xlu1 %6804  ;;  %v6803_v3 = vpop.permute.xlu0 %6802 }
0x279d   :  { %v6809_v9 = vpop.permute.xlu1 %6808  ;;  %v6807_v4 = vpop.permute.xlu0 %6806 }
0x27a1   :  { %v6813_v16 = vpop.permute.xlu1 %6812  ;;  %v6811_v55 = vpop.permute.xlu0 %6810 }
0x27a5   :  { %v6817_v7 = vpop.permute.xlu1 %6816  ;;  %v6815_v2 = vpop.permute.xlu0 %6814 }
0x27a9   :  { %v6837_v51 = vpop.permute.xlu1 %6836  ;;  %v6835_v1 = vpop.permute.xlu0 %6834 }
0x27aa   :  { %v6851_v46 = vsub.f32 %v6805_v19, %v6837_v51  ;;  %v6850_v40 = vsub.f32 %v6803_v3, %v6835_v1 }
0x27ad   :  { %v6841_v24 = vpop.permute.xlu1 %6840  ;;  %v6839_v43 = vpop.permute.xlu0 %6838 }
0x27ae   :  { %v6853_v29 = vsub.f32 %v6809_v9, %v6841_v24  ;;  %v6852_v45 = vsub.f32 %v6807_v4, %v6839_v43  ;;  %v6907_v9 = vld [vmem:[#allocation5 + $0x8] sm:$0xff]  ;;  %v6906_v4 = vld [vmem:[#allocation5] sm:$0xff] }
0x27b1   :  { %v6845_v6 = vpop.permute.xlu1 %6844  ;;  %v6843_v61 = vpop.permute.xlu0 %6842 }
0x27b2   :  { %v6855_v17 = vsub.f32 %v6813_v16, %v6845_v6  ;;  %v6854_v41 = vsub.f32 %v6811_v55, %v6843_v61 }
0x27b5   :  { %v6849_v57 = vpop.permute.xlu1 %6848  ;;  %v6847_v36 = vpop.permute.xlu0 %6846 }
0x27b6   :  { %v6857_v16 = vsub.f32 %v6817_v7, %v6849_v57  ;;  %v6856_v55 = vsub.f32 %v6815_v2, %v6847_v36 }
0x27b9   :  { %v6821_v47 = vpop.permute.xlu1 %6820  ;;  %v6819_v42 = vpop.permute.xlu0 %6818 }
0x27ba   :  { %v6859_v15 = vmul.f32 %v6851_v46, %v6821_v47  ;;  %v6858_v26 = vmul.f32 %v6850_v40, %v6819_v42 }
0x27bc   :  { %v6867_v53 = vsub.f32 %v6859_v15, %v13716_v48  ;;  %v6866_v5 = vsub.f32 %v6858_v26, %v13719_v13  ;;  %v6909_v15 = vld [vmem:[#allocation5 + $0x18] sm:$0xff] }
0x27bd   :  { %v6825_v62 = vpop.permute.xlu1 %6824  ;;  %v6823_v12 = vpop.permute.xlu0 %6822 }
0x27be   :  { %v6875_v0 = vadd.f32 8.0, %v6867_v53  ;;  %v6874_v52 = vadd.f32 8.0, %v6866_v5  ;;  %v6861_v35 = vmul.f32 %v6853_v29, %v6825_v62  ;;  %v6860_v60 = vmul.f32 %v6852_v45, %v6823_v12 }
0x27c0   :  { %v6883_v27 = vadd.f32 %v6875_v0, %v13721_v11  ;;  %v6882_v28 = vadd.f32 %v6874_v52, %v13723_v30  ;;  %v6869_v50 = vsub.f32 %v6861_v35, %v13735_v18  ;;  %v6868_v8 = vsub.f32 %v6860_v60, %v13738_v63  ;;  %v6911_v0 = vld [vmem:[#allocation5 + $0x28] sm:$0xff] }
0x27c1   :  { %v6829_v39 = vpop.permute.xlu1 %6828  ;;  %v6827_v48 = vpop.permute.xlu0 %6826 }
0x27c2   :  { %v6891_v59 = vmul.f32 0.008333334, %v6883_v27  ;;  %v6890_v13 = vmul.f32 0.008333334, %v6882_v28  ;;  %v6877_v19 = vadd.f32 8.0, %v6869_v50  ;;  %v6876_v3 = vadd.f32 8.0, %v6868_v8 }
0x27c3   :  { %v6863_v51 = vmul.f32 %v6855_v17, %v6829_v39  ;;  %v6862_v1 = vmul.f32 %v6854_v41, %v6827_v48  ;;  %v6913_v27 = vld [vmem:[#allocation5 + $0x38] sm:$0xff]  ;;  %v6912_v28 = vld [vmem:[#allocation5 + $0x30] sm:$0xff] }
0x27c4   :  { %v6899_v11 = vadd.f32 %v6891_v59, %v13407_v56  ;;  %v6898_v30 = vadd.f32 %v6890_v13, %v13410_v58  ;;  %v6885_v18 = vadd.f32 %v6877_v19, %v13740_v49  ;;  %v6884_v63 = vadd.f32 %v6876_v3, %v13742_v38  ;;  %v6908_v56 = vld [vmem:[#allocation5 + $0x10] sm:$0xff] }
0x27c5   :  { %v6871_v24 = vsub.f32 %v6863_v51, %v13751_v44  ;;  %v6870_v43 = vsub.f32 %v6862_v1, %v13754_v32  ;;  %v6833_v6 = vpop.permute.xlu1 %6832  ;;  %v6831_v61 = vpop.permute.xlu0 %6830 }
0x27c6   :  { %v6915_v46 = vmul.f32 %v6907_v9, %v6899_v11  ;;  %v6914_v40 = vmul.f32 %v6906_v4, %v6898_v30  ;;  %v6893_v47 = vmul.f32 0.008333334, %v6885_v18  ;;  %v6892_v42 = vmul.f32 0.008333334, %v6884_v63 }
0x27c7   :  { %v6879_v26 = vadd.f32 8.0, %v6871_v24  ;;  %v6878_v58 = vadd.f32 8.0, %v6870_v43  ;;  %v6865_v29 = vmul.f32 %v6857_v16, %v6833_v6  ;;  %v6864_v49 = vmul.f32 %v6856_v55, %v6831_v61 }
0x27c8   :  { %6924 = vst [vmem:[#allocation7 + $0xc8] sm:$0xff] %v6915_v46  ;;  %6923 = vst [vmem:[#allocation7 + $0xc0] sm:$0xff] %v6914_v40  ;;  %v6901_v38 = vadd.f32 %v6893_v47, %v13421_v22  ;;  %v6900_v44 = vadd.f32 %v6892_v42, %v13424_v10  ;;  %v6910_v22 = vld [vmem:[#allocation5 + $0x20] sm:$0xff] }
0x27c9   :  { %v6887_v32 = vadd.f32 %v6879_v26, %v13756_v21  ;;  %v6886_v7 = vadd.f32 %v6878_v58, %v13758_v25  ;;  %v6873_v2 = vsub.f32 %v6865_v29, %v13767_v14  ;;  %v6872_v57 = vsub.f32 %v6864_v49, %v13770_v33 }
0x27ca   :  { %v6917_v36 = vmul.f32 %v6909_v15, %v6901_v38  ;;  %v6916_v45 = vmul.f32 %v6908_v56, %v6900_v44 }
0x27cb   :  { %v6895_v53 = vmul.f32 0.008333334, %v6887_v32  ;;  %v6894_v5 = vmul.f32 0.008333334, %v6886_v7  ;;  %v6881_v62 = vadd.f32 8.0, %v6873_v2  ;;  %v6880_v12 = vadd.f32 8.0, %v6872_v57 }
0x27cc   :  { %6926 = vst [vmem:[#allocation7 + $0xd8] sm:$0xff] %v6917_v36  ;;  %6925 = vst [vmem:[#allocation7 + $0xd0] sm:$0xff] %v6916_v45 }
0x27cd   :  { %v6903_v10 = vadd.f32 %v6895_v53, %v13437_v23  ;;  %v6902_v21 = vadd.f32 %v6894_v5, %v13440_v34  ;;  %v6889_v25 = vadd.f32 %v6881_v62, %v13772_v31  ;;  %v6888_v14 = vadd.f32 %v6880_v12, %v13774_v20 }
0x27cf   :  { %v6919_v52 = vmul.f32 %v6911_v0, %v6903_v10  ;;  %v6918_v33 = vmul.f32 %v6910_v22, %v6902_v21  ;;  %v6897_v35 = vmul.f32 0.008333334, %v6889_v25  ;;  %v6896_v60 = vmul.f32 0.008333334, %v6888_v14 }
0x27d1   :  { %6928 = vst [vmem:[#allocation7 + $0xe8] sm:$0xff] %v6919_v52  ;;  %6927 = vst [vmem:[#allocation7 + $0xe0] sm:$0xff] %v6918_v33  ;;  %v6905_v50 = vadd.f32 %v6897_v35, %v13447_v37  ;;  %v6904_v23 = vadd.f32 %v6896_v60, %v13450_v54 }
0x27d3   :  { %v6921_v8 = vmul.f32 %v6913_v27, %v6905_v50  ;;  %v6920_v34 = vmul.f32 %v6912_v28, %v6904_v23 }
0x27d5   :  { %6930 = vst [vmem:[#allocation7 + $0xf8] sm:$0xff] %v6921_v8  ;;  %6929 = vst [vmem:[#allocation7 + $0xf0] sm:$0xff] %v6920_v34 }
0x27d6   :  { %7012 = shalt.err (!%p7009_p6)
}
0x27d7   :  { %s7013_s13 = scalar_lea.hbm %s13853_s2, 4096 }
0x27d8   :  { %p7014_p7 = scmp.ne.s32.totalorder %s13853_s2, %s7013_s13  ;;  %p7017_p8 = scmp.lt.u32.totalorder %s7013_s13, %s13853_s2 }
0x27da   :  { %p7019_p9 = pnand %p7017_p8, %p7014_p7 }
0x27dc   :  { %7022 = shalt.err (!%p7019_p9)
}
0x27dd   :  { %6942 = dma.vmem_to_hbm [thread:$0]  %s6937_s9, 4096, %s13853_s2, [#allocation4], %s7030_s19, %s7030_s19, %s7031_s20  }
0x27de   :  { %7027 = dma.done.wait [#allocation4], 4096  }
0x27df   :  { %7028 = vsyncadd [#allocation4], 4294963200 }
0x27e0   :  { %6946 = vsyncpa [#allocation3], 1 }
0x27e1   :  { %6947 = vsyncpa [#allocation6], 1 }
0x27e2   :  { %6948 = vsyncpa [#allocation4], 1 }

</bundles_post_ra>
